<compile_context>
chip_gen: v5e
topology: v5e:2x2
jax: 0.10.0
libtpu: 0.0.40
codegen_flags: <defaults>
</compile_context>

<pallas_src>
import functools

import jax
import jax.numpy as jnp
from jax.experimental import pallas as pl
from jax.experimental.pallas import tpu as pltpu


def _round_up(x, m):
    return ((x + m - 1) // m) * m


# ---------------------------------------------------------------------------
# Kernel: three MLP branches (features, features2, labels) + combine + sigmoid.
# Weights arrive pre-padded / pre-split / bf16; biases f32.
# ---------------------------------------------------------------------------
def attack_kernel(x1_ref, x2_ref, l_ref,
                  w1a, b1a, w1b, b1b, w1c, b1c,
                  w2a, b2a, w2b, b2b, w2c, b2c,
                  wl1, bl1, wl2, bl2,
                  wc0a, wc0b, wc0c, bc0,
                  wc1, bc1, wc2, bc2, wc3, bc3,
                  wc4, bc4,
                  o_ref):
    def linear(x, w_ref, b_ref, relu=True):
        # bf16 operands on the MXU, f32 accumulation, f32 bias/ReLU.
        y = jnp.dot(x.astype(jnp.bfloat16), w_ref[...],
                    preferred_element_type=jnp.float32) + b_ref[...]
        return jnp.maximum(y, 0.0) if relu else y

    # features branch: 128(pad of 100) -> 1024 -> 512 -> 64, ReLU each
    h1 = linear(x1_ref[...], w1a, b1a)
    h1 = linear(h1, w1b, b1b)
    h1 = linear(h1, w1c, b1c)

    # features2 branch: 128 -> 1024 -> 512 -> 64, ReLU each
    h2 = linear(x2_ref[...], w2a, b2a)
    h2 = linear(h2, w2b, b2b)
    h2 = linear(h2, w2c, b2c)

    # labels branch: 128(pad of num_classes) -> 128 -> 64, ReLU each
    hl = linear(l_ref[...], wl1, bl1)
    hl = linear(hl, wl2, bl2)

    # combine layer 0: concat([h1, h2, hl], axis=1) @ Wc0 + bc0, implemented as a
    # split-weight sum of three MXU matmuls (weights pre-split on the host).
    c = (jnp.dot(h1.astype(jnp.bfloat16), wc0a[...], preferred_element_type=jnp.float32)
         + jnp.dot(h2.astype(jnp.bfloat16), wc0b[...], preferred_element_type=jnp.float32)
         + jnp.dot(hl.astype(jnp.bfloat16), wc0c[...], preferred_element_type=jnp.float32)
         + bc0[...])
    c = jnp.maximum(c, 0.0)

    # combine: 512 -> 256 -> 128 -> 64, ReLU each
    c = linear(c, wc1, bc1)
    c = linear(c, wc2, bc2)
    c = linear(c, wc3, bc3)

    # final 64 -> 1 layer on the VPU/XLU: broadcast multiply by the f32 weight row
    # and reduce along lanes (avoids a lane-sparse N=1 MXU matmul).
    logits = jnp.sum(c * wc4[...], axis=-1, keepdims=True) + bc4[...]
    o_ref[...] = jax.nn.sigmoid(logits)


# ---------------------------------------------------------------------------
# Parameters: PyTorch-equivalent f32 params (normal std=0.01 weights, zero bias),
# stored as (in_features, out_features) so y = x @ W + b.
# ---------------------------------------------------------------------------
def make_params(key, num_classes):
    layer_dims = [
        (100, 1024), (1024, 512), (512, 64),      # features
        (100, 1024), (1024, 512), (512, 64),      # features2
        (num_classes, 128), (128, 64),            # labels
        (64 * 3, 512), (512, 256), (256, 128), (128, 64), (64, 1),  # combine
    ]
    params = []
    for (din, dout) in layer_dims:
        key, sub = jax.random.split(key)
        params.append(0.01 * jax.random.normal(sub, (din, dout), dtype=jnp.float32))
        params.append(jnp.zeros((1, dout), dtype=jnp.float32))
    return params


def prepare_params(params):
    """One-time host-side prep: pad odd K dims, split Wc0, cast weights to bf16."""
    ws = params[0::2]
    bs = params[1::2]
    (w_f1, w_f2, w_f3, w_g1, w_g2, w_g3,
     w_l1, w_l2, w_c0, w_c1, w_c2, w_c3, w_c4) = ws
    (b_f1, b_f2, b_f3, b_g1, b_g2, b_g3,
     b_l1, b_l2, b_c0, b_c1, b_c2, b_c3, b_c4) = bs

    def pad_k(w, k_to):
        return jnp.pad(w, ((0, k_to - w.shape[0]), (0, 0)))

    bf = lambda w: w.astype(jnp.bfloat16)

    w_f1 = pad_k(w_f1, 128)                                   # 100 -> 128
    w_g1 = pad_k(w_g1, 128)                                   # 100 -> 128
    w_l1 = pad_k(w_l1, _round_up(max(w_l1.shape[0], 128), 128))  # num_classes -> 128k

    # pre-split the first combine weight into the three concat segments
    w_c0a, w_c0b, w_c0c = w_c0[0:64], w_c0[64:128], w_c0[128:192]

    kparams = (
        bf(w_f1), b_f1, bf(w_f2), b_f2, bf(w_f3), b_f3,
        bf(w_g1), b_g1, bf(w_g2), b_g2, bf(w_g3), b_g3,
        bf(w_l1), b_l1, bf(w_l2), b_l2,
        bf(w_c0a), bf(w_c0b), bf(w_c0c), b_c0,
        bf(w_c1), b_c1, bf(w_c2), b_c2, bf(w_c3), b_c3,
        w_c4.T,   # (1, 64) f32 row for the VPU final layer
        b_c4,     # (1, 1)  f32
    )
    return kparams


# ---------------------------------------------------------------------------
# Wrapper: pad inputs, tile the batch, run the kernel, slice padding off.
# ---------------------------------------------------------------------------
@jax.jit
def inference_attack_hz2(x1, x2, l, kparams):
    batch = x1.shape[0]
    k_lab = kparams[12].shape[0]                 # padded label K (= wl1 rows)

    tm = min(256, _round_up(batch, 8))           # batch tile (multiple of 8)
    b_pad = _round_up(batch, tm)

    def pad_input(x, k_to):
        return jnp.pad(x, ((0, b_pad - batch), (0, k_to - x.shape[1])))

    x1p = pad_input(x1, 128)
    x2p = pad_input(x2, 128)
    lp = pad_input(l, k_lab)

    in_specs = [
        pl.BlockSpec((tm, 128), lambda i: (i, 0)),
        pl.BlockSpec((tm, 128), lambda i: (i, 0)),
        pl.BlockSpec((tm, k_lab), lambda i: (i, 0)),
    ] + [pl.BlockSpec(p.shape, lambda i: (0, 0)) for p in kparams]  # VMEM-resident

    out = pl.pallas_call(
        attack_kernel,
        out_shape=jax.ShapeDtypeStruct((b_pad, 1), jnp.float32),
        grid=(b_pad // tm,),
        in_specs=in_specs,
        out_specs=pl.BlockSpec((tm, 1), lambda i: (i, 0)),
        compiler_params=pltpu.CompilerParams(
            dimension_semantics=("parallel",),
            vmem_limit_bytes=32 << 20,
        ),
    )(x1p, x2p, lp, *kparams)
    return out[:batch]


# ---------------------------------------------------------------------------
# Plain-JAX f32 reference (exact PyTorch math) for correctness checking.
# ---------------------------------------------------------------------------
def reference(x1, x2, l, params):
    def mlp(x, layers, relu_last=True):
        n = len(layers) // 2
        for i in range(n):
            w, b = layers[2 * i], layers[2 * i + 1]
            x = x @ w + b
            if i < n - 1 or relu_last:
                x = jnp.maximum(x, 0.0)
        return x

    h1 = mlp(x1, params[0:6])
    h2 = mlp(x2, params[6:12])
    hl = mlp(l, params[12:16])
    cat = jnp.concatenate([h1, h2, hl], axis=1)
    out = mlp(cat, params[16:26], relu_last=False)
    return jax.nn.sigmoid(out)


if __name__ == "__main__":
    num_classes = 10
    batch = 8

    key = jax.random.PRNGKey(0)
    kx1, kx2, kl, kp = jax.random.split(key, 4)

    x1 = jax.random.normal(kx1, (batch, 100), dtype=jnp.float32)
    x2 = jax.random.normal(kx2, (batch, 100), dtype=jnp.float32)
    logits = jax.random.normal(kl, (batch, num_classes), dtype=jnp.float32)
    l = jax.nn.softmax(logits, axis=-1)          # label/posterior-like input

    params = make_params(kp, num_classes)        # f32, PyTorch layout
    kparams = prepare_params(params)             # bf16, padded, split, once

    out = inference_attack_hz2(x1, x2, l, kparams)
    out = jax.block_until_ready(out)

    ref = reference(x1, x2, l, params)
    assert out.shape == (batch, 1)
    # bf16 weights vs full-f32 reference: loose absolute tolerance on sigmoid output
    assert jnp.allclose(out, ref, atol=2e-3, rtol=0.0)

    print("KERNEL_OK")
</pallas_src>

<mosaic_0001>
module attributes {stable_mosaic.version = 11 : i64} {
  func.func @attack_kernel(%arg0: i32, %arg1: memref<8x128xf32, #tpu.memory_space<vmem>>, %arg2: memref<8x128xf32, #tpu.memory_space<vmem>>, %arg3: memref<8x128xf32, #tpu.memory_space<vmem>>, %arg4: memref<128x1024xbf16, #tpu.memory_space<vmem>>, %arg5: memref<1x1024xf32, #tpu.memory_space<vmem>>, %arg6: memref<1024x512xbf16, #tpu.memory_space<vmem>>, %arg7: memref<1x512xf32, #tpu.memory_space<vmem>>, %arg8: memref<512x64xbf16, #tpu.memory_space<vmem>>, %arg9: memref<1x64xf32, #tpu.memory_space<vmem>>, %arg10: memref<128x1024xbf16, #tpu.memory_space<vmem>>, %arg11: memref<1x1024xf32, #tpu.memory_space<vmem>>, %arg12: memref<1024x512xbf16, #tpu.memory_space<vmem>>, %arg13: memref<1x512xf32, #tpu.memory_space<vmem>>, %arg14: memref<512x64xbf16, #tpu.memory_space<vmem>>, %arg15: memref<1x64xf32, #tpu.memory_space<vmem>>, %arg16: memref<128x128xbf16, #tpu.memory_space<vmem>>, %arg17: memref<1x128xf32, #tpu.memory_space<vmem>>, %arg18: memref<128x64xbf16, #tpu.memory_space<vmem>>, %arg19: memref<1x64xf32, #tpu.memory_space<vmem>>, %arg20: memref<64x512xbf16, #tpu.memory_space<vmem>>, %arg21: memref<64x512xbf16, #tpu.memory_space<vmem>>, %arg22: memref<64x512xbf16, #tpu.memory_space<vmem>>, %arg23: memref<1x512xf32, #tpu.memory_space<vmem>>, %arg24: memref<512x256xbf16, #tpu.memory_space<vmem>>, %arg25: memref<1x256xf32, #tpu.memory_space<vmem>>, %arg26: memref<256x128xbf16, #tpu.memory_space<vmem>>, %arg27: memref<1x128xf32, #tpu.memory_space<vmem>>, %arg28: memref<128x64xbf16, #tpu.memory_space<vmem>>, %arg29: memref<1x64xf32, #tpu.memory_space<vmem>>, %arg30: memref<1x64xf32, #tpu.memory_space<vmem>>, %arg31: memref<1x1xf32, #tpu.memory_space<vmem>>, %arg32: memref<8x1xf32, #tpu.memory_space<vmem>>) attributes {dimension_semantics = [#tpu.dimension_semantics<parallel>], iteration_bounds = array<i64: 1>, scalar_prefetch = 0 : i64, scratch_operands = 0 : i64, tpu.core_type = #tpu.core_type<tc>, window_params = [{transform_indices = @transform_0, window_bounds = array<i64: 8, 128>}, {transform_indices = @transform_1, window_bounds = array<i64: 8, 128>}, {transform_indices = @transform_2, window_bounds = array<i64: 8, 128>}, {pipeline_mode = #tpu.pipeline_mode<synchronous>, transform_indices = @transform_3, window_bounds = array<i64: 128, 1024>}, {pipeline_mode = #tpu.pipeline_mode<synchronous>, transform_indices = @transform_4, window_bounds = array<i64: 1, 1024>}, {pipeline_mode = #tpu.pipeline_mode<synchronous>, transform_indices = @transform_5, window_bounds = array<i64: 1024, 512>}, {pipeline_mode = #tpu.pipeline_mode<synchronous>, transform_indices = @transform_6, window_bounds = array<i64: 1, 512>}, {pipeline_mode = #tpu.pipeline_mode<synchronous>, transform_indices = @transform_7, window_bounds = array<i64: 512, 64>}, {pipeline_mode = #tpu.pipeline_mode<synchronous>, transform_indices = @transform_8, window_bounds = array<i64: 1, 64>}, {pipeline_mode = #tpu.pipeline_mode<synchronous>, transform_indices = @transform_9, window_bounds = array<i64: 128, 1024>}, {pipeline_mode = #tpu.pipeline_mode<synchronous>, transform_indices = @transform_10, window_bounds = array<i64: 1, 1024>}, {pipeline_mode = #tpu.pipeline_mode<synchronous>, transform_indices = @transform_11, window_bounds = array<i64: 1024, 512>}, {pipeline_mode = #tpu.pipeline_mode<synchronous>, transform_indices = @transform_12, window_bounds = array<i64: 1, 512>}, {pipeline_mode = #tpu.pipeline_mode<synchronous>, transform_indices = @transform_13, window_bounds = array<i64: 512, 64>}, {pipeline_mode = #tpu.pipeline_mode<synchronous>, transform_indices = @transform_14, window_bounds = array<i64: 1, 64>}, {pipeline_mode = #tpu.pipeline_mode<synchronous>, transform_indices = @transform_15, window_bounds = array<i64: 128, 128>}, {pipeline_mode = #tpu.pipeline_mode<synchronous>, transform_indices = @transform_16, window_bounds = array<i64: 1, 128>}, {pipeline_mode = #tpu.pipeline_mode<synchronous>, transform_indices = @transform_17, window_bounds = array<i64: 128, 64>}, {pipeline_mode = #tpu.pipeline_mode<synchronous>, transform_indices = @transform_18, window_bounds = array<i64: 1, 64>}, {pipeline_mode = #tpu.pipeline_mode<synchronous>, transform_indices = @transform_19, window_bounds = array<i64: 64, 512>}, {pipeline_mode = #tpu.pipeline_mode<synchronous>, transform_indices = @transform_20, window_bounds = array<i64: 64, 512>}, {pipeline_mode = #tpu.pipeline_mode<synchronous>, transform_indices = @transform_21, window_bounds = array<i64: 64, 512>}, {pipeline_mode = #tpu.pipeline_mode<synchronous>, transform_indices = @transform_22, window_bounds = array<i64: 1, 512>}, {pipeline_mode = #tpu.pipeline_mode<synchronous>, transform_indices = @transform_23, window_bounds = array<i64: 512, 256>}, {pipeline_mode = #tpu.pipeline_mode<synchronous>, transform_indices = @transform_24, window_bounds = array<i64: 1, 256>}, {pipeline_mode = #tpu.pipeline_mode<synchronous>, transform_indices = @transform_25, window_bounds = array<i64: 256, 128>}, {pipeline_mode = #tpu.pipeline_mode<synchronous>, transform_indices = @transform_26, window_bounds = array<i64: 1, 128>}, {pipeline_mode = #tpu.pipeline_mode<synchronous>, transform_indices = @transform_27, window_bounds = array<i64: 128, 64>}, {pipeline_mode = #tpu.pipeline_mode<synchronous>, transform_indices = @transform_28, window_bounds = array<i64: 1, 64>}, {pipeline_mode = #tpu.pipeline_mode<synchronous>, transform_indices = @transform_29, window_bounds = array<i64: 1, 64>}, {pipeline_mode = #tpu.pipeline_mode<synchronous>, transform_indices = @transform_30, window_bounds = array<i64: 1, 1>}, {transform_indices = @transform_31, window_bounds = array<i64: 8, 1>}]} {
    %c0 = arith.constant 0 : index
    %c0_0 = arith.constant 0 : index
    %0 = vector.load %arg1[%c0, %c0_0] : memref<8x128xf32, #tpu.memory_space<vmem>>, vector<8x128xf32>
    %1 = arith.truncf %0 : vector<8x128xf32> to vector<8x128xbf16>
    %c0_1 = arith.constant 0 : index
    %c0_2 = arith.constant 0 : index
    %2 = vector.load %arg4[%c0_1, %c0_2] : memref<128x1024xbf16, #tpu.memory_space<vmem>>, vector<128x1024xbf16>
    %cst = arith.constant dense<0.000000e+00> : vector<8x1024xf32>
    %3 = tpu.matmul %1, %2, %cst {dimension_numbers = #tpu.dot_dimension_numbers<[1], [0], [0], [1], [0, 0, 1, 1], [], []>} : vector<8x128xbf16>, vector<128x1024xbf16>, vector<8x1024xf32> -> vector<8x1024xf32>
    %c0_3 = arith.constant 0 : index
    %c0_4 = arith.constant 0 : index
    %4 = vector.load %arg5[%c0_3, %c0_4] : memref<1x1024xf32, #tpu.memory_space<vmem>>, vector<1x1024xf32>
    %5 = vector.broadcast %4 : vector<1x1024xf32> to vector<8x1024xf32>
    %6 = arith.addf %3, %5 : vector<8x1024xf32>
    %cst_5 = arith.constant 0.000000e+00 : f32
    %7 = vector.broadcast %cst_5 : f32 to vector<8x1024xf32>
    %8 = arith.maximumf %6, %7 : vector<8x1024xf32>
    %9 = arith.truncf %8 : vector<8x1024xf32> to vector<8x1024xbf16>
    %c0_6 = arith.constant 0 : index
    %c0_7 = arith.constant 0 : index
    %10 = vector.load %arg6[%c0_6, %c0_7] : memref<1024x512xbf16, #tpu.memory_space<vmem>>, vector<1024x512xbf16>
    %cst_8 = arith.constant dense<0.000000e+00> : vector<8x512xf32>
    %11 = tpu.matmul %9, %10, %cst_8 {dimension_numbers = #tpu.dot_dimension_numbers<[1], [0], [0], [1], [0, 0, 1, 1], [], []>} : vector<8x1024xbf16>, vector<1024x512xbf16>, vector<8x512xf32> -> vector<8x512xf32>
    %c0_9 = arith.constant 0 : index
    %c0_10 = arith.constant 0 : index
    %12 = vector.load %arg7[%c0_9, %c0_10] : memref<1x512xf32, #tpu.memory_space<vmem>>, vector<1x512xf32>
    %13 = vector.broadcast %12 : vector<1x512xf32> to vector<8x512xf32>
    %14 = arith.addf %11, %13 : vector<8x512xf32>
    %cst_11 = arith.constant 0.000000e+00 : f32
    %15 = vector.broadcast %cst_11 : f32 to vector<8x512xf32>
    %16 = arith.maximumf %14, %15 : vector<8x512xf32>
    %17 = arith.truncf %16 : vector<8x512xf32> to vector<8x512xbf16>
    %c0_12 = arith.constant 0 : index
    %c0_13 = arith.constant 0 : index
    %18 = vector.load %arg8[%c0_12, %c0_13] : memref<512x64xbf16, #tpu.memory_space<vmem>>, vector<512x64xbf16>
    %cst_14 = arith.constant dense<0.000000e+00> : vector<8x64xf32>
    %19 = tpu.matmul %17, %18, %cst_14 {dimension_numbers = #tpu.dot_dimension_numbers<[1], [0], [0], [1], [0, 0, 1, 1], [], []>} : vector<8x512xbf16>, vector<512x64xbf16>, vector<8x64xf32> -> vector<8x64xf32>
    %c0_15 = arith.constant 0 : index
    %c0_16 = arith.constant 0 : index
    %20 = vector.load %arg9[%c0_15, %c0_16] : memref<1x64xf32, #tpu.memory_space<vmem>>, vector<1x64xf32>
    %21 = vector.broadcast %20 : vector<1x64xf32> to vector<8x64xf32>
    %22 = arith.addf %19, %21 : vector<8x64xf32>
    %cst_17 = arith.constant 0.000000e+00 : f32
    %23 = vector.broadcast %cst_17 : f32 to vector<8x64xf32>
    %24 = arith.maximumf %22, %23 : vector<8x64xf32>
    %c0_18 = arith.constant 0 : index
    %c0_19 = arith.constant 0 : index
    %25 = vector.load %arg2[%c0_18, %c0_19] : memref<8x128xf32, #tpu.memory_space<vmem>>, vector<8x128xf32>
    %26 = arith.truncf %25 : vector<8x128xf32> to vector<8x128xbf16>
    %c0_20 = arith.constant 0 : index
    %c0_21 = arith.constant 0 : index
    %27 = vector.load %arg10[%c0_20, %c0_21] : memref<128x1024xbf16, #tpu.memory_space<vmem>>, vector<128x1024xbf16>
    %cst_22 = arith.constant dense<0.000000e+00> : vector<8x1024xf32>
    %28 = tpu.matmul %26, %27, %cst_22 {dimension_numbers = #tpu.dot_dimension_numbers<[1], [0], [0], [1], [0, 0, 1, 1], [], []>} : vector<8x128xbf16>, vector<128x1024xbf16>, vector<8x1024xf32> -> vector<8x1024xf32>
    %c0_23 = arith.constant 0 : index
    %c0_24 = arith.constant 0 : index
    %29 = vector.load %arg11[%c0_23, %c0_24] : memref<1x1024xf32, #tpu.memory_space<vmem>>, vector<1x1024xf32>
    %30 = vector.broadcast %29 : vector<1x1024xf32> to vector<8x1024xf32>
    %31 = arith.addf %28, %30 : vector<8x1024xf32>
    %cst_25 = arith.constant 0.000000e+00 : f32
    %32 = vector.broadcast %cst_25 : f32 to vector<8x1024xf32>
    %33 = arith.maximumf %31, %32 : vector<8x1024xf32>
    %34 = arith.truncf %33 : vector<8x1024xf32> to vector<8x1024xbf16>
    %c0_26 = arith.constant 0 : index
    %c0_27 = arith.constant 0 : index
    %35 = vector.load %arg12[%c0_26, %c0_27] : memref<1024x512xbf16, #tpu.memory_space<vmem>>, vector<1024x512xbf16>
    %cst_28 = arith.constant dense<0.000000e+00> : vector<8x512xf32>
    %36 = tpu.matmul %34, %35, %cst_28 {dimension_numbers = #tpu.dot_dimension_numbers<[1], [0], [0], [1], [0, 0, 1, 1], [], []>} : vector<8x1024xbf16>, vector<1024x512xbf16>, vector<8x512xf32> -> vector<8x512xf32>
    %c0_29 = arith.constant 0 : index
    %c0_30 = arith.constant 0 : index
    %37 = vector.load %arg13[%c0_29, %c0_30] : memref<1x512xf32, #tpu.memory_space<vmem>>, vector<1x512xf32>
    %38 = vector.broadcast %37 : vector<1x512xf32> to vector<8x512xf32>
    %39 = arith.addf %36, %38 : vector<8x512xf32>
    %cst_31 = arith.constant 0.000000e+00 : f32
    %40 = vector.broadcast %cst_31 : f32 to vector<8x512xf32>
    %41 = arith.maximumf %39, %40 : vector<8x512xf32>
    %42 = arith.truncf %41 : vector<8x512xf32> to vector<8x512xbf16>
    %c0_32 = arith.constant 0 : index
    %c0_33 = arith.constant 0 : index
    %43 = vector.load %arg14[%c0_32, %c0_33] : memref<512x64xbf16, #tpu.memory_space<vmem>>, vector<512x64xbf16>
    %cst_34 = arith.constant dense<0.000000e+00> : vector<8x64xf32>
    %44 = tpu.matmul %42, %43, %cst_34 {dimension_numbers = #tpu.dot_dimension_numbers<[1], [0], [0], [1], [0, 0, 1, 1], [], []>} : vector<8x512xbf16>, vector<512x64xbf16>, vector<8x64xf32> -> vector<8x64xf32>
    %c0_35 = arith.constant 0 : index
    %c0_36 = arith.constant 0 : index
    %45 = vector.load %arg15[%c0_35, %c0_36] : memref<1x64xf32, #tpu.memory_space<vmem>>, vector<1x64xf32>
    %46 = vector.broadcast %45 : vector<1x64xf32> to vector<8x64xf32>
    %47 = arith.addf %44, %46 : vector<8x64xf32>
    %cst_37 = arith.constant 0.000000e+00 : f32
    %48 = vector.broadcast %cst_37 : f32 to vector<8x64xf32>
    %49 = arith.maximumf %47, %48 : vector<8x64xf32>
    %c0_38 = arith.constant 0 : index
    %c0_39 = arith.constant 0 : index
    %50 = vector.load %arg3[%c0_38, %c0_39] : memref<8x128xf32, #tpu.memory_space<vmem>>, vector<8x128xf32>
    %51 = arith.truncf %50 : vector<8x128xf32> to vector<8x128xbf16>
    %c0_40 = arith.constant 0 : index
    %c0_41 = arith.constant 0 : index
    %52 = vector.load %arg16[%c0_40, %c0_41] : memref<128x128xbf16, #tpu.memory_space<vmem>>, vector<128x128xbf16>
    %cst_42 = arith.constant dense<0.000000e+00> : vector<8x128xf32>
    %53 = tpu.matmul %51, %52, %cst_42 {dimension_numbers = #tpu.dot_dimension_numbers<[1], [0], [0], [1], [0, 0, 1, 1], [], []>} : vector<8x128xbf16>, vector<128x128xbf16>, vector<8x128xf32> -> vector<8x128xf32>
    %c0_43 = arith.constant 0 : index
    %c0_44 = arith.constant 0 : index
    %54 = vector.load %arg17[%c0_43, %c0_44] : memref<1x128xf32, #tpu.memory_space<vmem>>, vector<1x128xf32>
    %55 = vector.broadcast %54 : vector<1x128xf32> to vector<8x128xf32>
    %56 = arith.addf %53, %55 : vector<8x128xf32>
    %cst_45 = arith.constant 0.000000e+00 : f32
    %57 = vector.broadcast %cst_45 : f32 to vector<8x128xf32>
    %58 = arith.maximumf %56, %57 : vector<8x128xf32>
    %59 = arith.truncf %58 : vector<8x128xf32> to vector<8x128xbf16>
    %c0_46 = arith.constant 0 : index
    %c0_47 = arith.constant 0 : index
    %60 = vector.load %arg18[%c0_46, %c0_47] : memref<128x64xbf16, #tpu.memory_space<vmem>>, vector<128x64xbf16>
    %cst_48 = arith.constant dense<0.000000e+00> : vector<8x64xf32>
    %61 = tpu.matmul %59, %60, %cst_48 {dimension_numbers = #tpu.dot_dimension_numbers<[1], [0], [0], [1], [0, 0, 1, 1], [], []>} : vector<8x128xbf16>, vector<128x64xbf16>, vector<8x64xf32> -> vector<8x64xf32>
    %c0_49 = arith.constant 0 : index
    %c0_50 = arith.constant 0 : index
    %62 = vector.load %arg19[%c0_49, %c0_50] : memref<1x64xf32, #tpu.memory_space<vmem>>, vector<1x64xf32>
    %63 = vector.broadcast %62 : vector<1x64xf32> to vector<8x64xf32>
    %64 = arith.addf %61, %63 : vector<8x64xf32>
    %cst_51 = arith.constant 0.000000e+00 : f32
    %65 = vector.broadcast %cst_51 : f32 to vector<8x64xf32>
    %66 = arith.maximumf %64, %65 : vector<8x64xf32>
    %67 = arith.truncf %24 : vector<8x64xf32> to vector<8x64xbf16>
    %c0_52 = arith.constant 0 : index
    %c0_53 = arith.constant 0 : index
    %68 = vector.load %arg20[%c0_52, %c0_53] : memref<64x512xbf16, #tpu.memory_space<vmem>>, vector<64x512xbf16>
    %cst_54 = arith.constant dense<0.000000e+00> : vector<8x512xf32>
    %69 = tpu.matmul %67, %68, %cst_54 {dimension_numbers = #tpu.dot_dimension_numbers<[1], [0], [0], [1], [0, 0, 1, 1], [], []>} : vector<8x64xbf16>, vector<64x512xbf16>, vector<8x512xf32> -> vector<8x512xf32>
    %70 = arith.truncf %49 : vector<8x64xf32> to vector<8x64xbf16>
    %c0_55 = arith.constant 0 : index
    %c0_56 = arith.constant 0 : index
    %71 = vector.load %arg21[%c0_55, %c0_56] : memref<64x512xbf16, #tpu.memory_space<vmem>>, vector<64x512xbf16>
    %cst_57 = arith.constant dense<0.000000e+00> : vector<8x512xf32>
    %72 = tpu.matmul %70, %71, %cst_57 {dimension_numbers = #tpu.dot_dimension_numbers<[1], [0], [0], [1], [0, 0, 1, 1], [], []>} : vector<8x64xbf16>, vector<64x512xbf16>, vector<8x512xf32> -> vector<8x512xf32>
    %73 = arith.addf %69, %72 : vector<8x512xf32>
    %74 = arith.truncf %66 : vector<8x64xf32> to vector<8x64xbf16>
    %c0_58 = arith.constant 0 : index
    %c0_59 = arith.constant 0 : index
    %75 = vector.load %arg22[%c0_58, %c0_59] : memref<64x512xbf16, #tpu.memory_space<vmem>>, vector<64x512xbf16>
    %cst_60 = arith.constant dense<0.000000e+00> : vector<8x512xf32>
    %76 = tpu.matmul %74, %75, %cst_60 {dimension_numbers = #tpu.dot_dimension_numbers<[1], [0], [0], [1], [0, 0, 1, 1], [], []>} : vector<8x64xbf16>, vector<64x512xbf16>, vector<8x512xf32> -> vector<8x512xf32>
    %77 = arith.addf %73, %76 : vector<8x512xf32>
    %c0_61 = arith.constant 0 : index
    %c0_62 = arith.constant 0 : index
    %78 = vector.load %arg23[%c0_61, %c0_62] : memref<1x512xf32, #tpu.memory_space<vmem>>, vector<1x512xf32>
    %79 = vector.broadcast %78 : vector<1x512xf32> to vector<8x512xf32>
    %80 = arith.addf %77, %79 : vector<8x512xf32>
    %cst_63 = arith.constant 0.000000e+00 : f32
    %81 = vector.broadcast %cst_63 : f32 to vector<8x512xf32>
    %82 = arith.maximumf %80, %81 : vector<8x512xf32>
    %83 = arith.truncf %82 : vector<8x512xf32> to vector<8x512xbf16>
    %c0_64 = arith.constant 0 : index
    %c0_65 = arith.constant 0 : index
    %84 = vector.load %arg24[%c0_64, %c0_65] : memref<512x256xbf16, #tpu.memory_space<vmem>>, vector<512x256xbf16>
    %cst_66 = arith.constant dense<0.000000e+00> : vector<8x256xf32>
    %85 = tpu.matmul %83, %84, %cst_66 {dimension_numbers = #tpu.dot_dimension_numbers<[1], [0], [0], [1], [0, 0, 1, 1], [], []>} : vector<8x512xbf16>, vector<512x256xbf16>, vector<8x256xf32> -> vector<8x256xf32>
    %c0_67 = arith.constant 0 : index
    %c0_68 = arith.constant 0 : index
    %86 = vector.load %arg25[%c0_67, %c0_68] : memref<1x256xf32, #tpu.memory_space<vmem>>, vector<1x256xf32>
    %87 = vector.broadcast %86 : vector<1x256xf32> to vector<8x256xf32>
    %88 = arith.addf %85, %87 : vector<8x256xf32>
    %cst_69 = arith.constant 0.000000e+00 : f32
    %89 = vector.broadcast %cst_69 : f32 to vector<8x256xf32>
    %90 = arith.maximumf %88, %89 : vector<8x256xf32>
    %91 = arith.truncf %90 : vector<8x256xf32> to vector<8x256xbf16>
    %c0_70 = arith.constant 0 : index
    %c0_71 = arith.constant 0 : index
    %92 = vector.load %arg26[%c0_70, %c0_71] : memref<256x128xbf16, #tpu.memory_space<vmem>>, vector<256x128xbf16>
    %cst_72 = arith.constant dense<0.000000e+00> : vector<8x128xf32>
    %93 = tpu.matmul %91, %92, %cst_72 {dimension_numbers = #tpu.dot_dimension_numbers<[1], [0], [0], [1], [0, 0, 1, 1], [], []>} : vector<8x256xbf16>, vector<256x128xbf16>, vector<8x128xf32> -> vector<8x128xf32>
    %c0_73 = arith.constant 0 : index
    %c0_74 = arith.constant 0 : index
    %94 = vector.load %arg27[%c0_73, %c0_74] : memref<1x128xf32, #tpu.memory_space<vmem>>, vector<1x128xf32>
    %95 = vector.broadcast %94 : vector<1x128xf32> to vector<8x128xf32>
    %96 = arith.addf %93, %95 : vector<8x128xf32>
    %cst_75 = arith.constant 0.000000e+00 : f32
    %97 = vector.broadcast %cst_75 : f32 to vector<8x128xf32>
    %98 = arith.maximumf %96, %97 : vector<8x128xf32>
    %99 = arith.truncf %98 : vector<8x128xf32> to vector<8x128xbf16>
    %c0_76 = arith.constant 0 : index
    %c0_77 = arith.constant 0 : index
    %100 = vector.load %arg28[%c0_76, %c0_77] : memref<128x64xbf16, #tpu.memory_space<vmem>>, vector<128x64xbf16>
    %cst_78 = arith.constant dense<0.000000e+00> : vector<8x64xf32>
    %101 = tpu.matmul %99, %100, %cst_78 {dimension_numbers = #tpu.dot_dimension_numbers<[1], [0], [0], [1], [0, 0, 1, 1], [], []>} : vector<8x128xbf16>, vector<128x64xbf16>, vector<8x64xf32> -> vector<8x64xf32>
    %c0_79 = arith.constant 0 : index
    %c0_80 = arith.constant 0 : index
    %102 = vector.load %arg29[%c0_79, %c0_80] : memref<1x64xf32, #tpu.memory_space<vmem>>, vector<1x64xf32>
    %103 = vector.broadcast %102 : vector<1x64xf32> to vector<8x64xf32>
    %104 = arith.addf %101, %103 : vector<8x64xf32>
    %cst_81 = arith.constant 0.000000e+00 : f32
    %105 = vector.broadcast %cst_81 : f32 to vector<8x64xf32>
    %106 = arith.maximumf %104, %105 : vector<8x64xf32>
    %c0_82 = arith.constant 0 : index
    %c0_83 = arith.constant 0 : index
    %107 = vector.load %arg30[%c0_82, %c0_83] : memref<1x64xf32, #tpu.memory_space<vmem>>, vector<1x64xf32>
    %108 = vector.broadcast %107 : vector<1x64xf32> to vector<8x64xf32>
    %109 = arith.mulf %106, %108 : vector<8x64xf32>
    %cst_84 = arith.constant dense<0.000000e+00> : vector<8xf32>
    %110 = vector.multi_reduction <add>, %109, %cst_84 [1] : vector<8x64xf32> to vector<8xf32>
    %111 = vector.shape_cast %110 : vector<8xf32> to vector<8x1xf32>
    %c0_85 = arith.constant 0 : index
    %c0_86 = arith.constant 0 : index
    %112 = vector.load %arg31[%c0_85, %c0_86] : memref<1x1xf32, #tpu.memory_space<vmem>>, vector<1x1xf32>
    %113 = vector.broadcast %112 : vector<1x1xf32> to vector<8x1xf32>
    %114 = arith.addf %111, %113 : vector<8x1xf32>
    %115 = arith.negf %114 : vector<8x1xf32>
    %116 = math.exp %115 : vector<8x1xf32>
    %cst_87 = arith.constant 1.000000e+00 : f32
    %117 = vector.broadcast %cst_87 : f32 to vector<8x1xf32>
    %118 = arith.addf %117, %116 : vector<8x1xf32>
    %119 = arith.divf %117, %118 : vector<8x1xf32>
    %c0_88 = arith.constant 0 : index
    %c0_89 = arith.constant 0 : index
    %120 = vector.load %arg32[%c0_88, %c0_89] : memref<8x1xf32, #tpu.memory_space<vmem>>, vector<8x1xf32>
    tpu.vector_store %arg32[%c0_88, %c0_89], %119 {strides = array<i32>} : memref<8x1xf32, #tpu.memory_space<vmem>>, vector<8x1xf32>,
    return
  }
  func.func @transform_0(%arg0: i32) -> (i32, i32) {
    %c0_i32 = arith.constant 0 : i32
    %c0_i32_0 = arith.constant 0 : i32
    return %arg0, %c0_i32 : i32, i32
  }
  func.func @transform_1(%arg0: i32) -> (i32, i32) {
    %c0_i32 = arith.constant 0 : i32
    %c0_i32_0 = arith.constant 0 : i32
    return %arg0, %c0_i32 : i32, i32
  }
  func.func @transform_2(%arg0: i32) -> (i32, i32) {
    %c0_i32 = arith.constant 0 : i32
    %c0_i32_0 = arith.constant 0 : i32
    return %arg0, %c0_i32 : i32, i32
  }
  func.func @transform_3(%arg0: i32) -> (i32, i32) {
    %c0_i32 = arith.constant 0 : i32
    %c0_i32_0 = arith.constant 0 : i32
    %c0_i32_1 = arith.constant 0 : i32
    return %c0_i32, %c0_i32_0 : i32, i32
  }
  func.func @transform_4(%arg0: i32) -> (i32, i32) {
    %c0_i32 = arith.constant 0 : i32
    %c0_i32_0 = arith.constant 0 : i32
    %c0_i32_1 = arith.constant 0 : i32
    return %c0_i32, %c0_i32_0 : i32, i32
  }
  func.func @transform_5(%arg0: i32) -> (i32, i32) {
    %c0_i32 = arith.constant 0 : i32
    %c0_i32_0 = arith.constant 0 : i32
    %c0_i32_1 = arith.constant 0 : i32
    return %c0_i32, %c0_i32_0 : i32, i32
  }
  func.func @transform_6(%arg0: i32) -> (i32, i32) {
    %c0_i32 = arith.constant 0 : i32
    %c0_i32_0 = arith.constant 0 : i32
    %c0_i32_1 = arith.constant 0 : i32
    return %c0_i32, %c0_i32_0 : i32, i32
  }
  func.func @transform_7(%arg0: i32) -> (i32, i32) {
    %c0_i32 = arith.constant 0 : i32
    %c0_i32_0 = arith.constant 0 : i32
    %c0_i32_1 = arith.constant 0 : i32
    return %c0_i32, %c0_i32_0 : i32, i32
  }
  func.func @transform_8(%arg0: i32) -> (i32, i32) {
    %c0_i32 = arith.constant 0 : i32
    %c0_i32_0 = arith.constant 0 : i32
    %c0_i32_1 = arith.constant 0 : i32
    return %c0_i32, %c0_i32_0 : i32, i32
  }
  func.func @transform_9(%arg0: i32) -> (i32, i32) {
    %c0_i32 = arith.constant 0 : i32
    %c0_i32_0 = arith.constant 0 : i32
    %c0_i32_1 = arith.constant 0 : i32
    return %c0_i32, %c0_i32_0 : i32, i32
  }
  func.func @transform_10(%arg0: i32) -> (i32, i32) {
    %c0_i32 = arith.constant 0 : i32
    %c0_i32_0 = arith.constant 0 : i32
    %c0_i32_1 = arith.constant 0 : i32
    return %c0_i32, %c0_i32_0 : i32, i32
  }
  func.func @transform_11(%arg0: i32) -> (i32, i32) {
    %c0_i32 = arith.constant 0 : i32
    %c0_i32_0 = arith.constant 0 : i32
    %c0_i32_1 = arith.constant 0 : i32
    return %c0_i32, %c0_i32_0 : i32, i32
  }
  func.func @transform_12(%arg0: i32) -> (i32, i32) {
    %c0_i32 = arith.constant 0 : i32
    %c0_i32_0 = arith.constant 0 : i32
    %c0_i32_1 = arith.constant 0 : i32
    return %c0_i32, %c0_i32_0 : i32, i32
  }
  func.func @transform_13(%arg0: i32) -> (i32, i32) {
    %c0_i32 = arith.constant 0 : i32
    %c0_i32_0 = arith.constant 0 : i32
    %c0_i32_1 = arith.constant 0 : i32
    return %c0_i32, %c0_i32_0 : i32, i32
  }
  func.func @transform_14(%arg0: i32) -> (i32, i32) {
    %c0_i32 = arith.constant 0 : i32
    %c0_i32_0 = arith.constant 0 : i32
    %c0_i32_1 = arith.constant 0 : i32
    return %c0_i32, %c0_i32_0 : i32, i32
  }
  func.func @transform_15(%arg0: i32) -> (i32, i32) {
    %c0_i32 = arith.constant 0 : i32
    %c0_i32_0 = arith.constant 0 : i32
    %c0_i32_1 = arith.constant 0 : i32
    return %c0_i32, %c0_i32_0 : i32, i32
  }
  func.func @transform_16(%arg0: i32) -> (i32, i32) {
    %c0_i32 = arith.constant 0 : i32
    %c0_i32_0 = arith.constant 0 : i32
    %c0_i32_1 = arith.constant 0 : i32
    return %c0_i32, %c0_i32_0 : i32, i32
  }
  func.func @transform_17(%arg0: i32) -> (i32, i32) {
    %c0_i32 = arith.constant 0 : i32
    %c0_i32_0 = arith.constant 0 : i32
    %c0_i32_1 = arith.constant 0 : i32
    return %c0_i32, %c0_i32_0 : i32, i32
  }
  func.func @transform_18(%arg0: i32) -> (i32, i32) {
    %c0_i32 = arith.constant 0 : i32
    %c0_i32_0 = arith.constant 0 : i32
    %c0_i32_1 = arith.constant 0 : i32
    return %c0_i32, %c0_i32_0 : i32, i32
  }
  func.func @transform_19(%arg0: i32) -> (i32, i32) {
    %c0_i32 = arith.constant 0 : i32
    %c0_i32_0 = arith.constant 0 : i32
    %c0_i32_1 = arith.constant 0 : i32
    return %c0_i32, %c0_i32_0 : i32, i32
  }
  func.func @transform_20(%arg0: i32) -> (i32, i32) {
    %c0_i32 = arith.constant 0 : i32
    %c0_i32_0 = arith.constant 0 : i32
    %c0_i32_1 = arith.constant 0 : i32
    return %c0_i32, %c0_i32_0 : i32, i32
  }
  func.func @transform_21(%arg0: i32) -> (i32, i32) {
    %c0_i32 = arith.constant 0 : i32
    %c0_i32_0 = arith.constant 0 : i32
    %c0_i32_1 = arith.constant 0 : i32
    return %c0_i32, %c0_i32_0 : i32, i32
  }
  func.func @transform_22(%arg0: i32) -> (i32, i32) {
    %c0_i32 = arith.constant 0 : i32
    %c0_i32_0 = arith.constant 0 : i32
    %c0_i32_1 = arith.constant 0 : i32
    return %c0_i32, %c0_i32_0 : i32, i32
  }
  func.func @transform_23(%arg0: i32) -> (i32, i32) {
    %c0_i32 = arith.constant 0 : i32
    %c0_i32_0 = arith.constant 0 : i32
    %c0_i32_1 = arith.constant 0 : i32
    return %c0_i32, %c0_i32_0 : i32, i32
  }
  func.func @transform_24(%arg0: i32) -> (i32, i32) {
    %c0_i32 = arith.constant 0 : i32
    %c0_i32_0 = arith.constant 0 : i32
    %c0_i32_1 = arith.constant 0 : i32
    return %c0_i32, %c0_i32_0 : i32, i32
  }
  func.func @transform_25(%arg0: i32) -> (i32, i32) {
    %c0_i32 = arith.constant 0 : i32
    %c0_i32_0 = arith.constant 0 : i32
    %c0_i32_1 = arith.constant 0 : i32
    return %c0_i32, %c0_i32_0 : i32, i32
  }
  func.func @transform_26(%arg0: i32) -> (i32, i32) {
    %c0_i32 = arith.constant 0 : i32
    %c0_i32_0 = arith.constant 0 : i32
    %c0_i32_1 = arith.constant 0 : i32
    return %c0_i32, %c0_i32_0 : i32, i32
  }
  func.func @transform_27(%arg0: i32) -> (i32, i32) {
    %c0_i32 = arith.constant 0 : i32
    %c0_i32_0 = arith.constant 0 : i32
    %c0_i32_1 = arith.constant 0 : i32
    return %c0_i32, %c0_i32_0 : i32, i32
  }
  func.func @transform_28(%arg0: i32) -> (i32, i32) {
    %c0_i32 = arith.constant 0 : i32
    %c0_i32_0 = arith.constant 0 : i32
    %c0_i32_1 = arith.constant 0 : i32
    return %c0_i32, %c0_i32_0 : i32, i32
  }
  func.func @transform_29(%arg0: i32) -> (i32, i32) {
    %c0_i32 = arith.constant 0 : i32
    %c0_i32_0 = arith.constant 0 : i32
    %c0_i32_1 = arith.constant 0 : i32
    return %c0_i32, %c0_i32_0 : i32, i32
  }
  func.func @transform_30(%arg0: i32) -> (i32, i32) {
    %c0_i32 = arith.constant 0 : i32
    %c0_i32_0 = arith.constant 0 : i32
    %c0_i32_1 = arith.constant 0 : i32
    return %c0_i32, %c0_i32_0 : i32, i32
  }
  func.func @transform_31(%arg0: i32) -> (i32, i32) {
    %c0_i32 = arith.constant 0 : i32
    %c0_i32_0 = arith.constant 0 : i32
    return %arg0, %c0_i32 : i32, i32
  }
}

</mosaic_0001>

<bundles_post_ra>
// kernel: inference_attack_hz2.1
= control target key start
LH: loop header
LB: loop body
LE: loop exit
PB: predicated region body
PF: predicated region fallthrough
CT: control target
= control target key end

     0   :  { %s11890_s6 = smov 1   ;;  %s11891_s10 = smov 2   ;;  %s12726_s0 = inlined_call_operand.smem [shape: u32[32], index: -1, kind: input, shape index: {}] }
   0x1   :  { %s11945_s5 = sld [smem:[%s12726_s0]]   ;;  %s11892_s14 = smov 3  }
   0x2   :  { %s11950_s9 = sld [smem:[%s12726_s0 + %s11890_s6]]   ;;  %s11893_s18 = smov 4  }
   0x3   :  { %s11955_s13 = sld [smem:[%s12726_s0 + %s11891_s10]]   ;;  %s11894_s22 = smov 5  }
   0x4   :  { %s11960_s17 = sld [smem:[%s12726_s0 + %s11892_s14]]   ;;  %s11895_s26 = smov 6  }
   0x5   :  { %s11965_s21 = sld [smem:[%s12726_s0 + %s11893_s18]]   ;;  %s11896_s30 = smov 7  }
   0x6   :  { %s11970_s25 = sld [smem:[%s12726_s0 + %s11894_s22]]   ;;  %s11897_s4 = smov 8  }
   0x7   :  { %s11975_s29 = sld [smem:[%s12726_s0 + %s11895_s26]]   ;;  %s11898_s10 = smov 9  }
   0x8   :  { %s11980_s3 = sld [smem:[%s12726_s0 + %s11896_s30]]   ;;  %s11899_s15 = smov 10  }
   0x9   :  { %12731 = sst [smem:[#allocation21_spill]] %s11955_s13  ;;  %s11900_s20 = smov 11  }
   0xa   :  { %s11985_s8 = sld [smem:[%s12726_s0 + %s11897_s4]]   ;;  %s11901_s26 = smov 12  }
   0xb   :  { %s11990_s14 = sld [smem:[%s12726_s0 + %s11898_s10]]   ;;  %s11902_s1 = smov 13  }
   0xc   :  { %s11995_s19 = sld [smem:[%s12726_s0 + %s11899_s15]]   ;;  %s11903_s7 = smov 14  }
   0xd   :  { %s12000_s24 = sld [smem:[%s12726_s0 + %s11900_s20]]   ;;  %s11904_s15 = smov 15  }
   0xe   :  { %s12005_s30 = sld [smem:[%s12726_s0 + %s11901_s26]]   ;;  %s11905_s22 = smov 16  }
   0xf   :  { %s12010_s6 = sld [smem:[%s12726_s0 + %s11902_s1]]   ;;  %s11906_s28 = smov 17  }
  0x10   :  { %12732 = sst [smem:[#allocation22_spill]] %s11985_s8  ;;  %s11920_s16 = smov 31  }
  0x11   :  { %s12015_s12 = sld [smem:[%s12726_s0 + %s11903_s7]]   ;;  %s11907_s7 = smov 18  }
  0x12   :  { %12733 = sst [smem:[#allocation23_spill]] %s11995_s19 }
  0x13   :  { %s12020_s20 = sld [smem:[%s12726_s0 + %s11904_s15]]   ;;  %s11908_s15 = smov 19  }
  0x14   :  { %12734 = sst [smem:[#allocation24_spill]] %s12005_s30 }
  0x15   :  { %12735 = sst [smem:[#allocation25_spill]] %s12010_s6 }
  0x16   :  { %s12025_s27 = sld [smem:[%s12726_s0 + %s11905_s22]]   ;;  %s11909_s22 = smov 20  }
  0x17   :  { %12736 = sst [smem:[#allocation26_spill]] %s12015_s12 }
  0x18   :  { %s12030_s4 = sld [smem:[%s12726_s0 + %s11906_s28]]   ;;  %s11910_s28 = smov 21  }
  0x19   :  { %s12035_s12 = sld [smem:[%s12726_s0 + %s11907_s7]]   ;;  %s11911_s7 = smov 22  }
  0x1a   :  { %s12040_s13 = sld [smem:[%s12726_s0 + %s11908_s15]]   ;;  %s11912_s15 = smov 23  }
  0x1c   :  { %12737 = sst [smem:[#allocation27_spill]] %s12025_s27 }
  0x1d   :  { %s12045_s27 = sld [smem:[%s12726_s0 + %s11909_s22]]   ;;  %s11913_s22 = smov 24  }
  0x1e   :  { %12738 = sst [smem:[#allocation28_spill]] %s12030_s4 }
  0x1f   :  { %12739 = sst [smem:[#allocation29_spill]] %s12035_s12 }
  0x20   :  { %12740 = sst [smem:[#allocation30_spill]] %s12040_s13 }
  0x21   :  { %s12050_s4 = sld [smem:[%s12726_s0 + %s11910_s28]]   ;;  %s11914_s28 = smov 25  }
  0x22   :  { %s12055_s12 = sld [smem:[%s12726_s0 + %s11911_s7]]   ;;  %s11915_s7 = smov 26  }
  0x23   :  { %s12060_s13 = sld [smem:[%s12726_s0 + %s11912_s15]]   ;;  %s11916_s15 = smov 27  }
  0x24   :  { %s12065_s6 = sld [smem:[%s12726_s0 + %s11913_s22]]   ;;  %s11917_s22 = smov 28  }
  0x25   :  { %s12070_s30 = sld [smem:[%s12726_s0 + %s11914_s28]]   ;;  %s11918_s28 = smov 29  }
  0x26   :  { %s12080_s19 = sld [smem:[%s12726_s0 + %s11916_s15]]  }
  0x27   :  { %s12090_s8 = sld [smem:[%s12726_s0 + %s11918_s28]]  }
  0x28   :  { %12741 = sst [smem:[#allocation31_spill]] %s12055_s12 }
  0x29   :  { %s12075_s12 = sld [smem:[%s12726_s0 + %s11915_s7]]   ;;  %s11919_s7 = smov 30  }
  0x2a   :  { %12742 = sst [smem:[#allocation32_spill]] %s12065_s6 }
  0x2b   :  { %s12085_s6 = sld [smem:[%s12726_s0 + %s11917_s22]]  }
  0x2c   :  { %12744 = sst [smem:[#allocation34_spill]] %s12080_s19 }
  0x2d   :  { %s12098_s19 = sld [smem:[%s12726_s0 + %s11920_s16]]  }
  0x2f   :  { %12743 = sst [smem:[#allocation33_spill]] %s12075_s12 }
  0x30   :  { %s7334_s12 = sld [smem:[%s12726_s0 + %s11919_s7]]  }
  0x36   :  { %v68_v0 = vstv %s7334_s12 }
  0x37   :  { %69 = vst [vmem:[#allocation2] sm:$0x1] %v68_v0 }
  0x38   :  { %70 = vsyncpa [#allocation4], 0 }
  0x39   :  { %71 = vsyncpa [#allocation6], 0 }
  0x3a   :  { %72 = vsyncpa [#allocation9], 0 }
  0x3b   :  { %73 = vsyncpa [#allocation12], 0  ;;  %s108_s22 = sshll.u32 %s11990_s14, 4  ;;  %s109_s22 = int_to_ptr.hbm [resolvable:$true] %s108_s22 }
  0x3c   :  { %74 = vsyncpa [#allocation15], 0  ;;  %s11921_s23 = smov [#allocation5]   ;;  %s142_s28 = sshll.u32 %s12020_s20, 4  ;;  %s143_s28 = int_to_ptr.hbm [resolvable:$true] %s142_s28 }
  0x3d   :  { %s110_s26 = sshll.u32 %s11921_s23, 4  ;;  %s11688_s1 = sshra.s32 %s109_s22, 4  ;;  %s111_s26 = int_to_ptr.vmem [resolvable:$true] %s110_s26  ;;  %s11689_s1 = int_to_ptr.hbm [resolvable:$true] %s11688_s1 }
  0x3e   :  { %s11690_s0 = scalar_lea.hbm %s11689_s1, 512  ;;  %s11692_s12 = scalar_lea.hbm %s11990_s14, 512 }
  0x3f   :  { %p11691_p0 = scmp.ne.s32.totalorder %s11689_s1, %s11690_s0  ;;  %p11693_p1 = scmp.lt.s32.totalorder %s11689_s1, %s11990_s14 }
  0x40   :  { %p11694_p2 = scmp.lt.s32.totalorder %s11692_s12, %s11690_s0 }
  0x42   :  { %p11695_p3 = por %p11694_p2, %p11693_p1 }
  0x44   :  { %p11696_p4 = pnand %p11695_p3, %p11691_p0 }
  0x46   :  { %11699 = shalt.err (!%p11696_p4)
}
  0x47   :  { %s11922_s2 = smov 512   ;;  %s11923_s7 = smov 32  }
  0x48   :  { %116 = dma.hbm_to_vmem [thread:$0]  %s109_s22, 8192, %s111_s26, [#allocation6], %s11922_s2, %s11922_s2, %s11923_s7  }
  0x49   :  { %s11924_s10 = smov [#allocation8]   ;;  %s11712_s16 = sshra.s32 %s143_s28, 4  ;;  %s11713_s16 = int_to_ptr.hbm [resolvable:$true] %s11712_s16 }
  0x4a   :  { %s144_s11 = sshll.u32 %s11924_s10, 4  ;;  %s11714_s15 = scalar_lea.hbm %s11713_s16, 64  ;;  %s145_s11 = int_to_ptr.vmem [resolvable:$true] %s144_s11 }
  0x4b   :  { %p11715_p5 = scmp.ne.s32.totalorder %s11713_s16, %s11714_s15  ;;  %s11716_s18 = scalar_lea.hbm %s12020_s20, 64 }
  0x4c   :  { %p11717_p6 = scmp.lt.s32.totalorder %s11713_s16, %s12020_s20  ;;  %p11718_p7 = scmp.lt.s32.totalorder %s11716_s18, %s11714_s15 }
  0x4e   :  { %p11719_p8 = por %p11718_p7, %p11717_p6 }
  0x50   :  { %p11720_p9 = pnand %p11719_p8, %p11715_p5 }
  0x52   :  { %11723 = shalt.err (!%p11720_p9)
}
  0x53   :  { %s11925_s14 = smov 64   ;;  %s11926_s22 = smov 4  }
  0x54   :  { %150 = dma.hbm_to_vmem [thread:$0]  %s143_s28, 1024, %s145_s11, [#allocation9], %s11925_s14, %s11925_s14, %s11926_s22  }
  0x55   :  { %s176_s23 = sshll.u32 %s12050_s4, 4  ;;  %s11927_s26 = smov [#allocation11]   ;;  %s177_s23 = int_to_ptr.hbm [resolvable:$true] %s176_s23 }
  0x56   :  { %s178_s1 = sshll.u32 %s11927_s26, 4  ;;  %s89_s20 = sshll.u32 %s11970_s25, 4  ;;  %s179_s1 = int_to_ptr.vmem [resolvable:$true] %s178_s1  ;;  %s90_s20 = int_to_ptr.hbm [resolvable:$true] %s89_s20 }
  0x57   :  { %s11736_s0 = sshra.s32 %s177_s23, 4  ;;  %s11740_s2 = scalar_lea.hbm %s12050_s4, 128  ;;  %s11737_s0 = int_to_ptr.hbm [resolvable:$true] %s11736_s0 }
  0x58   :  { %s11738_s12 = scalar_lea.hbm %s11737_s0, 128  ;;  %p11741_p11 = scmp.lt.s32.totalorder %s11737_s0, %s12050_s4 }
  0x59   :  { %p11739_p10 = scmp.ne.s32.totalorder %s11737_s0, %s11738_s12  ;;  %p11742_p12 = scmp.lt.s32.totalorder %s11740_s2, %s11738_s12 }
  0x5b   :  { %p11743_p13 = por %p11742_p12, %p11741_p11 }
  0x5d   :  { %p11744_p0 = pnand %p11743_p13, %p11739_p10 }
  0x5f   :  { %11747 = shalt.err (!%p11744_p0)
}
  0x60   :  { %s11928_s7 = smov 256   ;;  %s11929_s28 = smov 16  }
  0x61   :  { %184 = dma.hbm_to_vmem [thread:$0]  %s177_s23, 2048, %s179_s1, [#allocation12], %s11928_s7, %s11928_s7, %s11929_s28  }
  0x62   :  { %s11930_s10 = smov [#allocation3]   ;;  %s123_s16 = sshll.u32 %s12000_s24, 4  ;;  %s12117_s16 = int_to_ptr.hbm [resolvable:$true] %s123_s16 }
  0x63   :  { %s91_s11 = sshll.u32 %s11930_s10, 4  ;;  %s11760_s4 = sshra.s32 %s90_s20, 4  ;;  %s92_s11 = int_to_ptr.vmem [resolvable:$true] %s91_s11  ;;  %s11761_s4 = int_to_ptr.hbm [resolvable:$true] %s11760_s4 }
  0x64   :  { %s11762_s15 = scalar_lea.hbm %s11761_s4, 2048  ;;  %s11764_s18 = scalar_lea.hbm %s11970_s25, 2048 }
  0x65   :  { %p11763_p1 = scmp.ne.s32.totalorder %s11761_s4, %s11762_s15  ;;  %p11765_p2 = scmp.lt.s32.totalorder %s11761_s4, %s11970_s25 }
  0x66   :  { %p11766_p3 = scmp.lt.s32.totalorder %s11764_s18, %s11762_s15 }
  0x68   :  { %p11767_p4 = por %p11766_p3, %p11765_p2 }
  0x6a   :  { %p11768_p5 = pnand %p11767_p4, %p11763_p1 }
  0x6c   :  { %11771 = shalt.err (!%p11768_p5)
}
  0x6d   :  { %97 = dma.hbm_to_vmem [thread:$0]  %s90_s20, 32768, %s92_s11, [#allocation4], %s11928_s7, %s11928_s7, %s11929_s28  }
  0x6e   :  { %s163_s23 = sshll.u32 %s12045_s27, 4  ;;  %s11931_s26 = smov [#allocation7]   ;;  %s12125_s23 = int_to_ptr.hbm [resolvable:$true] %s163_s23 }
  0x6f   :  { %s125_s1 = sshll.u32 %s11931_s26, 4  ;;  %s11784_s0 = sshra.s32 %s12117_s16, 4  ;;  %s126_s1 = int_to_ptr.vmem [resolvable:$true] %s125_s1  ;;  %s11785_s0 = int_to_ptr.hbm [resolvable:$true] %s11784_s0 }
  0x70   :  { %s11786_s25 = scalar_lea.hbm %s11785_s0, 2048  ;;  %s11788_s12 = scalar_lea.hbm %s12000_s24, 2048 }
  0x71   :  { %p11787_p6 = scmp.ne.s32.totalorder %s11785_s0, %s11786_s25  ;;  %p11789_p7 = scmp.lt.s32.totalorder %s11785_s0, %s12000_s24 }
  0x72   :  { %p11790_p8 = scmp.lt.s32.totalorder %s11788_s12, %s11786_s25 }
  0x74   :  { %p11791_p9 = por %p11790_p8, %p11789_p7 }
  0x76   :  { %p11792_p10 = pnand %p11791_p9, %p11787_p6 }
  0x78   :  { %11795 = shalt.err (!%p11792_p10)
}
  0x79   :  { %131 = dma.hbm_to_vmem [thread:$0]  %s12117_s16, 32768, %s126_s1, [#allocation6], %s11928_s7, %s11928_s7, %s11929_s28  }
  0x7a   :  { %s11932_s20 = smov [#allocation10]   ;;  %s191_s10 = sshll.u32 %s12060_s13, 4  ;;  %s12135_s10 = int_to_ptr.hbm [resolvable:$true] %s191_s10 }
  0x7b   :  { %s165_s2 = sshll.u32 %s11932_s20, 4  ;;  %s11808_s24 = sshra.s32 %s12125_s23, 4  ;;  %s166_s2 = int_to_ptr.vmem [resolvable:$true] %s165_s2  ;;  %s11809_s24 = int_to_ptr.hbm [resolvable:$true] %s11808_s24 }
  0x7c   :  { %s11810_s11 = scalar_lea.hbm %s11809_s24, 128  ;;  %s11812_s4 = scalar_lea.hbm %s12045_s27, 128 }
  0x7d   :  { %p11811_p11 = scmp.ne.s32.totalorder %s11809_s24, %s11810_s11  ;;  %p11813_p12 = scmp.lt.s32.totalorder %s11809_s24, %s12045_s27 }
  0x7e   :  { %p11814_p13 = scmp.lt.s32.totalorder %s11812_s4, %s11810_s11 }
  0x80   :  { %p11815_p0 = por %p11814_p13, %p11813_p12 }
  0x82   :  { %p11816_p1 = pnand %p11815_p0, %p11811_p11 }
  0x84   :  { %11819 = shalt.err (!%p11816_p1)
}
  0x85   :  { %171 = dma.hbm_to_vmem [thread:$0]  %s12125_s23, 2048, %s166_s2, [#allocation9], %s11928_s7, %s11928_s7, %s11929_s28  }
  0x86   :  { %s11933_s16 = smov [#allocation13]   ;;  %s206_s18 = sshll.u32 %s12070_s30, 4  ;;  %s207_s18 = int_to_ptr.hbm [resolvable:$true] %s206_s18 }
  0x87   :  { %s193_s15 = sshll.u32 %s11933_s16, 4  ;;  %s11832_s26 = sshra.s32 %s12135_s10, 4  ;;  %s194_s15 = int_to_ptr.vmem [resolvable:$true] %s193_s15  ;;  %s11833_s26 = int_to_ptr.hbm [resolvable:$true] %s11832_s26 }
  0x88   :  { %s11834_s27 = scalar_lea.hbm %s11833_s26, 512  ;;  %s11836_s1 = scalar_lea.hbm %s12060_s13, 512 }
  0x89   :  { %p11835_p2 = scmp.ne.s32.totalorder %s11833_s26, %s11834_s27  ;;  %p11837_p3 = scmp.lt.s32.totalorder %s11833_s26, %s12060_s13 }
  0x8a   :  { %p11838_p4 = scmp.lt.s32.totalorder %s11836_s1, %s11834_s27 }
  0x8c   :  { %p11839_p5 = por %p11838_p4, %p11837_p3 }
  0x8e   :  { %p11840_p6 = pnand %p11839_p5, %p11835_p2 }
  0x90   :  { %11843 = shalt.err (!%p11840_p6)
}
  0x91   :  { %s11934_s0 = smov 128   ;;  %s11935_s25 = smov 8  }
  0x92   :  { %199 = dma.hbm_to_vmem [thread:$0]  %s12135_s10, 8192, %s194_s15, [#allocation12], %s11934_s0, %s11934_s0, %s11935_s25  }
  0x93   :  { %s11936_s7 = smov [#allocation14]   ;;  %s11856_s23 = sshra.s32 %s207_s18, 4  ;;  %s11857_s23 = int_to_ptr.hbm [resolvable:$true] %s11856_s23 }
  0x94   :  { %s208_s28 = sshll.u32 %s11936_s7, 4  ;;  %s11858_s12 = scalar_lea.hbm %s11857_s23, 128  ;;  %s209_s28 = int_to_ptr.vmem [resolvable:$true] %s208_s28 }
  0x95   :  { %p11859_p7 = scmp.ne.s32.totalorder %s11857_s23, %s11858_s12  ;;  %s11860_s20 = scalar_lea.hbm %s12070_s30, 128 }
  0x96   :  { %p11861_p8 = scmp.lt.s32.totalorder %s11857_s23, %s12070_s30  ;;  %p11862_p9 = scmp.lt.s32.totalorder %s11860_s20, %s11858_s12 }
  0x98   :  { %p11863_p10 = por %p11862_p9, %p11861_p8 }
  0x9a   :  { %p11864_p11 = pnand %p11863_p10, %p11859_p7 }
  0x9c   :  { %11867 = shalt.err (!%p11864_p11)
}
  0x9d   :  { %214 = dma.hbm_to_vmem [thread:$0]  %s207_s18, 2048, %s209_s28, [#allocation15], %s11925_s14, %s11925_s14, %s11926_s22  }
  0x9e   :  { %11880 = dma.done.wait [#allocation4], 32768  }
  0x9f   :  { %11881 = vsyncadd [#allocation4], 4294934528 }
  0xa0   :  { %11882 = dma.done.wait [#allocation6], 40960  }
  0xa1   :  { %11883 = vsyncadd [#allocation6], 4294926336 }
  0xa2   :  { %11884 = dma.done.wait [#allocation9], 3072  }
  0xa3   :  { %11885 = vsyncadd [#allocation9], 4294964224 }
  0xa4   :  { %11886 = dma.done.wait [#allocation12], 10240  }
  0xa5   :  { %11887 = vsyncadd [#allocation12], 4294957056 }
  0xa6   :  { %11888 = dma.done.wait [#allocation15], 2048  }
  0xa7   :  { %11889 = vsyncadd [#allocation15], 4294965248  ;;  %v7562_v1 = vld [vmem:[%s11960_s17 + $0x1c0] sm:$0xf]  ;;  %v10829_v3 = vld [vmem:[%s11960_s17 + $0x1c4] sm:$0xf] }
  0xa8   :  { %v10833_v2 = vld [vmem:[%s11960_s17 + $0x1dc] sm:$0xf0]  ;;  %v7564_v5 = vld [vmem:[%s11960_s17 + $0x1e0] sm:$0xf0]  ;;  %v7570_v6 = vld [vmem:[%s11960_s17 + $0x1c8] sm:$0xf] }
  0xa9   :  { %v7563_v4 = vor.u32 %v10833_v2, %v7562_v1  ;;  %v10834_v7 = vld [vmem:[%s11960_s17 + $0x1e4] sm:$0xf0]  ;;  %v7567_v8 = vor.u32 %v10829_v3, %v7564_v5  ;;  %v10830_v10 = vld [vmem:[%s11960_s17 + $0x1cc] sm:$0xf]  ;;  %v7530_v12 = vld [vmem:[%s11960_s17 + $0x180] sm:$0xf] }
  0xaa   :  { %v7571_v9 = vor.u32 %v10834_v7, %v7570_v6  ;;  %v7572_v11 = vld [vmem:[%s11960_s17 + $0x1e8] sm:$0xf0]  ;;  %v10825_v14 = vld [vmem:[%s11960_s17 + $0x19c] sm:$0xf0]  ;;  %v10821_v15 = vld [vmem:[%s11960_s17 + $0x184] sm:$0xf] }
  0xab   :  { %662 = vmatpush.bf16.msra.mxu0 %v7563_v4  ;;  %v7575_v13 = vor.u32 %v10830_v10, %v7572_v11  ;;  %v7532_v16 = vld [vmem:[%s11960_s17 + $0x1a0] sm:$0xf0]  ;;  %675 = vmatpush.bf16.msra.mxu1 %v7567_v8  ;;  %v7531_v17 = vor.u32 %v10825_v14, %v7530_v12  ;;  %v7538_v19 = vld [vmem:[%s11960_s17 + $0x188] sm:$0xf]  ;;  %v10822_v21 = vld [vmem:[%s11960_s17 + $0x18c] sm:$0xf] }
  0xac   :  { %688 = vmatpush.bf16.msra.mxu2 %v7571_v9  ;;  %v7535_v18 = vor.u32 %v10821_v15, %v7532_v16  ;;  %v10826_v20 = vld [vmem:[%s11960_s17 + $0x1a4] sm:$0xf0]  ;;  %v7540_v23 = vld [vmem:[%s11960_s17 + $0x1a8] sm:$0xf0]  ;;  %v7498_v24 = vld [vmem:[%s11960_s17 + $0x140] sm:$0xf] }
  0xad   :  { %701 = vmatpush.bf16.msra.mxu3 %v7575_v13  ;;  %v7539_v22 = vor.u32 %v10826_v20, %v7538_v19  ;;  %v10817_v25 = vld [vmem:[%s11960_s17 + $0x15c] sm:$0xf0]  ;;  %v7543_v26 = vor.u32 %v10822_v21, %v7540_v23  ;;  %v10813_v27 = vld [vmem:[%s11960_s17 + $0x144] sm:$0xf]  ;;  %v7506_v29 = vld [vmem:[%s11960_s17 + $0x148] sm:$0xf] }
  0xae   :  { %v7500_v28 = vld [vmem:[%s11960_s17 + $0x160] sm:$0xf0]  ;;  %v7499_v30 = vor.u32 %v10817_v25, %v7498_v24  ;;  %v10818_v31 = vld [vmem:[%s11960_s17 + $0x164] sm:$0xf0]  ;;  %v10814_v32 = vld [vmem:[%s11960_s17 + $0x14c] sm:$0xf] }
  0xaf   :  { %663 = vmatpush.bf16.msra.mxu0 %v7531_v17  ;;  %v7508_v33 = vld [vmem:[%s11960_s17 + $0x168] sm:$0xf0]  ;;  %676 = vmatpush.bf16.msra.mxu1 %v7535_v18  ;;  %v7503_v34 = vor.u32 %v10813_v27, %v7500_v28  ;;  %v7507_v35 = vor.u32 %v10818_v31, %v7506_v29  ;;  %v7466_v36 = vld [vmem:[%s11960_s17 + $0x100] sm:$0xf]  ;;  %v10805_v38 = vld [vmem:[%s11960_s17 + $0x104] sm:$0xf] }
  0xb0   :  { %689 = vmatpush.bf16.msra.mxu2 %v7539_v22  ;;  %v10809_v37 = vld [vmem:[%s11960_s17 + $0x11c] sm:$0xf0]  ;;  %v7511_v39 = vor.u32 %v10814_v32, %v7508_v33  ;;  %v7468_v40 = vld [vmem:[%s11960_s17 + $0x120] sm:$0xf0]  ;;  %v7474_v41 = vld [vmem:[%s11960_s17 + $0x108] sm:$0xf] }
  0xb1   :  { %702 = vmatpush.bf16.msra.mxu3 %v7543_v26  ;;  %v10810_v42 = vld [vmem:[%s11960_s17 + $0x124] sm:$0xf0]  ;;  %v10806_v43 = vld [vmem:[%s11960_s17 + $0x10c] sm:$0xf]  ;;  %v7467_v45 = vor.u32 %v10809_v37, %v7466_v36  ;;  %v7471_v46 = vor.u32 %v10805_v38, %v7468_v40  ;;  %v7434_v48 = vld [vmem:[%s11960_s17 + $0xc0] sm:$0xf] }
  0xb2   :  { %v7476_v44 = vld [vmem:[%s11960_s17 + $0x128] sm:$0xf0]  ;;  %v7475_v47 = vor.u32 %v10810_v42, %v7474_v41  ;;  %v10801_v49 = vld [vmem:[%s11960_s17 + $0xdc] sm:$0xf0]  ;;  %v10797_v50 = vld [vmem:[%s11960_s17 + $0xc4] sm:$0xf] }
  0xb3   :  { %664 = vmatpush.bf16.msra.mxu0 %v7499_v30  ;;  %677 = vmatpush.bf16.msra.mxu1 %v7503_v34  ;;  %v7479_v51 = vor.u32 %v10806_v43, %v7476_v44  ;;  %v7436_v52 = vld [vmem:[%s11960_s17 + $0xe0] sm:$0xf0]  ;;  %v7442_v53 = vld [vmem:[%s11960_s17 + $0xc8] sm:$0xf]  ;;  %v10798_v55 = vld [vmem:[%s11960_s17 + $0xcc] sm:$0xf]  ;;  %v7435_v57 = vor.u32 %v10801_v49, %v7434_v48 }
  0xb4   :  { %690 = vmatpush.bf16.msra.mxu2 %v7507_v35  ;;  %v10802_v54 = vld [vmem:[%s11960_s17 + $0xe4] sm:$0xf0]  ;;  %v7444_v56 = vld [vmem:[%s11960_s17 + $0xe8] sm:$0xf0]  ;;  %v7439_v58 = vor.u32 %v10797_v50, %v7436_v52  ;;  %v7402_v60 = vld [vmem:[%s11960_s17 + $0x80] sm:$0xf] }
  0xb5   :  { %703 = vmatpush.bf16.msra.mxu3 %v7511_v39  ;;  %v7443_v59 = vor.u32 %v10802_v54, %v7442_v53  ;;  %v10793_v61 = vld [vmem:[%s11960_s17 + $0x9c] sm:$0xf0]  ;;  %v10789_v62 = vld [vmem:[%s11960_s17 + $0x84] sm:$0xf]  ;;  %v7447_v63 = vor.u32 %v10798_v55, %v7444_v56  ;;  %v7410_v1 = vld [vmem:[%s11960_s17 + $0x88] sm:$0xf] }
  0xb6   :  { %v7404_v0 = vld [vmem:[%s11960_s17 + $0xa0] sm:$0xf0]  ;;  %v10794_v2 = vld [vmem:[%s11960_s17 + $0xa4] sm:$0xf0]  ;;  %v10790_v3 = vld [vmem:[%s11960_s17 + $0x8c] sm:$0xf]  ;;  %v7403_v5 = vor.u32 %v10793_v61, %v7402_v60 }
  0xb7   :  { %665 = vmatpush.bf16.msra.mxu0 %v7467_v45  ;;  %678 = vmatpush.bf16.msra.mxu1 %v7471_v46  ;;  %v7412_v4 = vld [vmem:[%s11960_s17 + $0xa8] sm:$0xf0]  ;;  %v7407_v6 = vor.u32 %v10789_v62, %v7404_v0  ;;  %v7411_v7 = vor.u32 %v10794_v2, %v7410_v1  ;;  %v7370_v8 = vld [vmem:[%s11960_s17 + $0x40] sm:$0xf]  ;;  %v10781_v10 = vld [vmem:[%s11960_s17 + $0x44] sm:$0xf] }
  0xb8   :  { %691 = vmatpush.bf16.msra.mxu2 %v7475_v47  ;;  %v10785_v9 = vld [vmem:[%s11960_s17 + $0x5c] sm:$0xf0]  ;;  %v7415_v11 = vor.u32 %v10790_v3, %v7412_v4  ;;  %v7372_v12 = vld [vmem:[%s11960_s17 + $0x60] sm:$0xf0]  ;;  %v7378_v13 = vld [vmem:[%s11960_s17 + $0x48] sm:$0xf] }
  0xb9   :  { %704 = vmatpush.bf16.msra.mxu3 %v7479_v51  ;;  %v10786_v14 = vld [vmem:[%s11960_s17 + $0x64] sm:$0xf0]  ;;  %v10782_v15 = vld [vmem:[%s11960_s17 + $0x4c] sm:$0xf]  ;;  %v7371_v17 = vor.u32 %v10785_v9, %v7370_v8  ;;  %v7338_v18 = vld [vmem:[%s11960_s17] sm:$0xf]  ;;  %v7375_v20 = vor.u32 %v10781_v10, %v7372_v12 }
  0xba   :  { %v7380_v16 = vld [vmem:[%s11960_s17 + $0x68] sm:$0xf0]  ;;  %v10777_v19 = vld [vmem:[%s11960_s17 + $0x1c] sm:$0xf0]  ;;  %v7379_v21 = vor.u32 %v10786_v14, %v7378_v13  ;;  %v10773_v22 = vld [vmem:[%s11960_s17 + $0x4] sm:$0xf] }
  0xbb   :  { %666 = vmatpush.bf16.msra.mxu0 %v7435_v57  ;;  %679 = vmatpush.bf16.msra.mxu1 %v7439_v58  ;;  %v7340_v23 = vld [vmem:[%s11960_s17 + $0x20] sm:$0xf0]  ;;  %v7346_v24 = vld [vmem:[%s11960_s17 + $0x8] sm:$0xf]  ;;  %v7383_v25 = vor.u32 %v10782_v15, %v7380_v16  ;;  %v10774_v27 = vld [vmem:[%s11960_s17 + $0xc] sm:$0xf]  ;;  %v7339_v32 = vor.u32 %v10777_v19, %v7338_v18 }
  0xbc   :  { %692 = vmatpush.bf16.msra.mxu2 %v7443_v59  ;;  %v10778_v26 = vld [vmem:[%s11960_s17 + $0x24] sm:$0xf0]  ;;  %v7348_v28 = vld [vmem:[%s11960_s17 + $0x28] sm:$0xf0]  ;;  %v7578_v29 = vld [vmem:[%s11960_s17 + $0x1d0] sm:$0xf]  ;;  %v7343_v36 = vor.u32 %v10773_v22, %v7340_v23 }
  0xbd   :  { %705 = vmatpush.bf16.msra.mxu3 %v7447_v63  ;;  %v10835_v30 = vld [vmem:[%s11960_s17 + $0x1ec] sm:$0xf0]  ;;  %v10831_v31 = vld [vmem:[%s11960_s17 + $0x1d4] sm:$0xf]  ;;  %v7586_v34 = vld [vmem:[%s11960_s17 + $0x1d8] sm:$0xf]  ;;  %v7347_v37 = vor.u32 %v10778_v26, %v7346_v24  ;;  %v7351_v41 = vor.u32 %v10774_v27, %v7348_v28 }
  0xbe   :  { %v7580_v33 = vld [vmem:[%s11960_s17 + $0x1f0] sm:$0xf0]  ;;  %v10836_v35 = vld [vmem:[%s11960_s17 + $0x1f4] sm:$0xf0]  ;;  %v10832_v38 = vld [vmem:[%s11960_s17 + $0x1dc] sm:$0xf]  ;;  %v7579_v42 = vor.u32 %v10835_v30, %v7578_v29 }
  0xbf   :  { %667 = vmatpush.bf16.msra.mxu0 %v7403_v5  ;;  %680 = vmatpush.bf16.msra.mxu1 %v7407_v6  ;;  %v7588_v39 = vld [vmem:[%s11960_s17 + $0x1f8] sm:$0xf0]  ;;  %v258_v40 = vld [vmem:[%s11945_s5] sm:$0xff]  ;;  %v7583_v43 = vor.u32 %v10831_v31, %v7580_v33  ;;  %v7587_v44 = vor.u32 %v10836_v35, %v7586_v34  ;;  %v7546_v45 = vld [vmem:[%s11960_s17 + $0x190] sm:$0xf]  ;;  %s12745_s5 = sld [smem:[#allocation22_spill]] }
  0xc0   :  { %693 = vmatpush.bf16.msra.mxu2 %v7411_v7  ;;  %v10827_v46 = vld [vmem:[%s11960_s17 + $0x1ac] sm:$0xf0]  ;;  %v10823_v47 = vld [vmem:[%s11960_s17 + $0x194] sm:$0xf]  ;;  %v7591_v48 = vor.u32 %v10832_v38, %v7588_v39  ;;  %v12230_v49 = vpack.c.bf16 %v258_v40, %v258_v40  ;;  %v7554_v51 = vld [vmem:[%s11960_s17 + $0x198] sm:$0xf] }
  0xc1   :  { %706 = vmatpush.bf16.msra.mxu3 %v7415_v11  ;;  %v7548_v50 = vld [vmem:[%s11960_s17 + $0x1b0] sm:$0xf0]  ;;  %v10828_v52 = vld [vmem:[%s11960_s17 + $0x1b4] sm:$0xf0]  ;;  %v10824_v53 = vld [vmem:[%s11960_s17 + $0x19c] sm:$0xf]  ;;  %v7547_v55 = vor.u32 %v10827_v46, %v7546_v45 }
  0xc2   :  { %v7556_v54 = vld [vmem:[%s11960_s17 + $0x1b8] sm:$0xf0]  ;;  %v7551_v56 = vor.u32 %v10823_v47, %v7548_v50  ;;  %v7555_v57 = vor.u32 %v10828_v52, %v7554_v51  ;;  %v7514_v58 = vld [vmem:[%s11960_s17 + $0x150] sm:$0xf]  ;;  %v10815_v60 = vld [vmem:[%s11960_s17 + $0x154] sm:$0xf] }
  0xc3   :  { %668 = vmatpush.bf16.msra.mxu0 %v7371_v17  ;;  %681 = vmatpush.bf16.msra.mxu1 %v7375_v20  ;;  %v10819_v59 = vld [vmem:[%s11960_s17 + $0x16c] sm:$0xf0]  ;;  %v7559_v61 = vor.u32 %v10824_v53, %v7556_v54  ;;  %v7516_v62 = vld [vmem:[%s11960_s17 + $0x170] sm:$0xf0]  ;;  %v7522_v63 = vld [vmem:[%s11960_s17 + $0x158] sm:$0xf] }
  0xc4   :  { %694 = vmatpush.bf16.msra.mxu2 %v7379_v21  ;;  %v10820_v0 = vld [vmem:[%s11960_s17 + $0x174] sm:$0xf0]  ;;  %v10816_v1 = vld [vmem:[%s11960_s17 + $0x15c] sm:$0xf]  ;;  %v7515_v3 = vor.u32 %v10819_v59, %v7514_v58  ;;  %v7519_v4 = vor.u32 %v10815_v60, %v7516_v62  ;;  %v7482_v6 = vld [vmem:[%s11960_s17 + $0x110] sm:$0xf] }
  0xc5   :  { %707 = vmatpush.bf16.msra.mxu3 %v7383_v25  ;;  %v7524_v2 = vld [vmem:[%s11960_s17 + $0x178] sm:$0xf0]  ;;  %v7523_v5 = vor.u32 %v10820_v0, %v7522_v63  ;;  %v10811_v7 = vld [vmem:[%s11960_s17 + $0x12c] sm:$0xf0]  ;;  %v10807_v8 = vld [vmem:[%s11960_s17 + $0x114] sm:$0xf] }
  0xc6   :  { %v7527_v9 = vor.u32 %v10816_v1, %v7524_v2  ;;  %v7484_v10 = vld [vmem:[%s11960_s17 + $0x130] sm:$0xf0]  ;;  %v7490_v11 = vld [vmem:[%s11960_s17 + $0x118] sm:$0xf]  ;;  %v10808_v13 = vld [vmem:[%s11960_s17 + $0x11c] sm:$0xf]  ;;  %v7483_v15 = vor.u32 %v10811_v7, %v7482_v6 }
  0xc7   :  { %669 = vmatpush.bf16.msra.mxu0 %v7339_v32  ;;  %682 = vmatpush.bf16.msra.mxu1 %v7343_v36  ;;  %v10812_v12 = vld [vmem:[%s11960_s17 + $0x134] sm:$0xf0]  ;;  %v7492_v14 = vld [vmem:[%s11960_s17 + $0x138] sm:$0xf0]  ;;  %v7487_v16 = vor.u32 %v10807_v8, %v7484_v10  ;;  %v7450_v18 = vld [vmem:[%s11960_s17 + $0xd0] sm:$0xf] }
  0xc8   :  { %695 = vmatpush.bf16.msra.mxu2 %v7347_v37  ;;  %v7491_v17 = vor.u32 %v10812_v12, %v7490_v11  ;;  %v10803_v19 = vld [vmem:[%s11960_s17 + $0xec] sm:$0xf0]  ;;  %v10799_v20 = vld [vmem:[%s11960_s17 + $0xd4] sm:$0xf]  ;;  %v7495_v21 = vor.u32 %v10808_v13, %v7492_v14  ;;  %v7458_v23 = vld [vmem:[%s11960_s17 + $0xd8] sm:$0xf] }
  0xc9   :  { %708 = vmatpush.bf16.msra.mxu3 %v7351_v41  ;;  %v7452_v22 = vld [vmem:[%s11960_s17 + $0xf0] sm:$0xf0]  ;;  %v10804_v24 = vld [vmem:[%s11960_s17 + $0xf4] sm:$0xf0]  ;;  %v10800_v25 = vld [vmem:[%s11960_s17 + $0xdc] sm:$0xf]  ;;  %v7451_v27 = vor.u32 %v10803_v19, %v7450_v18 }
  0xca   :  { %670 = vmatmul.bf16.vlgmr.msra.gmra.mxu0 %v12230_v49  ;;  %683 = vmatmul.bf16.vlgmr.msra.gmra.mxu1 %v12230_v49  ;;  %v7460_v26 = vld [vmem:[%s11960_s17 + $0xf8] sm:$0xf0]  ;;  %v7455_v28 = vor.u32 %v10799_v20, %v7452_v22  ;;  %v7459_v29 = vor.u32 %v10804_v24, %v7458_v23  ;;  %v7418_v30 = vld [vmem:[%s11960_s17 + $0x90] sm:$0xf]  ;;  %v10791_v32 = vld [vmem:[%s11960_s17 + $0x94] sm:$0xf] }
  0xcb   :  { %714 = vmatpush.bf16.msrb.mxu0 %v7579_v42  ;;  %727 = vmatpush.bf16.msrb.mxu1 %v7583_v43  ;;  %v10795_v31 = vld [vmem:[%s11960_s17 + $0xac] sm:$0xf0]  ;;  %v7463_v33 = vor.u32 %v10800_v25, %v7460_v26  ;;  %v7420_v34 = vld [vmem:[%s11960_s17 + $0xb0] sm:$0xf0]  ;;  %v7426_v35 = vld [vmem:[%s11960_s17 + $0x98] sm:$0xf] }
  0xcc   :  { %740 = vmatpush.bf16.msrb.mxu2 %v7587_v44  ;;  %709 = vmatmul.bf16.vlgmr.msra.gmra.mxu3 %v12230_v49  ;;  %v10796_v36 = vld [vmem:[%s11960_s17 + $0xb4] sm:$0xf0]  ;;  %v10792_v37 = vld [vmem:[%s11960_s17 + $0x9c] sm:$0xf]  ;;  %v7419_v39 = vor.u32 %v10795_v31, %v7418_v30  ;;  %v7423_v40 = vor.u32 %v10791_v32, %v7420_v34  ;;  %v7386_v42 = vld [vmem:[%s11960_s17 + $0x50] sm:$0xf] }
  0xcd   :  { %753 = vmatpush.bf16.msrb.mxu3 %v7591_v48  ;;  %696 = vmatmul.bf16.vlgmr.msra.gmra.mxu2 %v12230_v49  ;;  %v7428_v38 = vld [vmem:[%s11960_s17 + $0xb8] sm:$0xf0]  ;;  %v7427_v41 = vor.u32 %v10796_v36, %v7426_v35  ;;  %v10787_v43 = vld [vmem:[%s11960_s17 + $0x6c] sm:$0xf0]  ;;  %v10783_v44 = vld [vmem:[%s11960_s17 + $0x54] sm:$0xf] }
  0xce   :  { %v7431_v45 = vor.u32 %v10792_v37, %v7428_v38  ;;  %v7388_v46 = vld [vmem:[%s11960_s17 + $0x70] sm:$0xf0]  ;;  %v7394_v47 = vld [vmem:[%s11960_s17 + $0x58] sm:$0xf]  ;;  %v10784_v50 = vld [vmem:[%s11960_s17 + $0x5c] sm:$0xf]  ;;  %v7387_v52 = vor.u32 %v10787_v43, %v7386_v42 }
  0xcf   :  { %715 = vmatpush.bf16.msrb.mxu0 %v7547_v55  ;;  %728 = vmatpush.bf16.msrb.mxu1 %v7551_v56  ;;  %v10788_v48 = vld [vmem:[%s11960_s17 + $0x74] sm:$0xf0]  ;;  %v7396_v51 = vld [vmem:[%s11960_s17 + $0x78] sm:$0xf0]  ;;  %v7354_v53 = vld [vmem:[%s11960_s17 + $0x10] sm:$0xf]  ;;  %v7391_v54 = vor.u32 %v10783_v44, %v7388_v46 }
  0xd0   :  { %741 = vmatpush.bf16.msrb.mxu2 %v7555_v57  ;;  %v7395_v55 = vor.u32 %v10788_v48, %v7394_v47  ;;  %v10779_v56 = vld [vmem:[%s11960_s17 + $0x2c] sm:$0xf0]  ;;  %v10775_v57 = vld [vmem:[%s11960_s17 + $0x14] sm:$0xf]  ;;  %v7399_v59 = vor.u32 %v10784_v50, %v7396_v51  ;;  %v7362_v60 = vld [vmem:[%s11960_s17 + $0x18] sm:$0xf] }
  0xd1   :  { %754 = vmatpush.bf16.msrb.mxu3 %v7559_v61  ;;  %v7356_v58 = vld [vmem:[%s11960_s17 + $0x30] sm:$0xf0]  ;;  %v10780_v61 = vld [vmem:[%s11960_s17 + $0x34] sm:$0xf0]  ;;  %v10776_v62 = vld [vmem:[%s11960_s17 + $0x1c] sm:$0xf]  ;;  %v7355_v2 = vor.u32 %v10779_v56, %v7354_v53 }
  0xd2   :  { %v7364_v63 = vld [vmem:[%s11960_s17 + $0x38] sm:$0xf0]  ;;  %v7706_v0 = vld [vmem:[#allocation3 + $0xe0] sm:$0xf]  ;;  %v10867_v1 = vld [vmem:[#allocation3 + $0xec] sm:$0xf0]  ;;  %v7363_v6 = vor.u32 %v10780_v61, %v7362_v60 }
  0xd3   :  { %716 = vmatpush.bf16.msrb.mxu0 %v7515_v3  ;;  %729 = vmatpush.bf16.msrb.mxu1 %v7519_v4  ;;  %v7834_v3 = vld [vmem:[#allocation3 + $0x1e0] sm:$0xf]  ;;  %v10899_v4 = vld [vmem:[#allocation3 + $0x1ec] sm:$0xf0]  ;;  %v7367_v7 = vor.u32 %v10776_v62, %v7364_v63  ;;  %v7707_v8 = vor.u32 %v10867_v1, %v7706_v0  ;;  %s12747_s13 = sld [smem:[#allocation24_spill]]  ;;  %vm6153_vm0 = vcmask 523264  }
  0xd4   :  { %742 = vmatpush.bf16.msrb.mxu2 %v7523_v5  ;;  %v7359_v5 = vor.u32 %v10775_v57, %v7356_v58  ;;  %v7962_v10 = vld [vmem:[#allocation3 + $0x2e0] sm:$0xf]  ;;  %v10931_v11 = vld [vmem:[#allocation3 + $0x2ec] sm:$0xf0]  ;;  %v7835_v12 = vor.u32 %v10899_v4, %v7834_v3  ;;  %s12748_s17 = sld [smem:[#allocation25_spill]]  ;;  %vm7294_vm4 = vcmask 7168  }
  0xd5   :  { %755 = vmatpush.bf16.msrb.mxu3 %v7527_v9  ;;  %v7690_v9 = vld [vmem:[#allocation3 + $0xc0] sm:$0xf]  ;;  %v10863_v13 = vld [vmem:[#allocation3 + $0xcc] sm:$0xf0]  ;;  %v7963_v18 = vor.u32 %v10931_v11, %v7962_v10  ;;  %s12752_s30 = sld [smem:[#allocation27_spill]] }
  0xd6   :  { %v8090_v14 = vld [vmem:[#allocation3 + $0x3e0] sm:$0xf]  ;;  %v7691_v19 = vor.u32 %v10863_v13, %v7690_v9  ;;  %v10927_v23 = vld [vmem:[#allocation3 + $0x2cc] sm:$0xf0]  ;;  %s12753_s14 = sld [smem:[#allocation26_spill]] }
  0xd7   :  { %717 = vmatpush.bf16.msrb.mxu0 %v7483_v15  ;;  %730 = vmatpush.bf16.msrb.mxu1 %v7487_v16  ;;  %v10963_v15 = vld [vmem:[#allocation3 + $0x3ec] sm:$0xf0]  ;;  %v7818_v16 = vld [vmem:[#allocation3 + $0x1c0] sm:$0xf]  ;;  %s12754_s22 = sld [smem:[#allocation29_spill]] }
  0xd8   :  { %743 = vmatpush.bf16.msrb.mxu2 %v7491_v17  ;;  %v10895_v17 = vld [vmem:[#allocation3 + $0x1cc] sm:$0xf0]  ;;  %v8091_v20 = vor.u32 %v10963_v15, %v8090_v14  ;;  %v7946_v22 = vld [vmem:[#allocation3 + $0x2c0] sm:$0xf]  ;;  %s12755_s2 = sld [smem:[#allocation31_spill]] }
  0xd9   :  { %756 = vmatpush.bf16.msrb.mxu3 %v7495_v21  ;;  %v7674_v21 = vld [vmem:[#allocation3 + $0xa0] sm:$0xf]  ;;  %v7819_v24 = vor.u32 %v10895_v17, %v7818_v16  ;;  %v10859_v25 = vld [vmem:[#allocation3 + $0xac] sm:$0xf0]  ;;  %v7947_v30 = vor.u32 %v10927_v23, %v7946_v22  ;;  %s12756_s10 = sld [smem:[#allocation32_spill]] }
  0xda   :  { %v8074_v26 = vld [vmem:[#allocation3 + $0x3c0] sm:$0xf]  ;;  %v7675_v31 = vor.u32 %v10859_v25, %v7674_v21  ;;  %v10923_v35 = vld [vmem:[#allocation3 + $0x2ac] sm:$0xf0]  ;;  %s12757_s24 = sld [smem:[#allocation34_spill]] }
  0xdb   :  { %718 = vmatpush.bf16.msrb.mxu0 %v7451_v27  ;;  %731 = vmatpush.bf16.msrb.mxu1 %v7455_v28  ;;  %v10959_v27 = vld [vmem:[#allocation3 + $0x3cc] sm:$0xf0]  ;;  %v7802_v28 = vld [vmem:[#allocation3 + $0x1a0] sm:$0xf]  ;;  %s12758_s11 = sld [smem:[#allocation33_spill]] }
  0xdc   :  { %744 = vmatpush.bf16.msrb.mxu2 %v7459_v29  ;;  %v10891_v29 = vld [vmem:[#allocation3 + $0x1ac] sm:$0xf0]  ;;  %v8075_v32 = vor.u32 %v10959_v27, %v8074_v26  ;;  %v7930_v34 = vld [vmem:[#allocation3 + $0x2a0] sm:$0xf] }
  0xdd   :  { %757 = vmatpush.bf16.msrb.mxu3 %v7463_v33  ;;  %v7658_v33 = vld [vmem:[#allocation3 + $0x80] sm:$0xf]  ;;  %v7803_v36 = vor.u32 %v10891_v29, %v7802_v28  ;;  %v10855_v37 = vld [vmem:[#allocation3 + $0x8c] sm:$0xf0]  ;;  %v7931_v42 = vor.u32 %v10923_v35, %v7930_v34 }
  0xde   :  { %v8058_v38 = vld [vmem:[#allocation3 + $0x3a0] sm:$0xf]  ;;  %v7659_v44 = vor.u32 %v10855_v37, %v7658_v33  ;;  %v10919_v47 = vld [vmem:[#allocation3 + $0x28c] sm:$0xf0] }
  0xdf   :  { %719 = vmatpush.bf16.msrb.mxu0 %v7419_v39  ;;  %732 = vmatpush.bf16.msrb.mxu1 %v7423_v40  ;;  %v10955_v39 = vld [vmem:[#allocation3 + $0x3ac] sm:$0xf0]  ;;  %v7786_v40 = vld [vmem:[#allocation3 + $0x180] sm:$0xf] }
  0xe0   :  { %745 = vmatpush.bf16.msrb.mxu2 %v7427_v41  ;;  %v10887_v41 = vld [vmem:[#allocation3 + $0x18c] sm:$0xf0]  ;;  %v7642_v43 = vld [vmem:[#allocation3 + $0x60] sm:$0xf] }
  0xe1   :  { %758 = vmatpush.bf16.msrb.mxu3 %v7431_v45  ;;  %v8059_v45 = vor.u32 %v10955_v39, %v8058_v38  ;;  %v7914_v46 = vld [vmem:[#allocation3 + $0x280] sm:$0xf]  ;;  %v7787_v48 = vor.u32 %v10887_v41, %v7786_v40  ;;  %v10951_v51 = vld [vmem:[#allocation3 + $0x38c] sm:$0xf0] }
  0xe2   :  { %v8042_v50 = vld [vmem:[#allocation3 + $0x380] sm:$0xf]  ;;  %v10883_v53 = vld [vmem:[#allocation3 + $0x16c] sm:$0xf0] }
  0xe3   :  { %720 = vmatpush.bf16.msrb.mxu0 %v7387_v52  ;;  %733 = vmatpush.bf16.msrb.mxu1 %v7391_v54  ;;  %v7770_v52 = vld [vmem:[#allocation3 + $0x160] sm:$0xf]  ;;  %v7915_v54 = vor.u32 %v10919_v47, %v7914_v46  ;;  %v10847_v56 = vld [vmem:[#allocation3 + $0x4c] sm:$0xf0]  ;;  %v8043_v60 = vor.u32 %v10951_v51, %v8042_v50 }
  0xe4   :  { %746 = vmatpush.bf16.msrb.mxu2 %v7395_v55  ;;  %v7626_v55 = vld [vmem:[#allocation3 + $0x40] sm:$0xf]  ;;  %v10915_v58 = vld [vmem:[#allocation3 + $0x26c] sm:$0xf0]  ;;  %v7771_v61 = vor.u32 %v10883_v53, %v7770_v52 }
  0xe5   :  { %759 = vmatpush.bf16.msrb.mxu3 %v7399_v59  ;;  %v7898_v57 = vld [vmem:[#allocation3 + $0x260] sm:$0xf]  ;;  %v10947_v63 = vld [vmem:[#allocation3 + $0x36c] sm:$0xf0] }
  0xe6   :  { %v8026_v62 = vld [vmem:[#allocation3 + $0x360] sm:$0xf]  ;;  %v10879_v1 = vld [vmem:[#allocation3 + $0x14c] sm:$0xf0] }
  0xe7   :  { %721 = vmatpush.bf16.msrb.mxu0 %v7355_v2  ;;  %734 = vmatpush.bf16.msrb.mxu1 %v7359_v5  ;;  %v7754_v0 = vld [vmem:[#allocation3 + $0x140] sm:$0xf]  ;;  %v7899_v2 = vor.u32 %v10915_v58, %v7898_v57  ;;  %v7627_v5 = vor.u32 %v10847_v56, %v7626_v55  ;;  %v10843_v9 = vld [vmem:[#allocation3 + $0x2c] sm:$0xf0] }
  0xe8   :  { %747 = vmatpush.bf16.msrb.mxu2 %v7363_v6  ;;  %v7610_v3 = vld [vmem:[#allocation3 + $0x20] sm:$0xf]  ;;  %v8027_v6 = vor.u32 %v10947_v63, %v8026_v62  ;;  %v10943_v11 = vld [vmem:[#allocation3 + $0x34c] sm:$0xf0] }
  0xe9   :  { %760 = vmatpush.bf16.msrb.mxu3 %v7367_v7  ;;  %v7882_v4 = vld [vmem:[#allocation3 + $0x240] sm:$0xf]  ;;  %v10911_v7 = vld [vmem:[#allocation3 + $0x24c] sm:$0xf0]  ;;  %v7611_v16 = vor.u32 %v10843_v9, %v7610_v3 }
  0xea   :  { %722 = vmatmul.bf16.vlgmr.msrb.gmra.mxu0 %v12230_v49  ;;  %735 = vmatmul.bf16.vlgmr.msrb.gmra.mxu1 %v12230_v49  ;;  %v8010_v10 = vld [vmem:[#allocation3 + $0x340] sm:$0xf]  ;;  %v10875_v13 = vld [vmem:[#allocation3 + $0x12c] sm:$0xf0]  ;;  %v7883_v14 = vor.u32 %v10911_v7, %v7882_v4 }
  0xeb   :  { %2328 = vmatpush.bf16.msra.mxu0 %v7707_v8  ;;  %2341 = vmatpush.bf16.msra.mxu1 %v7835_v12  ;;  %v7755_v8 = vor.u32 %v10879_v1, %v7754_v0  ;;  %v7738_v12 = vld [vmem:[#allocation3 + $0x120] sm:$0xf]  ;;  %v8011_v17 = vor.u32 %v10943_v11, %v8010_v10  ;;  %v10871_v25 = vld [vmem:[#allocation3 + $0x10c] sm:$0xf0] }
  0xec   :  { %748 = vmatmul.bf16.vlgmr.msrb.gmra.mxu2 %v12230_v49  ;;  %761 = vmatmul.bf16.vlgmr.msrb.gmra.mxu3 %v12230_v49  ;;  %v10851_v49 = vld [vmem:[#allocation3 + $0x6c] sm:$0xf0]  ;;  %v7594_v15 = vld [vmem:[#allocation3] sm:$0xf]  ;;  %v7739_v21 = vor.u32 %v10875_v13, %v7738_v12 }
  0xed   :  { %2354 = vmatpush.bf16.msra.mxu2 %v7963_v18  ;;  %2367 = vmatpush.bf16.msra.mxu3 %v8091_v20  ;;  %v7643_v59 = vor.u32 %v10851_v49, %v7642_v43  ;;  %v10839_v18 = vld [vmem:[#allocation3 + $0xc] sm:$0xf0]  ;;  %v7722_v22 = vld [vmem:[#allocation3 + $0x100] sm:$0xf] }
  0xee   :  { %v10907_v20 = vld [vmem:[#allocation3 + $0x22c] sm:$0xf0]  ;;  %v7994_v23 = vld [vmem:[#allocation3 + $0x320] sm:$0xf]  ;;  %v7723_v37 = vor.u32 %v10871_v25, %v7722_v22 }
  0xef   :  { %2329 = vmatpush.bf16.msra.mxu0 %v7691_v19  ;;  %2342 = vmatpush.bf16.msra.mxu1 %v7819_v24  ;;  %v7866_v19 = vld [vmem:[#allocation3 + $0x220] sm:$0xf]  ;;  %v10939_v24 = vld [vmem:[#allocation3 + $0x32c] sm:$0xf0] }
  0xf0   :  { %v8218_v26 = vld [vmem:[#allocation3 + $0x4e0] sm:$0xf]  ;;  %v10995_v27 = vld [vmem:[#allocation3 + $0x4ec] sm:$0xf0] }
  0xf1   :  { %2355 = vmatpush.bf16.msra.mxu2 %v7947_v30  ;;  %2368 = vmatpush.bf16.msra.mxu3 %v8075_v32  ;;  %v8346_v28 = vld [vmem:[#allocation3 + $0x5e0] sm:$0xf]  ;;  %v11027_v29 = vld [vmem:[#allocation3 + $0x5ec] sm:$0xf0]  ;;  %v7867_v30 = vor.u32 %v10907_v20, %v7866_v19  ;;  %v7995_v32 = vor.u32 %v10939_v24, %v7994_v23  ;;  %v8219_v38 = vor.u32 %v10995_v27, %v8218_v26 }
  0xf2   :  { %v8202_v33 = vld [vmem:[#allocation3 + $0x4c0] sm:$0xf]  ;;  %v10903_v35 = vld [vmem:[#allocation3 + $0x20c] sm:$0xf0] }
  0xf3   :  { %2330 = vmatpush.bf16.msra.mxu0 %v7675_v31  ;;  %2343 = vmatpush.bf16.msra.mxu1 %v7803_v36  ;;  %v7595_v31 = vor.u32 %v10839_v18, %v7594_v15  ;;  %v7850_v34 = vld [vmem:[#allocation3 + $0x200] sm:$0xf]  ;;  %v10935_v39 = vld [vmem:[#allocation3 + $0x30c] sm:$0xf0] }
  0xf4   :  { %v7978_v36 = vld [vmem:[#allocation3 + $0x300] sm:$0xf]  ;;  %v11059_v41 = vld [vmem:[#allocation3 + $0x6ec] sm:$0xf0]  ;;  %v7851_v47 = vor.u32 %v10903_v35, %v7850_v34 }
  0xf5   :  { %2356 = vmatpush.bf16.msra.mxu2 %v7931_v42  ;;  %2369 = vmatpush.bf16.msra.mxu3 %v8059_v45  ;;  %v8474_v40 = vld [vmem:[#allocation3 + $0x6e0] sm:$0xf]  ;;  %v8347_v42 = vor.u32 %v11027_v29, %v8346_v28  ;;  %v10991_v43 = vld [vmem:[#allocation3 + $0x4cc] sm:$0xf0] }
  0xf6   :  { %v8602_v49 = vld [vmem:[#allocation3 + $0x7e0] sm:$0xf]  ;;  %v11023_v46 = vld [vmem:[#allocation3 + $0x5cc] sm:$0xf0]  ;;  %v8475_v50 = vor.u32 %v11059_v41, %v8474_v40  ;;  %v8203_v51 = vor.u32 %v10991_v43, %v8202_v33 }
  0xf7   :  { %2331 = vmatpush.bf16.msra.mxu0 %v7659_v44  ;;  %2344 = vmatpush.bf16.msra.mxu1 %v7787_v48  ;;  %v11091_v44 = vld [vmem:[#allocation3 + $0x7ec] sm:$0xf0]  ;;  %v8330_v45 = vld [vmem:[#allocation3 + $0x5c0] sm:$0xf]  ;;  %v7979_v48 = vor.u32 %v10935_v39, %v7978_v36 }
  0xf8   :  { %v8603_v52 = vor.u32 %v11091_v44, %v8602_v49  ;;  %v8186_v53 = vld [vmem:[#allocation3 + $0x4a0] sm:$0xf]  ;;  %v11055_v55 = vld [vmem:[#allocation3 + $0x6cc] sm:$0xf0]  ;;  %v8331_v56 = vor.u32 %v11023_v46, %v8330_v45 }
  0xf9   :  { %2357 = vmatpush.bf16.msra.mxu2 %v7915_v54  ;;  %2370 = vmatpush.bf16.msra.mxu3 %v8043_v60  ;;  %v8458_v54 = vld [vmem:[#allocation3 + $0x6c0] sm:$0xf]  ;;  %v10987_v57 = vld [vmem:[#allocation3 + $0x4ac] sm:$0xf0] }
  0xfa   :  { %v8586_v58 = vld [vmem:[#allocation3 + $0x7c0] sm:$0xf]  ;;  %v8459_v62 = vor.u32 %v11055_v55, %v8458_v54  ;;  %v8187_v63 = vor.u32 %v10987_v57, %v8186_v53  ;;  %v11051_v3 = vld [vmem:[#allocation3 + $0x6ac] sm:$0xf0] }
  0xfb   :  { %2332 = vmatpush.bf16.msra.mxu0 %v7643_v59  ;;  %2345 = vmatpush.bf16.msra.mxu1 %v7771_v61  ;;  %v11087_v59 = vld [vmem:[#allocation3 + $0x7cc] sm:$0xf0]  ;;  %v8314_v60 = vld [vmem:[#allocation3 + $0x5a0] sm:$0xf] }
  0xfc   :  { %v11019_v61 = vld [vmem:[#allocation3 + $0x5ac] sm:$0xf0]  ;;  %v8587_v0 = vor.u32 %v11087_v59, %v8586_v58  ;;  %v8170_v1 = vld [vmem:[#allocation3 + $0x480] sm:$0xf] }
  0xfd   :  { %2358 = vmatpush.bf16.msra.mxu2 %v7899_v2  ;;  %2371 = vmatpush.bf16.msra.mxu3 %v8027_v6  ;;  %v8442_v2 = vld [vmem:[#allocation3 + $0x6a0] sm:$0xf]  ;;  %v8315_v4 = vor.u32 %v11019_v61, %v8314_v60  ;;  %v11083_v7 = vld [vmem:[#allocation3 + $0x7ac] sm:$0xf0] }
  0xfe   :  { %v8570_v6 = vld [vmem:[#allocation3 + $0x7a0] sm:$0xf]  ;;  %v11015_v9 = vld [vmem:[#allocation3 + $0x58c] sm:$0xf0]  ;;  %v8443_v10 = vor.u32 %v11051_v3, %v8442_v2 }
  0xff   :  { %2333 = vmatpush.bf16.msra.mxu0 %v7627_v5  ;;  %2346 = vmatpush.bf16.msra.mxu1 %v7755_v8  ;;  %v10983_v5 = vld [vmem:[#allocation3 + $0x48c] sm:$0xf0]  ;;  %v8298_v8 = vld [vmem:[#allocation3 + $0x580] sm:$0xf]  ;;  %v8571_v12 = vor.u32 %v11083_v7, %v8570_v6 }
 0x100   :  { %v8171_v11 = vor.u32 %v10983_v5, %v8170_v1  ;;  %v8154_v13 = vld [vmem:[#allocation3 + $0x460] sm:$0xf]  ;;  %v11047_v15 = vld [vmem:[#allocation3 + $0x68c] sm:$0xf0] }
 0x101   :  { %2359 = vmatpush.bf16.msra.mxu2 %v7883_v14  ;;  %2372 = vmatpush.bf16.msra.mxu3 %v8011_v17  ;;  %v8426_v14 = vld [vmem:[#allocation3 + $0x680] sm:$0xf]  ;;  %v10979_v17 = vld [vmem:[#allocation3 + $0x46c] sm:$0xf0] }
 0x102   :  { %v8554_v18 = vld [vmem:[#allocation3 + $0x780] sm:$0xf]  ;;  %v11079_v19 = vld [vmem:[#allocation3 + $0x78c] sm:$0xf0]  ;;  %v8427_v22 = vor.u32 %v11047_v15, %v8426_v14  ;;  %v8155_v23 = vor.u32 %v10979_v17, %v8154_v13  ;;  %v10897_v13 = vld [vmem:[#allocation3 + $0x1e4] sm:$0xf] }
 0x103   :  { %2334 = vmatpush.bf16.msra.mxu0 %v7611_v16  ;;  %2347 = vmatpush.bf16.msra.mxu1 %v7739_v21  ;;  %v8299_v16 = vor.u32 %v11015_v9, %v8298_v8  ;;  %v8282_v20 = vld [vmem:[#allocation3 + $0x560] sm:$0xf]  ;;  %v11011_v21 = vld [vmem:[#allocation3 + $0x56c] sm:$0xf0]  ;;  %v8555_v24 = vor.u32 %v11079_v19, %v8554_v18  ;;  %v7836_v14 = vld [vmem:[#allocation3 + $0x1f0] sm:$0xf0] }
 0x104   :  { %v8283_v25 = vor.u32 %v11011_v21, %v8282_v20  ;;  %v8138_v26 = vld [vmem:[#allocation3 + $0x440] sm:$0xf]  ;;  %v10975_v27 = vld [vmem:[#allocation3 + $0x44c] sm:$0xf0]  ;;  %v7839_v21 = vor.u32 %v10897_v13, %v7836_v14  ;;  %v10917_v13 = vld [vmem:[#allocation3 + $0x284] sm:$0xf] }
 0x105   :  { %2360 = vmatpush.bf16.msra.mxu2 %v7867_v30  ;;  %2373 = vmatpush.bf16.msra.mxu3 %v7995_v32  ;;  %v8266_v28 = vld [vmem:[#allocation3 + $0x540] sm:$0xf]  ;;  %v11007_v29 = vld [vmem:[#allocation3 + $0x54c] sm:$0xf0]  ;;  %v8139_v30 = vor.u32 %v10975_v27, %v8138_v26  ;;  %v7820_v26 = vld [vmem:[#allocation3 + $0x1d0] sm:$0xf0] }
 0x106   :  { %v8410_v32 = vld [vmem:[#allocation3 + $0x660] sm:$0xf]  ;;  %v11043_v33 = vld [vmem:[#allocation3 + $0x66c] sm:$0xf0]  ;;  %v7916_v14 = vld [vmem:[#allocation3 + $0x290] sm:$0xf0] }
 0x107   :  { %2335 = vmatpush.bf16.msra.mxu0 %v7595_v31  ;;  %2348 = vmatpush.bf16.msra.mxu1 %v7723_v37  ;;  %v8267_v31 = vor.u32 %v11007_v29, %v8266_v28  ;;  %v8538_v34 = vld [vmem:[#allocation3 + $0x760] sm:$0xf]  ;;  %v8411_v35 = vor.u32 %v11043_v33, %v8410_v32  ;;  %v11075_v36 = vld [vmem:[#allocation3 + $0x76c] sm:$0xf0]  ;;  %v10929_v32 = vld [vmem:[#allocation3 + $0x2e4] sm:$0xf] }
 0x108   :  { %v8539_v37 = vor.u32 %v11075_v36, %v8538_v34  ;;  %v10971_v39 = vld [vmem:[#allocation3 + $0x42c] sm:$0xf0]  ;;  %v8250_v41 = vld [vmem:[#allocation3 + $0x520] sm:$0xf]  ;;  %v7964_v33 = vld [vmem:[#allocation3 + $0x2f0] sm:$0xf0] }
 0x109   :  { %2361 = vmatpush.bf16.msra.mxu2 %v7851_v47  ;;  %2374 = vmatpush.bf16.msra.mxu3 %v7979_v48  ;;  %v8394_v49 = vld [vmem:[#allocation3 + $0x640] sm:$0xf]  ;;  %v11039_v44 = vld [vmem:[#allocation3 + $0x64c] sm:$0xf0]  ;;  %v10961_v34 = vld [vmem:[#allocation3 + $0x3e4] sm:$0xf] }
 0x10a   :  { %v8522_v45 = vld [vmem:[#allocation3 + $0x740] sm:$0xf]  ;;  %v8395_v46 = vor.u32 %v11039_v44, %v8394_v49  ;;  %v11071_v47 = vld [vmem:[#allocation3 + $0x74c] sm:$0xf0]  ;;  %v7967_v44 = vor.u32 %v10929_v32, %v7964_v33  ;;  %v10841_v32 = vld [vmem:[#allocation3 + $0x24] sm:$0xf] }
 0x10b   :  { %2380 = vmatpush.bf16.msrb.mxu0 %v8219_v38  ;;  %2393 = vmatpush.bf16.msrb.mxu1 %v8347_v42  ;;  %v8122_v38 = vld [vmem:[#allocation3 + $0x420] sm:$0xf]  ;;  %v11003_v42 = vld [vmem:[#allocation3 + $0x52c] sm:$0xf0]  ;;  %v8523_v48 = vor.u32 %v11071_v47, %v8522_v45  ;;  %v7612_v33 = vld [vmem:[#allocation3 + $0x30] sm:$0xf0] }
 0x10c   :  { %v8123_v40 = vor.u32 %v10971_v39, %v8122_v38  ;;  %v8251_v43 = vor.u32 %v11003_v42, %v8250_v41  ;;  %v10999_v54 = vld [vmem:[#allocation3 + $0x50c] sm:$0xf0]  ;;  %v8506_v59 = vld [vmem:[#allocation3 + $0x720] sm:$0xf]  ;;  %v8092_v38 = vld [vmem:[#allocation3 + $0x3f0] sm:$0xf0] }
 0x10d   :  { %2406 = vmatpush.bf16.msrb.mxu2 %v8475_v50  ;;  %2419 = vmatpush.bf16.msrb.mxu3 %v8603_v52  ;;  %v8106_v50 = vld [vmem:[#allocation3 + $0x400] sm:$0xf]  ;;  %v11035_v57 = vld [vmem:[#allocation3 + $0x62c] sm:$0xf0]  ;;  %v10857_v39 = vld [vmem:[#allocation3 + $0xa4] sm:$0xf] }
 0x10e   :  { %v8234_v52 = vld [vmem:[#allocation3 + $0x500] sm:$0xf]  ;;  %v11067_v60 = vld [vmem:[#allocation3 + $0x72c] sm:$0xf0]  ;;  %v10889_v42 = vld [vmem:[#allocation3 + $0x1a4] sm:$0xf] }
 0x10f   :  { %2381 = vmatpush.bf16.msrb.mxu0 %v8203_v51  ;;  %2394 = vmatpush.bf16.msrb.mxu1 %v8331_v56  ;;  %v10967_v51 = vld [vmem:[#allocation3 + $0x40c] sm:$0xf0]  ;;  %v8235_v55 = vor.u32 %v10999_v54, %v8234_v52  ;;  %v8378_v56 = vld [vmem:[#allocation3 + $0x620] sm:$0xf]  ;;  %v8507_v61 = vor.u32 %v11067_v60, %v8506_v59  ;;  %v8076_v54 = vld [vmem:[#allocation3 + $0x3d0] sm:$0xf0] }
 0x110   :  { %v8107_v53 = vor.u32 %v10967_v51, %v8106_v50  ;;  %v8379_v58 = vor.u32 %v11035_v57, %v8378_v56  ;;  %v8490_v1 = vld [vmem:[#allocation3 + $0x700] sm:$0xf]  ;;  %v11063_v2 = vld [vmem:[#allocation3 + $0x70c] sm:$0xf0]  ;;  %v7948_v50 = vld [vmem:[#allocation3 + $0x2d0] sm:$0xf0] }
 0x111   :  { %2407 = vmatpush.bf16.msrb.mxu2 %v8459_v62  ;;  %2420 = vmatpush.bf16.msrb.mxu3 %v8587_v0  ;;  %v8362_v62 = vld [vmem:[#allocation3 + $0x600] sm:$0xf]  ;;  %v8491_v3 = vor.u32 %v11063_v2, %v8490_v1  ;;  %v10957_v51 = vld [vmem:[#allocation3 + $0x3c4] sm:$0xf]  ;;  %v7660_v56 = vld [vmem:[#allocation3 + $0x90] sm:$0xf0] }
 0x112   :  { %v10885_v57 = vld [vmem:[#allocation3 + $0x184] sm:$0xf]  ;;  %v7932_v1 = vld [vmem:[#allocation3 + $0x2b0] sm:$0xf0] }
 0x113   :  { %2382 = vmatpush.bf16.msrb.mxu0 %v8187_v63  ;;  %2395 = vmatpush.bf16.msrb.mxu1 %v8315_v4  ;;  %v11031_v63 = vld [vmem:[#allocation3 + $0x60c] sm:$0xf0]  ;;  %v12294_v4 = vld [vmem:[%s11965_s21] sm:$0xff]  ;;  %s12749_s21 = sld [smem:[#allocation21_spill]] }
 0x114   :  { %v8363_v0 = vor.u32 %v11031_v63, %v8362_v62  ;;  %v326_v5 = vperm.slane %v12294_v4, 0  ;;  %v327_v6 = vperm.slane %v12294_v4, 1  ;;  %v328_v17 = vperm.slane %v12294_v4, 2  ;;  %v10953_v2 = vld [vmem:[#allocation3 + $0x3a4] sm:$0xf] }
 0x115   :  { %2408 = vmatpush.bf16.msrb.mxu2 %v8443_v10  ;;  %2421 = vmatpush.bf16.msrb.mxu3 %v8571_v12  ;;  %v10865_v10 = vld [vmem:[#allocation3 + $0xe4] sm:$0xf]  ;;  %v329_v20 = vperm.slane %v12294_v4, 3  ;;  %v8079_v62 = vor.u32 %v10957_v51, %v8076_v54  ;;  %v7724_v54 = vld [vmem:[#allocation3 + $0x110] sm:$0xf0] }
 0x117   :  { %2383 = vmatpush.bf16.msrb.mxu0 %v8171_v11  ;;  %2396 = vmatpush.bf16.msrb.mxu1 %v8299_v16  ;;  %v7708_v11 = vld [vmem:[#allocation3 + $0xf0] sm:$0xf0] }
 0x118   :  { %v7711_v18 = vor.u32 %v10865_v10, %v7708_v11 }
 0x119   :  { %2409 = vmatpush.bf16.msrb.mxu2 %v8427_v22  ;;  %2422 = vmatpush.bf16.msrb.mxu3 %v8555_v24  ;;  %v10861_v22 = vld [vmem:[#allocation3 + $0xc4] sm:$0xf] }
 0x11b   :  { %2384 = vmatpush.bf16.msrb.mxu0 %v8155_v23  ;;  %2397 = vmatpush.bf16.msrb.mxu1 %v8283_v25  ;;  %v7692_v23 = vld [vmem:[#allocation3 + $0xd0] sm:$0xf0]  ;;  %v10893_v25 = vld [vmem:[#allocation3 + $0x1c4] sm:$0xf] }
 0x11d   :  { %2410 = vmatpush.bf16.msrb.mxu2 %v8411_v35  ;;  %2423 = vmatpush.bf16.msrb.mxu3 %v8539_v37  ;;  %v7823_v37 = vor.u32 %v10893_v25, %v7820_v26 }
 0x11f   :  { %2385 = vmatpush.bf16.msrb.mxu0 %v8139_v30  ;;  %2398 = vmatpush.bf16.msrb.mxu1 %v8267_v31  ;;  %v7695_v31 = vor.u32 %v10861_v22, %v7692_v23  ;;  %v7756_v22 = vld [vmem:[#allocation3 + $0x150] sm:$0xf0]  ;;  %v7919_v23 = vor.u32 %v10917_v13, %v7916_v14  ;;  %v10989_v14 = vld [vmem:[#allocation3 + $0x4c4] sm:$0xf] }
 0x121   :  { %2411 = vmatpush.bf16.msrb.mxu2 %v8395_v46  ;;  %2424 = vmatpush.bf16.msrb.mxu3 %v8523_v48  ;;  %v8095_v46 = vor.u32 %v10961_v34, %v8092_v38  ;;  %v10925_v48 = vld [vmem:[#allocation3 + $0x2c4] sm:$0xf]  ;;  %v330_v34 = vperm.slane %v12294_v4, 4 }
 0x122   :  { %v7951_v60 = vor.u32 %v10925_v48, %v7948_v50  ;;  %v7596_v48 = vld [vmem:[#allocation3 + $0x10] sm:$0xf0] }
 0x123   :  { %2386 = vmatpush.bf16.msrb.mxu0 %v8123_v40  ;;  %2399 = vmatpush.bf16.msrb.mxu1 %v8251_v43  ;;  %v7676_v40 = vld [vmem:[#allocation3 + $0xb0] sm:$0xf0] }
 0x124   :  { %v7804_v43 = vld [vmem:[#allocation3 + $0x1b0] sm:$0xf0]  ;;  %v7679_v47 = vor.u32 %v10857_v39, %v7676_v40  ;;  %v7615_v40 = vor.u32 %v10841_v32, %v7612_v33  ;;  %v11089_v33 = vld [vmem:[#allocation3 + $0x7e4] sm:$0xf] }
 0x125   :  { %2412 = vmatpush.bf16.msrb.mxu2 %v8379_v58  ;;  %2425 = vmatpush.bf16.msrb.mxu3 %v8507_v61  ;;  %v7788_v58 = vld [vmem:[#allocation3 + $0x190] sm:$0xf0] }
 0x126   :  { %v8476_v32 = vld [vmem:[#allocation3 + $0x6f0] sm:$0xf0] }
 0x127   :  { %2387 = vmatpush.bf16.msrb.mxu0 %v8107_v53  ;;  %2400 = vmatpush.bf16.msrb.mxu1 %v8235_v55  ;;  %v7807_v53 = vor.u32 %v10889_v42, %v7804_v43  ;;  %v10853_v55 = vld [vmem:[#allocation3 + $0x84] sm:$0xf]  ;;  %v7884_v42 = vld [vmem:[#allocation3 + $0x250] sm:$0xf0] }
 0x128   :  { %v7663_v63 = vor.u32 %v10853_v55, %v7660_v56  ;;  %v10941_v43 = vld [vmem:[#allocation3 + $0x344] sm:$0xf] }
 0x129   :  { %2413 = vmatpush.bf16.msrb.mxu2 %v8363_v0  ;;  %2426 = vmatpush.bf16.msrb.mxu3 %v8491_v3  ;;  %v10921_v0 = vld [vmem:[#allocation3 + $0x2a4] sm:$0xf]  ;;  %v7791_v3 = vor.u32 %v10885_v57, %v7788_v58  ;;  %v8220_v58 = vld [vmem:[#allocation3 + $0x4f0] sm:$0xf0] }
 0x12a   :  { %v7935_v10 = vor.u32 %v10921_v0, %v7932_v1  ;;  %v10993_v55 = vld [vmem:[#allocation3 + $0x4e4] sm:$0xf]  ;;  %v7868_v1 = vld [vmem:[#allocation3 + $0x230] sm:$0xf0] }
 0x12b   :  { %v10905_v0 = vld [vmem:[#allocation3 + $0x224] sm:$0xf] }
 0x12c   :  { %v7871_v13 = vor.u32 %v10905_v0, %v7868_v1  ;;  %v11049_v1 = vld [vmem:[#allocation3 + $0x6a4] sm:$0xf] }
 0x147   :  { %v671_v7 = vpop.f32.mrf.mxu0  ;;  %v684_v9 = vpop.f32.mrf.mxu1 }
 0x148   :  { %v672_v8 = vadd.f32 %v671_v7, %v326_v5  ;;  %v685_v12 = vadd.f32 %v684_v9, %v327_v6  ;;  %v8060_v5 = vld [vmem:[#allocation3 + $0x3b0] sm:$0xf0]  ;;  %v10849_v6 = vld [vmem:[#allocation3 + $0x64] sm:$0xf] }
 0x149   :  { %v7644_v7 = vld [vmem:[#allocation3 + $0x70] sm:$0xf0]  ;;  %v8063_v11 = vor.u32 %v10953_v2, %v8060_v5 }
 0x14a   :  { %v766_v15 = vmax.f32 %v672_v8, 0.0  ;;  %v767_v16 = vmax.f32 %v685_v12, 0.0  ;;  %v10881_v8 = vld [vmem:[#allocation3 + $0x164] sm:$0xf]  ;;  %v7772_v9 = vld [vmem:[#allocation3 + $0x170] sm:$0xf0]  ;;  %v7647_v12 = vor.u32 %v10849_v6, %v7644_v7 }
 0x14b   :  { %v10937_v6 = vld [vmem:[#allocation3 + $0x324] sm:$0xf]  ;;  %v7996_v7 = vld [vmem:[#allocation3 + $0x330] sm:$0xf0] }
 0x14c   :  { %v12299_v19 = vpack.c.bf16 %v766_v15, %v766_v15  ;;  %v12302_v24 = vpack.c.bf16 %v767_v16, %v767_v16  ;;  %v10949_v15 = vld [vmem:[#allocation3 + $0x384] sm:$0xf]  ;;  %v7775_v16 = vor.u32 %v10881_v8, %v7772_v9  ;;  %v333_v9 = vperm.slane %v12294_v4, 7 }
 0x14e   :  { %2336 = vmatmul.bf16.vlgmr.msra.gmra.mxu0 %v12299_v19  ;;  %2349 = vmatmul.bf16.vlgmr.msra.gmra.mxu1 %v12302_v24 }
 0x14f   :  { %v710_v29 = vpop.f32.mrf.mxu3  ;;  %2432 = vmatpush.bf16.msra.mxu0 %v7711_v18  ;;  %v673_v30 = vpop.f32.mrf.mxu0  ;;  %2445 = vmatpush.bf16.msra.mxu1 %v7839_v21  ;;  %v10845_v18 = vld [vmem:[#allocation3 + $0x44] sm:$0xf] }
 0x150   :  { %v697_v27 = vpop.f32.mrf.mxu2  ;;  %v711_v35 = vadd.f32 %v710_v29, %v329_v20  ;;  %v686_v36 = vpop.f32.mrf.mxu1  ;;  %v7628_v20 = vld [vmem:[#allocation3 + $0x50] sm:$0xf0]  ;;  %v10877_v21 = vld [vmem:[#allocation3 + $0x144] sm:$0xf] }
 0x151   :  { %v698_v28 = vadd.f32 %v697_v27, %v328_v17  ;;  %v8044_v17 = vld [vmem:[#allocation3 + $0x390] sm:$0xf0]  ;;  %v7631_v26 = vor.u32 %v10845_v18, %v7628_v20  ;;  %v10913_v27 = vld [vmem:[#allocation3 + $0x264] sm:$0xf]  ;;  %v7759_v30 = vor.u32 %v10877_v21, %v7756_v22  ;;  %v7999_v18 = vor.u32 %v10937_v6, %v7996_v7 }
 0x152   :  { %v769_v49 = vmax.f32 %v711_v35, 0.0  ;;  %v8047_v25 = vor.u32 %v10949_v15, %v8044_v17  ;;  %v10945_v29 = vld [vmem:[#allocation3 + $0x364] sm:$0xf]  ;;  %v7740_v36 = vld [vmem:[#allocation3 + $0x130] sm:$0xf0] }
 0x153   :  { %v768_v41 = vmax.f32 %v698_v28, 0.0  ;;  %2433 = vmatpush.bf16.msra.mxu0 %v7695_v31  ;;  %2446 = vmatpush.bf16.msra.mxu1 %v7823_v37  ;;  %v7900_v28 = vld [vmem:[#allocation3 + $0x270] sm:$0xf0]  ;;  %v10873_v35 = vld [vmem:[#allocation3 + $0x124] sm:$0xf]  ;;  %v331_v37 = vperm.slane %v12294_v4, 5 }
 0x154   :  { %v12308_v52 = vpack.c.bf16 %v769_v49, %v769_v49  ;;  %v8028_v31 = vld [vmem:[#allocation3 + $0x370] sm:$0xf0]  ;;  %v7903_v38 = vor.u32 %v10913_v27, %v7900_v28  ;;  %v10901_v21 = vld [vmem:[#allocation3 + $0x204] sm:$0xf] }
 0x155   :  { %v12306_v45 = vpack.c.bf16 %v768_v41, %v768_v41  ;;  %v8031_v39 = vor.u32 %v10945_v29, %v8028_v31  ;;  %v10909_v41 = vld [vmem:[#allocation3 + $0x244] sm:$0xf]  ;;  %v8204_v15 = vld [vmem:[#allocation3 + $0x4d0] sm:$0xf0] }
 0x156   :  { %2375 = vmatmul.bf16.vlgmr.msra.gmra.mxu3 %v12308_v52  ;;  %v7887_v57 = vor.u32 %v10909_v41, %v7884_v42  ;;  %v8332_v20 = vld [vmem:[#allocation3 + $0x5d0] sm:$0xf0]  ;;  %v11057_v28 = vld [vmem:[#allocation3 + $0x6e4] sm:$0xf]  ;;  %v8207_v31 = vor.u32 %v10989_v14, %v8204_v15 }
 0x157   :  { %2362 = vmatmul.bf16.vlgmr.msra.gmra.mxu2 %v12306_v45  ;;  %2471 = vmatpush.bf16.msra.mxu3 %v8095_v46  ;;  %v712_v61 = vpop.f32.mrf.mxu3  ;;  %v8012_v46 = vld [vmem:[#allocation3 + $0x350] sm:$0xf0]  ;;  %v11017_v42 = vld [vmem:[#allocation3 + $0x5a4] sm:$0xf] }
 0x158   :  { %2458 = vmatpush.bf16.msra.mxu2 %v7967_v44  ;;  %v699_v59 = vpop.f32.mrf.mxu2  ;;  %2434 = vmatpush.bf16.msra.mxu0 %v7679_v47  ;;  %v7743_v44 = vor.u32 %v10873_v35, %v7740_v36  ;;  %v10837_v47 = vld [vmem:[#allocation3 + $0x4] sm:$0xf]  ;;  %v7852_v22 = vld [vmem:[#allocation3 + $0x210] sm:$0xf0] }
 0x159   :  { %2447 = vmatpush.bf16.msra.mxu1 %v7807_v53  ;;  %v10869_v53 = vld [vmem:[#allocation3 + $0x104] sm:$0xf]  ;;  %v7980_v27 = vld [vmem:[#allocation3 + $0x310] sm:$0xf0] }
 0x15a   :  { %v11025_v59 = vld [vmem:[#allocation3 + $0x5e4] sm:$0xf]  ;;  %v7727_v5 = vor.u32 %v10869_v53, %v7724_v54  ;;  %v8572_v6 = vld [vmem:[#allocation3 + $0x7b0] sm:$0xf0] }
 0x15b   :  { %2472 = vmatpush.bf16.msra.mxu3 %v8079_v62  ;;  %v8015_v62 = vor.u32 %v10941_v43, %v8012_v46  ;;  %v8316_v43 = vld [vmem:[#allocation3 + $0x5b0] sm:$0xf0]  ;;  %v11085_v53 = vld [vmem:[#allocation3 + $0x7c4] sm:$0xf] }
 0x15c   :  { %2459 = vmatpush.bf16.msra.mxu2 %v7951_v60  ;;  %2435 = vmatpush.bf16.msra.mxu0 %v7663_v63  ;;  %v8348_v60 = vld [vmem:[#allocation3 + $0x5f0] sm:$0xf0]  ;;  %v7599_v63 = vor.u32 %v10837_v47, %v7596_v48  ;;  %v8319_v54 = vor.u32 %v11017_v42, %v8316_v43  ;;  %v10977_v7 = vld [vmem:[#allocation3 + $0x464] sm:$0xf] }
 0x15d   :  { %2448 = vmatpush.bf16.msra.mxu1 %v7791_v3  ;;  %v332_v3 = vperm.slane %v12294_v4, 6  ;;  %v11045_v15 = vld [vmem:[#allocation3 + $0x684] sm:$0xf] }
 0x15e   :  { %v11069_v42 = vld [vmem:[#allocation3 + $0x744] sm:$0xf] }
 0x15f   :  { %2473 = vmatpush.bf16.msra.mxu3 %v8063_v11 }
 0x160   :  { %2460 = vmatpush.bf16.msra.mxu2 %v7935_v10  ;;  %2436 = vmatpush.bf16.msra.mxu0 %v7647_v12  ;;  %v8223_v10 = vor.u32 %v10993_v55, %v8220_v58  ;;  %v8351_v12 = vor.u32 %v11025_v59, %v8348_v60  ;;  %v8588_v55 = vld [vmem:[#allocation3 + $0x7d0] sm:$0xf0]  ;;  %v11013_v59 = vld [vmem:[#allocation3 + $0x584] sm:$0xf] }
 0x161   :  { %2449 = vmatpush.bf16.msra.mxu1 %v7775_v16  ;;  %v11021_v16 = vld [vmem:[#allocation3 + $0x5c4] sm:$0xf]  ;;  %v8300_v60 = vld [vmem:[#allocation3 + $0x590] sm:$0xf0] }
 0x162   :  { %v8335_v36 = vor.u32 %v11021_v16, %v8332_v20  ;;  %v8428_v16 = vld [vmem:[#allocation3 + $0x690] sm:$0xf0]  ;;  %v11077_v20 = vld [vmem:[#allocation3 + $0x784] sm:$0xf] }
 0x163   :  { %2474 = vmatpush.bf16.msra.mxu3 %v8047_v25 }
 0x164   :  { %2461 = vmatpush.bf16.msra.mxu2 %v7919_v23  ;;  %2437 = vmatpush.bf16.msra.mxu0 %v7631_v26  ;;  %v10933_v26 = vld [vmem:[#allocation3 + $0x304] sm:$0xf] }
 0x165   :  { %2450 = vmatpush.bf16.msra.mxu1 %v7759_v30  ;;  %v7983_v41 = vor.u32 %v10933_v26, %v7980_v27  ;;  %v8431_v26 = vor.u32 %v11045_v15, %v8428_v16  ;;  %v11061_v15 = vld [vmem:[#allocation3 + $0x704] sm:$0xf]  ;;  %v8492_v16 = vld [vmem:[#allocation3 + $0x710] sm:$0xf0] }
 0x167   :  { %v723_v49 = vpop.f32.mrf.mxu0  ;;  %v736_v51 = vpop.f32.mrf.mxu1  ;;  %2475 = vmatpush.bf16.msra.mxu3 %v8031_v39  ;;  %v8188_v39 = vld [vmem:[#allocation3 + $0x4b0] sm:$0xf0] }
 0x168   :  { %v724_v50 = vadd.f32 %v723_v49, %v330_v34  ;;  %v737_v56 = vadd.f32 %v736_v51, %v331_v37  ;;  %2462 = vmatpush.bf16.msra.mxu2 %v7903_v38  ;;  %2438 = vmatpush.bf16.msra.mxu0 %v7615_v40  ;;  %v8604_v34 = vld [vmem:[#allocation3 + $0x7f0] sm:$0xf0]  ;;  %v7855_v37 = vor.u32 %v10901_v21, %v7852_v22  ;;  %v10985_v38 = vld [vmem:[#allocation3 + $0x4a4] sm:$0xf] }
 0x169   :  { %2451 = vmatpush.bf16.msra.mxu1 %v7743_v44  ;;  %v8479_v44 = vor.u32 %v11057_v28, %v8476_v32  ;;  %v8607_v47 = vor.u32 %v11089_v33, %v8604_v34  ;;  %v8191_v48 = vor.u32 %v10985_v38, %v8188_v39  ;;  %v8460_v51 = vld [vmem:[#allocation3 + $0x6d0] sm:$0xf0]  ;;  %v10973_v22 = vld [vmem:[#allocation3 + $0x444] sm:$0xf] }
 0x16a   :  { %v770_v61 = vmax.f32 %v724_v50, 0.0  ;;  %v771_v2 = vmax.f32 %v737_v56, 0.0  ;;  %v11053_v50 = vld [vmem:[#allocation3 + $0x6c4] sm:$0xf]  ;;  %v8556_v21 = vld [vmem:[#allocation3 + $0x790] sm:$0xf0] }
 0x16b   :  { %2476 = vmatpush.bf16.msra.mxu3 %v8015_v62  ;;  %v10981_v56 = vld [vmem:[#allocation3 + $0x484] sm:$0xf]  ;;  %v8463_v62 = vor.u32 %v11053_v50, %v8460_v51  ;;  %v8559_v27 = vor.u32 %v11077_v20, %v8556_v21  ;;  %v8540_v33 = vld [vmem:[#allocation3 + $0x770] sm:$0xf0] }
 0x16c   :  { %v12315_v8 = vpack.c.bf16 %v770_v61, %v770_v61  ;;  %v12318_v11 = vpack.c.bf16 %v771_v2, %v771_v2  ;;  %2463 = vmatpush.bf16.msra.mxu2 %v7887_v57  ;;  %2439 = vmatpush.bf16.msra.mxu0 %v7599_v63  ;;  %v8172_v57 = vld [vmem:[#allocation3 + $0x490] sm:$0xf0]  ;;  %v8591_v63 = vor.u32 %v11085_v53, %v8588_v55  ;;  %v11041_v28 = vld [vmem:[#allocation3 + $0x664] sm:$0xf] }
 0x16d   :  { %2452 = vmatpush.bf16.msra.mxu1 %v7727_v5  ;;  %v8175_v0 = vor.u32 %v10981_v56, %v8172_v57  ;;  %v8444_v2 = vld [vmem:[#allocation3 + $0x6b0] sm:$0xf0]  ;;  %v11081_v5 = vld [vmem:[#allocation3 + $0x7a4] sm:$0xf]  ;;  %v10868_v56 = vld [vmem:[#allocation3 + $0xf4] sm:$0xf0] }
 0x16e   :  { %2388 = vmatmul.bf16.vlgmr.msrb.gmra.mxu0 %v12315_v8  ;;  %2401 = vmatmul.bf16.vlgmr.msrb.gmra.mxu1 %v12318_v11  ;;  %v8575_v14 = vor.u32 %v11081_v5, %v8572_v6  ;;  %v11073_v32 = vld [vmem:[#allocation3 + $0x764] sm:$0xf]  ;;  %v8108_v50 = vld [vmem:[#allocation3 + $0x410] sm:$0xf0]  ;;  %v7842_v57 = vld [vmem:[#allocation3 + $0x1e8] sm:$0xf] }
 0x16f   :  { %v749_v17 = vpop.f32.mrf.mxu2  ;;  %v762_v25 = vpop.f32.mrf.mxu3  ;;  %2477 = vmatpush.bf16.msra.mxu3 %v7999_v18  ;;  %v10969_v34 = vld [vmem:[#allocation3 + $0x424] sm:$0xf]  ;;  %v8543_v39 = vor.u32 %v11073_v32, %v8540_v33  ;;  %v8236_v53 = vld [vmem:[#allocation3 + $0x510] sm:$0xf0]  ;;  %v7698_v5 = vld [vmem:[#allocation3 + $0xc8] sm:$0xf] }
 0x170   :  { %v750_v23 = vadd.f32 %v749_v17, %v332_v3  ;;  %v725_v4 = vpop.f32.mrf.mxu0  ;;  %v763_v29 = vadd.f32 %v762_v25, %v333_v9  ;;  %2484 = vmatpush.bf16.msrb.mxu0 %v8223_v10  ;;  %v738_v30 = vpop.f32.mrf.mxu1  ;;  %2464 = vmatpush.bf16.msra.mxu2 %v7871_v13  ;;  %v8303_v3 = vor.u32 %v11013_v59, %v8300_v60  ;;  %v8156_v9 = vld [vmem:[#allocation3 + $0x470] sm:$0xf0]  ;;  %v11009_v10 = vld [vmem:[#allocation3 + $0x564] sm:$0xf]  ;;  %v7954_v32 = vld [vmem:[#allocation3 + $0x2c8] sm:$0xf] }
 0x171   :  { %2497 = vmatpush.bf16.msrb.mxu1 %v8351_v12  ;;  %v8284_v12 = vld [vmem:[#allocation3 + $0x570] sm:$0xf0]  ;;  %v8447_v13 = vor.u32 %v11049_v1, %v8444_v2  ;;  %v8159_v17 = vor.u32 %v10977_v7, %v8156_v9  ;;  %v11005_v25 = vld [vmem:[#allocation3 + $0x544] sm:$0xf]  ;;  %v10864_v7 = vld [vmem:[#allocation3 + $0xd4] sm:$0xf0] }
 0x172   :  { %v772_v35 = vmax.f32 %v750_v23, 0.0  ;;  %v773_v40 = vmax.f32 %v763_v29, 0.0  ;;  %v8287_v18 = vor.u32 %v11009_v10, %v8284_v12  ;;  %v8140_v23 = vld [vmem:[#allocation3 + $0x450] sm:$0xf0]  ;;  %v10997_v51 = vld [vmem:[#allocation3 + $0x504] sm:$0xf]  ;;  %v7699_v20 = vor.u32 %v10864_v7, %v7698_v5 }
 0x173   :  { %2478 = vmatpush.bf16.msra.mxu3 %v7983_v41  ;;  %v8268_v4 = vld [vmem:[#allocation3 + $0x550] sm:$0xf0]  ;;  %v8143_v30 = vor.u32 %v10973_v22, %v8140_v23  ;;  %v11033_v60 = vld [vmem:[#allocation3 + $0x624] sm:$0xf]  ;;  %v7826_v9 = vld [vmem:[#allocation3 + $0x1c8] sm:$0xf] }
 0x174   :  { %v12322_v49 = vpack.c.bf16 %v772_v35, %v772_v35  ;;  %v12324_v46 = vpack.c.bf16 %v773_v40, %v773_v40  ;;  %2485 = vmatpush.bf16.msrb.mxu0 %v8207_v31  ;;  %2465 = vmatpush.bf16.msra.mxu2 %v7855_v37  ;;  %v8412_v29 = vld [vmem:[#allocation3 + $0x670] sm:$0xf0]  ;;  %v8271_v31 = vor.u32 %v11005_v25, %v8268_v4  ;;  %v11037_v40 = vld [vmem:[#allocation3 + $0x644] sm:$0xf]  ;;  %v10896_v10 = vld [vmem:[#allocation3 + $0x1d4] sm:$0xf0] }
 0x175   :  { %2498 = vmatpush.bf16.msrb.mxu1 %v8335_v36  ;;  %v8124_v35 = vld [vmem:[#allocation3 + $0x430] sm:$0xf0]  ;;  %v11001_v36 = vld [vmem:[#allocation3 + $0x524] sm:$0xf]  ;;  %v8415_v38 = vor.u32 %v11041_v28, %v8412_v29  ;;  %v7827_v21 = vor.u32 %v10896_v10, %v7826_v9  ;;  %v8098_v22 = vld [vmem:[#allocation3 + $0x3e8] sm:$0xf]  ;;  %v8495_v29 = vor.u32 %v11061_v15, %v8492_v16 }
 0x176   :  { %2414 = vmatmul.bf16.vlgmr.msrb.gmra.mxu2 %v12322_v49  ;;  %2427 = vmatmul.bf16.vlgmr.msrb.gmra.mxu3 %v12324_v46  ;;  %v8252_v37 = vld [vmem:[#allocation3 + $0x530] sm:$0xf0]  ;;  %v8127_v43 = vor.u32 %v10969_v34, %v8124_v35  ;;  %v10964_v23 = vld [vmem:[#allocation3 + $0x3f4] sm:$0xf0]  ;;  %v7682_v25 = vld [vmem:[#allocation3 + $0xa8] sm:$0xf] }
 0x177   :  { %v751_v58 = vpop.f32.mrf.mxu2  ;;  %v764_v61 = vpop.f32.mrf.mxu3  ;;  %2523 = vmatpush.bf16.msrb.mxu3 %v8607_v47  ;;  %v8396_v41 = vld [vmem:[#allocation3 + $0x650] sm:$0xf0]  ;;  %v10892_v28 = vld [vmem:[#allocation3 + $0x1b4] sm:$0xf0]  ;;  %v7762_v5 = vld [vmem:[#allocation3 + $0x148] sm:$0xf] }
 0x178   :  { %2510 = vmatpush.bf16.msrb.mxu2 %v8479_v44  ;;  %2486 = vmatpush.bf16.msrb.mxu0 %v8191_v48  ;;  %v8255_v44 = vor.u32 %v11001_v36, %v8252_v37  ;;  %v8524_v47 = vld [vmem:[#allocation3 + $0x750] sm:$0xf0]  ;;  %v10965_v48 = vld [vmem:[#allocation3 + $0x404] sm:$0xf]  ;;  %v8399_v55 = vor.u32 %v11037_v40, %v8396_v41  ;;  %v10900_v58 = vld [vmem:[#allocation3 + $0x1f4] sm:$0xf0] }
 0x179   :  { %2499 = vmatpush.bf16.msrb.mxu1 %v8319_v54  ;;  %v7714_v54 = vld [vmem:[#allocation3 + $0xe8] sm:$0xf]  ;;  %v8527_v59 = vor.u32 %v11069_v42, %v8524_v47  ;;  %v8380_v61 = vld [vmem:[#allocation3 + $0x630] sm:$0xf0]  ;;  %v10928_v33 = vld [vmem:[#allocation3 + $0x2d4] sm:$0xf0] }
 0x17a   :  { %v8508_v1 = vld [vmem:[#allocation3 + $0x730] sm:$0xf0]  ;;  %v7715_v2 = vor.u32 %v10868_v56, %v7714_v54  ;;  %v8383_v6 = vor.u32 %v11033_v60, %v8380_v61  ;;  %v8082_v36 = vld [vmem:[#allocation3 + $0x3c8] sm:$0xf]  ;;  %v10960_v37 = vld [vmem:[#allocation3 + $0x3d4] sm:$0xf0]  ;;  %v7955_v42 = vor.u32 %v10928_v33, %v7954_v32 }
 0x17b   :  { %2524 = vmatpush.bf16.msrb.mxu3 %v8591_v63  ;;  %v8239_v63 = vor.u32 %v10997_v51, %v8236_v53  ;;  %v7794_v40 = vld [vmem:[#allocation3 + $0x188] sm:$0xf]  ;;  %v10888_v41 = vld [vmem:[#allocation3 + $0x194] sm:$0xf0] }
 0x17c   :  { %2511 = vmatpush.bf16.msrb.mxu2 %v8463_v62  ;;  %2487 = vmatpush.bf16.msrb.mxu0 %v8175_v0  ;;  %v8111_v62 = vor.u32 %v10965_v48, %v8108_v50  ;;  %v11065_v0 = vld [vmem:[#allocation3 + $0x724] sm:$0xf]  ;;  %v10924_v47 = vld [vmem:[#allocation3 + $0x2b4] sm:$0xf0]  ;;  %v7795_v50 = vor.u32 %v10888_v41, %v7794_v40  ;;  %v8066_v51 = vld [vmem:[#allocation3 + $0x3a8] sm:$0xf] }
 0x17d   :  { %2500 = vmatpush.bf16.msrb.mxu1 %v8303_v3  ;;  %v7843_v3 = vor.u32 %v10900_v58, %v7842_v57  ;;  %v8511_v12 = vor.u32 %v11065_v0, %v8508_v1  ;;  %v10956_v53 = vld [vmem:[#allocation3 + $0x3b4] sm:$0xf0]  ;;  %v7650_v54 = vld [vmem:[#allocation3 + $0x68] sm:$0xf] }
 0x17e   :  { %2440 = vmatmul.bf16.vlgmr.msra.gmra.mxu0 %v12299_v19  ;;  %2453 = vmatmul.bf16.vlgmr.msra.gmra.mxu1 %v12302_v24  ;;  %v7778_v56 = vld [vmem:[#allocation3 + $0x168] sm:$0xf]  ;;  %v10884_v57 = vld [vmem:[#allocation3 + $0x174] sm:$0xf0] }
 0x17f   :  { %2525 = vmatpush.bf16.msrb.mxu3 %v8575_v14  ;;  %v8364_v14 = vld [vmem:[#allocation3 + $0x610] sm:$0xf0]  ;;  %v7922_v60 = vld [vmem:[#allocation3 + $0x288] sm:$0xf]  ;;  %v10920_v61 = vld [vmem:[#allocation3 + $0x294] sm:$0xf0] }
 0x180   :  { %2512 = vmatpush.bf16.msrb.mxu2 %v8447_v13  ;;  %2488 = vmatpush.bf16.msrb.mxu0 %v8159_v17  ;;  %v11029_v13 = vld [vmem:[#allocation3 + $0x604] sm:$0xf]  ;;  %v7970_v17 = vld [vmem:[#allocation3 + $0x2e8] sm:$0xf]  ;;  %v10952_v1 = vld [vmem:[#allocation3 + $0x394] sm:$0xf0]  ;;  %v7923_v7 = vor.u32 %v10920_v61, %v7922_v60 }
 0x181   :  { %2501 = vmatpush.bf16.msrb.mxu1 %v8287_v18  ;;  %v10932_v18 = vld [vmem:[#allocation3 + $0x2f4] sm:$0xf0]  ;;  %v8367_v4 = vor.u32 %v11029_v13, %v8364_v14  ;;  %v8050_v0 = vld [vmem:[#allocation3 + $0x388] sm:$0xf] }
 0x182   :  { %v8051_v9 = vor.u32 %v10952_v1, %v8050_v0  ;;  %v7906_v10 = vld [vmem:[#allocation3 + $0x268] sm:$0xf]  ;;  %v10948_v16 = vld [vmem:[#allocation3 + $0x374] sm:$0xf0] }
 0x183   :  { %2526 = vmatpush.bf16.msrb.mxu3 %v8559_v27  ;;  %v7810_v27 = vld [vmem:[#allocation3 + $0x1a8] sm:$0xf]  ;;  %v10872_v33 = vld [vmem:[#allocation3 + $0x114] sm:$0xf0] }
 0x184   :  { %2513 = vmatpush.bf16.msrb.mxu2 %v8431_v26  ;;  %2489 = vmatpush.bf16.msrb.mxu0 %v8143_v30  ;;  %v10860_v26 = vld [vmem:[#allocation3 + $0xb4] sm:$0xf0]  ;;  %v7971_v30 = vor.u32 %v10932_v18, %v7970_v17  ;;  %v7811_v35 = vor.u32 %v10892_v28, %v7810_v27  ;;  %v8034_v15 = vld [vmem:[#allocation3 + $0x368] sm:$0xf] }
 0x185   :  { %2502 = vmatpush.bf16.msrb.mxu1 %v8271_v31  ;;  %v8099_v31 = vor.u32 %v10964_v23, %v8098_v22  ;;  %v7683_v34 = vor.u32 %v10860_v26, %v7682_v25  ;;  %v7618_v17 = vld [vmem:[#allocation3 + $0x28] sm:$0xf]  ;;  %v10844_v18 = vld [vmem:[#allocation3 + $0x34] sm:$0xf0]  ;;  %v8035_v23 = vor.u32 %v10948_v16, %v8034_v15 }
 0x186   :  { %2466 = vmatmul.bf16.vlgmr.msra.gmra.mxu2 %v12306_v45  ;;  %2479 = vmatmul.bf16.vlgmr.msra.gmra.mxu3 %v12308_v52  ;;  %v7890_v25 = vld [vmem:[#allocation3 + $0x248] sm:$0xf]  ;;  %v7619_v27 = vor.u32 %v10844_v18, %v7618_v17  ;;  %v10908_v41 = vld [vmem:[#allocation3 + $0x234] sm:$0xf0] }
 0x187   :  { %2527 = vmatpush.bf16.msrb.mxu3 %v8543_v39  ;;  %v10856_v39 = vld [vmem:[#allocation3 + $0x94] sm:$0xf0]  ;;  %v8018_v26 = vld [vmem:[#allocation3 + $0x348] sm:$0xf] }
 0x188   :  { %2514 = vmatpush.bf16.msrb.mxu2 %v8415_v38  ;;  %2490 = vmatpush.bf16.msrb.mxu0 %v8127_v43  ;;  %v7666_v38 = vld [vmem:[#allocation3 + $0x88] sm:$0xf]  ;;  %v8083_v43 = vor.u32 %v10960_v37, %v8082_v36  ;;  %v10996_v36 = vld [vmem:[#allocation3 + $0x4f4] sm:$0xf0] }
 0x189   :  { %2503 = vmatpush.bf16.msrb.mxu1 %v8255_v44  ;;  %v7938_v44 = vld [vmem:[#allocation3 + $0x2a8] sm:$0xf]  ;;  %v7667_v48 = vor.u32 %v10856_v39, %v7666_v38  ;;  %v11028_v38 = vld [vmem:[#allocation3 + $0x5f4] sm:$0xf0] }
 0x18a   :  { %v7939_v58 = vor.u32 %v10924_v47, %v7938_v44  ;;  %v7730_v32 = vld [vmem:[#allocation3 + $0x108] sm:$0xf]  ;;  %v10940_v47 = vld [vmem:[#allocation3 + $0x334] sm:$0xf0] }
 0x18b   :  { %2528 = vmatpush.bf16.msrb.mxu3 %v8527_v59  ;;  %v8067_v59 = vor.u32 %v10956_v53, %v8066_v51  ;;  %v8354_v37 = vld [vmem:[#allocation3 + $0x5e8] sm:$0xf]  ;;  %v10936_v61 = vld [vmem:[#allocation3 + $0x314] sm:$0xf0] }
 0x18c   :  { %2515 = vmatpush.bf16.msrb.mxu2 %v8399_v55  ;;  %2491 = vmatpush.bf16.msrb.mxu0 %v8111_v62  ;;  %v10852_v55 = vld [vmem:[#allocation3 + $0x74] sm:$0xf0]  ;;  %v7874_v40 = vld [vmem:[#allocation3 + $0x228] sm:$0xf] }
 0x18d   :  { %2504 = vmatpush.bf16.msrb.mxu1 %v8239_v63  ;;  %v7651_v62 = vor.u32 %v10852_v55, %v7650_v54  ;;  %v7779_v63 = vor.u32 %v10884_v57, %v7778_v56  ;;  %v8002_v44 = vld [vmem:[#allocation3 + $0x328] sm:$0xf]  ;;  %v7875_v53 = vor.u32 %v10908_v41, %v7874_v40  ;;  %v10992_v54 = vld [vmem:[#allocation3 + $0x4d4] sm:$0xf0] }
 0x18e   :  { %v8210_v51 = vld [vmem:[#allocation3 + $0x4c8] sm:$0xf]  ;;  %v11024_v56 = vld [vmem:[#allocation3 + $0x5d4] sm:$0xf0]  ;;  %v8003_v57 = vor.u32 %v10940_v47, %v8002_v44 }
 0x18f   :  { %2529 = vmatpush.bf16.msrb.mxu3 %v8511_v12  ;;  %2492 = vmatmul.bf16.vlgmr.msrb.gmra.mxu0 %v12315_v8  ;;  %v10916_v12 = vld [vmem:[#allocation3 + $0x274] sm:$0xf0]  ;;  %v8338_v55 = vld [vmem:[#allocation3 + $0x5c8] sm:$0xf]  ;;  %v8211_v0 = vor.u32 %v10992_v54, %v8210_v51 }
 0x190   :  { %2536 = vmatpush.bf16.msra.mxu0 %v7715_v2  ;;  %2516 = vmatpush.bf16.msrb.mxu2 %v8383_v6  ;;  %v7634_v2 = vld [vmem:[#allocation3 + $0x48] sm:$0xf]  ;;  %v10880_v6 = vld [vmem:[#allocation3 + $0x154] sm:$0xf0]  ;;  %v7907_v22 = vor.u32 %v10916_v12, %v7906_v10  ;;  %v8339_v1 = vor.u32 %v11024_v56, %v8338_v55 }
 0x191   :  { %2549 = vmatpush.bf16.msra.mxu1 %v7843_v3  ;;  %v10848_v3 = vld [vmem:[#allocation3 + $0x54] sm:$0xf0]  ;;  %v7763_v14 = vor.u32 %v10880_v6, %v7762_v5  ;;  %v7986_v60 = vld [vmem:[#allocation3 + $0x308] sm:$0xf] }
 0x192   :  { %2505 = vmatmul.bf16.vlgmr.msrb.gmra.mxu1 %v12318_v11  ;;  %v7635_v13 = vor.u32 %v10848_v3, %v7634_v2  ;;  %v8610_v2 = vld [vmem:[#allocation3 + $0x7e8] sm:$0xf]  ;;  %v11092_v3 = vld [vmem:[#allocation3 + $0x7f4] sm:$0xf0] }
 0x193   :  { %2530 = vmatpush.bf16.msrb.mxu3 %v8495_v29  ;;  %v10944_v29 = vld [vmem:[#allocation3 + $0x354] sm:$0xf0]  ;;  %v8194_v6 = vld [vmem:[#allocation3 + $0x4a8] sm:$0xf] }
 0x194   :  { %2537 = vmatpush.bf16.msra.mxu0 %v7699_v20  ;;  %2517 = vmatpush.bf16.msrb.mxu2 %v8367_v4  ;;  %v7746_v20 = vld [vmem:[#allocation3 + $0x128] sm:$0xf]  ;;  %v10912_v4 = vld [vmem:[#allocation3 + $0x254] sm:$0xf0]  ;;  %v8019_v39 = vor.u32 %v10944_v29, %v8018_v26 }
 0x195   :  { %2550 = vmatpush.bf16.msra.mxu1 %v7827_v21  ;;  %v10876_v21 = vld [vmem:[#allocation3 + $0x134] sm:$0xf0]  ;;  %v8322_v12 = vld [vmem:[#allocation3 + $0x5a8] sm:$0xf] }
 0x196   :  { %2531 = vmatmul.bf16.vlgmr.msrb.gmra.mxu3 %v12324_v46  ;;  %v7747_v28 = vor.u32 %v10876_v21, %v7746_v20  ;;  %v8466_v15 = vld [vmem:[#allocation3 + $0x6c8] sm:$0xf]  ;;  %v11056_v16 = vld [vmem:[#allocation3 + $0x6d4] sm:$0xf0] }
 0x197   :  { %2575 = vmatpush.bf16.msra.mxu3 %v8099_v31  ;;  %2518 = vmatmul.bf16.vlgmr.msrb.gmra.mxu2 %v12322_v49  ;;  %v10840_v31 = vld [vmem:[#allocation3 + $0x14] sm:$0xf0]  ;;  %v8594_v18 = vld [vmem:[#allocation3 + $0x7c8] sm:$0xf] }
 0x198   :  { %2562 = vmatpush.bf16.msra.mxu2 %v7971_v30  ;;  %2538 = vmatpush.bf16.msra.mxu0 %v7683_v34  ;;  %v7602_v30 = vld [vmem:[#allocation3 + $0x8] sm:$0xf]  ;;  %v11088_v20 = vld [vmem:[#allocation3 + $0x7d4] sm:$0xf0] }
 0x199   :  { %2551 = vmatpush.bf16.msra.mxu1 %v7811_v35  ;;  %v8226_v34 = vld [vmem:[#allocation3 + $0x4e8] sm:$0xf]  ;;  %v7891_v35 = vor.u32 %v10912_v4, %v7890_v25  ;;  %v8467_v25 = vor.u32 %v11056_v16, %v8466_v15  ;;  %v11016_v26 = vld [vmem:[#allocation3 + $0x594] sm:$0xf0] }
 0x19a   :  { %v8306_v4 = vld [vmem:[#allocation3 + $0x588] sm:$0xf]  ;;  %v11052_v29 = vld [vmem:[#allocation3 + $0x6b4] sm:$0xf0] }
 0x19b   :  { %2576 = vmatpush.bf16.msra.mxu3 %v8083_v43  ;;  %v7731_v43 = vor.u32 %v10872_v33, %v7730_v32  ;;  %v11084_v32 = vld [vmem:[#allocation3 + $0x7b4] sm:$0xf0]  ;;  %v8307_v33 = vor.u32 %v11016_v26, %v8306_v4  ;;  %v8434_v40 = vld [vmem:[#allocation3 + $0x688] sm:$0xf] }
 0x19c   :  { %2563 = vmatpush.bf16.msra.mxu2 %v7955_v42  ;;  %2539 = vmatpush.bf16.msra.mxu0 %v7667_v48  ;;  %v7603_v42 = vor.u32 %v10840_v31, %v7602_v30  ;;  %v8227_v48 = vor.u32 %v10996_v36, %v8226_v34  ;;  %v8578_v31 = vld [vmem:[#allocation3 + $0x7a8] sm:$0xf]  ;;  %v11048_v41 = vld [vmem:[#allocation3 + $0x694] sm:$0xf0] }
 0x19d   :  { %2552 = vmatpush.bf16.msra.mxu1 %v7795_v50  ;;  %v8355_v50 = vor.u32 %v11028_v38, %v8354_v37  ;;  %v8162_v34 = vld [vmem:[#allocation3 + $0x468] sm:$0xf]  ;;  %v11012_v38 = vld [vmem:[#allocation3 + $0x574] sm:$0xf0]  ;;  %v8435_v51 = vor.u32 %v11048_v41, %v8434_v40 }
 0x19e   :  { %v8290_v37 = vld [vmem:[#allocation3 + $0x568] sm:$0xf]  ;;  %v11080_v44 = vld [vmem:[#allocation3 + $0x794] sm:$0xf0] }
 0x19f   :  { %2577 = vmatpush.bf16.msra.mxu3 %v8067_v59  ;;  %v10904_v59 = vld [vmem:[#allocation3 + $0x214] sm:$0xf0]  ;;  %v8291_v47 = vor.u32 %v11012_v38, %v8290_v37  ;;  %v8418_v56 = vld [vmem:[#allocation3 + $0x668] sm:$0xf] }
 0x1a0   :  { %2564 = vmatpush.bf16.msra.mxu2 %v7939_v58  ;;  %2540 = vmatpush.bf16.msra.mxu0 %v7651_v62  ;;  %v7858_v58 = vld [vmem:[#allocation3 + $0x208] sm:$0xf]  ;;  %v11008_v54 = vld [vmem:[#allocation3 + $0x554] sm:$0xf0] }
 0x1a1   :  { %2553 = vmatpush.bf16.msra.mxu1 %v7779_v63  ;;  %v8482_v62 = vld [vmem:[#allocation3 + $0x6e8] sm:$0xf]  ;;  %v11060_v63 = vld [vmem:[#allocation3 + $0x6f4] sm:$0xf0]  ;;  %v7859_v5 = vor.u32 %v10904_v59, %v7858_v58 }
 0x1a2   :  { %v8483_v10 = vor.u32 %v11060_v63, %v8482_v62  ;;  %v8546_v59 = vld [vmem:[#allocation3 + $0x768] sm:$0xf]  ;;  %v10972_v63 = vld [vmem:[#allocation3 + $0x434] sm:$0xf0] }
 0x1a3   :  { %2578 = vmatpush.bf16.msra.mxu3 %v8051_v9  ;;  %v7987_v9 = vor.u32 %v10936_v61, %v7986_v60  ;;  %v11076_v60 = vld [vmem:[#allocation3 + $0x774] sm:$0xf0]  ;;  %v8130_v62 = vld [vmem:[#allocation3 + $0x428] sm:$0xf] }
 0x1a4   :  { %2565 = vmatpush.bf16.msra.mxu2 %v7923_v7  ;;  %2541 = vmatpush.bf16.msra.mxu0 %v7635_v13  ;;  %v10988_v7 = vld [vmem:[#allocation3 + $0x4b4] sm:$0xf0]  ;;  %v8242_v15 = vld [vmem:[#allocation3 + $0x508] sm:$0xf] }
 0x1a5   :  { %2554 = vmatpush.bf16.msra.mxu1 %v7763_v14  ;;  %v11020_v13 = vld [vmem:[#allocation3 + $0x5b4] sm:$0xf0]  ;;  %v8611_v14 = vor.u32 %v11092_v3, %v8610_v2  ;;  %v8195_v17 = vor.u32 %v10988_v7, %v8194_v6  ;;  %v8547_v3 = vor.u32 %v11076_v60, %v8546_v59  ;;  %v8131_v7 = vor.u32 %v10972_v63, %v8130_v62  ;;  %v8370_v38 = vld [vmem:[#allocation3 + $0x608] sm:$0xf]  ;;  %v10926_v60 = vld [vmem:[#allocation3 + $0x2cc] sm:$0xf] }
 0x1a6   :  { %v8323_v21 = vor.u32 %v11020_v13, %v8322_v12  ;;  %v11004_v2 = vld [vmem:[#allocation3 + $0x534] sm:$0xf0]  ;;  %v8114_v12 = vld [vmem:[#allocation3 + $0x408] sm:$0xf]  ;;  %v10958_v63 = vld [vmem:[#allocation3 + $0x3cc] sm:$0xf] }
 0x1a7   :  { %2579 = vmatpush.bf16.msra.mxu3 %v8035_v23  ;;  %v10984_v23 = vld [vmem:[#allocation3 + $0x494] sm:$0xf0]  ;;  %v8498_v40 = vld [vmem:[#allocation3 + $0x708] sm:$0xf] }
 0x1a8   :  { %2566 = vmatpush.bf16.msra.mxu2 %v7907_v22  ;;  %2542 = vmatpush.bf16.msra.mxu0 %v7619_v27  ;;  %v8178_v22 = vld [vmem:[#allocation3 + $0x488] sm:$0xf]  ;;  %v8595_v27 = vor.u32 %v11088_v20, %v8594_v18  ;;  %v11040_v6 = vld [vmem:[#allocation3 + $0x654] sm:$0xf0]  ;;  %v10866_v18 = vld [vmem:[#allocation3 + $0xec] sm:$0xf] }
 0x1a9   :  { %2555 = vmatpush.bf16.msra.mxu1 %v7747_v28  ;;  %v8450_v28 = vld [vmem:[#allocation3 + $0x6a8] sm:$0xf]  ;;  %v8179_v30 = vor.u32 %v10984_v23, %v8178_v22  ;;  %v11000_v16 = vld [vmem:[#allocation3 + $0x514] sm:$0xf0]  ;;  %v7716_v20 = vld [vmem:[#allocation3 + $0xf8] sm:$0xf0] }
 0x1aa   :  { %v8451_v36 = vor.u32 %v11052_v29, %v8450_v28  ;;  %v7844_v23 = vld [vmem:[#allocation3 + $0x1f8] sm:$0xf0]  ;;  %v11036_v4 = vld [vmem:[#allocation3 + $0x634] sm:$0xf0]  ;;  %v8243_v29 = vor.u32 %v11000_v16, %v8242_v15  ;;  %v10954_v16 = vld [vmem:[#allocation3 + $0x3ac] sm:$0xf] }
 0x1ab   :  { %2580 = vmatpush.bf16.msra.mxu3 %v8019_v39  ;;  %v8579_v39 = vor.u32 %v11084_v32, %v8578_v31  ;;  %v11068_v28 = vld [vmem:[#allocation3 + $0x734] sm:$0xf0]  ;;  %v10862_v31 = vld [vmem:[#allocation3 + $0xcc] sm:$0xf] }
 0x1ac   :  { %2567 = vmatpush.bf16.msra.mxu2 %v7891_v35  ;;  %2543 = vmatpush.bf16.msra.mxu0 %v7603_v42  ;;  %v10980_v35 = vld [vmem:[#allocation3 + $0x474] sm:$0xf0] }
 0x1ad   :  { %2556 = vmatpush.bf16.msra.mxu1 %v7731_v43  ;;  %v8163_v42 = vor.u32 %v10980_v35, %v8162_v34  ;;  %v8562_v43 = vld [vmem:[#allocation3 + $0x788] sm:$0xf]  ;;  %v7700_v34 = vld [vmem:[#allocation3 + $0xd8] sm:$0xf0]  ;;  %v10894_v35 = vld [vmem:[#allocation3 + $0x1cc] sm:$0xf] }
 0x1ae   :  { %v8563_v55 = vor.u32 %v11080_v44, %v8562_v43  ;;  %v11064_v41 = vld [vmem:[#allocation3 + $0x714] sm:$0xf0]  ;;  %v7972_v43 = vld [vmem:[#allocation3 + $0x2f8] sm:$0xf0]  ;;  %v7703_v44 = vor.u32 %v10862_v31, %v7700_v34 }
 0x1af   :  { %2581 = vmatpush.bf16.msra.mxu3 %v8003_v57  ;;  %2544 = vmatmul.bf16.vlgmr.msra.gmra.mxu0 %v12299_v19  ;;  %v11044_v57 = vld [vmem:[#allocation3 + $0x674] sm:$0xf0] }
 0x1b0   :  { %2588 = vmatpush.bf16.msrb.mxu0 %v8227_v48  ;;  %2568 = vmatpush.bf16.msra.mxu2 %v7875_v53  ;;  %v8146_v48 = vld [vmem:[#allocation3 + $0x448] sm:$0xf] }
 0x1b1   :  { %2601 = vmatpush.bf16.msrb.mxu1 %v8355_v50  ;;  %v10976_v50 = vld [vmem:[#allocation3 + $0x454] sm:$0xf0]  ;;  %v8274_v53 = vld [vmem:[#allocation3 + $0x548] sm:$0xf] }
 0x1b2   :  { %2557 = vmatmul.bf16.vlgmr.msra.gmra.mxu1 %v12302_v24  ;;  %v8147_v58 = vor.u32 %v10976_v50, %v8146_v48  ;;  %v8275_v61 = vor.u32 %v11008_v54, %v8274_v53  ;;  %v8100_v48 = vld [vmem:[#allocation3 + $0x3f8] sm:$0xf0]  ;;  %v10858_v53 = vld [vmem:[#allocation3 + $0xac] sm:$0xf] }
 0x1b3   :  { %2582 = vmatpush.bf16.msra.mxu3 %v7987_v9  ;;  %v8530_v9 = vld [vmem:[#allocation3 + $0x748] sm:$0xf]  ;;  %v7684_v54 = vld [vmem:[#allocation3 + $0xb8] sm:$0xf0] }
 0x1b4   :  { %2589 = vmatpush.bf16.msrb.mxu0 %v8211_v0  ;;  %2569 = vmatpush.bf16.msra.mxu2 %v7859_v5  ;;  %v8419_v0 = vor.u32 %v11044_v57, %v8418_v56  ;;  %v8402_v5 = vld [vmem:[#allocation3 + $0x648] sm:$0xf]  ;;  %v10890_v57 = vld [vmem:[#allocation3 + $0x1ac] sm:$0xf]  ;;  %v7687_v62 = vor.u32 %v10858_v53, %v7684_v54  ;;  %v7748_v54 = vld [vmem:[#allocation3 + $0x138] sm:$0xf0] }
 0x1b5   :  { %2602 = vmatpush.bf16.msrb.mxu1 %v8339_v1  ;;  %v8258_v1 = vld [vmem:[#allocation3 + $0x528] sm:$0xf]  ;;  %v10874_v53 = vld [vmem:[#allocation3 + $0x12c] sm:$0xf] }
 0x1b6   :  { %2583 = vmatmul.bf16.vlgmr.msra.gmra.mxu3 %v12308_v52  ;;  %v8259_v13 = vor.u32 %v11004_v2, %v8258_v1  ;;  %v10854_v2 = vld [vmem:[#allocation3 + $0x8c] sm:$0xf] }
 0x1b7   :  { %2627 = vmatpush.bf16.msrb.mxu3 %v8611_v14  ;;  %2570 = vmatmul.bf16.vlgmr.msra.gmra.mxu2 %v12306_v45  ;;  %v10968_v14 = vld [vmem:[#allocation3 + $0x414] sm:$0xf0] }
 0x1b8   :  { %2614 = vmatpush.bf16.msrb.mxu2 %v8483_v10  ;;  %2590 = vmatpush.bf16.msrb.mxu0 %v8195_v17  ;;  %v11072_v10 = vld [vmem:[#allocation3 + $0x754] sm:$0xf0]  ;;  %v8403_v17 = vor.u32 %v11040_v6, %v8402_v5  ;;  %v8115_v26 = vor.u32 %v10968_v14, %v8114_v12  ;;  %v7940_v14 = vld [vmem:[#allocation3 + $0x2b8] sm:$0xf0] }
 0x1b9   :  { %2603 = vmatpush.bf16.msrb.mxu1 %v8323_v21  ;;  %v10898_v21 = vld [vmem:[#allocation3 + $0x1ec] sm:$0xf]  ;;  %v8531_v22 = vor.u32 %v11072_v10, %v8530_v9  ;;  %v7796_v9 = vld [vmem:[#allocation3 + $0x198] sm:$0xf0] }
 0x1ba   :  { %v7847_v32 = vor.u32 %v10898_v21, %v7844_v23  ;;  %v7652_v21 = vld [vmem:[#allocation3 + $0x78] sm:$0xf0]  ;;  %v10882_v23 = vld [vmem:[#allocation3 + $0x16c] sm:$0xf] }
 0x1bb   :  { %2628 = vmatpush.bf16.msrb.mxu3 %v8595_v27  ;;  %v8514_v27 = vld [vmem:[#allocation3 + $0x728] sm:$0xf] }
 0x1bc   :  { %2615 = vmatpush.bf16.msrb.mxu2 %v8467_v25  ;;  %2591 = vmatpush.bf16.msrb.mxu0 %v8179_v30  ;;  %v8386_v25 = vld [vmem:[#allocation3 + $0x628] sm:$0xf]  ;;  %v7719_v30 = vor.u32 %v10866_v18, %v7716_v20  ;;  %v8515_v37 = vor.u32 %v11068_v28, %v8514_v27  ;;  %v10850_v20 = vld [vmem:[#allocation3 + $0x6c] sm:$0xf]  ;;  %v7924_v27 = vld [vmem:[#allocation3 + $0x298] sm:$0xf0] }
 0x1bd   :  { %2604 = vmatpush.bf16.msrb.mxu1 %v8307_v33  ;;  %v8387_v33 = vor.u32 %v11036_v4, %v8386_v25  ;;  %v7780_v25 = vld [vmem:[#allocation3 + $0x178] sm:$0xf0]  ;;  %v7655_v28 = vor.u32 %v10850_v20, %v7652_v21 }
 0x1be   :  { %v7783_v31 = vor.u32 %v10882_v23, %v7780_v25  ;;  %v8004_v20 = vld [vmem:[#allocation3 + $0x338] sm:$0xf0]  ;;  %v10990_v23 = vld [vmem:[#allocation3 + $0x4cc] sm:$0xf] }
 0x1bf   :  { %2629 = vmatpush.bf16.msrb.mxu3 %v8579_v39  ;;  %v11032_v39 = vld [vmem:[#allocation3 + $0x614] sm:$0xf0] }
 0x1c0   :  { %2616 = vmatpush.bf16.msrb.mxu2 %v8451_v36  ;;  %2592 = vmatpush.bf16.msrb.mxu0 %v8163_v42  ;;  %v7828_v36 = vld [vmem:[#allocation3 + $0x1d8] sm:$0xf0]  ;;  %v10930_v42 = vld [vmem:[#allocation3 + $0x2ec] sm:$0xf] }
 0x1c1   :  { %2605 = vmatpush.bf16.msrb.mxu1 %v8291_v47  ;;  %v10962_v47 = vld [vmem:[#allocation3 + $0x3ec] sm:$0xf]  ;;  %v7831_v50 = vor.u32 %v10894_v35, %v7828_v36  ;;  %v7975_v56 = vor.u32 %v10930_v42, %v7972_v43 }
 0x1c2   :  { %v8103_v59 = vor.u32 %v10962_v47, %v8100_v48  ;;  %v10878_v36 = vld [vmem:[#allocation3 + $0x14c] sm:$0xf] }
 0x1c3   :  { %2630 = vmatpush.bf16.msrb.mxu3 %v8563_v55  ;;  %v8499_v55 = vor.u32 %v11064_v41, %v8498_v40  ;;  %v10914_v40 = vld [vmem:[#allocation3 + $0x26c] sm:$0xf]  ;;  %v7908_v41 = vld [vmem:[#allocation3 + $0x278] sm:$0xf0] }
 0x1c4   :  { %2617 = vmatpush.bf16.msrb.mxu2 %v8435_v51  ;;  %2593 = vmatpush.bf16.msrb.mxu0 %v8147_v58  ;;  %v8371_v51 = vor.u32 %v11032_v39, %v8370_v38  ;;  %v7812_v58 = vld [vmem:[#allocation3 + $0x1b8] sm:$0xf0]  ;;  %v10946_v43 = vld [vmem:[#allocation3 + $0x36c] sm:$0xf] }
 0x1c5   :  { %2606 = vmatpush.bf16.msrb.mxu1 %v8275_v61  ;;  %v7956_v61 = vld [vmem:[#allocation3 + $0x2d8] sm:$0xf0]  ;;  %v7815_v1 = vor.u32 %v10890_v57, %v7812_v58  ;;  %v10842_v48 = vld [vmem:[#allocation3 + $0x2c] sm:$0xf] }
 0x1c6   :  { %v7959_v6 = vor.u32 %v10926_v60, %v7956_v61  ;;  %v10910_v57 = vld [vmem:[#allocation3 + $0x24c] sm:$0xf]  ;;  %v7892_v58 = vld [vmem:[#allocation3 + $0x258] sm:$0xf0] }
 0x1c7   :  { %2631 = vmatpush.bf16.msrb.mxu3 %v8547_v3  ;;  %v7668_v3 = vld [vmem:[#allocation3 + $0x98] sm:$0xf0]  ;;  %v10942_v61 = vld [vmem:[#allocation3 + $0x34c] sm:$0xf] }
 0x1c8   :  { %2618 = vmatpush.bf16.msrb.mxu2 %v8419_v0  ;;  %2594 = vmatpush.bf16.msrb.mxu0 %v8131_v7  ;;  %v8084_v0 = vld [vmem:[#allocation3 + $0x3d8] sm:$0xf0]  ;;  %v10886_v7 = vld [vmem:[#allocation3 + $0x18c] sm:$0xf]  ;;  %v7671_v15 = vor.u32 %v10854_v2, %v7668_v3 }
 0x1c9   :  { %2607 = vmatpush.bf16.msrb.mxu1 %v8259_v13  ;;  %v8087_v10 = vor.u32 %v10958_v63, %v8084_v0  ;;  %v10922_v13 = vld [vmem:[#allocation3 + $0x2ac] sm:$0xf]  ;;  %v7799_v18 = vor.u32 %v10886_v7, %v7796_v9  ;;  %v7751_v0 = vor.u32 %v10874_v53, %v7748_v54  ;;  %v7732_v3 = vld [vmem:[#allocation3 + $0x118] sm:$0xf0] }
 0x1ca   :  { %v10838_v63 = vld [vmem:[#allocation3 + $0xc] sm:$0xf]  ;;  %v8228_v9 = vld [vmem:[#allocation3 + $0x4f8] sm:$0xf0] }
 0x1cb   :  { %2632 = vmatpush.bf16.msrb.mxu3 %v8531_v22  ;;  %v12342_v5 = vpop.f32.mrf.mxu0  ;;  %v12344_v12 = vpop.f32.mrf.mxu1  ;;  %v7943_v22 = vor.u32 %v10922_v13, %v7940_v14  ;;  %v10870_v2 = vld [vmem:[#allocation3 + $0x10c] sm:$0xf]  ;;  %v8356_v14 = vld [vmem:[#allocation3 + $0x5f8] sm:$0xf0] }
 0x1cc   :  { %2619 = vmatpush.bf16.msrb.mxu2 %v8403_v17  ;;  %2595 = vmatpush.bf16.msrb.mxu0 %v8115_v26  ;;  %v8068_v17 = vld [vmem:[#allocation3 + $0x3b8] sm:$0xf0]  ;;  %v10918_v26 = vld [vmem:[#allocation3 + $0x28c] sm:$0xf]  ;;  %v7735_v21 = vor.u32 %v10870_v2, %v7732_v3 }
 0x1cd   :  { %2608 = vmatpush.bf16.msrb.mxu1 %v8243_v29  ;;  %v8071_v4 = vor.u32 %v10954_v16, %v8068_v17  ;;  %v10950_v29 = vld [vmem:[#allocation3 + $0x38c] sm:$0xf]  ;;  %v7927_v35 = vor.u32 %v10918_v26, %v7924_v27  ;;  %v7876_v16 = vld [vmem:[#allocation3 + $0x238] sm:$0xf0] }
 0x1ce   :  { %v10994_v7 = vld [vmem:[#allocation3 + $0x4ec] sm:$0xf]  ;;  %v8212_v26 = vld [vmem:[#allocation3 + $0x4d8] sm:$0xf0] }
 0x1cf   :  { %2633 = vmatpush.bf16.msrb.mxu3 %v8515_v37  ;;  %2596 = vmatmul.bf16.vlgmr.msrb.gmra.mxu0 %v12315_v8  ;;  %v7764_v37 = vld [vmem:[#allocation3 + $0x158] sm:$0xf0]  ;;  %v11022_v27 = vld [vmem:[#allocation3 + $0x5cc] sm:$0xf] }
 0x1d0   :  { %2640 = vmatpush.bf16.msra.mxu0 %v7719_v30  ;;  %2620 = vmatpush.bf16.msrb.mxu2 %v8387_v33  ;;  %v8052_v30 = vld [vmem:[#allocation3 + $0x398] sm:$0xf0]  ;;  %v7767_v47 = vor.u32 %v10878_v36, %v7764_v37  ;;  %v11058_v36 = vld [vmem:[#allocation3 + $0x6ec] sm:$0xf] }
 0x1d1   :  { %2653 = vmatpush.bf16.msra.mxu1 %v7847_v32  ;;  %v10846_v32 = vld [vmem:[#allocation3 + $0x4c] sm:$0xf]  ;;  %v7636_v33 = vld [vmem:[#allocation3 + $0x58] sm:$0xf0]  ;;  %v8055_v38 = vor.u32 %v10950_v29, %v8052_v30 }
 0x1d2   :  { %2609 = vmatmul.bf16.vlgmr.msrb.gmra.mxu1 %v12318_v11  ;;  %v7639_v42 = vor.u32 %v10846_v32, %v7636_v33  ;;  %v7860_v32 = vld [vmem:[#allocation3 + $0x218] sm:$0xf0]  ;;  %v10934_v33 = vld [vmem:[#allocation3 + $0x30c] sm:$0xf] }
 0x1d3   :  { %2634 = vmatpush.bf16.msrb.mxu3 %v8499_v55  ;;  %v2339_v34 = vpop.f32.mrf.mxu0  ;;  %v2352_v39 = vpop.f32.mrf.mxu1  ;;  %v8484_v37 = vld [vmem:[#allocation3 + $0x6f8] sm:$0xf0]  ;;  %v11054_v54 = vld [vmem:[#allocation3 + $0x6cc] sm:$0xf] }
 0x1d4   :  { %2641 = vmatpush.bf16.msra.mxu0 %v7703_v44  ;;  %2621 = vmatpush.bf16.msrb.mxu2 %v8371_v51  ;;  %v8036_v44 = vld [vmem:[#allocation3 + $0x378] sm:$0xf0]  ;;  %v7911_v51 = vor.u32 %v10914_v40, %v7908_v41  ;;  %v11090_v39 = vld [vmem:[#allocation3 + $0x7ec] sm:$0xf] }
 0x1d5   :  { %2654 = vmatpush.bf16.msra.mxu1 %v7831_v50  ;;  %v7620_v50 = vld [vmem:[#allocation3 + $0x38] sm:$0xf0]  ;;  %v11050_v3 = vld [vmem:[#allocation3 + $0x6ac] sm:$0xf] }
 0x1d6   :  { %2635 = vmatmul.bf16.vlgmr.msrb.gmra.mxu3 %v12324_v46  ;;  %v7623_v60 = vor.u32 %v10842_v48, %v7620_v50  ;;  %v8612_v40 = vld [vmem:[#allocation3 + $0x7f8] sm:$0xf0]  ;;  %v8487_v48 = vor.u32 %v11058_v36, %v8484_v37  ;;  %v11018_v50 = vld [vmem:[#allocation3 + $0x5ac] sm:$0xf] }
 0x1d7   :  { %2679 = vmatpush.bf16.msra.mxu3 %v8103_v59  ;;  %2622 = vmatmul.bf16.vlgmr.msrb.gmra.mxu2 %v12322_v49  ;;  %v8615_v53 = vor.u32 %v11090_v39, %v8612_v40  ;;  %v11074_v37 = vld [vmem:[#allocation3 + $0x76c] sm:$0xf] }
 0x1d8   :  { %2666 = vmatpush.bf16.msra.mxu2 %v7975_v56  ;;  %2642 = vmatpush.bf16.msra.mxu0 %v7687_v62  ;;  %v8039_v56 = vor.u32 %v10946_v43, %v8036_v44  ;;  %v8020_v62 = vld [vmem:[#allocation3 + $0x358] sm:$0xf0]  ;;  %v10986_v43 = vld [vmem:[#allocation3 + $0x4ac] sm:$0xf] }
 0x1d9   :  { %2655 = vmatpush.bf16.msra.mxu1 %v7815_v1  ;;  %v12350_v59 = vpop.f32.mrf.mxu3  ;;  %v7604_v1 = vld [vmem:[#allocation3 + $0x18] sm:$0xf0]  ;;  %v8023_v13 = vor.u32 %v10942_v61, %v8020_v62  ;;  %v10982_v62 = vld [vmem:[#allocation3 + $0x48c] sm:$0xf] }
 0x1da   :  { %v12348_v55 = vpop.f32.mrf.mxu2  ;;  %v7607_v17 = vor.u32 %v10838_v63, %v7604_v1  ;;  %v8196_v44 = vld [vmem:[#allocation3 + $0x4b8] sm:$0xf0]  ;;  %v10970_v40 = vld [vmem:[#allocation3 + $0x42c] sm:$0xf] }
 0x1db   :  { %2680 = vmatpush.bf16.msra.mxu3 %v8087_v10  ;;  %v11026_v10 = vld [vmem:[#allocation3 + $0x5ec] sm:$0xf]  ;;  %v8180_v63 = vld [vmem:[#allocation3 + $0x498] sm:$0xf0] }
 0x1dc   :  { %2667 = vmatpush.bf16.msra.mxu2 %v7959_v6  ;;  %2643 = vmatpush.bf16.msra.mxu0 %v7671_v15  ;;  %v7895_v6 = vor.u32 %v10910_v57, %v7892_v58  ;;  %v10906_v15 = vld [vmem:[#allocation3 + $0x22c] sm:$0xf]  ;;  %v8359_v25 = vor.u32 %v11026_v10, %v8356_v14  ;;  %v8199_v57 = vor.u32 %v10986_v43, %v8196_v44  ;;  %v8308_v1 = vld [vmem:[#allocation3 + $0x598] sm:$0xf0] }
 0x1dd   :  { %2656 = vmatpush.bf16.msra.mxu1 %v7799_v18  ;;  %v10938_v18 = vld [vmem:[#allocation3 + $0x32c] sm:$0xf]  ;;  %v8260_v44 = vld [vmem:[#allocation3 + $0x538] sm:$0xf0] }
 0x1de   :  { %v8007_v30 = vor.u32 %v10938_v18, %v8004_v20  ;;  %v11086_v58 = vld [vmem:[#allocation3 + $0x7cc] sm:$0xf]  ;;  %v8292_v20 = vld [vmem:[#allocation3 + $0x578] sm:$0xf0] }
 0x1df   :  { %2681 = vmatpush.bf16.msra.mxu3 %v8071_v4  ;;  %v7879_v4 = vor.u32 %v10906_v15, %v7876_v16  ;;  %v11082_v10 = vld [vmem:[#allocation3 + $0x7ac] sm:$0xf]  ;;  %v8164_v16 = vld [vmem:[#allocation3 + $0x478] sm:$0xf0] }
 0x1e0   :  { %2668 = vmatpush.bf16.msra.mxu2 %v7943_v22  ;;  %2644 = vmatpush.bf16.msra.mxu0 %v7655_v28  ;;  %v8231_v22 = vor.u32 %v10994_v7, %v8228_v9  ;;  %v8340_v28 = vld [vmem:[#allocation3 + $0x5d8] sm:$0xf0]  ;;  %v8183_v9 = vor.u32 %v10982_v62, %v8180_v63  ;;  %v10978_v15 = vld [vmem:[#allocation3 + $0x46c] sm:$0xf] }
 0x1e1   :  { %2657 = vmatpush.bf16.msra.mxu1 %v7783_v31  ;;  %v10902_v31 = vld [vmem:[#allocation3 + $0x20c] sm:$0xf]  ;;  %v2378_v34 = vpop.f32.mrf.mxu3  ;;  %v8343_v41 = vor.u32 %v11022_v27, %v8340_v28  ;;  %v8116_v62 = vld [vmem:[#allocation3 + $0x418] sm:$0xf0] }
 0x1e2   :  { %v2365_v29 = vpop.f32.mrf.mxu2  ;;  %v11010_v18 = vld [vmem:[#allocation3 + $0x56c] sm:$0xf]  ;;  %v8420_v34 = vld [vmem:[#allocation3 + $0x678] sm:$0xf0] }
 0x1e3   :  { %2682 = vmatpush.bf16.msra.mxu3 %v8055_v38  ;;  %v8215_v38 = vor.u32 %v10990_v23, %v8212_v26  ;;  %v8167_v23 = vor.u32 %v10978_v15, %v8164_v16  ;;  %v8295_v26 = vor.u32 %v11010_v18, %v8292_v20  ;;  %v10974_v27 = vld [vmem:[#allocation3 + $0x44c] sm:$0xf]  ;;  %v8516_v15 = vld [vmem:[#allocation3 + $0x738] sm:$0xf0] }
 0x1e4   :  { %2669 = vmatpush.bf16.msra.mxu2 %v7927_v35  ;;  %2645 = vmatpush.bf16.msra.mxu0 %v7639_v42  ;;  %v7988_v35 = vld [vmem:[#allocation3 + $0x318] sm:$0xf0]  ;;  %v7863_v42 = vor.u32 %v10902_v31, %v7860_v32  ;;  %v11006_v29 = vld [vmem:[#allocation3 + $0x54c] sm:$0xf] }
 0x1e5   :  { %2658 = vmatpush.bf16.msra.mxu1 %v7767_v47  ;;  %v7991_v47 = vor.u32 %v10934_v33, %v7988_v35  ;;  %v11042_v33 = vld [vmem:[#allocation3 + $0x66c] sm:$0xf]  ;;  %v11108_v20 = vld [vmem:[%s11980_s3 + $0x78] sm:$0xff] }
 0x1e6   :  { %v11002_v43 = vld [vmem:[#allocation3 + $0x52c] sm:$0xf] }
 0x1e7   :  { %2683 = vmatpush.bf16.msra.mxu3 %v8039_v56  ;;  %v8468_v56 = vld [vmem:[#allocation3 + $0x6d8] sm:$0xf0] }
 0x1e8   :  { %2670 = vmatpush.bf16.msra.mxu2 %v7911_v51  ;;  %2646 = vmatpush.bf16.msra.mxu0 %v7623_v60  ;;  %v8324_v51 = vld [vmem:[#allocation3 + $0x5b8] sm:$0xf0] }
 0x1e9   :  { %2659 = vmatpush.bf16.msra.mxu1 %v7751_v0  ;;  %v8596_v60 = vld [vmem:[#allocation3 + $0x7d8] sm:$0xf0]  ;;  %v8327_v61 = vor.u32 %v11018_v50, %v8324_v51  ;;  %v11014_v0 = vld [vmem:[#allocation3 + $0x58c] sm:$0xf] }
 0x1ea   :  { %v8311_v14 = vor.u32 %v11014_v0, %v8308_v1  ;;  %v11038_v50 = vld [vmem:[#allocation3 + $0x64c] sm:$0xf]  ;;  %v8404_v51 = vld [vmem:[#allocation3 + $0x658] sm:$0xf0] }
 0x1eb   :  { %2684 = vmatpush.bf16.msra.mxu3 %v8023_v13  ;;  %v12354_v2 = vpop.f32.mrf.mxu0  ;;  %v12357_v7 = vpop.f32.mrf.mxu1  ;;  %v8580_v13 = vld [vmem:[#allocation3 + $0x7b8] sm:$0xf0]  ;;  %v10998_v0 = vld [vmem:[#allocation3 + $0x50c] sm:$0xf] }
 0x1ec   :  { %2671 = vmatpush.bf16.msra.mxu2 %v7895_v6  ;;  %2647 = vmatpush.bf16.msra.mxu0 %v7607_v17  ;;  %v8452_v6 = vld [vmem:[#allocation3 + $0x6b8] sm:$0xf0] }
 0x1ed   :  { %2660 = vmatpush.bf16.msra.mxu1 %v7735_v21  ;;  %v8455_v17 = vor.u32 %v11050_v3, %v8452_v6  ;;  %v8583_v21 = vor.u32 %v11082_v10, %v8580_v13  ;;  %v8244_v1 = vld [vmem:[#allocation3 + $0x518] sm:$0xf0]  ;;  %v11034_v6 = vld [vmem:[#allocation3 + $0x62c] sm:$0xf] }
 0x1ee   :  { %v8247_v16 = vor.u32 %v10998_v0, %v8244_v1  ;;  %v11114_v0 = vld [vmem:[%s11980_s3 + $0xa8] sm:$0xff]  ;;  %v8970_v1 = vld [vmem:[#allocation5 + $0x1c0] sm:$0xf] }
 0x1ef   :  { %2685 = vmatpush.bf16.msra.mxu3 %v8007_v30  ;;  %2648 = vmatmul.bf16.vlgmr.msra.gmra.mxu0 %v12299_v19  ;;  %v8471_v19 = vor.u32 %v11054_v54, %v8468_v56  ;;  %v8276_v30 = vld [vmem:[#allocation3 + $0x558] sm:$0xf0]  ;;  %v11070_v56 = vld [vmem:[#allocation3 + $0x74c] sm:$0xf] }
 0x1f0   :  { %2692 = vmatpush.bf16.msrb.mxu0 %v8231_v22  ;;  %2672 = vmatpush.bf16.msra.mxu2 %v7879_v4  ;;  %v11046_v22 = vld [vmem:[#allocation3 + $0x68c] sm:$0xf]  ;;  %v8564_v4 = vld [vmem:[#allocation3 + $0x798] sm:$0xf0]  ;;  %v8279_v39 = vor.u32 %v11006_v29, %v8276_v30 }
 0x1f1   :  { %2705 = vmatpush.bf16.msrb.mxu1 %v8359_v25  ;;  %v11078_v25 = vld [vmem:[#allocation3 + $0x78c] sm:$0xf] }
 0x1f2   :  { %2661 = vmatmul.bf16.vlgmr.msra.gmra.mxu1 %v12302_v24  ;;  %v8599_v24 = vor.u32 %v11086_v58, %v8596_v60  ;;  %v8567_v32 = vor.u32 %v11078_v25, %v8564_v4  ;;  %v8263_v60 = vor.u32 %v11002_v43, %v8260_v44  ;;  %v11062_v4 = vld [vmem:[#allocation3 + $0x70c] sm:$0xf]  ;;  %v11104_v44 = vld [vmem:[%s11980_s3 + $0x58] sm:$0xff] }
 0x1f3   :  { %2686 = vmatpush.bf16.msra.mxu3 %v7991_v47  ;;  %v2391_v31 = vpop.f32.mrf.mxu0  ;;  %v2404_v35 = vpop.f32.mrf.mxu1  ;;  %v12361_v47 = vld [vmem:[%s11975_s29] sm:$0xf]  ;;  %v11107_v29 = vld [vmem:[%s11980_s3 + $0x70] sm:$0xff]  ;;  %s12750_s29 = sld [smem:[#allocation28_spill]] }
 0x1f4   :  { %2693 = vmatpush.bf16.msrb.mxu0 %v8215_v38  ;;  %2673 = vmatpush.bf16.msra.mxu2 %v7863_v42  ;;  %v8548_v38 = vld [vmem:[#allocation3 + $0x778] sm:$0xf0]  ;;  %v8423_v42 = vor.u32 %v11042_v33, %v8420_v34  ;;  %v1040_v63 = vperm.slane %v12361_v47, 0  ;;  %v11098_v34 = vld [vmem:[%s11980_s3 + $0x28] sm:$0xff] }
 0x1f5   :  { %2706 = vmatpush.bf16.msrb.mxu1 %v8343_v41  ;;  %v8132_v41 = vld [vmem:[#allocation3 + $0x438] sm:$0xf0] }
 0x1f6   :  { %2687 = vmatmul.bf16.vlgmr.msra.gmra.mxu3 %v12308_v52  ;;  %v8148_v52 = vld [vmem:[#allocation3 + $0x458] sm:$0xf0]  ;;  %v8135_v54 = vor.u32 %v10970_v40, %v8132_v41  ;;  %v2338_v18 = vadd.f32 %v12342_v5, %v1040_v63  ;;  %v1041_v5 = vperm.slane %v12361_v47, 1 }
 0x1f7   :  { %2731 = vmatpush.bf16.msrb.mxu3 %v8615_v53  ;;  %2674 = vmatmul.bf16.vlgmr.msra.gmra.mxu2 %v12306_v45  ;;  %v8436_v45 = vld [vmem:[#allocation3 + $0x698] sm:$0xf0]  ;;  %v8151_v36 = vor.u32 %v10974_v27, %v8148_v52  ;;  %v11099_v52 = vld [vmem:[%s11980_s3 + $0x30] sm:$0xff] }
 0x1f8   :  { %2718 = vmatpush.bf16.msrb.mxu2 %v8487_v48  ;;  %2694 = vmatpush.bf16.msrb.mxu0 %v8199_v57  ;;  %v8439_v28 = vor.u32 %v11046_v22, %v8436_v45  ;;  %v8551_v48 = vor.u32 %v11074_v37, %v8548_v38  ;;  %v8532_v57 = vld [vmem:[#allocation3 + $0x758] sm:$0xf0]  ;;  %v11030_v45 = vld [vmem:[#allocation3 + $0x60c] sm:$0xf] }
 0x1f9   :  { %2707 = vmatpush.bf16.msrb.mxu1 %v8327_v61  ;;  %v12363_v53 = vpop.f32.mrf.mxu2  ;;  %v12365_v58 = vpop.f32.mrf.mxu3  ;;  %v10966_v61 = vld [vmem:[#allocation3 + $0x40c] sm:$0xf]  ;;  %v8535_v3 = vor.u32 %v11070_v56, %v8532_v57 }
 0x1fa   :  { %v8119_v13 = vor.u32 %v10966_v61, %v8116_v62  ;;  %v11103_v56 = vld [vmem:[%s11980_s3 + $0x50] sm:$0xff] }
 0x1fb   :  { %2732 = vmatpush.bf16.msrb.mxu3 %v8599_v24  ;;  %v2441_v24 = vpop.f32.mrf.mxu0  ;;  %v2454_v10 = vpop.f32.mrf.mxu1  ;;  %v11115_v57 = vld [vmem:[%s11980_s3 + $0xb0] sm:$0xff] }
 0x1fc   :  { %2719 = vmatpush.bf16.msrb.mxu2 %v8471_v19  ;;  %2695 = vmatpush.bf16.msrb.mxu0 %v8183_v9  ;;  %v8407_v19 = vor.u32 %v11038_v50, %v8404_v51  ;;  %v8388_v9 = vld [vmem:[#allocation3 + $0x638] sm:$0xf0]  ;;  %v2442_v35 = vadd.f32 %v2441_v24, %v1041_v5  ;;  %v11185_v24 = vld [vmem:[#allocation5 + $0x1dc] sm:$0xf0] }
 0x1fd   :  { %2708 = vmatpush.bf16.msrb.mxu1 %v8311_v14  ;;  %v11066_v14 = vld [vmem:[#allocation3 + $0x72c] sm:$0xf]  ;;  %v11169_v5 = vld [vmem:[#allocation5 + $0x15c] sm:$0xf0] }
 0x1fe   :  { %v8519_v22 = vor.u32 %v11066_v14, %v8516_v15 }
 0x1ff   :  { %2733 = vmatpush.bf16.msrb.mxu3 %v8583_v21  ;;  %v8391_v21 = vor.u32 %v11034_v6, %v8388_v9  ;;  %v8972_v6 = vld [vmem:[#allocation5 + $0x1e0] sm:$0xf0] }
 0x200   :  { %2720 = vmatpush.bf16.msrb.mxu2 %v8455_v17  ;;  %2696 = vmatpush.bf16.msrb.mxu0 %v8167_v23  ;;  %v11100_v17 = vld [vmem:[%s11980_s3 + $0x38] sm:$0xff] }
 0x201   :  { %2709 = vmatpush.bf16.msrb.mxu1 %v8295_v26  ;;  %v8372_v23 = vld [vmem:[#allocation3 + $0x618] sm:$0xf0]  ;;  %v2417_v25 = vpop.f32.mrf.mxu2  ;;  %v2430_v27 = vpop.f32.mrf.mxu3 }
 0x202   :  { %v8500_v26 = vld [vmem:[#allocation3 + $0x718] sm:$0xf0]  ;;  %v8375_v30 = vor.u32 %v11030_v45, %v8372_v23  ;;  %v11173_v45 = vld [vmem:[#allocation5 + $0x184] sm:$0xf] }
 0x203   :  { %2734 = vmatpush.bf16.msrb.mxu3 %v8567_v32  ;;  %v2443_v31 = vpop.f32.mrf.mxu0  ;;  %v8503_v32 = vor.u32 %v11062_v4, %v8500_v26  ;;  %v2456_v33 = vpop.f32.mrf.mxu1  ;;  %v8940_v23 = vld [vmem:[#allocation5 + $0x1a0] sm:$0xf0]  ;;  %v11112_v27 = vld [vmem:[%s11980_s3 + $0x98] sm:$0xff] }
 0x204   :  { %2721 = vmatpush.bf16.msrb.mxu2 %v8439_v28  ;;  %2697 = vmatpush.bf16.msrb.mxu0 %v8151_v36  ;;  %v2351_v28 = vadd.f32 %v12344_v12, %v2338_v18  ;;  %v11106_v36 = vld [vmem:[%s11980_s3 + $0x68] sm:$0xff] }
 0x205   :  { %2710 = vmatpush.bf16.msrb.mxu1 %v8279_v39  ;;  %v2455_v39 = vadd.f32 %v2454_v10, %v2442_v35  ;;  %v8908_v31 = vld [vmem:[#allocation5 + $0x160] sm:$0xf0] }
 0x206   :  { %v2364_v12 = vadd.f32 %v12348_v55, %v2351_v28  ;;  %v11105_v55 = vld [vmem:[%s11980_s3 + $0x60] sm:$0xff] }
 0x207   :  { %2735 = vmatpush.bf16.msrb.mxu3 %v8551_v48  ;;  %v11116_v48 = vld [vmem:[%s11980_s3 + $0xb8] sm:$0xff]  ;;  %v8906_v28 = vld [vmem:[#allocation5 + $0x140] sm:$0xf] }
 0x208   :  { %2722 = vmatpush.bf16.msrb.mxu2 %v8423_v42  ;;  %2698 = vmatpush.bf16.msrb.mxu0 %v8135_v54 }
 0x209   :  { %2711 = vmatpush.bf16.msrb.mxu1 %v8263_v60  ;;  %v2467_v37 = vpop.f32.mrf.mxu2  ;;  %v2480_v38 = vpop.f32.mrf.mxu3 }
 0x20a   :  { %v2468_v41 = vadd.f32 %v2467_v37, %v2455_v39  ;;  %v11161_v37 = vld [vmem:[#allocation5 + $0x11c] sm:$0xf0]  ;;  %v11110_v39 = vld [vmem:[%s11980_s3 + $0x88] sm:$0xff] }
 0x20b   :  { %2736 = vmatpush.bf16.msrb.mxu3 %v8535_v3  ;;  %v11181_v3 = vld [vmem:[#allocation5 + $0x1c4] sm:$0xf] }
 0x20c   :  { %2723 = vmatpush.bf16.msrb.mxu2 %v8407_v19  ;;  %2699 = vmatpush.bf16.msrb.mxu0 %v8119_v13  ;;  %v2493_v42 = vpop.f32.mrf.mxu0  ;;  %v2481_v50 = vadd.f32 %v2480_v38, %v2468_v41  ;;  %v11102_v19 = vld [vmem:[%s11980_s3 + $0x48] sm:$0xff]  ;;  %v11093_v13 = vld [vmem:[%s11980_s3] sm:$0xff]  ;;  %v8975_v18 = vor.u32 %v11181_v3, %v8972_v6 }
 0x20d   :  { %2712 = vmatpush.bf16.msrb.mxu1 %v8247_v16  ;;  %v11101_v16 = vld [vmem:[%s11980_s3 + $0x40] sm:$0xff] }
 0x20e   :  { %v2494_v60 = vadd.f32 %v2493_v42, %v2481_v50  ;;  %v11157_v38 = vld [vmem:[#allocation5 + $0x104] sm:$0xf]  ;;  %v11153_v41 = vld [vmem:[#allocation5 + $0xdc] sm:$0xf0]  ;;  %v8978_v50 = vld [vmem:[#allocation5 + $0x1c8] sm:$0xf] }
 0x20f   :  { %2737 = vmatpush.bf16.msrb.mxu3 %v8519_v22  ;;  %2700 = vmatmul.bf16.vlgmr.msrb.gmra.mxu0 %v12315_v8  ;;  %v11097_v8 = vld [vmem:[%s11980_s3 + $0x20] sm:$0xff]  ;;  %v2506_v43 = vpop.f32.mrf.mxu1 }
 0x210   :  { %3012 = vmatpush.bf16.msra.mxu0 %v11100_v17  ;;  %2724 = vmatpush.bf16.msrb.mxu2 %v8391_v21  ;;  %v11113_v17 = vld [vmem:[%s11980_s3 + $0xa0] sm:$0xff] }
 0x211   :  { %3025 = vmatpush.bf16.msra.mxu1 %v11108_v20  ;;  %v2482_v51 = vpop.f32.mrf.mxu3  ;;  %v8938_v20 = vld [vmem:[#allocation5 + $0x180] sm:$0xf]  ;;  %v11149_v42 = vld [vmem:[#allocation5 + $0xc4] sm:$0xf] }
 0x212   :  { %2713 = vmatmul.bf16.vlgmr.msrb.gmra.mxu1 %v12318_v11  ;;  %v2377_v11 = vadd.f32 %v12350_v59, %v2364_v12  ;;  %v11177_v21 = vld [vmem:[#allocation5 + $0x19c] sm:$0xf0]  ;;  %v8907_v12 = vor.u32 %v11169_v5, %v8906_v28 }
 0x213   :  { %2738 = vmatpush.bf16.msrb.mxu3 %v8503_v32  ;;  %v8939_v26 = vor.u32 %v11177_v21, %v8938_v20  ;;  %v11111_v32 = vld [vmem:[%s11980_s3 + $0x90] sm:$0xff]  ;;  %v8810_v51 = vld [vmem:[#allocation5 + $0x80] sm:$0xf] }
 0x214   :  { %3013 = vmatpush.bf16.msra.mxu0 %v11099_v52  ;;  %2725 = vmatpush.bf16.msrb.mxu2 %v8375_v30  ;;  %v2390_v40 = vadd.f32 %v12354_v2, %v2377_v11  ;;  %v11095_v2 = vld [vmem:[%s11980_s3 + $0x10] sm:$0xff]  ;;  %v2495_v61 = vpop.f32.mrf.mxu0  ;;  %v8943_v52 = vor.u32 %v11173_v45, %v8940_v23  ;;  %v11165_v30 = vld [vmem:[#allocation5 + $0x144] sm:$0xf] }
 0x215   :  { %3026 = vmatpush.bf16.msra.mxu1 %v11107_v29  ;;  %v8911_v35 = vor.u32 %v11165_v30, %v8908_v31  ;;  %v8986_v20 = vld [vmem:[#allocation5 + $0x1d0] sm:$0xf]  ;;  %v11183_v45 = vld [vmem:[#allocation5 + $0x1d4] sm:$0xf] }
 0x216   :  { %2739 = vmatmul.bf16.vlgmr.msrb.gmra.mxu3 %v12324_v46  ;;  %v2403_v59 = vadd.f32 %v12357_v7, %v2390_v40  ;;  %v2469_v46 = vpop.f32.mrf.mxu2  ;;  %v11094_v7 = vld [vmem:[%s11980_s3 + $0x8] sm:$0xff]  ;;  %v8842_v40 = vld [vmem:[#allocation5 + $0xc0] sm:$0xf]  ;;  %v11187_v21 = vld [vmem:[#allocation5 + $0x1ec] sm:$0xf0] }
 0x217   :  { %2726 = vmatmul.bf16.vlgmr.msrb.gmra.mxu2 %v12322_v49  ;;  %v11096_v49 = vld [vmem:[%s11980_s3 + $0x18] sm:$0xff]  ;;  %v2508_v62 = vpop.f32.mrf.mxu1  ;;  %v8987_v5 = vor.u32 %v11187_v21, %v8986_v20  ;;  %v8954_v31 = vld [vmem:[#allocation5 + $0x190] sm:$0xf] }
 0x218   :  { %3014 = vmatpush.bf16.msra.mxu0 %v11098_v34  ;;  %3038 = vmatpush.bf16.msra.mxu2 %v11116_v48  ;;  %v2416_v54 = vadd.f32 %v12363_v53, %v2403_v59  ;;  %v2507_v53 = vadd.f32 %v2506_v43, %v2494_v60  ;;  %v8844_v43 = vld [vmem:[#allocation5 + $0xe0] sm:$0xf0]  ;;  %v8843_v59 = vor.u32 %v11153_v41, %v8842_v40  ;;  %v8946_v62 = vld [vmem:[#allocation5 + $0x188] sm:$0xf]  ;;  %v8988_v23 = vld [vmem:[#allocation5 + $0x1f0] sm:$0xf0] }
 0x219   :  { %3027 = vmatpush.bf16.msra.mxu1 %v11106_v36  ;;  %v2532_v10 = vpop.f32.mrf.mxu3  ;;  %v8874_v36 = vld [vmem:[#allocation5 + $0x100] sm:$0xf]  ;;  %v8847_v46 = vor.u32 %v11149_v42, %v8844_v43  ;;  %v8991_v30 = vor.u32 %v11183_v45, %v8988_v23  ;;  %v11171_v40 = vld [vmem:[#allocation5 + $0x16c] sm:$0xf0]  ;;  %v11146_v41 = vld [vmem:[#allocation5 + $0xa4] sm:$0xf0] }
 0x21a   :  { %v2429_v63 = vadd.f32 %v12365_v58, %v2416_v54  ;;  %v8971_v58 = vor.u32 %v11185_v24, %v8970_v1  ;;  %v8875_v11 = vor.u32 %v11161_v37, %v8874_v36  ;;  %v11186_v54 = vld [vmem:[#allocation5 + $0x1e4] sm:$0xf0]  ;;  %v11133_v24 = vld [vmem:[#allocation5 + $0x44] sm:$0xf]  ;;  %v1042_v42 = vperm.slane %v12361_v47, 2 }
 0x21b   :  { %v8979_v60 = vor.u32 %v11186_v54, %v8978_v50  ;;  %v11154_v36 = vld [vmem:[#allocation5 + $0xe4] sm:$0xf0]  ;;  %v11123_v50 = vld [vmem:[%s11980_s3 + $0xf0] sm:$0xff] }
 0x21c   :  { %3015 = vmatpush.bf16.msra.mxu0 %v11097_v8  ;;  %3039 = vmatpush.bf16.msra.mxu2 %v11115_v57  ;;  %v2744_v14 = vmax.f32 %v2429_v63, 0.0  ;;  %v8876_v8 = vld [vmem:[#allocation5 + $0x120] sm:$0xf0]  ;;  %v8826_v21 = vld [vmem:[#allocation5 + $0x90] sm:$0xf] }
 0x21d   :  { %3028 = vmatpush.bf16.msra.mxu1 %v11105_v55  ;;  %v8879_v55 = vor.u32 %v11157_v38, %v8876_v8  ;;  %v8812_v57 = vld [vmem:[#allocation5 + $0xa0] sm:$0xf0]  ;;  %v11124_v38 = vld [vmem:[%s11980_s3 + $0xf8] sm:$0xff]  ;;  %v11147_v45 = vld [vmem:[#allocation5 + $0xac] sm:$0xf0] }
 0x21e   :  { %v2519_v9 = vpop.f32.mrf.mxu2  ;;  %v2748_v25 = vpack.c.bf16 %v2744_v14, %v2744_v14  ;;  %3051 = vmatpush.bf16.msra.mxu3 %v11124_v38  ;;  %v8828_v23 = vld [vmem:[#allocation5 + $0xb0] sm:$0xf0] }
 0x21f   :  { %v2520_v15 = vadd.f32 %v2519_v9, %v2507_v53  ;;  %v8780_v53 = vld [vmem:[#allocation5 + $0x60] sm:$0xf0]  ;;  %v11127_v38 = vld [vmem:[#allocation5 + $0x14] sm:$0xf] }
 0x220   :  { %3016 = vmatpush.bf16.msra.mxu0 %v11096_v49  ;;  %3040 = vmatpush.bf16.msra.mxu2 %v11114_v0  ;;  %v11137_v0 = vld [vmem:[#allocation5 + $0x5c] sm:$0xf0]  ;;  %v8783_v14 = vor.u32 %v11133_v24, %v8780_v53  ;;  %v8858_v53 = vld [vmem:[#allocation5 + $0xd0] sm:$0xf] }
 0x221   :  { %3029 = vmatpush.bf16.msra.mxu1 %v11104_v44  ;;  %v2533_v22 = vadd.f32 %v2532_v10, %v2520_v15  ;;  %v2534_v34 = vpop.f32.mrf.mxu3  ;;  %v11109_v44 = vld [vmem:[%s11980_s3 + $0x80] sm:$0xff]  ;;  %v8914_v10 = vld [vmem:[#allocation5 + $0x148] sm:$0xf] }
 0x222   :  { %v8746_v15 = vld [vmem:[#allocation5] sm:$0xf]  ;;  %v11175_v34 = vld [vmem:[#allocation5 + $0x194] sm:$0xf]  ;;  %3052 = vmatpush.bf16.msra.mxu3 %v11123_v50 }
 0x223   :  { %v2745_v4 = vmax.f32 %v2533_v22, 0.0 }
 0x224   :  { %3017 = vmatpush.bf16.msra.mxu0 %v11095_v2  ;;  %3041 = vmatpush.bf16.msra.mxu2 %v11113_v17  ;;  %v11145_v2 = vld [vmem:[#allocation5 + $0x9c] sm:$0xf0] }
 0x225   :  { %3030 = vmatpush.bf16.msra.mxu1 %v11103_v56  ;;  %v2749_v29 = vpack.c.bf16 %v2745_v4, %v2745_v4  ;;  %v11141_v56 = vld [vmem:[#allocation5 + $0x84] sm:$0xf]  ;;  %v8811_v61 = vor.u32 %v11145_v2, %v8810_v51 }
 0x226   :  { %v2521_v33 = vpop.f32.mrf.mxu2  ;;  %v8815_v63 = vor.u32 %v11141_v56, %v8812_v57  ;;  %v8890_v56 = vld [vmem:[#allocation5 + $0x110] sm:$0xf] }
 0x227   :  { %v11163_v57 = vld [vmem:[#allocation5 + $0x12c] sm:$0xf0] }
 0x228   :  { %3018 = vmatpush.bf16.msra.mxu0 %v11094_v7  ;;  %3042 = vmatpush.bf16.msra.mxu2 %v11112_v27  ;;  %v11178_v7 = vld [vmem:[#allocation5 + $0x1a4] sm:$0xf0] }
 0x229   :  { %3031 = vmatpush.bf16.msra.mxu1 %v11102_v19  ;;  %v8778_v19 = vld [vmem:[#allocation5 + $0x40] sm:$0xf]  ;;  %v8947_v1 = vor.u32 %v11178_v7, %v8946_v62  ;;  %v8882_v27 = vld [vmem:[#allocation5 + $0x108] sm:$0xf]  ;;  %v8892_v62 = vld [vmem:[#allocation5 + $0x130] sm:$0xf0] }
 0x22a   :  { %v8779_v9 = vor.u32 %v11137_v0, %v8778_v19  ;;  %v8786_v7 = vld [vmem:[#allocation5 + $0x48] sm:$0xf]  ;;  %v8891_v19 = vor.u32 %v11163_v57, %v8890_v56  ;;  %v11174_v57 = vld [vmem:[#allocation5 + $0x18c] sm:$0xf] }
 0x22b   :  { %v11122_v0 = vld [vmem:[%s11980_s3 + $0xe8] sm:$0xff] }
 0x22c   :  { %3019 = vmatpush.bf16.msra.mxu0 %v11093_v13  ;;  %3043 = vmatpush.bf16.msra.mxu2 %v11111_v32  ;;  %v12404_v49 = vpop.f32.mrf.mxu0  ;;  %v11170_v13 = vld [vmem:[#allocation5 + $0x164] sm:$0xf0]  ;;  %v11179_v32 = vld [vmem:[#allocation5 + $0x1ac] sm:$0xf0] }
 0x22d   :  { %3032 = vmatpush.bf16.msra.mxu1 %v11101_v16  ;;  %v11129_v16 = vld [vmem:[#allocation5 + $0x1c] sm:$0xf0]  ;;  %v8915_v17 = vor.u32 %v11170_v13, %v8914_v10  ;;  %v8955_v37 = vor.u32 %v11179_v32, %v8954_v31  ;;  %v8860_v10 = vld [vmem:[#allocation5 + $0xf0] sm:$0xf0]  ;;  %3053 = vmatpush.bf16.msra.mxu3 %v11122_v0 }
 0x22e   :  { %v8747_v4 = vor.u32 %v11129_v16, %v8746_v15  ;;  %v11121_v13 = vld [vmem:[%s11980_s3 + $0xe0] sm:$0xff]  ;;  %v11130_v15 = vld [vmem:[#allocation5 + $0x24] sm:$0xf0] }
 0x22f   :  { %3020 = vmatmul.bf16.vlgmr.msra.gmra.mxu0 %v2748_v25  ;;  %v12407_v48 = vpop.f32.mrf.mxu1 }
 0x230   :  { %3469 = vmatpush.bf16.msrb.mxu0 %v8971_v58  ;;  %3033 = vmatmul.bf16.vlgmr.msra.gmra.mxu1 %v2749_v29  ;;  %v11125_v58 = vld [vmem:[#allocation5 + $0x4] sm:$0xf] }
 0x231   :  { %3482 = vmatpush.bf16.msrb.mxu1 %v8975_v18  ;;  %3044 = vmatpush.bf16.msra.mxu2 %v11110_v39  ;;  %v8748_v18 = vld [vmem:[#allocation5 + $0x20] sm:$0xf0] }
 0x232   :  { %v8751_v28 = vor.u32 %v11125_v58, %v8748_v18  ;;  %3054 = vmatpush.bf16.msra.mxu3 %v11121_v13  ;;  %v11164_v13 = vld [vmem:[#allocation5 + $0x134] sm:$0xf0] }
 0x234   :  { %3470 = vmatpush.bf16.msrb.mxu0 %v8939_v26  ;;  %v2547_v3 = vpop.f32.mrf.mxu0  ;;  %v3065_v26 = vld [vmem:[%s11950_s9] sm:$0xff]  ;;  %s12746_s9 = sld [smem:[#allocation23_spill]] }
 0x235   :  { %3483 = vmatpush.bf16.msrb.mxu1 %v8943_v52  ;;  %3045 = vmatpush.bf16.msra.mxu2 %v11109_v44  ;;  %v11162_v52 = vld [vmem:[#allocation5 + $0x124] sm:$0xf0]  ;;  %v12414_v33 = vpack.c.bf16 %v3065_v26, %v3065_v26  ;;  %v11167_v44 = vld [vmem:[#allocation5 + $0x154] sm:$0xf]  ;;  %v11155_v3 = vld [vmem:[#allocation5 + $0xec] sm:$0xf0]  ;;  %v8827_v26 = vor.u32 %v11147_v45, %v8826_v21 }
 0x236   :  { %v8883_v29 = vor.u32 %v11162_v52, %v8882_v27  ;;  %v11120_v27 = vld [vmem:[%s11980_s3 + $0xd8] sm:$0xff]  ;;  %v8794_v52 = vld [vmem:[#allocation5 + $0x50] sm:$0xf]  ;;  %v9114_v21 = vld [vmem:[#allocation7 + $0xe0] sm:$0xf] }
 0x237   :  { %v2560_v6 = vpop.f32.mrf.mxu1  ;;  %3055 = vmatpush.bf16.msra.mxu3 %v11120_v27  ;;  %v11219_v45 = vld [vmem:[#allocation7 + $0xec] sm:$0xf0] }
 0x238   :  { %3471 = vmatpush.bf16.msrb.mxu0 %v8907_v12  ;;  %v8956_v12 = vld [vmem:[#allocation5 + $0x1b0] sm:$0xf0] }
 0x239   :  { %3484 = vmatpush.bf16.msrb.mxu1 %v8911_v35  ;;  %3495 = vmatpush.bf16.msrb.mxu2 %v8979_v60  ;;  %v12411_v25 = vpop.f32.mrf.mxu3  ;;  %v8850_v35 = vld [vmem:[#allocation5 + $0xc8] sm:$0xf]  ;;  %v8959_v39 = vor.u32 %v11175_v34, %v8956_v12  ;;  %v2546_v60 = vadd.f32 %v12404_v49, %v1042_v42  ;;  %v11119_v12 = vld [vmem:[%s11980_s3 + $0xd0] sm:$0xff] }
 0x23a   :  { %v12409_v22 = vpop.f32.mrf.mxu2  ;;  %v8851_v8 = vor.u32 %v11154_v36, %v8850_v35  ;;  %v8762_v35 = vld [vmem:[#allocation5 + $0x10] sm:$0xf] }
 0x23b   :  { %v2559_v6 = vadd.f32 %v12407_v48, %v2546_v60  ;;  %v11143_v48 = vld [vmem:[#allocation5 + $0x94] sm:$0xf]  ;;  %v11131_v36 = vld [vmem:[#allocation5 + $0x2c] sm:$0xf0]  ;;  %3056 = vmatpush.bf16.msra.mxu3 %v11119_v12 }
 0x23c   :  { %3472 = vmatpush.bf16.msrb.mxu0 %v8875_v11  ;;  %v8818_v11 = vld [vmem:[#allocation5 + $0x88] sm:$0xf] }
 0x23d   :  { %3485 = vmatpush.bf16.msrb.mxu1 %v8879_v55  ;;  %3496 = vmatpush.bf16.msrb.mxu2 %v8947_v1  ;;  %v8922_v55 = vld [vmem:[#allocation5 + $0x150] sm:$0xf]  ;;  %v8819_v51 = vor.u32 %v11146_v41, %v8818_v11  ;;  %v2572_v16 = vadd.f32 %v12409_v22, %v2559_v6  ;;  %v8831_v22 = vor.u32 %v11143_v48, %v8828_v23  ;;  %v8916_v6 = vld [vmem:[#allocation5 + $0x168] sm:$0xf0]  ;;  %v11156_v48 = vld [vmem:[#allocation5 + $0xf4] sm:$0xf0] }
 0x23e   :  { %v8923_v2 = vor.u32 %v11171_v40, %v8922_v55  ;;  %v8763_v41 = vor.u32 %v11131_v36, %v8762_v35  ;;  %v9115_v23 = vor.u32 %v11219_v45, %v9114_v21  ;;  %v9034_v21 = vld [vmem:[#allocation7 + $0x40] sm:$0xf]  ;;  %v11199_v45 = vld [vmem:[#allocation7 + $0x4c] sm:$0xf0] }
 0x240   :  { %3473 = vmatpush.bf16.msrb.mxu0 %v8843_v59  ;;  %v8924_v59 = vld [vmem:[#allocation5 + $0x170] sm:$0xf0] }
 0x241   :  { %3486 = vmatpush.bf16.msrb.mxu1 %v8847_v46  ;;  %3497 = vmatpush.bf16.msrb.mxu2 %v8915_v17  ;;  %v2586_v46 = vpop.f32.mrf.mxu3  ;;  %v8927_v54 = vor.u32 %v11167_v44, %v8924_v59  ;;  %v8859_v17 = vor.u32 %v11155_v3, %v8858_v53  ;;  %v8994_v44 = vld [vmem:[#allocation5 + $0x1d8] sm:$0xf]  ;;  %v11166_v3 = vld [vmem:[#allocation5 + $0x14c] sm:$0xf] }
 0x242   :  { %v2573_v43 = vpop.f32.mrf.mxu2  ;;  %v11188_v59 = vld [vmem:[#allocation5 + $0x1f4] sm:$0xf0]  ;;  %v11117_v46 = vld [vmem:[%s11980_s3 + $0xc0] sm:$0xff] }
 0x243   :  { %v11172_v53 = vld [vmem:[#allocation5 + $0x174] sm:$0xf0] }
 0x244   :  { %3474 = vmatpush.bf16.msrb.mxu0 %v8811_v61  ;;  %v11159_v61 = vld [vmem:[#allocation5 + $0x114] sm:$0xf] }
 0x245   :  { %3487 = vmatpush.bf16.msrb.mxu1 %v8815_v63  ;;  %3498 = vmatpush.bf16.msrb.mxu2 %v8883_v29  ;;  %v11138_v63 = vld [vmem:[#allocation5 + $0x64] sm:$0xf0]  ;;  %v8895_v24 = vor.u32 %v11159_v61, %v8892_v62  ;;  %v11135_v29 = vld [vmem:[#allocation5 + $0x54] sm:$0xf]  ;;  %v8962_v61 = vld [vmem:[#allocation5 + $0x198] sm:$0xf] }
 0x246   :  { %v8787_v1 = vor.u32 %v11138_v63, %v8786_v7  ;;  %v11180_v62 = vld [vmem:[#allocation5 + $0x1b4] sm:$0xf0]  ;;  %v8948_v7 = vld [vmem:[#allocation5 + $0x1a8] sm:$0xf0] }
 0x248   :  { %3475 = vmatpush.bf16.msrb.mxu0 %v8779_v9  ;;  %v11151_v9 = vld [vmem:[#allocation5 + $0xd4] sm:$0xf] }
 0x249   :  { %3488 = vmatpush.bf16.msrb.mxu1 %v8783_v14  ;;  %3499 = vmatpush.bf16.msrb.mxu2 %v8851_v8  ;;  %v8754_v14 = vld [vmem:[#allocation5 + $0x8] sm:$0xf]  ;;  %v8863_v20 = vor.u32 %v11151_v9, %v8860_v10  ;;  %v8764_v8 = vld [vmem:[#allocation5 + $0x30] sm:$0xf0]  ;;  %v8919_v10 = vor.u32 %v11166_v3, %v8916_v6 }
 0x24a   :  { %v8755_v18 = vor.u32 %v11130_v15, %v8754_v14  ;;  %v8767_v42 = vor.u32 %v11127_v38, %v8764_v8  ;;  %v11158_v15 = vld [vmem:[#allocation5 + $0x10c] sm:$0xf] }
 0x24b   :  { %v8820_v38 = vld [vmem:[#allocation5 + $0xa8] sm:$0xf0] }
 0x24c   :  { %3476 = vmatpush.bf16.msrb.mxu0 %v8747_v4  ;;  %v2597_v49 = vpop.f32.mrf.mxu0  ;;  %v2585_v4 = vadd.f32 %v12411_v25, %v2572_v16  ;;  %v8884_v16 = vld [vmem:[#allocation5 + $0x128] sm:$0xf0] }
 0x24d   :  { %3489 = vmatpush.bf16.msrb.mxu1 %v8751_v28  ;;  %3500 = vmatpush.bf16.msrb.mxu2 %v8819_v51  ;;  %v11139_v28 = vld [vmem:[#allocation5 + $0x6c] sm:$0xf0]  ;;  %v11182_v51 = vld [vmem:[#allocation5 + $0x1cc] sm:$0xf] }
 0x24e   :  { %v8795_v34 = vor.u32 %v11139_v28, %v8794_v52  ;;  %v8852_v52 = vld [vmem:[#allocation5 + $0xe8] sm:$0xf0] }
 0x24f   :  { %3477 = vmatmul.bf16.vlgmr.msrb.gmra.mxu0 %v12414_v33  ;;  %v2610_v58 = vpop.f32.mrf.mxu1 }
 0x250   :  { %3521 = vmatpush.bf16.msra.mxu0 %v8987_v5  ;;  %3490 = vmatmul.bf16.vlgmr.msrb.gmra.mxu1 %v12414_v33  ;;  %v2598_v5 = vadd.f32 %v2597_v49, %v2585_v4  ;;  %v8898_v49 = vld [vmem:[#allocation5 + $0x118] sm:$0xf]  ;;  %v9242_v4 = vld [vmem:[#allocation7 + $0x1e0] sm:$0xf] }
 0x251   :  { %3534 = vmatpush.bf16.msra.mxu1 %v8991_v30  ;;  %3501 = vmatpush.bf16.msrb.mxu2 %v8787_v1  ;;  %v8796_v30 = vld [vmem:[#allocation5 + $0x70] sm:$0xf0]  ;;  %v8963_v1 = vor.u32 %v11180_v62, %v8962_v61  ;;  %v9066_v62 = vld [vmem:[#allocation7 + $0x80] sm:$0xf] }
 0x252   :  { %v8799_v25 = vor.u32 %v11135_v29, %v8796_v30  ;;  %v11148_v29 = vld [vmem:[#allocation5 + $0xb4] sm:$0xf0] }
 0x254   :  { %3522 = vmatpush.bf16.msra.mxu0 %v8955_v37  ;;  %v2599_v31 = vpop.f32.mrf.mxu0  ;;  %v2611_v37 = vadd.f32 %v2610_v58, %v2598_v5  ;;  %v8834_v5 = vld [vmem:[#allocation5 + $0x98] sm:$0xf] }
 0x255   :  { %3535 = vmatpush.bf16.msra.mxu1 %v8959_v39  ;;  %3502 = vmatpush.bf16.msrb.mxu2 %v8755_v18  ;;  %v11118_v39 = vld [vmem:[%s11980_s3 + $0xc8] sm:$0xff]  ;;  %v8866_v18 = vld [vmem:[#allocation5 + $0xd8] sm:$0xf]  ;;  %v9098_v31 = vld [vmem:[#allocation7 + $0xc0] sm:$0xf]  ;;  %s12751_s3 = sld [smem:[#allocation30_spill]] }
 0x256   :  { %3057 = vmatpush.bf16.msra.mxu3 %v11118_v39  ;;  %v8867_v28 = vor.u32 %v11156_v48, %v8866_v18  ;;  %v8802_v39 = vld [vmem:[#allocation5 + $0x58] sm:$0xf]  ;;  %v9162_v48 = vld [vmem:[#allocation7 + $0x140] sm:$0xf] }
 0x257   :  { %v2612_v32 = vpop.f32.mrf.mxu1 }
 0x258   :  { %3523 = vmatpush.bf16.msra.mxu0 %v8923_v2  ;;  %v8980_v2 = vld [vmem:[#allocation5 + $0x1e8] sm:$0xf0]  ;;  %v11215_v32 = vld [vmem:[#allocation7 + $0xcc] sm:$0xf0] }
 0x259   :  { %3536 = vmatpush.bf16.msra.mxu1 %v8927_v54  ;;  %v2636_v40 = vpop.f32.mrf.mxu3  ;;  %v8995_v54 = vor.u32 %v11188_v59, %v8994_v44  ;;  %v8983_v56 = vor.u32 %v11182_v51, %v8980_v2  ;;  %v9099_v12 = vor.u32 %v11215_v32, %v9098_v31  ;;  %v11243_v59 = vld [vmem:[#allocation7 + $0x1ac] sm:$0xf0]  ;;  %v11134_v51 = vld [vmem:[#allocation5 + $0x4c] sm:$0xf] }
 0x25a   :  { %v2623_v11 = vpop.f32.mrf.mxu2  ;;  %3058 = vmatpush.bf16.msra.mxu3 %v11117_v46  ;;  %v8788_v2 = vld [vmem:[#allocation5 + $0x68] sm:$0xf0] }
 0x25b   :  { %v2624_v55 = vadd.f32 %v2623_v11, %v2611_v37  ;;  %v11142_v37 = vld [vmem:[#allocation5 + $0x8c] sm:$0xf]  ;;  %v8835_v11 = vor.u32 %v11148_v29, %v8834_v5  ;;  %v8791_v61 = vor.u32 %v11134_v51, %v8788_v2  ;;  %v11227_v5 = vld [vmem:[#allocation7 + $0x12c] sm:$0xf0] }
 0x25c   :  { %3524 = vmatpush.bf16.msra.mxu0 %v8891_v19  ;;  %v8951_v19 = vor.u32 %v11174_v57, %v8948_v7  ;;  %v8770_v57 = vld [vmem:[#allocation5 + $0x18] sm:$0xf]  ;;  %v11207_v7 = vld [vmem:[#allocation7 + $0x8c] sm:$0xf0] }
 0x25d   :  { %3537 = vmatpush.bf16.msra.mxu1 %v8895_v24  ;;  %v2637_v43 = vadd.f32 %v2636_v40, %v2624_v55  ;;  %v8930_v24 = vld [vmem:[#allocation5 + $0x158] sm:$0xf]  ;;  %v8823_v40 = vor.u32 %v11142_v37, %v8820_v38  ;;  %v9626_v37 = vld [vmem:[#allocation7 + $0x4e0] sm:$0xf]  ;;  %v11347_v38 = vld [vmem:[#allocation7 + $0x4ec] sm:$0xf0] }
 0x25e   :  { %3508 = vmatpush.bf16.msrb.mxu3 %v8983_v56  ;;  %v8931_v9 = vor.u32 %v11172_v53, %v8930_v24  ;;  %v11140_v55 = vld [vmem:[#allocation5 + $0x74] sm:$0xf0]  ;;  %v11126_v24 = vld [vmem:[#allocation5 + $0xc] sm:$0xf] }
 0x25f   :  { %v2746_v50 = vmax.f32 %v2637_v43, 0.0  ;;  %v9210_v43 = vld [vmem:[#allocation7 + $0x1a0] sm:$0xf]  ;;  %v8803_v56 = vor.u32 %v11140_v55, %v8802_v39  ;;  %v8756_v53 = vld [vmem:[#allocation5 + $0x28] sm:$0xf0] }
 0x260   :  { %3525 = vmatpush.bf16.msra.mxu0 %v8859_v17  ;;  %v8899_v17 = vor.u32 %v11164_v13, %v8898_v49  ;;  %v9211_v46 = vor.u32 %v11243_v59, %v9210_v43  ;;  %v8759_v6 = vor.u32 %v11126_v24, %v8756_v53  ;;  %v9178_v49 = vld [vmem:[#allocation7 + $0x160] sm:$0xf]  ;;  %v11379_v55 = vld [vmem:[#allocation7 + $0x5ec] sm:$0xf0] }
 0x261   :  { %3538 = vmatpush.bf16.msra.mxu1 %v8863_v20  ;;  %v2750_v60 = vpack.c.bf16 %v2746_v50, %v2746_v50  ;;  %v2638_v0 = vpop.f32.mrf.mxu3  ;;  %v8887_v20 = vor.u32 %v11158_v15, %v8884_v16  ;;  %v11235_v15 = vld [vmem:[#allocation7 + $0x16c] sm:$0xf0]  ;;  %v1043_v16 = vperm.slane %v12361_v47, 3  ;;  %v9754_v39 = vld [vmem:[#allocation7 + $0x5e0] sm:$0xf] }
 0x262   :  { %v2625_v63 = vpop.f32.mrf.mxu2  ;;  %3509 = vmatpush.bf16.msrb.mxu3 %v8951_v19  ;;  %v9067_v19 = vor.u32 %v11207_v7, %v9066_v62  ;;  %v11239_v0 = vld [vmem:[#allocation7 + $0x18c] sm:$0xf0]  ;;  %v9179_v18 = vor.u32 %v11235_v15, %v9178_v49  ;;  %v9738_v43 = vld [vmem:[#allocation7 + $0x5c0] sm:$0xf] }
 0x263   :  { %3046 = vmatmul.bf16.vlgmr.msra.gmra.mxu2 %v2750_v60  ;;  %v11132_v60 = vld [vmem:[#allocation5 + $0x34] sm:$0xf0]  ;;  %v9194_v63 = vld [vmem:[#allocation7 + $0x180] sm:$0xf]  ;;  %v11195_v47 = vld [vmem:[#allocation7 + $0x2c] sm:$0xf0] }
 0x264   :  { %3526 = vmatpush.bf16.msra.mxu0 %v8827_v26  ;;  %3547 = vmatpush.bf16.msra.mxu2 %v8995_v54  ;;  %v11251_v26 = vld [vmem:[#allocation7 + $0x1ec] sm:$0xf0]  ;;  %v8771_v3 = vor.u32 %v11132_v60, %v8770_v57  ;;  %v9722_v60 = vld [vmem:[#allocation7 + $0x5a0] sm:$0xf] }
 0x265   :  { %3539 = vmatpush.bf16.msra.mxu1 %v8831_v22  ;;  %v9243_v27 = vor.u32 %v11251_v26, %v9242_v4  ;;  %v11150_v22 = vld [vmem:[#allocation5 + $0xcc] sm:$0xf]  ;;  %v11231_v4 = vld [vmem:[#allocation7 + $0x14c] sm:$0xf0]  ;;  %v9706_v53 = vld [vmem:[#allocation7 + $0x580] sm:$0xf] }
 0x266   :  { %3510 = vmatpush.bf16.msrb.mxu3 %v8919_v10  ;;  %v8855_v30 = vor.u32 %v11150_v22, %v8852_v52  ;;  %v11203_v10 = vld [vmem:[#allocation7 + $0x6c] sm:$0xf0]  ;;  %v9018_v22 = vld [vmem:[#allocation7 + $0x20] sm:$0xf] }
 0x267   :  { %v9146_v52 = vld [vmem:[#allocation7 + $0x120] sm:$0xf]  ;;  %v11339_v57 = vld [vmem:[#allocation7 + $0x4ac] sm:$0xf0] }
 0x268   :  { %3527 = vmatpush.bf16.msra.mxu0 %v8795_v34  ;;  %3548 = vmatpush.bf16.msra.mxu2 %v8963_v1  ;;  %v9226_v34 = vld [vmem:[#allocation7 + $0x1c0] sm:$0xf]  ;;  %v9195_v1 = vor.u32 %v11239_v0, %v9194_v63  ;;  %v11335_v24 = vld [vmem:[#allocation7 + $0x48c] sm:$0xf0] }
 0x269   :  { %3540 = vmatpush.bf16.msra.mxu1 %v8799_v25  ;;  %v11247_v25 = vld [vmem:[#allocation7 + $0x1cc] sm:$0xf0] }
 0x26a   :  { %3511 = vmatpush.bf16.msrb.mxu3 %v8887_v20  ;;  %v9227_v36 = vor.u32 %v11247_v25, %v9226_v34  ;;  %v9130_v25 = vld [vmem:[#allocation7 + $0x100] sm:$0xf]  ;;  %v11367_v49 = vld [vmem:[#allocation7 + $0x58c] sm:$0xf0] }
 0x26c   :  { %3528 = vmatpush.bf16.msra.mxu0 %v8763_v41  ;;  %v12433_v14 = vpop.f32.mrf.mxu0  ;;  %3549 = vmatpush.bf16.msra.mxu2 %v8931_v9  ;;  %v9082_v41 = vld [vmem:[#allocation7 + $0xa0] sm:$0xf] }
 0x26d   :  { %3541 = vmatpush.bf16.msra.mxu1 %v8767_v42  ;;  %v11211_v42 = vld [vmem:[#allocation7 + $0xac] sm:$0xf0]  ;;  %v9050_v9 = vld [vmem:[#allocation7 + $0x60] sm:$0xf]  ;;  %v2650_v26 = vadd.f32 %v12433_v14, %v1043_v16 }
 0x26e   :  { %3512 = vmatpush.bf16.msrb.mxu3 %v8855_v30  ;;  %v9083_v44 = vor.u32 %v11211_v42, %v9082_v41  ;;  %v9051_v13 = vor.u32 %v11203_v10, %v9050_v9  ;;  %v9147_v30 = vor.u32 %v11227_v5, %v9146_v52  ;;  %v11191_v14 = vld [vmem:[#allocation7 + $0xc] sm:$0xf0]  ;;  %v9610_v41 = vld [vmem:[#allocation7 + $0x4c0] sm:$0xf]  ;;  %v8996_v9 = vld [vmem:[#allocation5 + $0x1f8] sm:$0xf0] }
 0x26f   :  { %3529 = vmatmul.bf16.vlgmr.msra.gmra.mxu0 %v12414_v33  ;;  %v12435_v58 = vpop.f32.mrf.mxu1  ;;  %v11343_v42 = vld [vmem:[#allocation7 + $0x4cc] sm:$0xf0] }
 0x270   :  { %3542 = vmatmul.bf16.vlgmr.msra.gmra.mxu1 %v12414_v33  ;;  %5135 = vmatpush.bf16.msrb.mxu0 %v9115_v23  ;;  %v9035_v23 = vor.u32 %v11199_v45, %v9034_v21  ;;  %v2663_v29 = vadd.f32 %v12435_v58, %v2650_v26  ;;  %v9611_v59 = vor.u32 %v11343_v42, %v9610_v41  ;;  %v11176_v45 = vld [vmem:[#allocation5 + $0x19c] sm:$0xf]  ;;  %v11327_v52 = vld [vmem:[#allocation7 + $0x44c] sm:$0xf0]  ;;  %v9354_v42 = vld [vmem:[#allocation7 + $0x2c0] sm:$0xf] }
 0x271   :  { %3550 = vmatpush.bf16.msra.mxu2 %v8899_v17  ;;  %5148 = vmatpush.bf16.msrb.mxu1 %v9243_v27  ;;  %v9163_v27 = vor.u32 %v11231_v4, %v9162_v48  ;;  %v8964_v48 = vld [vmem:[#allocation5 + $0x1b8] sm:$0xf0]  ;;  %v11363_v4 = vld [vmem:[#allocation7 + $0x56c] sm:$0xf0] }
 0x272   :  { %3513 = vmatpush.bf16.msrb.mxu3 %v8823_v40  ;;  %v9755_v40 = vor.u32 %v11379_v55, %v9754_v39  ;;  %v8967_v5 = vor.u32 %v11176_v45, %v8964_v48  ;;  %v9658_v55 = vld [vmem:[#allocation7 + $0x520] sm:$0xf]  ;;  %v8772_v45 = vld [vmem:[#allocation5 + $0x38] sm:$0xf0] }
 0x273   :  { %3503 = vmatmul.bf16.vlgmr.msrb.gmra.mxu2 %v12414_v33 }
 0x274   :  { %v2651_v35 = vpop.f32.mrf.mxu0  ;;  %5136 = vmatpush.bf16.msrb.mxu0 %v9099_v12  ;;  %v9002_v12 = vld [vmem:[#allocation7] sm:$0xf] }
 0x275   :  { %3551 = vmatpush.bf16.msra.mxu2 %v8867_v28  ;;  %5149 = vmatpush.bf16.msrb.mxu1 %v9227_v36  ;;  %v9019_v28 = vor.u32 %v11195_v47, %v9018_v22  ;;  %v9003_v35 = vor.u32 %v11191_v14, %v9002_v12  ;;  %v11223_v36 = vld [vmem:[#allocation7 + $0x10c] sm:$0xf0]  ;;  %v9546_v47 = vld [vmem:[#allocation7 + $0x440] sm:$0xf]  ;;  %v11676_v12 = vld [vmem:[%s12745_s5] ss:$0 sm:$0xff] }
 0x276   :  { %3514 = vmatpush.bf16.msrb.mxu3 %v8791_v61  ;;  %v9370_v14 = vld [vmem:[#allocation7 + $0x2e0] sm:$0xf] }
 0x277   :  { %v2664_v8 = vpop.f32.mrf.mxu1 }
 0x278   :  { %5137 = vmatpush.bf16.msrb.mxu0 %v9083_v44  ;;  %v9131_v8 = vor.u32 %v11223_v36, %v9130_v25  ;;  %v11283_v25 = vld [vmem:[#allocation7 + $0x2ec] sm:$0xf0]  ;;  %v11160_v36 = vld [vmem:[#allocation5 + $0x11c] sm:$0xf] }
 0x279   :  { %v12438_v54 = vpop.f32.mrf.mxu3  ;;  %3552 = vmatpush.bf16.msra.mxu2 %v8835_v11  ;;  %5150 = vmatpush.bf16.msrb.mxu1 %v9211_v46  ;;  %v9627_v11 = vor.u32 %v11347_v38, %v9626_v37  ;;  %v9371_v37 = vor.u32 %v11283_v25, %v9370_v14  ;;  %v9530_v38 = vld [vmem:[#allocation7 + $0x420] sm:$0xf] }
 0x27a   :  { %v2675_v50 = vpop.f32.mrf.mxu2  ;;  %3515 = vmatpush.bf16.msrb.mxu3 %v8759_v6  ;;  %v11184_v6 = vld [vmem:[#allocation5 + $0x1dc] sm:$0xf] }
 0x27b   :  { %v2676_v32 = vadd.f32 %v2675_v50, %v2663_v29  ;;  %v11375_v50 = vld [vmem:[#allocation7 + $0x5cc] sm:$0xf0]  ;;  %v8999_v16 = vor.u32 %v11184_v6, %v8996_v9  ;;  %v9547_v29 = vor.u32 %v11327_v52, %v9546_v47  ;;  %v9322_v9 = vld [vmem:[#allocation7 + $0x280] sm:$0xf] }
 0x27c   :  { %5138 = vmatpush.bf16.msrb.mxu0 %v9067_v19  ;;  %v9739_v51 = vor.u32 %v11375_v50, %v9738_v43  ;;  %v11279_v43 = vld [vmem:[#allocation7 + $0x2cc] sm:$0xf0] }
 0x27d   :  { %3553 = vmatpush.bf16.msra.mxu2 %v8803_v56  ;;  %5151 = vmatpush.bf16.msrb.mxu1 %v9195_v1  ;;  %v2689_v58 = vadd.f32 %v12438_v54, %v2676_v32  ;;  %v9594_v56 = vld [vmem:[#allocation7 + $0x4a0] sm:$0xf]  ;;  %v11371_v54 = vld [vmem:[#allocation7 + $0x5ac] sm:$0xf0]  ;;  %v8932_v32 = vld [vmem:[#allocation5 + $0x178] sm:$0xf0]  ;;  %v9355_v50 = vor.u32 %v11279_v43, %v9354_v42 }
 0x27e   :  { %v9595_v62 = vor.u32 %v11339_v57, %v9594_v56  ;;  %v9723_v63 = vor.u32 %v11371_v54, %v9722_v60  ;;  %v9578_v1 = vld [vmem:[#allocation7 + $0x480] sm:$0xf]  ;;  %v11152_v57 = vld [vmem:[#allocation5 + $0xdc] sm:$0xf]  ;;  %v11259_v47 = vld [vmem:[#allocation7 + $0x22c] sm:$0xf0] }
 0x27f   :  { %v9579_v10 = vor.u32 %v11335_v24, %v9578_v1  ;;  %v8868_v60 = vld [vmem:[#allocation5 + $0xf8] sm:$0xf0] }
 0x280   :  { %5139 = vmatpush.bf16.msrb.mxu0 %v9051_v13  ;;  %v9707_v13 = vor.u32 %v11367_v49, %v9706_v53  ;;  %v11144_v1 = vld [vmem:[#allocation5 + $0x9c] sm:$0xf] }
 0x281   :  { %v2690_v20 = vpop.f32.mrf.mxu3  ;;  %3554 = vmatpush.bf16.msra.mxu2 %v8771_v3  ;;  %5152 = vmatpush.bf16.msrb.mxu1 %v9179_v18  ;;  %v11331_v18 = vld [vmem:[#allocation7 + $0x46c] sm:$0xf0]  ;;  %v8836_v24 = vld [vmem:[#allocation5 + $0xb8] sm:$0xf0] }
 0x282   :  { %v2677_v17 = vpop.f32.mrf.mxu2  ;;  %v9690_v20 = vld [vmem:[#allocation7 + $0x560] sm:$0xf]  ;;  %v8839_v6 = vor.u32 %v11144_v1, %v8836_v24  ;;  %v9212_v24 = vld [vmem:[#allocation7 + $0x1b0] sm:$0xf0] }
 0x283   :  { %v9562_v17 = vld [vmem:[#allocation7 + $0x460] sm:$0xf] }
 0x284   :  { %3555 = vmatmul.bf16.vlgmr.msra.gmra.mxu2 %v12414_v33  ;;  %5140 = vmatpush.bf16.msrb.mxu0 %v9035_v23  ;;  %v9563_v23 = vor.u32 %v11331_v18, %v9562_v17  ;;  %v9306_v18 = vld [vmem:[#allocation7 + $0x260] sm:$0xf] }
 0x285   :  { %5153 = vmatpush.bf16.msrb.mxu1 %v9163_v27  ;;  %v9691_v27 = vor.u32 %v11363_v4, %v9690_v20  ;;  %5161 = vmatpush.bf16.msrb.mxu2 %v9371_v37  ;;  %v11267_v20 = vld [vmem:[#allocation7 + $0x26c] sm:$0xf0]  ;;  %v9290_v4 = vld [vmem:[#allocation7 + $0x240] sm:$0xf] }
 0x286   :  { %v9307_v48 = vor.u32 %v11267_v20, %v9306_v18  ;;  %v11395_v18 = vld [vmem:[#allocation7 + $0x66c] sm:$0xf0] }
 0x288   :  { %5141 = vmatpush.bf16.msrb.mxu0 %v9019_v28  ;;  %v9674_v28 = vld [vmem:[#allocation7 + $0x540] sm:$0xf] }
 0x289   :  { %5154 = vmatpush.bf16.msrb.mxu1 %v9147_v30  ;;  %v11359_v30 = vld [vmem:[#allocation7 + $0x54c] sm:$0xf0]  ;;  %5162 = vmatpush.bf16.msrb.mxu2 %v9355_v50  ;;  %v9100_v50 = vld [vmem:[#allocation7 + $0xd0] sm:$0xf0] }
 0x28c   :  { %v2701_v31 = vpop.f32.mrf.mxu0  ;;  %5142 = vmatpush.bf16.msrb.mxu0 %v9003_v35 }
 0x28d   :  { %5155 = vmatpush.bf16.msrb.mxu1 %v9131_v8  ;;  %v2702_v44 = vadd.f32 %v2701_v31, %v2689_v58  ;;  %v11168_v31 = vld [vmem:[#allocation5 + $0x15c] sm:$0xf]  ;;  %v11323_v8 = vld [vmem:[#allocation7 + $0x42c] sm:$0xf0] }
 0x28e   :  { %v8935_v35 = vor.u32 %v11168_v31, %v8932_v32  ;;  %v9531_v39 = vor.u32 %v11323_v8, %v9530_v38  ;;  %v9882_v32 = vld [vmem:[#allocation7 + $0x6e0] sm:$0xf]  ;;  %v9116_v38 = vld [vmem:[#allocation7 + $0xf0] sm:$0xf0] }
 0x28f   :  { %v2714_v34 = vpop.f32.mrf.mxu1  ;;  %v9866_v8 = vld [vmem:[#allocation7 + $0x6c0] sm:$0xf] }
 0x290   :  { %5187 = vmatpush.bf16.msra.mxu0 %v9627_v11  ;;  %v2715_v61 = vadd.f32 %v2714_v34, %v2702_v44  ;;  %v9675_v34 = vor.u32 %v11359_v30, %v9674_v28  ;;  %v8900_v11 = vld [vmem:[#allocation5 + $0x138] sm:$0xf0] }
 0x291   :  { %5200 = vmatpush.bf16.msra.mxu1 %v9755_v40  ;;  %v11355_v40 = vld [vmem:[#allocation7 + $0x52c] sm:$0xf0]  ;;  %v12450_v28 = vld [vmem:[%s12746_s9] sm:$0xff] }
 0x292   :  { %v9659_v58 = vor.u32 %v11355_v40, %v9658_v55  ;;  %v3133_v30 = vperm.slane %v12450_v28, 0  ;;  %v9244_v55 = vld [vmem:[#allocation7 + $0x1f0] sm:$0xf0] }
 0x294   :  { %v2703_v46 = vpop.f32.mrf.mxu0  ;;  %5188 = vmatpush.bf16.msra.mxu0 %v9611_v59  ;;  %v8903_v59 = vor.u32 %v11160_v36, %v8900_v11 }
 0x295   :  { %5201 = vmatpush.bf16.msra.mxu1 %v9739_v51  ;;  %v9514_v46 = vld [vmem:[#allocation7 + $0x400] sm:$0xf]  ;;  %v11319_v51 = vld [vmem:[#allocation7 + $0x40c] sm:$0xf0] }
 0x297   :  { %v2716_v2 = vpop.f32.mrf.mxu1 }
 0x298   :  { %5189 = vmatpush.bf16.msra.mxu0 %v9595_v62  ;;  %v9642_v2 = vld [vmem:[#allocation7 + $0x500] sm:$0xf]  ;;  %v11351_v62 = vld [vmem:[#allocation7 + $0x50c] sm:$0xf0] }
 0x299   :  { %v2740_v0 = vpop.f32.mrf.mxu3  ;;  %5202 = vmatpush.bf16.msra.mxu1 %v9723_v63  ;;  %v8871_v63 = vor.u32 %v11152_v57, %v8868_v60  ;;  %v11403_v57 = vld [vmem:[#allocation7 + $0x6ac] sm:$0xf0] }
 0x29a   :  { %v2727_v7 = vpop.f32.mrf.mxu2 }
 0x29b   :  { %v2728_v19 = vadd.f32 %v2727_v7, %v2715_v61  ;;  %v9515_v61 = vor.u32 %v11319_v51, %v9514_v46  ;;  %v9643_v7 = vor.u32 %v11351_v62, %v9642_v2  ;;  %v11245_v46 = vld [vmem:[#allocation7 + $0x1c4] sm:$0xf]  ;;  %v9228_v2 = vld [vmem:[#allocation7 + $0x1d0] sm:$0xf0] }
 0x29c   :  { %5190 = vmatpush.bf16.msra.mxu0 %v9579_v10  ;;  %v11271_v10 = vld [vmem:[#allocation7 + $0x28c] sm:$0xf0] }
 0x29d   :  { %v2741_v3 = vadd.f32 %v2740_v0, %v2728_v19  ;;  %5203 = vmatpush.bf16.msra.mxu1 %v9707_v13  ;;  %v9338_v19 = vld [vmem:[#allocation7 + $0x2a0] sm:$0xf]  ;;  %v11275_v0 = vld [vmem:[#allocation7 + $0x2ac] sm:$0xf0]  ;;  %v11136_v13 = vld [vmem:[#allocation5 + $0x5c] sm:$0xf] }
 0x29e   :  { %v9339_v53 = vor.u32 %v11275_v0, %v9338_v19  ;;  %v9084_v19 = vld [vmem:[#allocation7 + $0xb0] sm:$0xf0]  ;;  %v11241_v0 = vld [vmem:[#allocation7 + $0x1a4] sm:$0xf] }
 0x29f   :  { %v2747_v15 = vmax.f32 %v2741_v3, 0.0 }
 0x2a0   :  { %5191 = vmatpush.bf16.msra.mxu0 %v9563_v23  ;;  %5163 = vmatpush.bf16.msrb.mxu2 %v9339_v53  ;;  %v9834_v53 = vld [vmem:[#allocation7 + $0x680] sm:$0xf] }
 0x2a1   :  { %v2751_v21 = vpack.c.bf16 %v2747_v15, %v2747_v15  ;;  %v2742_v22 = vpop.f32.mrf.mxu3  ;;  %5204 = vmatpush.bf16.msra.mxu1 %v9691_v27  ;;  %v8804_v15 = vld [vmem:[#allocation5 + $0x78] sm:$0xf0] }
 0x2a2   :  { %v2729_v26 = vpop.f32.mrf.mxu2  ;;  %v8807_v17 = vor.u32 %v11136_v13, %v8804_v15  ;;  %v9274_v22 = vld [vmem:[#allocation7 + $0x220] sm:$0xf]  ;;  %v9068_v13 = vld [vmem:[#allocation7 + $0x90] sm:$0xf0]  ;;  %v11237_v15 = vld [vmem:[#allocation7 + $0x184] sm:$0xf] }
 0x2a3   :  { %3059 = vmatmul.bf16.vlgmr.msra.gmra.mxu3 %v2751_v21  ;;  %v11128_v21 = vld [vmem:[#allocation5 + $0x1c] sm:$0xf]  ;;  %v11263_v26 = vld [vmem:[#allocation7 + $0x24c] sm:$0xf0]  ;;  %v9275_v52 = vor.u32 %v11259_v47, %v9274_v22 }
 0x2a4   :  { %3560 = vmatpush.bf16.msra.mxu3 %v8999_v16  ;;  %5192 = vmatpush.bf16.msra.mxu0 %v9547_v29  ;;  %v9323_v16 = vor.u32 %v11271_v10, %v9322_v9  ;;  %v8775_v23 = vor.u32 %v11128_v21, %v8772_v45  ;;  %v9291_v27 = vor.u32 %v11263_v26, %v9290_v4  ;;  %v11255_v29 = vld [vmem:[#allocation7 + $0x20c] sm:$0xf0]  ;;  %v11233_v4 = vld [vmem:[#allocation7 + $0x164] sm:$0xf]  ;;  %v9180_v26 = vld [vmem:[#allocation7 + $0x170] sm:$0xf0] }
 0x2a5   :  { %5205 = vmatpush.bf16.msra.mxu1 %v9675_v34  ;;  %v11411_v34 = vld [vmem:[#allocation7 + $0x6ec] sm:$0xf0]  ;;  %v9215_v10 = vor.u32 %v11241_v0, %v9212_v24 }
 0x2a6   :  { %5164 = vmatpush.bf16.msrb.mxu2 %v9323_v16  ;;  %v9883_v14 = vor.u32 %v11411_v34, %v9882_v32  ;;  %v9196_v16 = vld [vmem:[#allocation7 + $0x190] sm:$0xf0]  ;;  %v11391_v22 = vld [vmem:[#allocation7 + $0x64c] sm:$0xf0]  ;;  %v9786_v34 = vld [vmem:[#allocation7 + $0x620] sm:$0xf] }
 0x2a7   :  { %v9199_v45 = vor.u32 %v11237_v15, %v9196_v16  ;;  %v9164_v32 = vld [vmem:[#allocation7 + $0x150] sm:$0xf0]  ;;  %v11311_v0 = vld [vmem:[#allocation7 + $0x3cc] sm:$0xf0] }
 0x2a8   :  { %3561 = vmatpush.bf16.msra.mxu3 %v8967_v5  ;;  %5193 = vmatpush.bf16.msra.mxu0 %v9531_v39  ;;  %v9258_v5 = vld [vmem:[#allocation7 + $0x200] sm:$0xf]  ;;  %v11249_v39 = vld [vmem:[#allocation7 + $0x1e4] sm:$0xf] }
 0x2a9   :  { %5206 = vmatpush.bf16.msra.mxu1 %v9659_v58  ;;  %v9259_v31 = vor.u32 %v11255_v29, %v9258_v5  ;;  %v9183_v5 = vor.u32 %v11233_v4, %v9180_v26  ;;  %v11197_v29 = vld [vmem:[#allocation7 + $0x44] sm:$0xf] }
 0x2aa   :  { %5165 = vmatpush.bf16.msrb.mxu2 %v9307_v48  ;;  %v11201_v48 = vld [vmem:[#allocation7 + $0x64] sm:$0xf] }
 0x2ac   :  { %v3021_v41 = vpop.f32.mrf.mxu0  ;;  %3562 = vmatpush.bf16.msra.mxu3 %v8935_v35  ;;  %5194 = vmatpush.bf16.msra.mxu0 %v9515_v61  ;;  %v11217_v35 = vld [vmem:[#allocation7 + $0xe4] sm:$0xf] }
 0x2ad   :  { %v3022_v44 = vadd.f32 %v11676_v12, %v3021_v41  ;;  %v3034_v56 = vpop.f32.mrf.mxu1  ;;  %5207 = vmatpush.bf16.msra.mxu1 %v9643_v7  ;;  %v3134_v12 = vperm.slane %v12450_v28, 1  ;;  %v9119_v42 = vor.u32 %v11217_v35, %v9116_v38  ;;  %v9231_v7 = vor.u32 %v11245_v46, %v9228_v2  ;;  %v9020_v38 = vld [vmem:[#allocation7 + $0x30] sm:$0xf0]  ;;  %v11189_v46 = vld [vmem:[#allocation7 + $0x4] sm:$0xf] }
 0x2ae   :  { %5166 = vmatpush.bf16.msrb.mxu2 %v9291_v27  ;;  %v9802_v27 = vld [vmem:[#allocation7 + $0x640] sm:$0xf]  ;;  %v3137_v35 = vperm.slane %v12450_v28, 4  ;;  %v9004_v2 = vld [vmem:[#allocation7 + $0x10] sm:$0xf0] }
 0x2af   :  { %v12446_v54 = vadd.f32 %v3034_v56, %v3022_v44  ;;  %v9247_v44 = vor.u32 %v11249_v39, %v9244_v55  ;;  %v9850_v56 = vld [vmem:[#allocation7 + $0x6a0] sm:$0xf]  ;;  %v9803_v47 = vor.u32 %v11391_v22, %v9802_v27  ;;  %v11383_v39 = vld [vmem:[#allocation7 + $0x60c] sm:$0xf0]  ;;  %v3138_v55 = vperm.slane %v12450_v28, 5 }
 0x2b0   :  { %3563 = vmatpush.bf16.msra.mxu3 %v8903_v59  ;;  %v11213_v59 = vld [vmem:[#allocation7 + $0xc4] sm:$0xf]  ;;  %v9851_v60 = vor.u32 %v11403_v57, %v9850_v56  ;;  %v9007_v24 = vor.u32 %v11189_v46, %v9004_v2  ;;  %v3135_v46 = vperm.slane %v12450_v28, 2 }
 0x2b1   :  { %v9103_v61 = vor.u32 %v11213_v59, %v9100_v50 }
 0x2b2   :  { %5167 = vmatpush.bf16.msrb.mxu2 %v9275_v52 }
 0x2b3   :  { %3516 = vmatmul.bf16.vlgmr.msrb.gmra.mxu3 %v12414_v33 }
 0x2b4   :  { %v3023_v3 = vpop.f32.mrf.mxu0  ;;  %3564 = vmatpush.bf16.msra.mxu3 %v8871_v63  ;;  %v11209_v63 = vld [vmem:[#allocation7 + $0xa4] sm:$0xf] }
 0x2b5   :  { %v3036_v49 = vpop.f32.mrf.mxu1  ;;  %v11399_v3 = vld [vmem:[#allocation7 + $0x68c] sm:$0xf0]  ;;  %v9087_v9 = vor.u32 %v11209_v63, %v9084_v19  ;;  %v9628_v63 = vld [vmem:[#allocation7 + $0x4f0] sm:$0xf0]  ;;  %v9482_v19 = vld [vmem:[#allocation7 + $0x3c0] sm:$0xf] }
 0x2b6   :  { %5168 = vmatpush.bf16.msrb.mxu2 %v9259_v31  ;;  %v11205_v49 = vld [vmem:[#allocation7 + $0x84] sm:$0xf] }
 0x2b7   :  { %v9071_v21 = vor.u32 %v11205_v49, %v9068_v13  ;;  %v11229_v31 = vld [vmem:[#allocation7 + $0x144] sm:$0xf] }
 0x2b8   :  { %3565 = vmatpush.bf16.msra.mxu3 %v8839_v6  ;;  %v9835_v6 = vor.u32 %v11399_v3, %v9834_v53  ;;  %v11377_v53 = vld [vmem:[#allocation7 + $0x5e4] sm:$0xf]  ;;  %v9756_v3 = vld [vmem:[#allocation7 + $0x5f0] sm:$0xf0] }
 0x2b9   :  { %v9759_v16 = vor.u32 %v11377_v53, %v9756_v3  ;;  %v9372_v53 = vld [vmem:[#allocation7 + $0x2f0] sm:$0xf0] }
 0x2ba   :  { %5213 = vmatpush.bf16.msra.mxu2 %v9883_v14 }
 0x2bc   :  { %3566 = vmatpush.bf16.msra.mxu3 %v8807_v17  ;;  %v9818_v17 = vld [vmem:[#allocation7 + $0x660] sm:$0xf] }
 0x2bd   :  { %v9819_v20 = vor.u32 %v11395_v18, %v9818_v17  ;;  %v11341_v17 = vld [vmem:[#allocation7 + $0x4c4] sm:$0xf]  ;;  %v9612_v18 = vld [vmem:[#allocation7 + $0x4d0] sm:$0xf0] }
 0x2be   :  { %v9615_v22 = vor.u32 %v11341_v17, %v9612_v18  ;;  %v11287_v17 = vld [vmem:[#allocation7 + $0x30c] sm:$0xf0] }
 0x2c0   :  { %3567 = vmatpush.bf16.msra.mxu3 %v8775_v23  ;;  %v9052_v23 = vld [vmem:[#allocation7 + $0x70] sm:$0xf0] }
 0x2c1   :  { %v9055_v52 = vor.u32 %v11201_v48, %v9052_v23  ;;  %v9740_v48 = vld [vmem:[#allocation7 + $0x5d0] sm:$0xf0]  ;;  %v11307_v23 = vld [vmem:[#allocation7 + $0x3ac] sm:$0xf0] }
 0x2c3   :  { %3568 = vmatmul.bf16.vlgmr.msra.gmra.mxu3 %v12414_v33  ;;  %v11407_v33 = vld [vmem:[#allocation7 + $0x6cc] sm:$0xf0] }
 0x2c4   :  { %v9867_v40 = vor.u32 %v11407_v33, %v9866_v8  ;;  %v11225_v8 = vld [vmem:[#allocation7 + $0x124] sm:$0xf]  ;;  %v9148_v33 = vld [vmem:[#allocation7 + $0x130] sm:$0xf0] }
 0x2c5   :  { %v9151_v50 = vor.u32 %v11225_v8, %v9148_v33  ;;  %v11365_v8 = vld [vmem:[#allocation7 + $0x584] sm:$0xf]  ;;  %v9708_v33 = vld [vmem:[#allocation7 + $0x590] sm:$0xf0] }
 0x2c6   :  { %5214 = vmatpush.bf16.msra.mxu2 %v9867_v40 }
 0x2ca   :  { %5215 = vmatpush.bf16.msra.mxu2 %v9851_v60  ;;  %v11221_v60 = vld [vmem:[#allocation7 + $0x104] sm:$0xf] }
 0x2cc   :  { %v3478_v25 = vpop.f32.mrf.mxu0 }
 0x2cd   :  { %v3479_v36 = vadd.f32 %v3478_v25, %v3133_v30  ;;  %v3491_v37 = vpop.f32.mrf.mxu1  ;;  %v9036_v30 = vld [vmem:[#allocation7 + $0x50] sm:$0xf0] }
 0x2ce   :  { %v3492_v11 = vadd.f32 %v3491_v37, %v3134_v12  ;;  %5216 = vmatpush.bf16.msra.mxu2 %v9835_v6  ;;  %v11387_v12 = vld [vmem:[#allocation7 + $0x62c] sm:$0xf0]  ;;  %v9039_v25 = vor.u32 %v11197_v29, %v9036_v30  ;;  %v11193_v37 = vld [vmem:[#allocation7 + $0x24] sm:$0xf]  ;;  %v9483_v6 = vor.u32 %v11311_v0, %v9482_v19  ;;  %v9596_v29 = vld [vmem:[#allocation7 + $0x4b0] sm:$0xf0] }
 0x2cf   :  { %v3573_v58 = vmax.f32 %v3479_v36, 0.0  ;;  %v9787_v14 = vor.u32 %v11387_v12, %v9786_v34  ;;  %v9167_v36 = vor.u32 %v11229_v31, %v9164_v32  ;;  %v9450_v30 = vld [vmem:[#allocation7 + $0x380] sm:$0xf]  ;;  %v11303_v31 = vld [vmem:[#allocation7 + $0x38c] sm:$0xf0] }
 0x2d0   :  { %v3574_v41 = vmax.f32 %v3492_v11, 0.0  ;;  %v9770_v11 = vld [vmem:[#allocation7 + $0x600] sm:$0xf]  ;;  %v11369_v32 = vld [vmem:[#allocation7 + $0x5a4] sm:$0xf] }
 0x2d1   :  { %v12455_v43 = vpack.c.bf16 %v3573_v58, %v3573_v58  ;;  %v9771_v40 = vor.u32 %v11383_v39, %v9770_v11  ;;  %v9498_v58 = vld [vmem:[#allocation7 + $0x3e0] sm:$0xf]  ;;  %v9724_v34 = vld [vmem:[#allocation7 + $0x5b0] sm:$0xf0] }
 0x2d2   :  { %v12457_v51 = vpack.c.bf16 %v3574_v41, %v3574_v41  ;;  %5217 = vmatpush.bf16.msra.mxu2 %v9819_v20  ;;  %v11315_v41 = vld [vmem:[#allocation7 + $0x3ec] sm:$0xf0]  ;;  %v9466_v20 = vld [vmem:[#allocation7 + $0x3a0] sm:$0xf]  ;;  %v9676_v19 = vld [vmem:[#allocation7 + $0x550] sm:$0xf0] }
 0x2d3   :  { %5143 = vmatmul.bf16.vlgmr.msrb.gmra.mxu0 %v12455_v43  ;;  %v9467_v26 = vor.u32 %v11307_v23, %v9466_v20  ;;  %v11353_v20 = vld [vmem:[#allocation7 + $0x524] sm:$0xf] }
 0x2d4   :  { %5156 = vmatmul.bf16.vlgmr.msrb.gmra.mxu1 %v12457_v51  ;;  %5239 = vmatpush.bf16.msrb.mxu0 %v9119_v42  ;;  %v3480_v62 = vpop.f32.mrf.mxu0  ;;  %v9023_v42 = vor.u32 %v11193_v37, %v9020_v38  ;;  %v11299_v37 = vld [vmem:[#allocation7 + $0x36c] sm:$0xf0] }
 0x2d5   :  { %5252 = vmatpush.bf16.msrb.mxu1 %v9247_v44  ;;  %v3493_v1 = vpop.f32.mrf.mxu1  ;;  %v9499_v44 = vor.u32 %v11315_v41, %v9498_v58  ;;  %v11345_v62 = vld [vmem:[#allocation7 + $0x4e4] sm:$0xf]  ;;  %v9564_v58 = vld [vmem:[#allocation7 + $0x470] sm:$0xf0]  ;;  %v9418_v41 = vld [vmem:[#allocation7 + $0x340] sm:$0xf] }
 0x2d6   :  { %5218 = vmatpush.bf16.msra.mxu2 %v9803_v47  ;;  %v9631_v13 = vor.u32 %v11345_v62, %v9628_v63  ;;  %v11337_v47 = vld [vmem:[#allocation7 + $0x4a4] sm:$0xf]  ;;  %v11291_v62 = vld [vmem:[#allocation7 + $0x32c] sm:$0xf0] }
 0x2d7   :  { %5174 = vmatpush.bf16.msrb.mxu3 %v9499_v44  ;;  %v9599_v12 = vor.u32 %v11337_v47, %v9596_v29  ;;  %v11361_v44 = vld [vmem:[#allocation7 + $0x564] sm:$0xf] }
 0x2d8   :  { %5240 = vmatpush.bf16.msrb.mxu0 %v9103_v61  ;;  %v9132_v61 = vld [vmem:[#allocation7 + $0x110] sm:$0xf0]  ;;  %v11357_v63 = vld [vmem:[#allocation7 + $0x544] sm:$0xf] }
 0x2d9   :  { %5253 = vmatpush.bf16.msrb.mxu1 %v9231_v7  ;;  %v11349_v29 = vld [vmem:[#allocation7 + $0x504] sm:$0xf] }
 0x2da   :  { %5219 = vmatpush.bf16.msra.mxu2 %v9787_v14  ;;  %v11333_v14 = vld [vmem:[#allocation7 + $0x484] sm:$0xf] }
 0x2db   :  { %5175 = vmatpush.bf16.msrb.mxu3 %v9483_v6  ;;  %v11321_v6 = vld [vmem:[#allocation7 + $0x424] sm:$0xf] }
 0x2dc   :  { %5241 = vmatpush.bf16.msrb.mxu0 %v9087_v9 }
 0x2dd   :  { %5254 = vmatpush.bf16.msrb.mxu1 %v9215_v10  ;;  %v9135_v10 = vor.u32 %v11221_v60, %v9132_v61  ;;  %v9548_v60 = vld [vmem:[#allocation7 + $0x450] sm:$0xf0]  ;;  %v9402_v61 = vld [vmem:[#allocation7 + $0x320] sm:$0xf] }
 0x2de   :  { %5220 = vmatpush.bf16.msra.mxu2 %v9771_v40  ;;  %v9711_v40 = vor.u32 %v11365_v8, %v9708_v33  ;;  %v9403_v0 = vor.u32 %v11291_v62, %v9402_v61  ;;  %v9340_v8 = vld [vmem:[#allocation7 + $0x2b0] sm:$0xf0]  ;;  %v9090_v62 = vld [vmem:[#allocation7 + $0xa8] sm:$0xf] }
 0x2df   :  { %5176 = vmatpush.bf16.msrb.mxu3 %v9467_v26  ;;  %v11277_v26 = vld [vmem:[#allocation7 + $0x2c4] sm:$0xf] }
 0x2e0   :  { %5242 = vmatpush.bf16.msrb.mxu0 %v9071_v21 }
 0x2e1   :  { %5255 = vmatpush.bf16.msrb.mxu1 %v9199_v45  ;;  %v11373_v45 = vld [vmem:[#allocation7 + $0x5c4] sm:$0xf] }
 0x2e4   :  { %5243 = vmatpush.bf16.msrb.mxu0 %v9055_v52 }
 0x2e5   :  { %5256 = vmatpush.bf16.msrb.mxu1 %v9183_v5  ;;  %v9743_v5 = vor.u32 %v11373_v45, %v9740_v48  ;;  %v10010_v48 = vld [vmem:[#allocation7 + $0x7e0] sm:$0xf] }
 0x2e6   :  { %v3047_v21 = vpop.f32.mrf.mxu2 }
 0x2e7   :  { %v12468_v4 = vadd.f32 %v3047_v21, %v12446_v54  ;;  %v9451_v54 = vor.u32 %v11303_v31, %v9450_v30  ;;  %v9660_v21 = vld [vmem:[#allocation7 + $0x530] sm:$0xf0] }
 0x2e8   :  { %5244 = vmatpush.bf16.msrb.mxu0 %v9039_v25  ;;  %v9727_v25 = vor.u32 %v11369_v32, %v9724_v34  ;;  %v9663_v31 = vor.u32 %v11353_v20, %v9660_v21  ;;  %v9644_v32 = vld [vmem:[#allocation7 + $0x510] sm:$0xf0]  ;;  %v9122_v34 = vld [vmem:[#allocation7 + $0xe8] sm:$0xf] }
 0x2e9   :  { %5257 = vmatpush.bf16.msrb.mxu1 %v9167_v36  ;;  %5177 = vmatpush.bf16.msrb.mxu3 %v9451_v54  ;;  %v9434_v36 = vld [vmem:[#allocation7 + $0x360] sm:$0xf]  ;;  %v11220_v54 = vld [vmem:[#allocation7 + $0xf4] sm:$0xf0] }
 0x2ea   :  { %v9435_v11 = vor.u32 %v11299_v37, %v9434_v36  ;;  %v11439_v36 = vld [vmem:[#allocation7 + $0x7cc] sm:$0xf0]  ;;  %v11252_v37 = vld [vmem:[#allocation7 + $0x1f4] sm:$0xf0] }
 0x2ec   :  { %v3530_v59 = vpop.f32.mrf.mxu0  ;;  %5245 = vmatpush.bf16.msrb.mxu0 %v9023_v42  ;;  %v11295_v42 = vld [vmem:[#allocation7 + $0x34c] sm:$0xf0] }
 0x2ed   :  { %v3531_v56 = vadd.f32 %v3530_v59, %v3137_v35  ;;  %v3543_v57 = vpop.f32.mrf.mxu1  ;;  %5258 = vmatpush.bf16.msrb.mxu1 %v9151_v50  ;;  %v9580_v35 = vld [vmem:[#allocation7 + $0x490] sm:$0xf0]  ;;  %5178 = vmatpush.bf16.msrb.mxu3 %v9435_v11  ;;  %v9419_v50 = vor.u32 %v11295_v42, %v9418_v41  ;;  %v9234_v41 = vld [vmem:[#allocation7 + $0x1c8] sm:$0xf] }
 0x2ee   :  { %v3544_v7 = vadd.f32 %v3543_v57, %v3138_v55  ;;  %v3049_v38 = vpop.f32.mrf.mxu2  ;;  %v9583_v39 = vor.u32 %v11333_v14, %v9580_v35  ;;  %v11329_v55 = vld [vmem:[#allocation7 + $0x464] sm:$0xf]  ;;  %v9692_v59 = vld [vmem:[#allocation7 + $0x570] sm:$0xf0]  ;;  %v9250_v14 = vld [vmem:[#allocation7 + $0x1e8] sm:$0xf] }
 0x2ef   :  { %v3577_v1 = vmax.f32 %v3531_v56, 0.0  ;;  %v9567_v2 = vor.u32 %v11329_v55, %v9564_v58  ;;  %v11325_v56 = vld [vmem:[#allocation7 + $0x444] sm:$0xf]  ;;  %v9695_v57 = vor.u32 %v11361_v44, %v9692_v59  ;;  %v9994_v35 = vld [vmem:[#allocation7 + $0x7c0] sm:$0xf]  ;;  %v9123_v55 = vor.u32 %v11220_v54, %v9122_v34 }
 0x2f0   :  { %v3578_v9 = vmax.f32 %v3544_v7, 0.0  ;;  %5246 = vmatpush.bf16.msrb.mxu0 %v9007_v24  ;;  %v11281_v24 = vld [vmem:[#allocation7 + $0x2e4] sm:$0xf]  ;;  %v9551_v3 = vor.u32 %v11325_v56, %v9548_v60  ;;  %v9995_v33 = vor.u32 %v11439_v36, %v9994_v35  ;;  %v11216_v58 = vld [vmem:[#allocation7 + $0xd4] sm:$0xf0]  ;;  %v9251_v42 = vor.u32 %v11252_v37, %v9250_v14 }
 0x2f1   :  { %v12463_v49 = vpack.c.bf16 %v3577_v1, %v3577_v1  ;;  %5259 = vmatpush.bf16.msrb.mxu1 %v9135_v10  ;;  %5179 = vmatpush.bf16.msrb.mxu3 %v9419_v50  ;;  %v9375_v18 = vor.u32 %v11281_v24, %v9372_v53  ;;  %v11273_v38 = vld [vmem:[#allocation7 + $0x2a4] sm:$0xf]  ;;  %v11248_v59 = vld [vmem:[#allocation7 + $0x1d4] sm:$0xf0]  ;;  %v9978_v50 = vld [vmem:[#allocation7 + $0x7a0] sm:$0xf] }
 0x2f2   :  { %v12465_v15 = vpack.c.bf16 %v3578_v9, %v3578_v9  ;;  %v9532_v9 = vld [vmem:[#allocation7 + $0x430] sm:$0xf0]  ;;  %v9343_v44 = vor.u32 %v11273_v38, %v9340_v8  ;;  %v9962_v24 = vld [vmem:[#allocation7 + $0x780] sm:$0xf]  ;;  %v11431_v53 = vld [vmem:[#allocation7 + $0x78c] sm:$0xf0] }
 0x2f3   :  { %5195 = vmatmul.bf16.vlgmr.msra.gmra.mxu0 %v12463_v49  ;;  %v9535_v47 = vor.u32 %v11321_v6, %v9532_v9  ;;  %v9324_v56 = vld [vmem:[#allocation7 + $0x290] sm:$0xf0]  ;;  %v11265_v6 = vld [vmem:[#allocation7 + $0x264] sm:$0xf]  ;;  %v9930_v14 = vld [vmem:[#allocation7 + $0x740] sm:$0xf] }
 0x2f4   :  { %v3532_v27 = vpop.f32.mrf.mxu0  ;;  %5208 = vmatmul.bf16.vlgmr.msra.gmra.mxu1 %v12465_v15  ;;  %5291 = vmatpush.bf16.msra.mxu0 %v9631_v13  ;;  %v9679_v13 = vor.u32 %v11357_v63, %v9676_v19  ;;  %v9235_v63 = vor.u32 %v11248_v59, %v9234_v41  ;;  %v9308_v9 = vld [vmem:[#allocation7 + $0x270] sm:$0xf0]  ;;  %v11236_v36 = vld [vmem:[#allocation7 + $0x174] sm:$0xf0]  ;;  %v11257_v37 = vld [vmem:[#allocation7 + $0x224] sm:$0xf] }
 0x2f5   :  { %v3545_v52 = vpop.f32.mrf.mxu1  ;;  %5304 = vmatpush.bf16.msra.mxu1 %v9759_v16  ;;  %5180 = vmatpush.bf16.msrb.mxu3 %v9403_v0  ;;  %v9386_v16 = vld [vmem:[#allocation7 + $0x300] sm:$0xf]  ;;  %v9356_v27 = vld [vmem:[#allocation7 + $0x2d0] sm:$0xf0]  ;;  %v9218_v0 = vld [vmem:[#allocation7 + $0x1a8] sm:$0xf] }
 0x2f6   :  { %v3504_v7 = vpop.f32.mrf.mxu2  ;;  %v9387_v45 = vor.u32 %v11287_v17, %v9386_v16  ;;  %v11317_v52 = vld [vmem:[#allocation7 + $0x404] sm:$0xf]  ;;  %v9074_v17 = vld [vmem:[#allocation7 + $0x88] sm:$0xf]  ;;  %v9276_v38 = vld [vmem:[#allocation7 + $0x230] sm:$0xf0] }
 0x2f7   :  { %v3505_v1 = vadd.f32 %v3504_v7, %v3135_v46  ;;  %v11435_v46 = vld [vmem:[#allocation7 + $0x7ac] sm:$0xf0]  ;;  %v11212_v7 = vld [vmem:[#allocation7 + $0xb4] sm:$0xf0]  ;;  %v9914_v41 = vld [vmem:[#allocation7 + $0x720] sm:$0xf] }
 0x2f8   :  { %5292 = vmatpush.bf16.msra.mxu0 %v9615_v22  ;;  %v11443_v22 = vld [vmem:[#allocation7 + $0x7ec] sm:$0xf0]  ;;  %v9979_v60 = vor.u32 %v11435_v46, %v9978_v50  ;;  %v9091_v16 = vor.u32 %v11212_v7, %v9090_v62  ;;  %v11253_v59 = vld [vmem:[#allocation7 + $0x204] sm:$0xf]  ;;  %v9260_v50 = vld [vmem:[#allocation7 + $0x210] sm:$0xf0] }
 0x2f9   :  { %5305 = vmatpush.bf16.msra.mxu1 %v9743_v5  ;;  %v3575_v10 = vmax.f32 %v3505_v1, 0.0  ;;  %v9516_v5 = vld [vmem:[#allocation7 + $0x410] sm:$0xf0]  ;;  %v10011_v30 = vor.u32 %v11443_v22, %v10010_v48  ;;  %5181 = vmatpush.bf16.msrb.mxu3 %v9387_v45  ;;  %v9311_v45 = vor.u32 %v11265_v6, %v9308_v9  ;;  %v9202_v48 = vld [vmem:[#allocation7 + $0x188] sm:$0xf]  ;;  %v9263_v62 = vor.u32 %v11253_v59, %v9260_v50 }
 0x2fa   :  { %v9519_v11 = vor.u32 %v11317_v52, %v9516_v5  ;;  %v11240_v22 = vld [vmem:[#allocation7 + $0x194] sm:$0xf0]  ;;  %v9292_v52 = vld [vmem:[#allocation7 + $0x250] sm:$0xf0]  ;;  %v9714_v50 = vld [vmem:[#allocation7 + $0x588] sm:$0xf] }
 0x2fb   :  { %v12475_v23 = vpack.c.bf16 %v3575_v10, %v3575_v10  ;;  %v9203_v34 = vor.u32 %v11240_v22, %v9202_v48  ;;  %v11196_v7 = vld [vmem:[#allocation7 + $0x34] sm:$0xf0]  ;;  %v9868_v6 = vld [vmem:[#allocation7 + $0x6d0] sm:$0xf0]  ;;  %v9762_v48 = vld [vmem:[#allocation7 + $0x5e8] sm:$0xf] }
 0x2fc   :  { %5293 = vmatpush.bf16.msra.mxu0 %v9599_v12  ;;  %v9359_v12 = vor.u32 %v11277_v26, %v9356_v27  ;;  %v9946_v26 = vld [vmem:[#allocation7 + $0x760] sm:$0xf]  ;;  %v11427_v27 = vld [vmem:[#allocation7 + $0x76c] sm:$0xf0]  ;;  %v9852_v22 = vld [vmem:[#allocation7 + $0x6b0] sm:$0xf0] }
 0x2fd   :  { %5306 = vmatpush.bf16.msra.mxu1 %v9727_v25  ;;  %5169 = vmatmul.bf16.vlgmr.msrb.gmra.mxu2 %v12475_v23  ;;  %v11336_v59 = vld [vmem:[#allocation7 + $0x494] sm:$0xf0] }
 0x2fe   :  { %5265 = vmatpush.bf16.msrb.mxu2 %v9375_v18  ;;  %v3506_v25 = vpop.f32.mrf.mxu2  ;;  %5226 = vmatpush.bf16.msra.mxu3 %v10011_v30  ;;  %v11208_v18 = vld [vmem:[#allocation7 + $0x94] sm:$0xf0] }
 0x2ff   :  { %v9075_v30 = vor.u32 %v11208_v18, %v9074_v17  ;;  %v11423_v25 = vld [vmem:[#allocation7 + $0x74c] sm:$0xf0]  ;;  %v9138_v17 = vld [vmem:[#allocation7 + $0x108] sm:$0xf]  ;;  %v11224_v18 = vld [vmem:[#allocation7 + $0x114] sm:$0xf0] }
 0x300   :  { %5294 = vmatpush.bf16.msra.mxu0 %v9583_v39  ;;  %v9647_v39 = vor.u32 %v11349_v29, %v9644_v32  ;;  %v9947_v29 = vor.u32 %v11427_v27, %v9946_v26  ;;  %v11204_v32 = vld [vmem:[#allocation7 + $0x74] sm:$0xf0]  ;;  %v9931_v8 = vor.u32 %v11423_v25, %v9930_v14  ;;  %v11401_v27 = vld [vmem:[#allocation7 + $0x6a4] sm:$0xf] }
 0x301   :  { %5307 = vmatpush.bf16.msra.mxu1 %v9711_v40  ;;  %v9106_v40 = vld [vmem:[#allocation7 + $0xc8] sm:$0xf]  ;;  %v11380_v26 = vld [vmem:[#allocation7 + $0x5f4] sm:$0xf0]  ;;  %v11397_v25 = vld [vmem:[#allocation7 + $0x684] sm:$0xf] }
 0x302   :  { %5266 = vmatpush.bf16.msrb.mxu2 %v9359_v12  ;;  %5227 = vmatpush.bf16.msra.mxu3 %v9995_v33  ;;  %v9107_v61 = vor.u32 %v11216_v58, %v9106_v40  ;;  %v9186_v12 = vld [vmem:[#allocation7 + $0x168] sm:$0xf]  ;;  %v9279_v40 = vor.u32 %v11257_v37, %v9276_v38  ;;  %v11376_v14 = vld [vmem:[#allocation7 + $0x5d4] sm:$0xf0] }
 0x303   :  { %5247 = vmatmul.bf16.vlgmr.msrb.gmra.mxu0 %v12455_v43  ;;  %v9170_v58 = vld [vmem:[#allocation7 + $0x148] sm:$0xf] }
 0x304   :  { %5295 = vmatpush.bf16.msra.mxu0 %v9567_v2  ;;  %5260 = vmatmul.bf16.vlgmr.msrb.gmra.mxu1 %v12457_v51  ;;  %v11269_v2 = vld [vmem:[#allocation7 + $0x284] sm:$0xf] }
 0x305   :  { %5308 = vmatpush.bf16.msra.mxu1 %v9695_v57  ;;  %v3139_v57 = vperm.slane %v12450_v28, 6  ;;  %v9327_v19 = vor.u32 %v11269_v2, %v9324_v56  ;;  %v11409_v2 = vld [vmem:[#allocation7 + $0x6e4] sm:$0xf]  ;;  %v9884_v56 = vld [vmem:[#allocation7 + $0x6f0] sm:$0xf0] }
 0x306   :  { %5267 = vmatpush.bf16.msrb.mxu2 %v9343_v44  ;;  %5228 = vmatpush.bf16.msra.mxu3 %v9979_v60  ;;  %v11232_v44 = vld [vmem:[#allocation7 + $0x154] sm:$0xf0]  ;;  %v9026_v60 = vld [vmem:[#allocation7 + $0x28] sm:$0xf] }
 0x307   :  { %v3556_v1 = vpop.f32.mrf.mxu2  ;;  %v9027_v9 = vor.u32 %v11196_v7, %v9026_v60  ;;  %v9570_v7 = vld [vmem:[#allocation7 + $0x468] sm:$0xf] }
 0x308   :  { %5296 = vmatpush.bf16.msra.mxu0 %v9551_v3  ;;  %v11244_v3 = vld [vmem:[#allocation7 + $0x1b4] sm:$0xf0]  ;;  %v3557_v10 = vadd.f32 %v3556_v1, %v3139_v57  ;;  %v9154_v1 = vld [vmem:[#allocation7 + $0x128] sm:$0xf] }
 0x309   :  { %5309 = vmatpush.bf16.msra.mxu1 %v9679_v13  ;;  %v9963_v13 = vor.u32 %v11431_v53, %v9962_v24  ;;  %v9219_v21 = vor.u32 %v11244_v3, %v9218_v0  ;;  %v9887_v0 = vor.u32 %v11409_v2, %v9884_v56  ;;  %v11228_v24 = vld [vmem:[#allocation7 + $0x134] sm:$0xf0]  ;;  %v11405_v3 = vld [vmem:[#allocation7 + $0x6c4] sm:$0xf] }
 0x30a   :  { %v3579_v20 = vmax.f32 %v3557_v10, 0.0  ;;  %5268 = vmatpush.bf16.msrb.mxu2 %v9327_v19  ;;  %v11415_v19 = vld [vmem:[#allocation7 + $0x70c] sm:$0xf0]  ;;  %v9010_v10 = vld [vmem:[#allocation7 + $0x8] sm:$0xf] }
 0x30b   :  { %5229 = vmatpush.bf16.msra.mxu3 %v9963_v13  ;;  %v9155_v13 = vor.u32 %v11228_v24, %v9154_v1  ;;  %v11368_v2 = vld [vmem:[#allocation7 + $0x594] sm:$0xf0]  ;;  %v11389_v56 = vld [vmem:[#allocation7 + $0x644] sm:$0xf]  ;;  %v9788_v24 = vld [vmem:[#allocation7 + $0x630] sm:$0xf0] }
 0x30c   :  { %5297 = vmatpush.bf16.msra.mxu0 %v9535_v47  ;;  %v11261_v47 = vld [vmem:[#allocation7 + $0x244] sm:$0xf]  ;;  %v12481_v5 = vpack.c.bf16 %v3579_v20, %v3579_v20  ;;  %v9871_v20 = vor.u32 %v11405_v3, %v9868_v6 }
 0x30d   :  { %5310 = vmatpush.bf16.msra.mxu1 %v9663_v31  ;;  %v9058_v31 = vld [vmem:[#allocation7 + $0x68] sm:$0xf]  ;;  %v9295_v54 = vor.u32 %v11261_v47, %v9292_v52  ;;  %v9139_v52 = vor.u32 %v11224_v18, %v9138_v17  ;;  %v11385_v1 = vld [vmem:[#allocation7 + $0x624] sm:$0xf]  ;;  %v11360_v18 = vld [vmem:[#allocation7 + $0x554] sm:$0xf0] }
 0x30e   :  { %5221 = vmatmul.bf16.vlgmr.msra.gmra.mxu2 %v12481_v5  ;;  %v9059_v33 = vor.u32 %v11204_v32, %v9058_v31  ;;  %v9855_v31 = vor.u32 %v11401_v27, %v9852_v22  ;;  %v9618_v32 = vld [vmem:[#allocation7 + $0x4c8] sm:$0xf]  ;;  %v11313_v22 = vld [vmem:[#allocation7 + $0x3e4] sm:$0xf] }
 0x30f   :  { %5269 = vmatpush.bf16.msrb.mxu2 %v9311_v45  ;;  %v3558_v35 = vpop.f32.mrf.mxu2  ;;  %5230 = vmatpush.bf16.msra.mxu3 %v9947_v29  ;;  %v11348_v45 = vld [vmem:[#allocation7 + $0x4f4] sm:$0xf0] }
 0x310   :  { %5298 = vmatpush.bf16.msra.mxu0 %v9519_v11  ;;  %v9042_v11 = vld [vmem:[#allocation7 + $0x48] sm:$0xf]  ;;  %v9836_v35 = vld [vmem:[#allocation7 + $0x690] sm:$0xf0] }
 0x311   :  { %5311 = vmatpush.bf16.msra.mxu1 %v9647_v39  ;;  %v11200_v39 = vld [vmem:[#allocation7 + $0x54] sm:$0xf0] }
 0x312   :  { %v9043_v57 = vor.u32 %v11200_v39, %v9042_v11  ;;  %v11340_v11 = vld [vmem:[#allocation7 + $0x4b4] sm:$0xf0]  ;;  %v9730_v39 = vld [vmem:[#allocation7 + $0x5a8] sm:$0xf] }
 0x313   :  { %5299 = vmatmul.bf16.vlgmr.msra.gmra.mxu0 %v12463_v49  ;;  %5270 = vmatpush.bf16.msrb.mxu2 %v9295_v54  ;;  %v9746_v54 = vld [vmem:[#allocation7 + $0x5c8] sm:$0xf] }
 0x314   :  { %5343 = vmatpush.bf16.msrb.mxu0 %v9123_v55  ;;  %5312 = vmatmul.bf16.vlgmr.msra.gmra.mxu1 %v12465_v15  ;;  %v9187_v55 = vor.u32 %v11236_v36, %v9186_v12  ;;  %v9747_v38 = vor.u32 %v11376_v14, %v9746_v54  ;;  %v9666_v54 = vld [vmem:[#allocation7 + $0x528] sm:$0xf] }
 0x315   :  { %5356 = vmatpush.bf16.msrb.mxu1 %v9251_v42  ;;  %v11419_v42 = vld [vmem:[#allocation7 + $0x72c] sm:$0xf0]  ;;  %5231 = vmatpush.bf16.msra.mxu3 %v9931_v8  ;;  %v9839_v8 = vor.u32 %v11397_v25, %v9836_v35  ;;  %v9362_v35 = vld [vmem:[#allocation7 + $0x2c8] sm:$0xf] }
 0x316   :  { %v9915_v46 = vor.u32 %v11419_v42, %v9914_v41 }
 0x317   :  { %5271 = vmatpush.bf16.msrb.mxu2 %v9279_v40  ;;  %v11393_v40 = vld [vmem:[#allocation7 + $0x664] sm:$0xf] }
 0x318   :  { %5344 = vmatpush.bf16.msrb.mxu0 %v9107_v61  ;;  %v9171_v61 = vor.u32 %v11232_v44, %v9170_v58  ;;  %v9820_v58 = vld [vmem:[#allocation7 + $0x670] sm:$0xf0]  ;;  %v9586_v44 = vld [vmem:[#allocation7 + $0x488] sm:$0xf] }
 0x319   :  { %5357 = vmatpush.bf16.msrb.mxu1 %v9235_v63  ;;  %v9898_v63 = vld [vmem:[#allocation7 + $0x700] sm:$0xf]  ;;  %5232 = vmatpush.bf16.msra.mxu3 %v9915_v46  ;;  %v9823_v42 = vor.u32 %v11393_v40, %v9820_v58  ;;  %v9587_v60 = vor.u32 %v11336_v59, %v9586_v44  ;;  %v9650_v40 = vld [vmem:[#allocation7 + $0x508] sm:$0xf]  ;;  %v11352_v58 = vld [vmem:[#allocation7 + $0x514] sm:$0xf0] }
 0x31a   :  { %v9899_v53 = vor.u32 %v11415_v19, %v9898_v63  ;;  %v11332_v63 = vld [vmem:[#allocation7 + $0x474] sm:$0xf0]  ;;  %v9698_v19 = vld [vmem:[#allocation7 + $0x568] sm:$0xf]  ;;  %v9124_v44 = vld [vmem:[#allocation7 + $0xf8] sm:$0xf0] }
 0x31b   :  { %5272 = vmatpush.bf16.msrb.mxu2 %v9263_v62  ;;  %v9571_v3 = vor.u32 %v11332_v63, %v9570_v7  ;;  %v11250_v59 = vld [vmem:[#allocation7 + $0x1ec] sm:$0xf]  ;;  %v3140_v63 = vperm.slane %v12450_v28, 7 }
 0x31c   :  { %5345 = vmatpush.bf16.msrb.mxu0 %v9091_v16  ;;  %v11192_v16 = vld [vmem:[#allocation7 + $0x14] sm:$0xf0] }
 0x31d   :  { %5358 = vmatpush.bf16.msrb.mxu1 %v9219_v21  ;;  %v9634_v21 = vld [vmem:[#allocation7 + $0x4e8] sm:$0xf]  ;;  %5233 = vmatpush.bf16.msra.mxu3 %v9899_v53  ;;  %v9011_v47 = vor.u32 %v11192_v16, %v9010_v10  ;;  %v3136_v53 = vperm.slane %v12450_v28, 3 }
 0x31e   :  { %5273 = vmatmul.bf16.vlgmr.msrb.gmra.mxu2 %v12475_v23  ;;  %v9635_v29 = vor.u32 %v11348_v45, %v9634_v21  ;;  %v9554_v10 = vld [vmem:[#allocation7 + $0x448] sm:$0xf]  ;;  %v9772_v21 = vld [vmem:[#allocation7 + $0x610] sm:$0xf0] }
 0x31f   :  { %5317 = vmatpush.bf16.msra.mxu2 %v9887_v0  ;;  %v11364_v0 = vld [vmem:[#allocation7 + $0x574] sm:$0xf0]  ;;  %v9682_v16 = vld [vmem:[#allocation7 + $0x548] sm:$0xf] }
 0x320   :  { %5346 = vmatpush.bf16.msrb.mxu0 %v9075_v30  ;;  %v9763_v30 = vor.u32 %v11380_v26, %v9762_v48  ;;  %v9699_v6 = vor.u32 %v11364_v0, %v9698_v19  ;;  %v9378_v48 = vld [vmem:[#allocation7 + $0x2e8] sm:$0xf]  ;;  %v11284_v26 = vld [vmem:[#allocation7 + $0x2f4] sm:$0xf0] }
 0x321   :  { %5359 = vmatpush.bf16.msrb.mxu1 %v9203_v34  ;;  %v11344_v34 = vld [vmem:[#allocation7 + $0x4d4] sm:$0xf0] }
 0x322   :  { %v9619_v37 = vor.u32 %v11344_v34, %v9618_v32  ;;  %v11324_v32 = vld [vmem:[#allocation7 + $0x434] sm:$0xf0]  ;;  %v9379_v34 = vor.u32 %v11284_v26, %v9378_v48 }
 0x323   :  { %5318 = vmatpush.bf16.msra.mxu2 %v9871_v20  ;;  %v11381_v20 = vld [vmem:[#allocation7 + $0x604] sm:$0xf] }
 0x324   :  { %5347 = vmatpush.bf16.msrb.mxu0 %v9059_v33  ;;  %v9602_v33 = vld [vmem:[#allocation7 + $0x4a8] sm:$0xf] }
 0x325   :  { %5360 = vmatpush.bf16.msrb.mxu1 %v9187_v55  ;;  %v11372_v55 = vld [vmem:[#allocation7 + $0x5b4] sm:$0xf0] }
 0x326   :  { %v3060_v12 = vpop.f32.mrf.mxu3  ;;  %v9731_v41 = vor.u32 %v11372_v55, %v9730_v39  ;;  %v11320_v55 = vld [vmem:[#allocation7 + $0x414] sm:$0xf0] }
 0x327   :  { %v12486_v36 = vadd.f32 %v3060_v12, %v12468_v4  ;;  %5319 = vmatpush.bf16.msra.mxu2 %v9855_v31  ;;  %v9603_v4 = vor.u32 %v11340_v11, %v9602_v33  ;;  %v9538_v31 = vld [vmem:[#allocation7 + $0x428] sm:$0xf]  ;;  %v11356_v12 = vld [vmem:[#allocation7 + $0x534] sm:$0xf0]  ;;  %v9484_v33 = vld [vmem:[#allocation7 + $0x3d0] sm:$0xf0] }
 0x328   :  { %5348 = vmatpush.bf16.msrb.mxu0 %v9043_v57  ;;  %v9804_v57 = vld [vmem:[#allocation7 + $0x650] sm:$0xf0]  ;;  %v9522_v11 = vld [vmem:[#allocation7 + $0x408] sm:$0xf]  ;;  %v9667_v39 = vor.u32 %v11356_v12, %v9666_v54  ;;  %v11206_v54 = vld [vmem:[#allocation7 + $0x8c] sm:$0xf] }
 0x329   :  { %5361 = vmatpush.bf16.msrb.mxu1 %v9171_v61  ;;  %v9715_v61 = vor.u32 %v11368_v2, %v9714_v50  ;;  %v9807_v62 = vor.u32 %v11389_v56, %v9804_v57  ;;  %v9346_v2 = vld [vmem:[#allocation7 + $0x2a8] sm:$0xf]  ;;  %v11276_v56 = vld [vmem:[#allocation7 + $0x2b4] sm:$0xf0]  ;;  %v9523_v57 = vor.u32 %v11320_v55, %v9522_v11  ;;  %v9076_v12 = vld [vmem:[#allocation7 + $0x98] sm:$0xf0] }
 0x32a   :  { %v9347_v0 = vor.u32 %v11276_v56, %v9346_v2  ;;  %v9420_v11 = vld [vmem:[#allocation7 + $0x350] sm:$0xf0]  ;;  %v11264_v55 = vld [vmem:[#allocation7 + $0x254] sm:$0xf0]  ;;  %v11289_v2 = vld [vmem:[#allocation7 + $0x324] sm:$0xf] }
 0x32b   :  { %5320 = vmatpush.bf16.msra.mxu2 %v9839_v8  ;;  %v11309_v8 = vld [vmem:[#allocation7 + $0x3c4] sm:$0xf]  ;;  %v9404_v56 = vld [vmem:[#allocation7 + $0x330] sm:$0xf0] }
 0x32c   :  { %5349 = vmatpush.bf16.msrb.mxu0 %v9027_v9  ;;  %v9791_v9 = vor.u32 %v11385_v1, %v9788_v24  ;;  %v9487_v50 = vor.u32 %v11309_v8, %v9484_v33  ;;  %v11214_v1 = vld [vmem:[#allocation7 + $0xcc] sm:$0xf]  ;;  %v9108_v24 = vld [vmem:[#allocation7 + $0xd8] sm:$0xf0]  ;;  %v11293_v33 = vld [vmem:[#allocation7 + $0x344] sm:$0xf] }
 0x32d   :  { %5362 = vmatpush.bf16.msrb.mxu1 %v9155_v13  ;;  %v11328_v13 = vld [vmem:[#allocation7 + $0x454] sm:$0xf0]  ;;  %v9204_v8 = vld [vmem:[#allocation7 + $0x198] sm:$0xf0] }
 0x32e   :  { %v3062_v46 = vpop.f32.mrf.mxu3  ;;  %v9555_v27 = vor.u32 %v11328_v13, %v9554_v10  ;;  %v11272_v10 = vld [vmem:[#allocation7 + $0x294] sm:$0xf0]  ;;  %v11301_v13 = vld [vmem:[#allocation7 + $0x384] sm:$0xf] }
 0x32f   :  { %5321 = vmatpush.bf16.msra.mxu2 %v9823_v42  ;;  %v11218_v42 = vld [vmem:[#allocation7 + $0xec] sm:$0xf]  ;;  %v9252_v46 = vld [vmem:[#allocation7 + $0x1f8] sm:$0xf0] }
 0x330   :  { %5350 = vmatpush.bf16.msrb.mxu0 %v9011_v47  ;;  %v9500_v47 = vld [vmem:[#allocation7 + $0x3f0] sm:$0xf0]  ;;  %v9127_v7 = vor.u32 %v11218_v42, %v9124_v44  ;;  %v9255_v19 = vor.u32 %v11250_v59, %v9252_v46  ;;  %v9060_v42 = vld [vmem:[#allocation7 + $0x78] sm:$0xf0]  ;;  %v9423_v44 = vor.u32 %v11293_v33, %v9420_v11  ;;  %v11190_v33 = vld [vmem:[#allocation7 + $0xc] sm:$0xf] }
 0x331   :  { %5363 = vmatpush.bf16.msrb.mxu1 %v9139_v52  ;;  %v9503_v25 = vor.u32 %v11313_v22, %v9500_v47  ;;  %v9220_v22 = vld [vmem:[#allocation7 + $0x1b8] sm:$0xf0]  ;;  %v11297_v47 = vld [vmem:[#allocation7 + $0x364] sm:$0xf] }
 0x332   :  { %v9188_v46 = vld [vmem:[#allocation7 + $0x178] sm:$0xf0] }
 0x333   :  { %5351 = vmatmul.bf16.vlgmr.msrb.gmra.mxu0 %v12455_v43  ;;  %5322 = vmatpush.bf16.msra.mxu2 %v9807_v62  ;;  %v9651_v62 = vor.u32 %v11352_v58, %v9650_v40  ;;  %v9079_v40 = vor.u32 %v11206_v54, %v9076_v12  ;;  %v9012_v11 = vld [vmem:[#allocation7 + $0x18] sm:$0xf0] }
 0x334   :  { %5395 = vmatpush.bf16.msra.mxu0 %v9635_v29  ;;  %5364 = vmatmul.bf16.vlgmr.msrb.gmra.mxu1 %v12457_v51  ;;  %v9683_v29 = vor.u32 %v11360_v18, %v9682_v16  ;;  %v9452_v16 = vld [vmem:[#allocation7 + $0x390] sm:$0xf0] }
 0x335   :  { %5408 = vmatpush.bf16.msra.mxu1 %v9763_v30  ;;  %v9775_v30 = vor.u32 %v11381_v20, %v9772_v21  ;;  %v11210_v21 = vld [vmem:[#allocation7 + $0xac] sm:$0xf]  ;;  %v9455_v26 = vor.u32 %v11301_v13, %v9452_v16  ;;  %v11256_v13 = vld [vmem:[#allocation7 + $0x214] sm:$0xf0]  ;;  %v11441_v16 = vld [vmem:[#allocation7 + $0x7e4] sm:$0xf] }
 0x336   :  { %v3517_v17 = vpop.f32.mrf.mxu3 }
 0x337   :  { %v3518_v45 = vadd.f32 %v3517_v17, %v3136_v53  ;;  %5323 = vmatpush.bf16.msra.mxu2 %v9791_v9  ;;  %v11246_v53 = vld [vmem:[#allocation7 + $0x1cc] sm:$0xf]  ;;  %v9330_v9 = vld [vmem:[#allocation7 + $0x288] sm:$0xf]  ;;  %v9111_v17 = vor.u32 %v11214_v1, %v9108_v24  ;;  %v11285_v1 = vld [vmem:[#allocation7 + $0x304] sm:$0xf]  ;;  %v9407_v24 = vor.u32 %v11289_v2, %v9404_v56  ;;  %v9015_v2 = vor.u32 %v11190_v33, %v9012_v11 }
 0x338   :  { %5396 = vmatpush.bf16.msra.mxu0 %v9619_v37  ;;  %v11280_v37 = vld [vmem:[#allocation7 + $0x2d4] sm:$0xf0]  ;;  %v9331_v20 = vor.u32 %v11272_v10, %v9330_v9  ;;  %v12502_v9 = vld [vmem:[%s12747_s13] sm:$0xf]  ;;  %v9980_v56 = vld [vmem:[#allocation7 + $0x7b0] sm:$0xf0] }
 0x339   :  { %5409 = vmatpush.bf16.msra.mxu1 %v9747_v38  ;;  %v3576_v52 = vmax.f32 %v3518_v45, 0.0  ;;  %v9539_v38 = vor.u32 %v11324_v32, %v9538_v31  ;;  %v9092_v45 = vld [vmem:[#allocation7 + $0xb8] sm:$0xf0] }
 0x33a   :  { %v9095_v32 = vor.u32 %v11210_v21, %v9092_v45  ;;  %v9890_v21 = vld [vmem:[#allocation7 + $0x6e8] sm:$0xf]  ;;  %v11412_v45 = vld [vmem:[#allocation7 + $0x6f4] sm:$0xf0] }
 0x33b   :  { %v12491_v14 = vpack.c.bf16 %v3576_v52, %v3576_v52  ;;  %5324 = vmatpush.bf16.msra.mxu2 %v9775_v30  ;;  %v9436_v52 = vld [vmem:[#allocation7 + $0x370] sm:$0xf0]  ;;  %v11268_v30 = vld [vmem:[#allocation7 + $0x274] sm:$0xf0] }
 0x33c   :  { %5397 = vmatpush.bf16.msra.mxu0 %v9603_v4 }
 0x33d   :  { %5410 = vmatpush.bf16.msra.mxu1 %v9731_v41  ;;  %5182 = vmatmul.bf16.vlgmr.msrb.gmra.mxu3 %v12491_v14  ;;  %v9363_v41 = vor.u32 %v11280_v37, %v9362_v35  ;;  %v9439_v35 = vor.u32 %v11297_v47, %v9436_v52 }
 0x33e   :  { %v3519_v4 = vpop.f32.mrf.mxu3  ;;  %5278 = vmatpush.bf16.msrb.mxu3 %v9503_v25  ;;  %5325 = vmatmul.bf16.vlgmr.msra.gmra.mxu2 %v12481_v5 }
 0x33f   :  { %5369 = vmatpush.bf16.msrb.mxu2 %v9379_v34 }
 0x340   :  { %5398 = vmatpush.bf16.msra.mxu0 %v9587_v60  ;;  %v11305_v60 = vld [vmem:[#allocation7 + $0x3a4] sm:$0xf] }
 0x341   :  { %5411 = vmatpush.bf16.msra.mxu1 %v9715_v61  ;;  %v9468_v61 = vld [vmem:[#allocation7 + $0x3b0] sm:$0xf0] }
 0x342   :  { %5279 = vmatpush.bf16.msrb.mxu3 %v9487_v50  ;;  %v11234_v50 = vld [vmem:[#allocation7 + $0x16c] sm:$0xf] }
 0x343   :  { %5370 = vmatpush.bf16.msrb.mxu2 %v9363_v41  ;;  %v11202_v41 = vld [vmem:[#allocation7 + $0x6c] sm:$0xf] }
 0x344   :  { %5399 = vmatpush.bf16.msra.mxu0 %v9571_v3  ;;  %v9471_v3 = vor.u32 %v11305_v60, %v9468_v61  ;;  %v11260_v60 = vld [vmem:[#allocation7 + $0x234] sm:$0xf0]  ;;  %v9063_v61 = vor.u32 %v11202_v41, %v9060_v42 }
 0x345   :  { %5412 = vmatpush.bf16.msra.mxu1 %v9699_v6  ;;  %v9236_v6 = vld [vmem:[#allocation7 + $0x1d8] sm:$0xf0] }
 0x346   :  { %v3569_v28 = vpop.f32.mrf.mxu3  ;;  %v9239_v18 = vor.u32 %v11246_v53, %v9236_v6  ;;  %5280 = vmatpush.bf16.msrb.mxu3 %v9471_v3  ;;  %v9388_v3 = vld [vmem:[#allocation7 + $0x310] sm:$0xf0]  ;;  %v9266_v6 = vld [vmem:[#allocation7 + $0x208] sm:$0xf] }
 0x347   :  { %5371 = vmatpush.bf16.msrb.mxu2 %v9347_v0  ;;  %v3570_v48 = vadd.f32 %v3569_v28, %v3140_v63  ;;  %v9191_v63 = vor.u32 %v11234_v50, %v9188_v46  ;;  %v9172_v0 = vld [vmem:[#allocation7 + $0x158] sm:$0xf0]  ;;  %v9391_v47 = vor.u32 %v11285_v1, %v9388_v3  ;;  %v9267_v52 = vor.u32 %v11256_v13, %v9266_v6  ;;  %v11433_v50 = vld [vmem:[#allocation7 + $0x7a4] sm:$0xf]  ;;  %v9964_v6 = vld [vmem:[#allocation7 + $0x790] sm:$0xf0] }
 0x348   :  { %5400 = vmatpush.bf16.msra.mxu0 %v9555_v27  ;;  %v11242_v27 = vld [vmem:[#allocation7 + $0x1ac] sm:$0xf]  ;;  %v11429_v3 = vld [vmem:[#allocation7 + $0x784] sm:$0xf]  ;;  %v11400_v13 = vld [vmem:[#allocation7 + $0x694] sm:$0xf0] }
 0x349   :  { %5413 = vmatpush.bf16.msra.mxu1 %v9683_v29  ;;  %v9314_v29 = vld [vmem:[#allocation7 + $0x268] sm:$0xf]  ;;  %v3580_v31 = vmax.f32 %v3570_v48, 0.0  ;;  %v9223_v34 = vor.u32 %v11242_v27, %v9220_v22  ;;  %v9028_v27 = vld [vmem:[#allocation7 + $0x38] sm:$0xf0] }
 0x34a   :  { %5281 = vmatpush.bf16.msrb.mxu3 %v9455_v26  ;;  %v9315_v37 = vor.u32 %v11268_v30, %v9314_v29  ;;  %v11194_v26 = vld [vmem:[#allocation7 + $0x2c] sm:$0xf]  ;;  %v9156_v30 = vld [vmem:[#allocation7 + $0x138] sm:$0xf0] }
 0x34b   :  { %5372 = vmatpush.bf16.msrb.mxu2 %v9331_v20  ;;  %v12498_v25 = vpack.c.bf16 %v3580_v31, %v3580_v31  ;;  %v10012_v20 = vld [vmem:[#allocation7 + $0x7f0] sm:$0xf0]  ;;  %v11226_v29 = vld [vmem:[#allocation7 + $0x12c] sm:$0xf]  ;;  %v9031_v12 = vor.u32 %v11194_v26, %v9028_v27  ;;  %v11425_v26 = vld [vmem:[#allocation7 + $0x764] sm:$0xf] }
 0x34c   :  { %5401 = vmatpush.bf16.msra.mxu0 %v9539_v38  ;;  %v11238_v38 = vld [vmem:[#allocation7 + $0x18c] sm:$0xf]  ;;  %v10015_v31 = vor.u32 %v11441_v16, %v10012_v20  ;;  %v9967_v20 = vor.u32 %v11429_v3, %v9964_v6  ;;  %v9948_v27 = vld [vmem:[#allocation7 + $0x770] sm:$0xf0]  ;;  %v11316_v6 = vld [vmem:[#allocation7 + $0x3f4] sm:$0xf0] }
 0x34d   :  { %5414 = vmatpush.bf16.msra.mxu1 %v9667_v39  ;;  %v9298_v39 = vld [vmem:[#allocation7 + $0x248] sm:$0xf]  ;;  %5234 = vmatmul.bf16.vlgmr.msra.gmra.mxu3 %v12498_v25  ;;  %v9207_v58 = vor.u32 %v11238_v38, %v9204_v8  ;;  %v11408_v38 = vld [vmem:[#allocation7 + $0x6d4] sm:$0xf0]  ;;  %v9159_v8 = vor.u32 %v11226_v29, %v9156_v30  ;;  %v11334_v30 = vld [vmem:[#allocation7 + $0x48c] sm:$0xf] }
 0x34e   :  { %v3571_v4 = vpop.f32.mrf.mxu3  ;;  %5282 = vmatpush.bf16.msrb.mxu3 %v9439_v35  ;;  %v9299_v59 = vor.u32 %v11264_v55, %v9298_v39  ;;  %v9996_v35 = vld [vmem:[#allocation7 + $0x7d0] sm:$0xf0]  ;;  %v11222_v39 = vld [vmem:[#allocation7 + $0x10c] sm:$0xf]  ;;  %v9140_v55 = vld [vmem:[#allocation7 + $0x118] sm:$0xf0] }
 0x34f   :  { %5373 = vmatpush.bf16.msrb.mxu2 %v9315_v37  ;;  %v9874_v37 = vld [vmem:[#allocation7 + $0x6c8] sm:$0xf] }
 0x350   :  { %5402 = vmatpush.bf16.msra.mxu0 %v9523_v57  ;;  %v9282_v57 = vld [vmem:[#allocation7 + $0x228] sm:$0xf]  ;;  %v5144_v10 = vpop.f32.mrf.mxu0  ;;  %v9875_v42 = vor.u32 %v11408_v38, %v9874_v37  ;;  %v11421_v37 = vld [vmem:[#allocation7 + $0x744] sm:$0xf]  ;;  %v9932_v38 = vld [vmem:[#allocation7 + $0x750] sm:$0xf0] }
 0x351   :  { %5415 = vmatpush.bf16.msra.mxu1 %v9651_v62  ;;  %v11198_v62 = vld [vmem:[#allocation7 + $0x4c] sm:$0xf]  ;;  %v9283_v53 = vor.u32 %v11260_v60, %v9282_v57  ;;  %v5157_v28 = vpop.f32.mrf.mxu1  ;;  %v9858_v57 = vld [vmem:[#allocation7 + $0x6a8] sm:$0xf]  ;;  %v11404_v60 = vld [vmem:[#allocation7 + $0x6b4] sm:$0xf0] }
 0x352   :  { %5283 = vmatpush.bf16.msrb.mxu3 %v9423_v44  ;;  %v11378_v44 = vld [vmem:[#allocation7 + $0x5ec] sm:$0xf]  ;;  %v9859_v1 = vor.u32 %v11404_v60, %v9858_v57  ;;  %v9556_v60 = vld [vmem:[#allocation7 + $0x458] sm:$0xf0] }
 0x353   :  { %5403 = vmatmul.bf16.vlgmr.msra.gmra.mxu0 %v12463_v49  ;;  %5374 = vmatpush.bf16.msrb.mxu2 %v9299_v59  ;;  %v9764_v59 = vld [vmem:[#allocation7 + $0x5f8] sm:$0xf0]  ;;  %v11326_v57 = vld [vmem:[#allocation7 + $0x44c] sm:$0xf] }
 0x354   :  { %5447 = vmatpush.bf16.msrb.mxu0 %v9127_v7  ;;  %5416 = vmatmul.bf16.vlgmr.msra.gmra.mxu1 %v12465_v15  ;;  %v9044_v7 = vld [vmem:[#allocation7 + $0x58] sm:$0xf0]  ;;  %v9559_v3 = vor.u32 %v11326_v57, %v9556_v60  ;;  %v11270_v57 = vld [vmem:[#allocation7 + $0x28c] sm:$0xf] }
 0x355   :  { %5460 = vmatpush.bf16.msrb.mxu1 %v9255_v19  ;;  %v11230_v19 = vld [vmem:[#allocation7 + $0x14c] sm:$0xf]  ;;  %v9332_v60 = vld [vmem:[#allocation7 + $0x298] sm:$0xf0] }
 0x356   :  { %v9175_v48 = vor.u32 %v11230_v19, %v9172_v0  ;;  %5284 = vmatpush.bf16.msrb.mxu3 %v9407_v24  ;;  %v9620_v19 = vld [vmem:[#allocation7 + $0x4d8] sm:$0xf0]  ;;  %v9983_v0 = vor.u32 %v11433_v50, %v9980_v56  ;;  %v11374_v24 = vld [vmem:[#allocation7 + $0x5cc] sm:$0xf]  ;;  %v9794_v50 = vld [vmem:[#allocation7 + $0x628] sm:$0xf] }
 0x357   :  { %5375 = vmatpush.bf16.msrb.mxu2 %v9283_v53  ;;  %v9748_v53 = vld [vmem:[#allocation7 + $0x5d8] sm:$0xf0] }
 0x358   :  { %5448 = vmatpush.bf16.msrb.mxu0 %v9111_v17  ;;  %v3847_v17 = vperm.slane %v12502_v9, 0  ;;  %v5146_v4 = vpop.f32.mrf.mxu0 }
 0x359   :  { %5461 = vmatpush.bf16.msrb.mxu1 %v9239_v18  ;;  %v9047_v18 = vor.u32 %v11198_v62, %v9044_v7  ;;  %v5159_v46 = vpop.f32.mrf.mxu1  ;;  %v9767_v7 = vor.u32 %v11378_v44, %v9764_v59  ;;  %v11417_v44 = vld [vmem:[#allocation7 + $0x724] sm:$0xf]  ;;  %v9916_v59 = vld [vmem:[#allocation7 + $0x730] sm:$0xf0] }
 0x35a   :  { %v5145_v22 = vadd.f32 %v5144_v10, %v3847_v17  ;;  %5285 = vmatpush.bf16.msrb.mxu3 %v9391_v47  ;;  %v9842_v10 = vld [vmem:[#allocation7 + $0x688] sm:$0xf]  ;;  %v9751_v17 = vor.u32 %v11374_v24, %v9748_v53  ;;  %v11396_v47 = vld [vmem:[#allocation7 + $0x674] sm:$0xf0] }
 0x35b   :  { %5376 = vmatpush.bf16.msrb.mxu2 %v9267_v52  ;;  %v11388_v46 = vld [vmem:[#allocation7 + $0x634] sm:$0xf0]  ;;  %v9506_v53 = vld [vmem:[#allocation7 + $0x3e8] sm:$0xf] }
 0x35c   :  { %5449 = vmatpush.bf16.msrb.mxu0 %v9095_v32  ;;  %v9891_v32 = vor.u32 %v11412_v45, %v9890_v21  ;;  %v12505_v54 = vadd.f32 %v5157_v28, %v5145_v22  ;;  %v11338_v28 = vld [vmem:[#allocation7 + $0x4ac] sm:$0xf]  ;;  %v9843_v21 = vor.u32 %v11400_v13, %v9842_v10  ;;  %v9826_v22 = vld [vmem:[#allocation7 + $0x668] sm:$0xf]  ;;  %v11384_v24 = vld [vmem:[#allocation7 + $0x614] sm:$0xf0] }
 0x35d   :  { %5462 = vmatpush.bf16.msrb.mxu1 %v9223_v34  ;;  %v11437_v34 = vld [vmem:[#allocation7 + $0x7c4] sm:$0xf]  ;;  %5286 = vmatmul.bf16.vlgmr.msrb.gmra.mxu3 %v12491_v14  ;;  %v11370_v45 = vld [vmem:[#allocation7 + $0x5ac] sm:$0xf]  ;;  %v9380_v13 = vld [vmem:[#allocation7 + $0x2f8] sm:$0xf0] }
 0x35e   :  { %5330 = vmatpush.bf16.msra.mxu3 %v10015_v31  ;;  %v9999_v41 = vor.u32 %v11437_v34, %v9996_v35  ;;  %5377 = vmatmul.bf16.vlgmr.msrb.gmra.mxu2 %v12475_v23  ;;  %v9588_v31 = vld [vmem:[#allocation7 + $0x498] sm:$0xf0]  ;;  %v9827_v34 = vor.u32 %v11396_v47, %v9826_v22  ;;  %v11282_v10 = vld [vmem:[#allocation7 + $0x2ec] sm:$0xf]  ;;  %v9490_v47 = vld [vmem:[#allocation7 + $0x3c8] sm:$0xf] }
 0x35f   :  { %5421 = vmatpush.bf16.msra.mxu2 %v9891_v32  ;;  %v9951_v32 = vor.u32 %v11425_v26, %v9948_v27  ;;  %v9716_v35 = vld [vmem:[#allocation7 + $0x598] sm:$0xf0]  ;;  %v9507_v27 = vor.u32 %v11316_v6, %v9506_v53  ;;  %v9383_v22 = vor.u32 %v11282_v10, %v9380_v13  ;;  %v9426_v6 = vld [vmem:[#allocation7 + $0x348] sm:$0xf]  ;;  %v11296_v10 = vld [vmem:[#allocation7 + $0x354] sm:$0xf0] }
 0x360   :  { %5450 = vmatpush.bf16.msrb.mxu0 %v9079_v40  ;;  %v11346_v40 = vld [vmem:[#allocation7 + $0x4ec] sm:$0xf]  ;;  %v9668_v26 = vld [vmem:[#allocation7 + $0x538] sm:$0xf0] }
 0x361   :  { %5463 = vmatpush.bf16.msrb.mxu1 %v9207_v58  ;;  %v9636_v58 = vld [vmem:[#allocation7 + $0x4f8] sm:$0xf0]  ;;  %v11262_v13 = vld [vmem:[#allocation7 + $0x24c] sm:$0xf] }
 0x362   :  { %v9639_v62 = vor.u32 %v11346_v40, %v9636_v58  ;;  %5331 = vmatpush.bf16.msra.mxu3 %v9999_v41  ;;  %v9935_v58 = vor.u32 %v11421_v37, %v9932_v38  ;;  %v11362_v41 = vld [vmem:[#allocation7 + $0x56c] sm:$0xf]  ;;  %v9652_v38 = vld [vmem:[#allocation7 + $0x518] sm:$0xf0] }
 0x363   :  { %5422 = vmatpush.bf16.msra.mxu2 %v9875_v42  ;;  %v9700_v42 = vld [vmem:[#allocation7 + $0x578] sm:$0xf0]  ;;  %v11350_v37 = vld [vmem:[#allocation7 + $0x50c] sm:$0xf] }
 0x364   :  { %5451 = vmatpush.bf16.msrb.mxu0 %v9063_v61  ;;  %v9143_v61 = vor.u32 %v11222_v39, %v9140_v55  ;;  %v11330_v39 = vld [vmem:[#allocation7 + $0x46c] sm:$0xf]  ;;  %v9572_v55 = vld [vmem:[#allocation7 + $0x478] sm:$0xf0]  ;;  %v9703_v56 = vor.u32 %v11362_v41, %v9700_v42  ;;  %v9655_v41 = vor.u32 %v11350_v37, %v9652_v38 }
 0x365   :  { %5464 = vmatpush.bf16.msrb.mxu1 %v9191_v63  ;;  %v11342_v63 = vld [vmem:[#allocation7 + $0x4cc] sm:$0xf]  ;;  %v9892_v37 = vld [vmem:[#allocation7 + $0x6f8] sm:$0xf0] }
 0x366   :  { %v9623_v16 = vor.u32 %v11342_v63, %v9620_v19  ;;  %5332 = vmatpush.bf16.msra.mxu3 %v9983_v0  ;;  %v9684_v63 = vld [vmem:[#allocation7 + $0x558] sm:$0xf0]  ;;  %v11413_v19 = vld [vmem:[#allocation7 + $0x704] sm:$0xf]  ;;  %v9900_v0 = vld [vmem:[#allocation7 + $0x710] sm:$0xf0] }
 0x367   :  { %5423 = vmatpush.bf16.msra.mxu2 %v9859_v1  ;;  %v9778_v1 = vld [vmem:[#allocation7 + $0x608] sm:$0xf] }
 0x368   :  { %5452 = vmatpush.bf16.msrb.mxu0 %v9047_v18  ;;  %v9604_v18 = vld [vmem:[#allocation7 + $0x4b8] sm:$0xf0] }
 0x369   :  { %5465 = vmatpush.bf16.msrb.mxu1 %v9175_v48  ;;  %v9732_v48 = vld [vmem:[#allocation7 + $0x5b8] sm:$0xf0]  ;;  %v9607_v52 = vor.u32 %v11338_v28, %v9604_v18  ;;  %v11322_v28 = vld [vmem:[#allocation7 + $0x42c] sm:$0xf] }
 0x36a   :  { %v9735_v29 = vor.u32 %v11370_v45, %v9732_v48  ;;  %5333 = vmatpush.bf16.msra.mxu3 %v9967_v20  ;;  %v9540_v18 = vld [vmem:[#allocation7 + $0x438] sm:$0xf0]  ;;  %v9779_v45 = vor.u32 %v11384_v24, %v9778_v1  ;;  %v11354_v48 = vld [vmem:[#allocation7 + $0x52c] sm:$0xf] }
 0x36b   :  { %5424 = vmatpush.bf16.msra.mxu2 %v9843_v21  ;;  %v9903_v21 = vor.u32 %v11413_v19, %v9900_v0  ;;  %v11266_v19 = vld [vmem:[#allocation7 + $0x26c] sm:$0xf]  ;;  %v9316_v0 = vld [vmem:[#allocation7 + $0x278] sm:$0xf0] }
 0x36c   :  { %5453 = vmatpush.bf16.msrb.mxu0 %v9031_v12  ;;  %v11366_v12 = vld [vmem:[#allocation7 + $0x58c] sm:$0xf] }
 0x36d   :  { %5466 = vmatpush.bf16.msrb.mxu1 %v9159_v8  ;;  %v11392_v8 = vld [vmem:[#allocation7 + $0x654] sm:$0xf0]  ;;  %v9719_v11 = vor.u32 %v11366_v12, %v9716_v35  ;;  %v9524_v12 = vld [vmem:[#allocation7 + $0x418] sm:$0xf0]  ;;  %v3848_v35 = vperm.slane %v12502_v9, 1 }
 0x36e   :  { %5334 = vmatpush.bf16.msra.mxu3 %v9951_v32  ;;  %v9671_v32 = vor.u32 %v11354_v48, %v9668_v26  ;;  %v11452_v26 = vld [vmem:[%s12748_s17 + $0x38] sm:$0xff] }
 0x36f   :  { %5425 = vmatpush.bf16.msra.mxu2 %v9827_v34  ;;  %v11318_v34 = vld [vmem:[#allocation7 + $0x40c] sm:$0xf] }
 0x370   :  { %5454 = vmatpush.bf16.msrb.mxu0 %v9015_v2  ;;  %v12511_v33 = vpop.f32.mrf.mxu0  ;;  %v9575_v2 = vor.u32 %v11330_v39, %v9572_v55  ;;  %v11308_v39 = vld [vmem:[#allocation7 + $0x3b4] sm:$0xf0]  ;;  %v11274_v55 = vld [vmem:[#allocation7 + $0x2ac] sm:$0xf] }
 0x371   :  { %5467 = vmatpush.bf16.msrb.mxu1 %v9143_v61  ;;  %v12513_v40 = vpop.f32.mrf.mxu1  ;;  %v11358_v61 = vld [vmem:[#allocation7 + $0x54c] sm:$0xf] }
 0x372   :  { %5335 = vmatpush.bf16.msra.mxu3 %v9935_v58  ;;  %v9348_v58 = vld [vmem:[#allocation7 + $0x2b8] sm:$0xf0] }
 0x373   :  { %5455 = vmatmul.bf16.vlgmr.msrb.gmra.mxu0 %v12455_v43  ;;  %v9810_v43 = vld [vmem:[#allocation7 + $0x648] sm:$0xf] }
 0x374   :  { %5499 = vmatpush.bf16.msra.mxu0 %v9639_v62  ;;  %5468 = vmatmul.bf16.vlgmr.msrb.gmra.mxu1 %v12457_v51  ;;  %v9591_v51 = vor.u32 %v11334_v30, %v9588_v31  ;;  %v9811_v4 = vor.u32 %v11392_v8, %v9810_v43  ;;  %v9919_v62 = vor.u32 %v11417_v44, %v9916_v59  ;;  %v11278_v30 = vld [vmem:[#allocation7 + $0x2cc] sm:$0xf]  ;;  %v9364_v31 = vld [vmem:[#allocation7 + $0x2d8] sm:$0xf0] }
 0x375   :  { %5512 = vmatpush.bf16.msra.mxu1 %v9767_v7  ;;  %v9795_v7 = vor.u32 %v11388_v46, %v9794_v50  ;;  %v9367_v8 = vor.u32 %v11278_v30, %v9364_v31  ;;  %v9351_v50 = vor.u32 %v11274_v55, %v9348_v58  ;;  %v9458_v46 = vld [vmem:[#allocation7 + $0x388] sm:$0xf]  ;;  %v9268_v30 = vld [vmem:[#allocation7 + $0x218] sm:$0xf0]  ;;  %v11440_v55 = vld [vmem:[#allocation7 + $0x7d4] sm:$0xf0] }
 0x376   :  { %5426 = vmatpush.bf16.msra.mxu2 %v9811_v4  ;;  %5336 = vmatpush.bf16.msra.mxu3 %v9919_v62  ;;  %v9335_v62 = vor.u32 %v11270_v57, %v9332_v60  ;;  %v10018_v31 = vld [vmem:[#allocation7 + $0x7e8] sm:$0xf]  ;;  %v11406_v58 = vld [vmem:[#allocation7 + $0x6cc] sm:$0xf]  ;;  %v9860_v60 = vld [vmem:[#allocation7 + $0x6b8] sm:$0xf0] }
 0x377   :  { %v11402_v57 = vld [vmem:[#allocation7 + $0x6ac] sm:$0xf] }
 0x378   :  { %5500 = vmatpush.bf16.msra.mxu0 %v9623_v16  ;;  %v5198_v16 = vpop.f32.mrf.mxu0 }
 0x379   :  { %5513 = vmatpush.bf16.msra.mxu1 %v9751_v17  ;;  %v9687_v17 = vor.u32 %v11358_v61, %v9684_v63  ;;  %v5211_v20 = vpop.f32.mrf.mxu1  ;;  %v11300_v63 = vld [vmem:[#allocation7 + $0x374] sm:$0xf0]  ;;  %v9300_v16 = vld [vmem:[#allocation7 + $0x258] sm:$0xf0] }
 0x37a   :  { %5427 = vmatpush.bf16.msra.mxu2 %v9795_v7  ;;  %5337 = vmatpush.bf16.msra.mxu3 %v9903_v21  ;;  %v9442_v7 = vld [vmem:[#allocation7 + $0x368] sm:$0xf]  ;;  %v11292_v20 = vld [vmem:[#allocation7 + $0x334] sm:$0xf0]  ;;  %v11258_v21 = vld [vmem:[#allocation7 + $0x22c] sm:$0xf] }
 0x37b   :  { %v9443_v53 = vor.u32 %v11300_v63, %v9442_v7  ;;  %v9863_v7 = vor.u32 %v11402_v57, %v9860_v60  ;;  %v9970_v63 = vld [vmem:[#allocation7 + $0x788] sm:$0xf]  ;;  %v11310_v60 = vld [vmem:[#allocation7 + $0x3cc] sm:$0xf] }
 0x37c   :  { %5501 = vmatpush.bf16.msra.mxu0 %v9607_v52  ;;  %v9543_v52 = vor.u32 %v11322_v28, %v9540_v18  ;;  %v9410_v18 = vld [vmem:[#allocation7 + $0x328] sm:$0xf] }
 0x37d   :  { %5514 = vmatpush.bf16.msra.mxu1 %v9735_v29  ;;  %v11312_v29 = vld [vmem:[#allocation7 + $0x3d4] sm:$0xf0]  ;;  %5338 = vmatmul.bf16.vlgmr.msra.gmra.mxu3 %v12498_v25 }
 0x37e   :  { %5428 = vmatpush.bf16.msra.mxu2 %v9779_v45  ;;  %5382 = vmatpush.bf16.msrb.mxu3 %v9507_v27  ;;  %v9491_v43 = vor.u32 %v11312_v29, %v9490_v47  ;;  %v9284_v45 = vld [vmem:[#allocation7 + $0x238] sm:$0xf0]  ;;  %v9394_v47 = vld [vmem:[#allocation7 + $0x308] sm:$0xf]  ;;  %v11254_v29 = vld [vmem:[#allocation7 + $0x20c] sm:$0xf] }
 0x380   :  { %5502 = vmatpush.bf16.msra.mxu0 %v9591_v51  ;;  %v9474_v51 = vld [vmem:[#allocation7 + $0x3a8] sm:$0xf]  ;;  %v5248_v4 = vpop.f32.mrf.mxu0 }
 0x381   :  { %5515 = vmatpush.bf16.msra.mxu1 %v9719_v11  ;;  %v9527_v11 = vor.u32 %v11318_v34, %v9524_v12  ;;  %v5249_v42 = vadd.f32 %v5248_v4, %v3848_v35  ;;  %v5261_v44 = vpop.f32.mrf.mxu1  ;;  %5429 = vmatmul.bf16.vlgmr.msra.gmra.mxu2 %v12481_v5  ;;  %v9475_v59 = vor.u32 %v11308_v39, %v9474_v51  ;;  %v11451_v34 = vld [vmem:[%s12748_s17 + $0x30] sm:$0xff]  ;;  %v11444_v12 = vld [vmem:[#allocation7 + $0x7f4] sm:$0xf0]  ;;  %v9876_v4 = vld [vmem:[#allocation7 + $0x6d8] sm:$0xf0] }
 0x382   :  { %5473 = vmatpush.bf16.msrb.mxu2 %v9383_v22  ;;  %5383 = vmatpush.bf16.msrb.mxu3 %v9491_v43  ;;  %v9411_v22 = vor.u32 %v11292_v20, %v9410_v18  ;;  %v11410_v35 = vld [vmem:[#allocation7 + $0x6ec] sm:$0xf]  ;;  %v9271_v43 = vor.u32 %v11254_v29, %v9268_v30  ;;  %v9938_v18 = vld [vmem:[#allocation7 + $0x748] sm:$0xf]  ;;  %v11424_v20 = vld [vmem:[#allocation7 + $0x754] sm:$0xf0] }
 0x383   :  { %v9895_v51 = vor.u32 %v11410_v35, %v9892_v37  ;;  %v11420_v29 = vld [vmem:[#allocation7 + $0x734] sm:$0xf0]  ;;  %v11445_v35 = vld [vmem:[%s12748_s17] sm:$0xff] }
 0x384   :  { %5503 = vmatpush.bf16.msra.mxu0 %v9575_v2  ;;  %v12518_v2 = vadd.f32 %v5261_v44, %v5249_v42  ;;  %v11450_v42 = vld [vmem:[%s12748_s17 + $0x28] sm:$0xff] }
 0x385   :  { %5516 = vmatpush.bf16.msra.mxu1 %v9703_v56  ;;  %v11304_v56 = vld [vmem:[#allocation7 + $0x394] sm:$0xf0] }
 0x386   :  { %5474 = vmatpush.bf16.msrb.mxu2 %v9367_v8  ;;  %5384 = vmatpush.bf16.msrb.mxu3 %v9475_v59  ;;  %v9459_v61 = vor.u32 %v11304_v56, %v9458_v46  ;;  %v10019_v8 = vor.u32 %v11444_v12, %v10018_v31  ;;  %v9879_v59 = vor.u32 %v11406_v58, %v9876_v4  ;;  %v11436_v46 = vld [vmem:[#allocation7 + $0x7b4] sm:$0xf0]  ;;  %v11386_v31 = vld [vmem:[#allocation7 + $0x62c] sm:$0xf]  ;;  %v9780_v4 = vld [vmem:[#allocation7 + $0x618] sm:$0xf0] }
 0x387   :  { %v11382_v58 = vld [vmem:[#allocation7 + $0x60c] sm:$0xf] }
 0x388   :  { %5504 = vmatpush.bf16.msra.mxu0 %v9559_v3  ;;  %v5250_v1 = vpop.f32.mrf.mxu0  ;;  %v9319_v3 = vor.u32 %v11266_v19, %v9316_v0  ;;  %v11432_v19 = vld [vmem:[#allocation7 + $0x794] sm:$0xf0]  ;;  %v11398_v0 = vld [vmem:[#allocation7 + $0x68c] sm:$0xf] }
 0x389   :  { %5517 = vmatpush.bf16.msra.mxu1 %v9687_v17  ;;  %v5263_v24 = vpop.f32.mrf.mxu1  ;;  %v5170_v17 = vpop.f32.mrf.mxu2  ;;  %v9844_v1 = vld [vmem:[#allocation7 + $0x698] sm:$0xf0] }
 0x38a   :  { %5475 = vmatpush.bf16.msrb.mxu2 %v9351_v50  ;;  %5385 = vmatpush.bf16.msrb.mxu3 %v9459_v61  ;;  %v12523_v28 = vadd.f32 %v5170_v17, %v12505_v54  ;;  %v9287_v54 = vor.u32 %v11258_v21, %v9284_v45  ;;  %v9986_v50 = vld [vmem:[#allocation7 + $0x7a8] sm:$0xf]  ;;  %v11449_v61 = vld [vmem:[%s12748_s17 + $0x20] sm:$0xff]  ;;  %v11448_v24 = vld [vmem:[%s12748_s17 + $0x18] sm:$0xff] }
 0x38b   :  { %v11447_v17 = vld [vmem:[%s12748_s17 + $0x10] sm:$0xff]  ;;  %v9812_v45 = vld [vmem:[#allocation7 + $0x658] sm:$0xf0] }
 0x38c   :  { %5505 = vmatpush.bf16.msra.mxu0 %v9543_v52  ;;  %v11288_v52 = vld [vmem:[#allocation7 + $0x314] sm:$0xf0]  ;;  %v11390_v21 = vld [vmem:[#allocation7 + $0x64c] sm:$0xf] }
 0x38d   :  { %5518 = vmatpush.bf16.msra.mxu1 %v9671_v32  ;;  %v9395_v38 = vor.u32 %v11288_v52, %v9394_v47  ;;  %v9815_v47 = vor.u32 %v11390_v21, %v9812_v45  ;;  %v9922_v52 = vld [vmem:[#allocation7 + $0x728] sm:$0xf] }
 0x38e   :  { %5476 = vmatpush.bf16.msrb.mxu2 %v9335_v62  ;;  %5386 = vmatpush.bf16.msrb.mxu3 %v9443_v53  ;;  %v9987_v62 = vor.u32 %v11436_v46, %v9986_v50  ;;  %v9971_v53 = vor.u32 %v11432_v19, %v9970_v63  ;;  %v11306_v19 = vld [vmem:[#allocation7 + $0x3ac] sm:$0xf] }
 0x390   :  { %5506 = vmatpush.bf16.msra.mxu0 %v9527_v11  ;;  %v12525_v48 = vpop.f32.mrf.mxu0  ;;  %v10002_v11 = vld [vmem:[#allocation7 + $0x7c8] sm:$0xf] }
 0x391   :  { %5519 = vmatpush.bf16.msra.mxu1 %v9655_v41  ;;  %v12528_v27 = vpop.f32.mrf.mxu1  ;;  %v5172_v32 = vpop.f32.mrf.mxu2  ;;  %v10003_v44 = vor.u32 %v11440_v55, %v10002_v11  ;;  %v9906_v11 = vld [vmem:[#allocation7 + $0x708] sm:$0xf]  ;;  %v11416_v55 = vld [vmem:[#allocation7 + $0x714] sm:$0xf0] }
 0x392   :  { %5477 = vmatpush.bf16.msrb.mxu2 %v9319_v3  ;;  %v9847_v3 = vor.u32 %v11398_v0, %v9844_v1  ;;  %v9796_v32 = vld [vmem:[#allocation7 + $0x638] sm:$0xf0]  ;;  %v11481_v1 = vld [vmem:[#allocation8 + $0x20] sm:$0xff] }
 0x393   :  { %5507 = vmatmul.bf16.vlgmr.msra.gmra.mxu0 %v12463_v49  ;;  %v9427_v49 = vor.u32 %v11296_v10, %v9426_v6  ;;  %v9954_v6 = vld [vmem:[#allocation7 + $0x768] sm:$0xf]  ;;  %v11428_v10 = vld [vmem:[#allocation7 + $0x774] sm:$0xf0]  ;;  %v9476_v0 = vld [vmem:[#allocation7 + $0x3b8] sm:$0xf0] }
 0x394   :  { %5520 = vmatmul.bf16.vlgmr.msra.gmra.mxu1 %v12465_v15  ;;  %v9303_v15 = vor.u32 %v11262_v13, %v9300_v16  ;;  %5819 = vmatpush.bf16.msrb.mxu0 %v11452_v26  ;;  %v9828_v16 = vld [vmem:[#allocation7 + $0x678] sm:$0xf0]  ;;  %v3849_v26 = vperm.slane %v12502_v9, 2 }
 0x395   :  { %5387 = vmatpush.bf16.msrb.mxu3 %v9427_v49  ;;  %v9955_v49 = vor.u32 %v11428_v10, %v9954_v6  ;;  %v11480_v6 = vld [vmem:[#allocation8 + $0x18] sm:$0xff] }
 0x396   :  { %5478 = vmatpush.bf16.msrb.mxu2 %v9303_v15 }
 0x398   :  { %5820 = vmatpush.bf16.msrb.mxu0 %v11451_v34  ;;  %v5302_v39 = vpop.f32.mrf.mxu0 }
 0x399   :  { %5388 = vmatpush.bf16.msrb.mxu3 %v9411_v22  ;;  %v5315_v41 = vpop.f32.mrf.mxu1  ;;  %v12532_v56 = vpop.f32.mrf.mxu2  ;;  %v11446_v22 = vld [vmem:[%s12748_s17 + $0x8] sm:$0xff] }
 0x39a   :  { %5479 = vmatpush.bf16.msrb.mxu2 %v9287_v54  ;;  %v9939_v54 = vor.u32 %v11424_v20, %v9938_v18  ;;  %v11314_v41 = vld [vmem:[#allocation7 + $0x3ec] sm:$0xf] }
 0x39b   :  { %v11478_v18 = vld [vmem:[#allocation8 + $0x8] sm:$0xff] }
 0x39c   :  { %5821 = vmatpush.bf16.msrb.mxu0 %v11450_v42  ;;  %v9508_v42 = vld [vmem:[#allocation7 + $0x3f8] sm:$0xf0] }
 0x39d   :  { %5389 = vmatpush.bf16.msrb.mxu3 %v9395_v38  ;;  %v9511_v46 = vor.u32 %v11314_v41, %v9508_v42  ;;  %v11457_v42 = vld [vmem:[%s12748_s17 + $0x60] sm:$0xff] }
 0x39e   :  { %5480 = vmatpush.bf16.msrb.mxu2 %v9271_v43  ;;  %v11484_v43 = vld [vmem:[#allocation8 + $0x38] sm:$0xff] }
 0x3a0   :  { %5390 = vmatmul.bf16.vlgmr.msrb.gmra.mxu3 %v12491_v14  ;;  %5822 = vmatpush.bf16.msrb.mxu0 %v11449_v61  ;;  %v9492_v61 = vld [vmem:[#allocation7 + $0x3d8] sm:$0xf0] }
 0x3a1   :  { %5434 = vmatpush.bf16.msra.mxu3 %v10019_v8  ;;  %5481 = vmatmul.bf16.vlgmr.msrb.gmra.mxu2 %v12475_v23  ;;  %v5224_v13 = vpop.f32.mrf.mxu2  ;;  %v11394_v23 = vld [vmem:[#allocation7 + $0x66c] sm:$0xf]  ;;  %v9923_v8 = vor.u32 %v11420_v29, %v9922_v52  ;;  %v9495_v63 = vor.u32 %v11310_v60, %v9492_v61  ;;  %v11460_v52 = vld [vmem:[%s12748_s17 + $0x78] sm:$0xff]  ;;  %v11477_v29 = vld [vmem:[#allocation8] sm:$0xff] }
 0x3a2   :  { %5525 = vmatpush.bf16.msra.mxu2 %v9895_v51  ;;  %v9831_v15 = vor.u32 %v11394_v23, %v9828_v16  ;;  %v9799_v51 = vor.u32 %v11386_v31, %v9796_v32  ;;  %v11298_v13 = vld [vmem:[#allocation7 + $0x36c] sm:$0xf]  ;;  %v9444_v23 = vld [vmem:[#allocation7 + $0x378] sm:$0xf0]  ;;  %v11479_v16 = vld [vmem:[#allocation8 + $0x10] sm:$0xff]  ;;  %5832 = vmatpush.bf16.msrb.mxu1 %v11460_v52 }
 0x3a3   :  { %v11286_v32 = vld [vmem:[#allocation7 + $0x30c] sm:$0xf] }
 0x3a4   :  { %5823 = vmatpush.bf16.msrb.mxu0 %v11448_v24  ;;  %v9479_v24 = vor.u32 %v11306_v19, %v9476_v0  ;;  %v11455_v19 = vld [vmem:[%s12748_s17 + $0x50] sm:$0xff] }
 0x3a5   :  { %5435 = vmatpush.bf16.msra.mxu3 %v10003_v44  ;;  %v9907_v44 = vor.u32 %v11416_v55, %v9906_v11 }
 0x3a6   :  { %5526 = vmatpush.bf16.msra.mxu2 %v9879_v59  ;;  %v9783_v59 = vor.u32 %v11382_v58, %v9780_v4  ;;  %v11458_v58 = vld [vmem:[%s12748_s17 + $0x68] sm:$0xff] }
 0x3a7   :  { %v11438_v4 = vld [vmem:[#allocation7 + $0x7cc] sm:$0xf] }
 0x3a8   :  { %5824 = vmatpush.bf16.msrb.mxu0 %v11447_v17  ;;  %v9447_v17 = vor.u32 %v11298_v13, %v9444_v23 }
 0x3a9   :  { %5436 = vmatpush.bf16.msra.mxu3 %v9987_v62  ;;  %v5274_v30 = vpop.f32.mrf.mxu2 }
 0x3aa   :  { %5527 = vmatpush.bf16.msra.mxu2 %v9863_v7  ;;  %v12542_v12 = vadd.f32 %v5274_v30, %v12518_v2  ;;  %v11483_v2 = vld [vmem:[#allocation8 + $0x30] sm:$0xff]  ;;  %v11482_v7 = vld [vmem:[#allocation8 + $0x28] sm:$0xff] }
 0x3ac   :  { %5825 = vmatpush.bf16.msrb.mxu0 %v11446_v22  ;;  %v9412_v22 = vld [vmem:[#allocation7 + $0x338] sm:$0xf0] }
 0x3ad   :  { %5437 = vmatpush.bf16.msra.mxu3 %v9971_v53  ;;  %v11302_v53 = vld [vmem:[#allocation7 + $0x38c] sm:$0xf] }
 0x3ae   :  { %5528 = vmatpush.bf16.msra.mxu2 %v9847_v3  ;;  %v9460_v3 = vld [vmem:[#allocation7 + $0x398] sm:$0xf0] }
 0x3af   :  { %v9463_v10 = vor.u32 %v11302_v53, %v9460_v3  ;;  %v11422_v53 = vld [vmem:[#allocation7 + $0x74c] sm:$0xf]  ;;  %v9940_v3 = vld [vmem:[#allocation7 + $0x758] sm:$0xf0] }
 0x3b0   :  { %v5352_v34 = vpop.f32.mrf.mxu0  ;;  %5826 = vmatpush.bf16.msrb.mxu0 %v11445_v35  ;;  %v11442_v35 = vld [vmem:[#allocation7 + $0x7ec] sm:$0xf]  ;;  %v9943_v13 = vor.u32 %v11422_v53, %v9940_v3  ;;  %v11476_v3 = vld [vmem:[%s12748_s17 + $0xf8] sm:$0xff] }
 0x3b1   :  { %5438 = vmatpush.bf16.msra.mxu3 %v9955_v49  ;;  %v5353_v37 = vadd.f32 %v5352_v34, %v3849_v26  ;;  %v5365_v38 = vpop.f32.mrf.mxu1  ;;  %v5276_v50 = vpop.f32.mrf.mxu2  ;;  %v11294_v49 = vld [vmem:[#allocation7 + $0x34c] sm:$0xf]  ;;  %v9396_v34 = vld [vmem:[#allocation7 + $0x318] sm:$0xf0] }
 0x3b2   :  { %5529 = vmatpush.bf16.msra.mxu2 %v9831_v15  ;;  %v9428_v15 = vld [vmem:[#allocation7 + $0x358] sm:$0xf0]  ;;  %v11290_v26 = vld [vmem:[#allocation7 + $0x32c] sm:$0xf] }
 0x3b3   :  { %v12545_v39 = vadd.f32 %v5365_v38, %v5353_v37  ;;  %v9431_v20 = vor.u32 %v11294_v49, %v9428_v15  ;;  %v9415_v30 = vor.u32 %v11290_v26, %v9412_v22  ;;  %v10020_v37 = vld [vmem:[#allocation7 + $0x7f8] sm:$0xf0]  ;;  %v11459_v38 = vld [vmem:[%s12748_s17 + $0x70] sm:$0xff] }
 0x3b4   :  { %5942 = vmatpush.bf16.msra.mxu0 %v11484_v43  ;;  %v9399_v43 = vor.u32 %v11286_v32, %v9396_v34  ;;  %5833 = vmatpush.bf16.msrb.mxu1 %v11459_v38  ;;  %v11434_v50 = vld [vmem:[#allocation7 + $0x7ac] sm:$0xf]  ;;  %v5872_v49 = vld [vmem:[%s12749_s21] sm:$0xff] }
 0x3b5   :  { %5439 = vmatpush.bf16.msra.mxu3 %v9939_v54  ;;  %v5873_v52 = vpack.c.bf16 %v5872_v49, %v5872_v49 }
 0x3b6   :  { %5530 = vmatpush.bf16.msra.mxu2 %v9815_v47 }
 0x3b8   :  { %v5354_v57 = vpop.f32.mrf.mxu0  ;;  %5943 = vmatpush.bf16.msra.mxu0 %v11483_v2  ;;  %5834 = vmatpush.bf16.msrb.mxu1 %v11458_v58 }
 0x3b9   :  { %5440 = vmatpush.bf16.msra.mxu3 %v9923_v8  ;;  %v5367_v62 = vpop.f32.mrf.mxu1 }
 0x3ba   :  { %5531 = vmatpush.bf16.msra.mxu2 %v9799_v51  ;;  %v10023_v51 = vor.u32 %v11442_v35, %v10020_v37  ;;  %v11430_v62 = vld [vmem:[#allocation7 + $0x78c] sm:$0xf] }
 0x3bc   :  { %5944 = vmatpush.bf16.msra.mxu0 %v11482_v7  ;;  %5835 = vmatpush.bf16.msrb.mxu1 %v11457_v42  ;;  %v9972_v7 = vld [vmem:[#allocation7 + $0x798] sm:$0xf0] }
 0x3bd   :  { %5441 = vmatpush.bf16.msra.mxu3 %v9907_v44 }
 0x3be   :  { %5532 = vmatpush.bf16.msra.mxu2 %v9783_v59 }
 0x3c0   :  { %5442 = vmatmul.bf16.vlgmr.msra.gmra.mxu3 %v12498_v25  ;;  %5945 = vmatpush.bf16.msra.mxu0 %v11481_v1  ;;  %v11426_v1 = vld [vmem:[#allocation7 + $0x76c] sm:$0xf] }
 0x3c1   :  { %5486 = vmatpush.bf16.msrb.mxu3 %v9511_v46  ;;  %5533 = vmatmul.bf16.vlgmr.msra.gmra.mxu2 %v12481_v5  ;;  %v5183_v5 = vpop.f32.mrf.mxu3  ;;  %v12549_v21 = vpop.f32.mrf.mxu2  ;;  %v9988_v46 = vld [vmem:[#allocation7 + $0x7b8] sm:$0xf0] }
 0x3c2   :  { %v5184_v45 = vadd.f32 %v5183_v5, %v12523_v28  ;;  %v9991_v61 = vor.u32 %v11434_v50, %v9988_v46  ;;  %v11462_v50 = vld [vmem:[%s12748_s17 + $0x88] sm:$0xff] }
 0x3c4   :  { %5946 = vmatpush.bf16.msra.mxu0 %v11480_v6  ;;  %v5197_v31 = vadd.f32 %v12511_v33, %v5184_v45  ;;  %v10004_v33 = vld [vmem:[#allocation7 + $0x7d8] sm:$0xf0]  ;;  %v11454_v6 = vld [vmem:[%s12748_s17 + $0x48] sm:$0xff] }
 0x3c5   :  { %5487 = vmatpush.bf16.msrb.mxu3 %v9495_v63  ;;  %v10007_v44 = vor.u32 %v11438_v4, %v10004_v33 }
 0x3c6   :  { %v5210_v11 = vadd.f32 %v12513_v40, %v5197_v31  ;;  %v11456_v40 = vld [vmem:[%s12748_s17 + $0x58] sm:$0xff] }
 0x3c7   :  { %5836 = vmatpush.bf16.msrb.mxu1 %v11456_v40 }
 0x3c8   :  { %5947 = vmatpush.bf16.msra.mxu0 %v11479_v16  ;;  %v5223_v2 = vadd.f32 %v12532_v56, %v5210_v11  ;;  %v9975_v56 = vor.u32 %v11430_v62, %v9972_v7  ;;  %v11418_v16 = vld [vmem:[#allocation7 + $0x72c] sm:$0xf] }
 0x3c9   :  { %5488 = vmatpush.bf16.msrb.mxu3 %v9479_v24  ;;  %v5185_v28 = vpop.f32.mrf.mxu3  ;;  %v5328_v8 = vpop.f32.mrf.mxu2  ;;  %v9956_v24 = vld [vmem:[#allocation7 + $0x778] sm:$0xf0]  ;;  %v11491_v62 = vld [vmem:[%s12750_s29 + $0x30] sm:$0xff] }
 0x3cb   :  { %5837 = vmatpush.bf16.msrb.mxu1 %v11455_v19 }
 0x3cc   :  { %5948 = vmatpush.bf16.msra.mxu0 %v11478_v18 }
 0x3cd   :  { %5489 = vmatpush.bf16.msrb.mxu3 %v9463_v10  ;;  %v3850_v10 = vperm.slane %v12502_v9, 3 }
 0x3cf   :  { %5838 = vmatpush.bf16.msrb.mxu1 %v11454_v6  ;;  %v11489_v6 = vld [vmem:[%s12750_s29 + $0x20] sm:$0xff] }
 0x3d0   :  { %v12552_v54 = vpop.f32.mrf.mxu0  ;;  %5949 = vmatpush.bf16.msra.mxu0 %v11477_v29  ;;  %v11414_v29 = vld [vmem:[#allocation7 + $0x70c] sm:$0xf] }
 0x3d1   :  { %5490 = vmatpush.bf16.msrb.mxu3 %v9447_v17  ;;  %v12554_v47 = vpop.f32.mrf.mxu1  ;;  %v5235_v59 = vpop.f32.mrf.mxu3  ;;  %v9924_v17 = vld [vmem:[#allocation7 + $0x738] sm:$0xf0] }
 0x3d2   :  { %v5236_v57 = vadd.f32 %v5235_v59, %v5223_v2  ;;  %v9927_v22 = vor.u32 %v11418_v16, %v9924_v17  ;;  %v11465_v2 = vld [vmem:[%s12748_s17 + $0xa0] sm:$0xff]  ;;  %v11463_v59 = vld [vmem:[%s12748_s17 + $0x90] sm:$0xff]  ;;  %v11474_v16 = vld [vmem:[%s12748_s17 + $0xe8] sm:$0xff] }
 0x3d4   :  { %v5551_v60 = vmax.f32 %v5236_v57, 0.0 }
 0x3d5   :  { %5491 = vmatpush.bf16.msrb.mxu3 %v9431_v20  ;;  %v11453_v20 = vld [vmem:[%s12748_s17 + $0x40] sm:$0xff] }
 0x3d6   :  { %v5555_v63 = vpack.c.bf16 %v5551_v60, %v5551_v60  ;;  %5839 = vmatpush.bf16.msrb.mxu1 %v11453_v20  ;;  %v11461_v60 = vld [vmem:[%s12748_s17 + $0x80] sm:$0xff]  ;;  %v11472_v20 = vld [vmem:[%s12748_s17 + $0xd8] sm:$0xff] }
 0x3d8   :  { %v5406_v55 = vpop.f32.mrf.mxu0  ;;  %5827 = vmatmul.bf16.vlgmr.msrb.gmra.mxu0 %v5555_v63 }
 0x3d9   :  { %5492 = vmatpush.bf16.msrb.mxu3 %v9415_v30  ;;  %v5419_v41 = vpop.f32.mrf.mxu1  ;;  %v5237_v0 = vpop.f32.mrf.mxu3  ;;  %v9908_v30 = vld [vmem:[#allocation7 + $0x718] sm:$0xf0] }
 0x3da   :  { %v9911_v31 = vor.u32 %v11414_v29, %v9908_v30  ;;  %v11501_v29 = vld [vmem:[%s12751_s3 + $0x44] sm:$0xf]  ;;  %v10320_v30 = vld [vmem:[%s12751_s3 + $0x50] sm:$0xf0] }
 0x3dd   :  { %5493 = vmatpush.bf16.msrb.mxu3 %v9399_v43 }
 0x3e0   :  { %5494 = vmatmul.bf16.vlgmr.msrb.gmra.mxu3 %v12491_v14  ;;  %v9959_v14 = vor.u32 %v11426_v1, %v9956_v24  ;;  %v11490_v1 = vld [vmem:[%s12750_s29 + $0x28] sm:$0xff] }
 0x3e1   :  { %5538 = vmatpush.bf16.msra.mxu3 %v10023_v51  ;;  %v5378_v23 = vpop.f32.mrf.mxu2  ;;  %v5287_v26 = vpop.f32.mrf.mxu3  ;;  %v11468_v51 = vld [vmem:[%s12748_s17 + $0xb8] sm:$0xff] }
 0x3e2   :  { %v12570_v15 = vadd.f32 %v5378_v23, %v12545_v39  ;;  %v5288_v35 = vadd.f32 %v5287_v26, %v12542_v12  ;;  %5845 = vmatpush.bf16.msrb.mxu2 %v11468_v51  ;;  %v11471_v26 = vld [vmem:[%s12748_s17 + $0xd0] sm:$0xff] }
 0x3e4   :  { %v5301_v37 = vadd.f32 %v12525_v48, %v5288_v35  ;;  %v11467_v48 = vld [vmem:[%s12748_s17 + $0xb0] sm:$0xff] }
 0x3e5   :  { %5539 = vmatpush.bf16.msra.mxu3 %v10007_v44  ;;  %v11464_v44 = vld [vmem:[%s12748_s17 + $0x98] sm:$0xff]  ;;  %v10304_v35 = vld [vmem:[%s12751_s3 + $0x30] sm:$0xf0] }
 0x3e6   :  { %v5314_v38 = vadd.f32 %v12528_v27, %v5301_v37  ;;  %5846 = vmatpush.bf16.msrb.mxu2 %v11467_v48  ;;  %v11466_v27 = vld [vmem:[%s12748_s17 + $0xa8] sm:$0xff]  ;;  %v11469_v37 = vld [vmem:[%s12748_s17 + $0xc0] sm:$0xff] }
 0x3e8   :  { %5950 = vmatmul.bf16.vlgmr.msra.gmra.mxu0 %v5873_v52  ;;  %v5327_v43 = vadd.f32 %v12549_v21, %v5314_v38  ;;  %v10336_v52 = vld [vmem:[%s12751_s3 + $0x70] sm:$0xf0] }
 0x3e9   :  { %5540 = vmatpush.bf16.msra.mxu3 %v9991_v61  ;;  %v5380_v32 = vpop.f32.mrf.mxu2  ;;  %v5289_v28 = vpop.f32.mrf.mxu3  ;;  %v11492_v61 = vld [vmem:[%s12750_s29 + $0x38] sm:$0xff] }
 0x3ea   :  { %5847 = vmatpush.bf16.msrb.mxu2 %v11466_v27  ;;  %6025 = vmatpush.bf16.msra.mxu1 %v11492_v61  ;;  %v10323_v32 = vor.u32 %v11501_v29, %v10320_v30  ;;  %v11497_v28 = vld [vmem:[%s12751_s3 + $0x24] sm:$0xf]  ;;  %v11511_v29 = vld [vmem:[#allocation10 + $0xc] sm:$0xf0] }
 0x3eb   :  { %v10307_v38 = vor.u32 %v11497_v28, %v10304_v35  ;;  %v11533_v30 = vld [vmem:[#allocation11 + $0x44] sm:$0xf]  ;;  %v10276_v28 = vld [vmem:[#allocation10 + $0x78] sm:$0xf0]  ;;  %v10274_v35 = vld [vmem:[#allocation10 + $0x68] sm:$0xf] }
 0x3ed   :  { %5541 = vmatpush.bf16.msra.mxu3 %v9975_v56 }
 0x3ee   :  { %5848 = vmatpush.bf16.msrb.mxu2 %v11465_v2  ;;  %6026 = vmatpush.bf16.msra.mxu1 %v11491_v62 }
 0x3f0   :  { %v5456_v5 = vpop.f32.mrf.mxu0 }
 0x3f1   :  { %5542 = vmatpush.bf16.msra.mxu3 %v9959_v14  ;;  %v5469_v18 = vpop.f32.mrf.mxu1  ;;  %v5457_v45 = vadd.f32 %v5456_v5, %v3850_v10  ;;  %v11473_v5 = vld [vmem:[%s12748_s17 + $0xe0] sm:$0xff] }
 0x3f2   :  { %5849 = vmatpush.bf16.msrb.mxu2 %v11464_v44  ;;  %6027 = vmatpush.bf16.msra.mxu1 %v11490_v1  ;;  %v10266_v1 = vld [vmem:[#allocation10 + $0x60] sm:$0xf] }
 0x3f3   :  { %v5470_v9 = vadd.f32 %v5469_v18, %v5457_v45  ;;  %v11486_v18 = vld [vmem:[%s12750_s29 + $0x8] sm:$0xff]  ;;  %v11485_v45 = vld [vmem:[%s12750_s29] sm:$0xff] }
 0x3f5   :  { %5543 = vmatpush.bf16.msra.mxu3 %v9943_v13 }
 0x3f6   :  { %5850 = vmatpush.bf16.msrb.mxu2 %v11463_v59  ;;  %6028 = vmatpush.bf16.msra.mxu1 %v11489_v6 }
 0x3f8   :  { %v5458_v34 = vpop.f32.mrf.mxu0 }
 0x3f9   :  { %5544 = vmatpush.bf16.msra.mxu3 %v9927_v22  ;;  %v5471_v39 = vpop.f32.mrf.mxu1  ;;  %v11505_v22 = vld [vmem:[%s12751_s3 + $0x64] sm:$0xf] }
 0x3fa   :  { %5851 = vmatpush.bf16.msrb.mxu2 %v11462_v50 }
 0x3fd   :  { %5545 = vmatpush.bf16.msra.mxu3 %v9911_v31  ;;  %v11470_v31 = vld [vmem:[%s12748_s17 + $0xc8] sm:$0xff] }
 0x3fe   :  { %5852 = vmatpush.bf16.msrb.mxu2 %v11461_v60 }
 0x400   :  { %5546 = vmatmul.bf16.vlgmr.msra.gmra.mxu3 %v12498_v25  ;;  %v5339_v8 = vpop.f32.mrf.mxu3 }
 0x401   :  { %v5340_v11 = vadd.f32 %v5339_v8, %v5327_v43  ;;  %5858 = vmatpush.bf16.msrb.mxu3 %v11476_v3  ;;  %v11493_v43 = vld [vmem:[%s12751_s3 + $0x4] sm:$0xf]  ;;  %v10288_v8 = vld [vmem:[%s12751_s3 + $0x10] sm:$0xf0] }
 0x402   :  { %v10291_v51 = vor.u32 %v11493_v43, %v10288_v8  ;;  %v10252_v3 = vld [vmem:[#allocation10 + $0x50] sm:$0xf0]  ;;  %v11524_v43 = vld [vmem:[#allocation10 + $0x74] sm:$0xf0]  ;;  %v11529_v8 = vld [vmem:[#allocation11 + $0x24] sm:$0xf] }
 0x403   :  { %v5552_v25 = vmax.f32 %v5340_v11, 0.0 }
 0x404   :  { %v5430_v55 = vpop.f32.mrf.mxu2 }
 0x405   :  { %v5556_v12 = vpack.c.bf16 %v5552_v25, %v5552_v25  ;;  %v11678_v25 = vld [vmem:[%s12752_s30] ss:$0 sm:$0xff] }
 0x407   :  { %5840 = vmatmul.bf16.vlgmr.msrb.gmra.mxu1 %v5556_v12 }
 0x408   :  { %v5341_v21 = vpop.f32.mrf.mxu3 }
 0x40c   :  { %v5432_v33 = vpop.f32.mrf.mxu2 }
 0x410   :  { %v12579_v58 = vpop.f32.mrf.mxu0 }
 0x411   :  { %v12581_v4 = vpop.f32.mrf.mxu1 }
 0x418   :  { %v5510_v41 = vpop.f32.mrf.mxu0 }
 0x419   :  { %v5523_v42 = vpop.f32.mrf.mxu1 }
 0x423   :  { %v5391_v46 = vpop.f32.mrf.mxu3 }
 0x424   :  { %v5482_v57 = vpop.f32.mrf.mxu2  ;;  %v5392_v19 = vadd.f32 %v5391_v46, %v12570_v15  ;;  %v11487_v15 = vld [vmem:[%s12750_s29 + $0x10] sm:$0xff] }
 0x425   :  { %v12589_v40 = vadd.f32 %v5482_v57, %v5470_v9  ;;  %v10339_v9 = vor.u32 %v11505_v22, %v10336_v52  ;;  %v3064_v57 = vmax.f32 %v12486_v36, 0.0  ;;  %v10268_v36 = vld [vmem:[#allocation10 + $0x70] sm:$0xf0]  ;;  %v10218_v52 = vld [vmem:[#allocation10] sm:$0xf] }
 0x426   :  { %v5405_v56 = vadd.f32 %v12552_v54, %v5392_v19  ;;  %v11475_v54 = vld [vmem:[%s12748_s17 + $0xf0] sm:$0xff] }
 0x427   :  { %5859 = vmatpush.bf16.msrb.mxu3 %v11475_v54  ;;  %v10220_v22 = vld [vmem:[#allocation10 + $0x10] sm:$0xf0] }
 0x428   :  { %v5418_v0 = vadd.f32 %v12554_v47, %v5405_v56  ;;  %v11488_v47 = vld [vmem:[%s12750_s29 + $0x18] sm:$0xff] }
 0x429   :  { %6029 = vmatpush.bf16.msra.mxu1 %v11488_v47  ;;  %v11513_v47 = vld [vmem:[#allocation10 + $0x24] sm:$0xf] }
 0x42a   :  { %v5431_v24 = vadd.f32 %v5430_v55, %v5418_v0  ;;  %v11521_v0 = vld [vmem:[#allocation10 + $0x64] sm:$0xf] }
 0x42b   :  { %v5393_v7 = vpop.f32.mrf.mxu3  ;;  %5860 = vmatpush.bf16.msrb.mxu3 %v11474_v16  ;;  %v10236_v16 = vld [vmem:[#allocation10 + $0x30] sm:$0xf0] }
 0x42c   :  { %v5484_v63 = vpop.f32.mrf.mxu2 }
 0x42d   :  { %6030 = vmatpush.bf16.msra.mxu1 %v11487_v15  ;;  %v11515_v15 = vld [vmem:[#allocation10 + $0x2c] sm:$0xf0] }
 0x42f   :  { %5861 = vmatpush.bf16.msrb.mxu3 %v11473_v5  ;;  %v11537_v5 = vld [vmem:[#allocation11 + $0x64] sm:$0xf] }
 0x431   :  { %6031 = vmatpush.bf16.msra.mxu1 %v11486_v18 }
 0x433   :  { %5862 = vmatpush.bf16.msrb.mxu3 %v11472_v20  ;;  %v10404_v20 = vld [vmem:[#allocation11 + $0x70] sm:$0xf0] }
 0x435   :  { %6032 = vmatpush.bf16.msra.mxu1 %v11485_v45  ;;  %v10407_v45 = vor.u32 %v11537_v5, %v10404_v20  ;;  %v10342_v5 = vld [vmem:[%s12751_s3 + $0x68] sm:$0xf] }
 0x437   :  { %5863 = vmatpush.bf16.msrb.mxu3 %v11471_v26  ;;  %v11509_v26 = vld [vmem:[#allocation10 + $0x4] sm:$0xf] }
 0x439   :  { %6309 = vmatpush.bf16.msrb.mxu1 %v10339_v9  ;;  %v10223_v9 = vor.u32 %v11509_v26, %v10220_v22  ;;  %v10318_v22 = vld [vmem:[%s12751_s3 + $0x40] sm:$0xf] }
 0x43b   :  { %5864 = vmatpush.bf16.msrb.mxu3 %v11470_v31  ;;  %v10388_v31 = vld [vmem:[#allocation11 + $0x50] sm:$0xf0] }
 0x43d   :  { %6310 = vmatpush.bf16.msrb.mxu1 %v10323_v32  ;;  %v10219_v32 = vor.u32 %v11511_v29, %v10218_v52  ;;  %v11503_v29 = vld [vmem:[%s12751_s3 + $0x4c] sm:$0xf0] }
 0x43f   :  { %5865 = vmatpush.bf16.msrb.mxu3 %v11469_v37  ;;  %v11679_v37 = vld [vmem:[%s12754_s22] ss:$0 sm:$0xff] }
 0x441   :  { %6311 = vmatpush.bf16.msrb.mxu1 %v10307_v38 }
 0x443   :  { %v5443_v14 = vpop.f32.mrf.mxu3 }
 0x444   :  { %v12598_v53 = vpop.f32.mrf.mxu2  ;;  %v5444_v10 = vadd.f32 %v5443_v14, %v5431_v24  ;;  %v10271_v24 = vor.u32 %v11521_v0, %v10268_v36  ;;  %v11523_v14 = vld [vmem:[#allocation10 + $0x6c] sm:$0xf0]  ;;  %v11512_v0 = vld [vmem:[#allocation10 + $0x14] sm:$0xf0] }
 0x445   :  { %6312 = vmatpush.bf16.msrb.mxu1 %v10291_v51  ;;  %v10267_v6 = vor.u32 %v11523_v14, %v10266_v1  ;;  %v10372_v51 = vld [vmem:[#allocation11 + $0x30] sm:$0xf0] }
 0x446   :  { %v5553_v13 = vmax.f32 %v5444_v10, 0.0  ;;  %v10250_v10 = vld [vmem:[#allocation10 + $0x40] sm:$0xf]  ;;  %6174 = vmatpush.bf16.msra.mxu3 %v10271_v24 }
 0x447   :  { %6161 = vmatpush.bf16.msra.mxu2 %v10267_v6 }
 0x448   :  { %v5557_v23 = vpack.c.bf16 %v5553_v13, %v5553_v13  ;;  %v11519_v13 = vld [vmem:[#allocation10 + $0x4c] sm:$0xf0] }
 0x449   :  { %v10251_v54 = vor.u32 %v11519_v13, %v10250_v10  ;;  %v10386_v13 = vld [vmem:[#allocation11 + $0x40] sm:$0xf] }
 0x44a   :  { %5853 = vmatmul.bf16.vlgmr.msrb.gmra.mxu2 %v5557_v23 }
 0x44b   :  { %v5445_v17 = vpop.f32.mrf.mxu3  ;;  %6162 = vmatpush.bf16.msra.mxu2 %v10251_v54 }
 0x44c   :  { %v5536_v49 = vpop.f32.mrf.mxu2  ;;  %v10239_v17 = vor.u32 %v11513_v47, %v10236_v16 }
 0x44d   :  { %v10234_v49 = vld [vmem:[#allocation10 + $0x20] sm:$0xf] }
 0x44e   :  { %v10235_v18 = vor.u32 %v11515_v15, %v10234_v49  ;;  %v11507_v15 = vld [vmem:[%s12751_s3 + $0x6c] sm:$0xf0] }
 0x450   :  { %6163 = vmatpush.bf16.msra.mxu2 %v10235_v18  ;;  %v11508_v18 = vld [vmem:[%s12751_s3 + $0x74] sm:$0xf0] }
 0x451   :  { %v10343_v26 = vor.u32 %v11508_v18, %v10342_v5  ;;  %v10542_v5 = vld [vmem:[#allocation13 + $0xf0] sm:$0xf]  ;;  %v11572_v18 = vld [vmem:[#allocation13 + $0xf4] sm:$0xf0] }
 0x454   :  { %6164 = vmatpush.bf16.msra.mxu2 %v10219_v32  ;;  %v10319_v32 = vor.u32 %v11503_v29, %v10318_v22  ;;  %v11570_v22 = vld [vmem:[#allocation13 + $0xe4] sm:$0xf0] }
 0x455   :  { %v5828_v39 = vpop.f32.mrf.mxu0 }
 0x45d   :  { %v5830_v55 = vpop.f32.mrf.mxu0 }
 0x45e   :  { %v10375_v55 = vor.u32 %v11529_v8, %v10372_v51  ;;  %v10354_v8 = vld [vmem:[#allocation11] sm:$0xf]  ;;  %v11527_v51 = vld [vmem:[#allocation11 + $0xc] sm:$0xf0] }
 0x463   :  { %v5495_v34 = vpop.f32.mrf.mxu3 }
 0x464   :  { %v5496_v12 = vadd.f32 %v5495_v34, %v12589_v40  ;;  %v12627_v40 = vpack.c.bf16 %v3064_v57, %v3064_v57  ;;  %v10391_v34 = vor.u32 %v11533_v30, %v10388_v31  ;;  %v10370_v30 = vld [vmem:[#allocation11 + $0x20] sm:$0xf] }
 0x465   :  { %v5951_v48 = vpop.f32.mrf.mxu0 }
 0x466   :  { %v5952_v27 = vadd.f32 %v11678_v25, %v5951_v48  ;;  %v5509_v33 = vadd.f32 %v12579_v58, %v5496_v12  ;;  %v11677_v58 = vld [vmem:[%s12753_s14] ss:$0 sm:$0xff]  ;;  %v11518_v25 = vld [vmem:[#allocation10 + $0x4c] sm:$0xf]  ;;  %v10258_v48 = vld [vmem:[#allocation10 + $0x48] sm:$0xf] }
 0x467   :  { %v5829_v62 = vadd.f32 %v11677_v58, %v5828_v39  ;;  %v11522_v39 = vld [vmem:[#allocation10 + $0x6c] sm:$0xf]  ;;  %v10260_v12 = vld [vmem:[#allocation10 + $0x58] sm:$0xf0] }
 0x468   :  { %v5955_v21 = vmax.f32 %v5952_v27, 0.0  ;;  %v5522_v42 = vadd.f32 %v12581_v4, %v5509_v33  ;;  %v10279_v38 = vor.u32 %v11522_v39, %v10276_v28  ;;  %v10263_v27 = vor.u32 %v11518_v25, %v10260_v12  ;;  %v11525_v33 = vld [vmem:[#allocation11 + $0x4] sm:$0xf]  ;;  %v10302_v39 = vld [vmem:[%s12751_s3 + $0x20] sm:$0xf] }
 0x469   :  { %v11499_v28 = vld [vmem:[%s12751_s3 + $0x2c] sm:$0xf0]  ;;  %v10286_v12 = vld [vmem:[%s12751_s3] sm:$0xf] }
 0x46a   :  { %v5956_v41 = vpack.c.bf16 %v5955_v21, %v5955_v21  ;;  %v5535_v44 = vadd.f32 %v12598_v53, %v5522_v42  ;;  %v11517_v53 = vld [vmem:[#allocation10 + $0x44] sm:$0xf]  ;;  %v11520_v21 = vld [vmem:[#allocation10 + $0x54] sm:$0xf0] }
 0x46b   :  { %v5497_v11 = vpop.f32.mrf.mxu3  ;;  %v10255_v23 = vor.u32 %v11517_v53, %v10252_v3  ;;  %v10259_v42 = vor.u32 %v11520_v21, %v10258_v48  ;;  %v10402_v53 = vld [vmem:[#allocation11 + $0x60] sm:$0xf]  ;;  %v11539_v3 = vld [vmem:[#allocation11 + $0x6c] sm:$0xf0]  ;;  %v11496_v21 = vld [vmem:[%s12751_s3 + $0x14] sm:$0xf0] }
 0x46c   :  { %6033 = vmatmul.bf16.vlgmr.msra.gmra.mxu1 %v5956_v41  ;;  %v10275_v11 = vor.u32 %v11524_v43, %v10274_v35  ;;  %v10356_v41 = vld [vmem:[#allocation11 + $0x10] sm:$0xf0]  ;;  %v10403_v6 = vor.u32 %v11539_v3, %v10402_v53  ;;  %v11531_v35 = vld [vmem:[#allocation11 + $0x2c] sm:$0xf0]  ;;  %v11494_v53 = vld [vmem:[%s12751_s3 + $0xc] sm:$0xf] }
 0x46d   :  { %v5953_v2 = vpop.f32.mrf.mxu0  ;;  %6175 = vmatpush.bf16.msra.mxu3 %v10255_v23  ;;  %6461 = vmatpush.bf16.msra.mxu1 %v10407_v45  ;;  %v11535_v23 = vld [vmem:[#allocation11 + $0x4c] sm:$0xf0]  ;;  %v10371_v43 = vor.u32 %v11531_v35, %v10370_v30  ;;  %v10296_v3 = vld [vmem:[%s12751_s3 + $0x18] sm:$0xf0] }
 0x46e   :  { %6187 = vmatpush.bf16.msrb.mxu2 %v10275_v11  ;;  %v10359_v2 = vor.u32 %v11525_v33, %v10356_v41  ;;  %6448 = vmatpush.bf16.msrb.mxu0 %v10403_v6  ;;  %v10387_v54 = vor.u32 %v11535_v23, %v10386_v13  ;;  %v10355_v11 = vor.u32 %v11527_v51, %v10354_v8  ;;  %v11495_v48 = vld [vmem:[%s12751_s3 + $0xc] sm:$0xf0]  ;;  %v10362_v6 = vld [vmem:[#allocation11 + $0x8] sm:$0xf]  ;;  %v11528_v13 = vld [vmem:[#allocation11 + $0x14] sm:$0xf0] }
 0x46f   :  { %v10287_v33 = vor.u32 %v11495_v48, %v10286_v12  ;;  %v10299_v23 = vor.u32 %v11494_v53, %v10296_v3  ;;  %v10510_v51 = vld [vmem:[#allocation13 + $0xb0] sm:$0xf]  ;;  %v11562_v12 = vld [vmem:[#allocation13 + $0xa4] sm:$0xf0]  ;;  %v10454_v3 = vld [vmem:[#allocation13 + $0x40] sm:$0xf] }
 0x471   :  { %6176 = vmatpush.bf16.msra.mxu3 %v10239_v17  ;;  %6462 = vmatpush.bf16.msra.mxu1 %v10391_v34  ;;  %v10334_v17 = vld [vmem:[%s12751_s3 + $0x60] sm:$0xf] }
 0x472   :  { %6188 = vmatpush.bf16.msrb.mxu2 %v10259_v42  ;;  %6449 = vmatpush.bf16.msrb.mxu0 %v10387_v54  ;;  %v10335_v45 = vor.u32 %v11507_v15, %v10334_v17  ;;  %v11506_v42 = vld [vmem:[%s12751_s3 + $0x6c] sm:$0xf]  ;;  %v10363_v54 = vor.u32 %v11528_v13, %v10362_v6  ;;  %v10396_v15 = vld [vmem:[#allocation11 + $0x58] sm:$0xf0] }
 0x473   :  { %v11550_v6 = vld [vmem:[#allocation13 + $0x44] sm:$0xf0] }
 0x474   :  { %v10455_v13 = vor.u32 %v11550_v6, %v10454_v3 }
 0x475   :  { %6177 = vmatpush.bf16.msra.mxu3 %v10223_v9  ;;  %6463 = vmatpush.bf16.msra.mxu1 %v10375_v55  ;;  %v10303_v55 = vor.u32 %v11499_v28, %v10302_v39  ;;  %v11556_v39 = vld [vmem:[#allocation13 + $0x74] sm:$0xf0] }
 0x476   :  { %6450 = vmatpush.bf16.msrb.mxu0 %v10371_v43 }
 0x479   :  { %6464 = vmatpush.bf16.msra.mxu1 %v10359_v2  ;;  %v10344_v2 = vld [vmem:[%s12751_s3 + $0x78] sm:$0xf0] }
 0x47a   :  { %6451 = vmatpush.bf16.msrb.mxu0 %v10355_v11  ;;  %v11564_v11 = vld [vmem:[#allocation13 + $0xb4] sm:$0xf0] }
 0x47c   :  { %10349 = vmatmul.msk.bf16.vlgmr.msrb.gmra.mxu1 %vm6153_vm0, %v12627_v40 }
 0x483   :  { %v5547_v59 = vpop.f32.mrf.mxu3 }
 0x484   :  { %v5548_v50 = vadd.f32 %v5547_v59, %v5535_v44  ;;  %v5841_v4 = vpop.f32.mrf.mxu1  ;;  %v11514_v44 = vld [vmem:[#allocation10 + $0x2c] sm:$0xf]  ;;  %v10244_v59 = vld [vmem:[#allocation10 + $0x38] sm:$0xf0] }
 0x485   :  { %v12632_v7 = vadd.f32 %v5841_v4, %v5829_v62  ;;  %v11510_v62 = vld [vmem:[#allocation10 + $0xc] sm:$0xf]  ;;  %v10228_v4 = vld [vmem:[#allocation10 + $0x18] sm:$0xf0] }
 0x486   :  { %v5554_v46 = vmax.f32 %v5548_v50, 0.0  ;;  %v10242_v50 = vld [vmem:[#allocation10 + $0x28] sm:$0xf]  ;;  %v10231_v1 = vor.u32 %v11510_v62, %v10228_v4 }
 0x488   :  { %v5558_v60 = vpack.c.bf16 %v5554_v46, %v5554_v46  ;;  %v11516_v46 = vld [vmem:[#allocation10 + $0x34] sm:$0xf0] }
 0x489   :  { %v10243_v58 = vor.u32 %v11516_v46, %v10242_v50  ;;  %v10347_v50 = vor.u32 %v11506_v42, %v10344_v2  ;;  %v11558_v42 = vld [vmem:[#allocation13 + $0x84] sm:$0xf0]  ;;  %v11571_v2 = vld [vmem:[#allocation13 + $0xf4] sm:$0xf] }
 0x48a   :  { %5866 = vmatmul.bf16.vlgmr.msrb.gmra.mxu3 %v5558_v60 }
 0x48b   :  { %v5549_v61 = vpop.f32.mrf.mxu3  ;;  %6200 = vmatpush.bf16.msrb.mxu3 %v10279_v38  ;;  %6189 = vmatpush.bf16.msrb.mxu2 %v10243_v58  ;;  %v11500_v38 = vld [vmem:[%s12751_s3 + $0x34] sm:$0xf0] }
 0x48c   :  { %v5843_v63 = vpop.f32.mrf.mxu1  ;;  %v10247_v61 = vor.u32 %v11514_v44, %v10244_v59  ;;  %v10410_v44 = vld [vmem:[#allocation11 + $0x68] sm:$0xf]  ;;  %v11540_v59 = vld [vmem:[#allocation11 + $0x74] sm:$0xf0] }
 0x48d   :  { %v10411_v46 = vor.u32 %v11540_v59, %v10410_v44  ;;  %v11536_v58 = vld [vmem:[#allocation11 + $0x54] sm:$0xf0]  ;;  %v10544_v44 = vld [vmem:[#allocation13 + $0xf8] sm:$0xf0] }
 0x48f   :  { %6201 = vmatpush.bf16.msrb.mxu3 %v10263_v27  ;;  %v10294_v27 = vld [vmem:[%s12751_s3 + $0x8] sm:$0xf] }
 0x490   :  { %v10295_v41 = vor.u32 %v11496_v21, %v10294_v27  ;;  %v10494_v27 = vld [vmem:[#allocation13 + $0x90] sm:$0xf]  ;;  %v11560_v21 = vld [vmem:[#allocation13 + $0x94] sm:$0xf0] }
 0x493   :  { %6202 = vmatpush.bf16.msrb.mxu3 %v10247_v61  ;;  %v10394_v61 = vld [vmem:[#allocation11 + $0x48] sm:$0xf] }
 0x494   :  { %v10395_v4 = vor.u32 %v11536_v58, %v10394_v61  ;;  %v11554_v61 = vld [vmem:[#allocation13 + $0x64] sm:$0xf0] }
 0x497   :  { %6203 = vmatpush.bf16.msrb.mxu3 %v10231_v1  ;;  %v11532_v1 = vld [vmem:[#allocation11 + $0x34] sm:$0xf0] }
 0x4cd   :  { %v12634_v19 = vpop.f32.mrf.mxu2 }
 0x4ce   :  { %v5855_v47 = vadd.f32 %v12634_v19, %v12632_v7  ;;  %v10326_v7 = vld [vmem:[%s12751_s3 + $0x48] sm:$0xf]  ;;  %v11504_v19 = vld [vmem:[%s12751_s3 + $0x54] sm:$0xf0] }
 0x4cf   :  { %v10327_v34 = vor.u32 %v11504_v19, %v10326_v7  ;;  %v10526_v7 = vld [vmem:[#allocation13 + $0xd0] sm:$0xf]  ;;  %v11568_v19 = vld [vmem:[#allocation13 + $0xd4] sm:$0xf0] }
 0x4d0   :  { %v10527_v28 = vor.u32 %v11568_v19, %v10526_v7  ;;  %v11546_v19 = vld [vmem:[#allocation13 + $0x24] sm:$0xf0] }
 0x4d5   :  { %v5856_v56 = vpop.f32.mrf.mxu2 }
 0x4d6   :  { %v10226_v56 = vld [vmem:[#allocation10 + $0x8] sm:$0xf] }
 0x4d7   :  { %v10227_v24 = vor.u32 %v11512_v0, %v10226_v56  ;;  %v10312_v56 = vld [vmem:[%s12751_s3 + $0x38] sm:$0xf0]  ;;  %v10378_v0 = vld [vmem:[#allocation11 + $0x28] sm:$0xf] }
 0x4d9   :  { %6190 = vmatpush.bf16.msrb.mxu2 %v10227_v24 }
 0x4e9   :  { %v6034_v57 = vpop.f32.mrf.mxu1 }
 0x4ea   :  { %v6035_v60 = vadd.f32 %v11679_v37, %v6034_v57  ;;  %v10310_v37 = vld [vmem:[%s12751_s3 + $0x28] sm:$0xf]  ;;  %v11502_v57 = vld [vmem:[%s12751_s3 + $0x4c] sm:$0xf] }
 0x4eb   :  { %v10311_v25 = vor.u32 %v11500_v38, %v10310_v37  ;;  %v10518_v37 = vld [vmem:[#allocation13 + $0xc0] sm:$0xf]  ;;  %v11566_v38 = vld [vmem:[#allocation13 + $0xc4] sm:$0xf0] }
 0x4ec   :  { %v6038_v63 = vmax.f32 %v6035_v60, 0.0  ;;  %v10328_v60 = vld [vmem:[%s12751_s3 + $0x58] sm:$0xf0]  ;;  %v10519_v8 = vor.u32 %v11566_v38, %v10518_v37 }
 0x4ed   :  { %v10331_v62 = vor.u32 %v11502_v57, %v10328_v60  ;;  %v10470_v60 = vld [vmem:[#allocation13 + $0x60] sm:$0xf]  ;;  %v11544_v38 = vld [vmem:[#allocation13 + $0x14] sm:$0xf0] }
 0x4ee   :  { %v12637_v36 = vpack.c.bf16 %v6038_v63, %v6038_v63  ;;  %v11498_v63 = vld [vmem:[%s12751_s3 + $0x2c] sm:$0xf]  ;;  %v10471_v58 = vor.u32 %v11554_v61, %v10470_v60  ;;  %v11553_v60 = vld [vmem:[#allocation13 + $0x64] sm:$0xf] }
 0x4ef   :  { %v10315_v24 = vor.u32 %v11498_v63, %v10312_v56  ;;  %v10462_v56 = vld [vmem:[#allocation13 + $0x50] sm:$0xf]  ;;  %v10472_v61 = vld [vmem:[#allocation13 + $0x68] sm:$0xf0] }
 0x4f0   :  { %10417 = vmatmul.msk.bf16.vlgmr.msra.gmra.mxu1 %vm6153_vm0, %v12637_v36  ;;  %10416 = vmatmul.msk.bf16.vlgmr.msrb.gmra.mxu0 %vm6153_vm0, %v12637_v36 }
 0x4f1   :  { %v6036_v14 = vpop.f32.mrf.mxu1 }
 0x4f2   :  { %v10379_v14 = vor.u32 %v11532_v1, %v10378_v0  ;;  %v11552_v0 = vld [vmem:[#allocation13 + $0x54] sm:$0xf0] }
 0x4f9   :  { %v12641_v10 = vpop.f32.mrf.mxu1 }
 0x501   :  { %v6316_v9 = vpop.f32.mrf.mxu1 }
 0x502   :  { %v10380_v9 = vld [vmem:[#allocation11 + $0x38] sm:$0xf0] }
 0x50d   :  { %v5867_v16 = vpop.f32.mrf.mxu3 }
 0x50e   :  { %v5868_v49 = vadd.f32 %v5867_v16, %v5855_v47  ;;  %v11538_v47 = vld [vmem:[#allocation11 + $0x6c] sm:$0xf]  ;;  %v10412_v16 = vld [vmem:[#allocation11 + $0x78] sm:$0xf0] }
 0x50f   :  { %v10415_v17 = vor.u32 %v11538_v47, %v10412_v16  ;;  %v10606_v47 = vld [vmem:[#allocation13 + $0x170] sm:$0xf] }
 0x510   :  { %v5871_v20 = vmax.f32 %v5868_v49, 0.0  ;;  %v11534_v49 = vld [vmem:[#allocation11 + $0x4c] sm:$0xf] }
 0x512   :  { %v6056_v52 = vpack.c.bf16 %v5871_v20, %v5871_v20  ;;  %v10534_v20 = vld [vmem:[#allocation13 + $0xe0] sm:$0xf] }
 0x513   :  { %v10535_v29 = vor.u32 %v11570_v22, %v10534_v20  ;;  %v11561_v20 = vld [vmem:[#allocation13 + $0xa4] sm:$0xf] }
 0x514   :  { %10280 = vmatmul.msk.bf16.vlgmr.msra.gmra.mxu2 %vm6153_vm0, %v6056_v52  ;;  %10281 = vmatmul.msk.bf16.vlgmr.msra.gmra.mxu3 %vm6153_vm0, %v6056_v52 }
 0x515   :  { %v5869_v31 = vpop.f32.mrf.mxu3  ;;  %6296 = vmatpush.bf16.msra.mxu3 %v10335_v45  ;;  %6322 = vmatpush.bf16.msra.mxu2 %v10343_v26  ;;  %v10399_v45 = vor.u32 %v11534_v49, %v10396_v15  ;;  %v10543_v26 = vor.u32 %v11572_v18, %v10542_v5  ;;  %v10446_v49 = vld [vmem:[#allocation13 + $0x30] sm:$0xf]  ;;  %v11548_v15 = vld [vmem:[#allocation13 + $0x34] sm:$0xf0] }
 0x516   :  { %v11526_v31 = vld [vmem:[#allocation11 + $0xc] sm:$0xf]  ;;  %v10447_v18 = vor.u32 %v11548_v15, %v10446_v49 }
 0x517   :  { %6925 = vmatpush.bf16.msrb.mxu1 %v10543_v26 }
 0x519   :  { %6297 = vmatpush.bf16.msra.mxu3 %v10319_v32  ;;  %6323 = vmatpush.bf16.msra.mxu2 %v10327_v34  ;;  %v10364_v32 = vld [vmem:[#allocation11 + $0x18] sm:$0xf0]  ;;  %v10478_v34 = vld [vmem:[#allocation13 + $0x70] sm:$0xf] }
 0x51a   :  { %v10479_v35 = vor.u32 %v11556_v39, %v10478_v34  ;;  %v10367_v43 = vor.u32 %v11526_v31, %v10364_v32  ;;  %v10496_v31 = vld [vmem:[#allocation13 + $0x98] sm:$0xf0]  ;;  %v10590_v39 = vld [vmem:[#allocation13 + $0x150] sm:$0xf] }
 0x51b   :  { %6926 = vmatpush.bf16.msrb.mxu1 %v10535_v29  ;;  %v10438_v29 = vld [vmem:[#allocation13 + $0x20] sm:$0xf] }
 0x51c   :  { %6912 = vmatpush.bf16.msra.mxu0 %v10479_v35  ;;  %v10439_v32 = vor.u32 %v11546_v19, %v10438_v29  ;;  %v10430_v35 = vld [vmem:[#allocation13 + $0x10] sm:$0xf]  ;;  %v11574_v29 = vld [vmem:[#allocation13 + $0x104] sm:$0xf0] }
 0x51d   :  { %6298 = vmatpush.bf16.msra.mxu3 %v10303_v55  ;;  %6324 = vmatpush.bf16.msra.mxu2 %v10311_v25  ;;  %v10511_v55 = vor.u32 %v11564_v11, %v10510_v51  ;;  %v10502_v25 = vld [vmem:[#allocation13 + $0xa0] sm:$0xf]  ;;  %v10488_v51 = vld [vmem:[#allocation13 + $0x88] sm:$0xf0] }
 0x51e   :  { %v10503_v48 = vor.u32 %v11562_v12, %v10502_v25  ;;  %v11582_v25 = vld [vmem:[#allocation13 + $0x144] sm:$0xf0]  ;;  %v10422_v12 = vld [vmem:[#allocation13] sm:$0xf] }
 0x51f   :  { %6927 = vmatpush.bf16.msrb.mxu1 %v10527_v28  ;;  %v11584_v28 = vld [vmem:[#allocation13 + $0x154] sm:$0xf0] }
 0x520   :  { %6913 = vmatpush.bf16.msra.mxu0 %v10471_v58  ;;  %v10591_v37 = vor.u32 %v11584_v28, %v10590_v39 }
 0x521   :  { %6299 = vmatpush.bf16.msra.mxu3 %v10287_v33  ;;  %6325 = vmatpush.bf16.msra.mxu2 %v10295_v41  ;;  %v10495_v33 = vor.u32 %v11560_v21, %v10494_v27  ;;  %v10486_v41 = vld [vmem:[#allocation13 + $0x80] sm:$0xf]  ;;  %v11542_v27 = vld [vmem:[#allocation13 + $0x4] sm:$0xf0] }
 0x522   :  { %v10487_v59 = vor.u32 %v11558_v42, %v10486_v41  ;;  %v10423_v21 = vor.u32 %v11542_v27, %v10422_v12  ;;  %v10480_v41 = vld [vmem:[#allocation13 + $0x78] sm:$0xf0]  ;;  %v10574_v42 = vld [vmem:[#allocation13 + $0x130] sm:$0xf]  ;;  %v10440_v27 = vld [vmem:[#allocation13 + $0x28] sm:$0xf0] }
 0x523   :  { %6928 = vmatpush.bf16.msrb.mxu1 %v10519_v8  ;;  %v11557_v8 = vld [vmem:[#allocation13 + $0x84] sm:$0xf] }
 0x524   :  { %10282 = vmatmul.msk.bf16.vlgmr.msrb.gmra.mxu2 %vm6153_vm0, %v6056_v52  ;;  %10283 = vmatmul.msk.bf16.vlgmr.msrb.gmra.mxu3 %vm6153_vm0, %v6056_v52  ;;  %v11530_v52 = vld [vmem:[#allocation11 + $0x2c] sm:$0xf]  ;;  %v10491_v11 = vor.u32 %v11557_v8, %v10488_v51  ;;  %v11596_v8 = vld [vmem:[#allocation13 + $0x1b4] sm:$0xf0]  ;;  %v11585_v51 = vld [vmem:[#allocation13 + $0x164] sm:$0xf] }
 0x525   :  { %6335 = vmatpush.bf16.msrb.mxu3 %v10347_v50  ;;  %6474 = vmatpush.bf16.msrb.mxu2 %v10411_v46  ;;  %v10383_v30 = vor.u32 %v11530_v52, %v10380_v9  ;;  %v10547_v50 = vor.u32 %v11571_v2, %v10544_v44  ;;  %v10536_v46 = vld [vmem:[#allocation13 + $0xe8] sm:$0xf0]  ;;  %v10598_v52 = vld [vmem:[#allocation13 + $0x160] sm:$0xf]  ;;  %v11586_v9 = vld [vmem:[#allocation13 + $0x164] sm:$0xf0] }
 0x526   :  { %v10599_v7 = vor.u32 %v11586_v9, %v10598_v52  ;;  %v11580_v44 = vld [vmem:[#allocation13 + $0x134] sm:$0xf0]  ;;  %v10550_v9 = vld [vmem:[#allocation13 + $0x100] sm:$0xf] }
 0x527   :  { %6929 = vmatpush.bf16.msrb.mxu1 %v10511_v55  ;;  %v10582_v55 = vld [vmem:[#allocation13 + $0x140] sm:$0xf] }
 0x529   :  { %6336 = vmatpush.bf16.msrb.mxu3 %v10331_v62  ;;  %6475 = vmatpush.bf16.msrb.mxu2 %v10395_v4  ;;  %v11567_v62 = vld [vmem:[#allocation13 + $0xd4] sm:$0xf]  ;;  %v10528_v4 = vld [vmem:[#allocation13 + $0xd8] sm:$0xf0] }
 0x52a   :  { %v10531_v63 = vor.u32 %v11567_v62, %v10528_v4  ;;  %v10475_v4 = vor.u32 %v11553_v60, %v10472_v61  ;;  %v10432_v60 = vld [vmem:[#allocation13 + $0x18] sm:$0xf0] }
 0x52b   :  { %6930 = vmatpush.bf16.msrb.mxu1 %v10503_v48  ;;  %v10583_v48 = vor.u32 %v11582_v25, %v10582_v55 }
 0x52d   :  { %6337 = vmatpush.bf16.msrb.mxu3 %v10315_v24  ;;  %6476 = vmatpush.bf16.msrb.mxu2 %v10379_v14  ;;  %v10463_v24 = vor.u32 %v11552_v0, %v10462_v56  ;;  %v11565_v14 = vld [vmem:[#allocation13 + $0xc4] sm:$0xf]  ;;  %v11578_v56 = vld [vmem:[#allocation13 + $0x124] sm:$0xf0]  ;;  %v10662_v0 = vld [vmem:[#allocation13 + $0x1e0] sm:$0xf] }
 0x52f   :  { %6931 = vmatpush.bf16.msrb.mxu1 %v10495_v33  ;;  %6914 = vmatpush.bf16.msra.mxu0 %v10463_v24  ;;  %v11555_v33 = vld [vmem:[#allocation13 + $0x74] sm:$0xf] }
 0x530   :  { %v10483_v2 = vor.u32 %v11555_v33, %v10480_v41 }
 0x531   :  { %6338 = vmatpush.bf16.msrb.mxu3 %v10299_v23  ;;  %6477 = vmatpush.bf16.msrb.mxu2 %v10363_v54  ;;  %v11563_v23 = vld [vmem:[#allocation13 + $0xb4] sm:$0xf]  ;;  %v10512_v54 = vld [vmem:[#allocation13 + $0xb8] sm:$0xf0] }
 0x532   :  { %v10515_v16 = vor.u32 %v11563_v23, %v10512_v54  ;;  %v10464_v23 = vld [vmem:[#allocation13 + $0x58] sm:$0xf0] }
 0x533   :  { %6932 = vmatpush.bf16.msrb.mxu1 %v10487_v59  ;;  %6915 = vmatpush.bf16.msra.mxu0 %v10455_v13  ;;  %v10670_v59 = vld [vmem:[#allocation13 + $0x1f0] sm:$0xf]  ;;  %v11551_v13 = vld [vmem:[#allocation13 + $0x54] sm:$0xf] }
 0x534   :  { %10348 = vmatmul.msk.bf16.vlgmr.msra.gmra.mxu3 %vm6153_vm0, %v12627_v40  ;;  %10350 = vmatmul.msk.bf16.vlgmr.msra.gmra.mxu2 %vm6153_vm0, %v12627_v40  ;;  %v10467_v54 = vor.u32 %v11551_v13, %v10464_v23  ;;  %v10614_v13 = vld [vmem:[#allocation13 + $0x180] sm:$0xf]  ;;  %v11590_v23 = vld [vmem:[#allocation13 + $0x184] sm:$0xf0] }
 0x535   :  { %6487 = vmatpush.bf16.msra.mxu3 %v10415_v17  ;;  %v11588_v17 = vld [vmem:[#allocation13 + $0x174] sm:$0xf0] }
 0x536   :  { %v10607_v5 = vor.u32 %v11588_v17, %v10606_v47  ;;  %v10558_v47 = vld [vmem:[#allocation13 + $0x110] sm:$0xf] }
 0x537   :  { %6977 = vmatpush.bf16.msra.mxu1 %v10547_v50  ;;  %6916 = vmatpush.bf16.msra.mxu0 %v10447_v18  ;;  %v11604_v50 = vld [vmem:[#allocation13 + $0x1f4] sm:$0xf0]  ;;  %v10654_v17 = vld [vmem:[#allocation13 + $0x1d0] sm:$0xf] }
 0x538   :  { %6938 = vmatpush.bf16.msra.mxu2 %v10607_v5  ;;  %v11600_v5 = vld [vmem:[#allocation13 + $0x1d4] sm:$0xf0] }
 0x539   :  { %6488 = vmatpush.bf16.msra.mxu3 %v10399_v45  ;;  %v10504_v45 = vld [vmem:[#allocation13 + $0xa8] sm:$0xf0]  ;;  %v10655_v18 = vor.u32 %v11600_v5, %v10654_v17  ;;  %v11603_v17 = vld [vmem:[#allocation13 + $0x1f4] sm:$0xf] }
 0x53a   :  { %v10507_v22 = vor.u32 %v11561_v20, %v10504_v45  ;;  %v11549_v45 = vld [vmem:[#allocation13 + $0x44] sm:$0xf] }
 0x53b   :  { %6917 = vmatpush.bf16.msra.mxu0 %v10439_v32  ;;  %v11587_v32 = vld [vmem:[#allocation13 + $0x174] sm:$0xf] }
 0x53c   :  { %6939 = vmatpush.bf16.msra.mxu2 %v10599_v7  ;;  %v10646_v7 = vld [vmem:[#allocation13 + $0x1c0] sm:$0xf] }
 0x53d   :  { %6489 = vmatpush.bf16.msra.mxu3 %v10383_v30  ;;  %v11559_v30 = vld [vmem:[#allocation13 + $0x94] sm:$0xf] }
 0x53e   :  { %v10499_v34 = vor.u32 %v11559_v30, %v10496_v31  ;;  %v10551_v30 = vor.u32 %v11574_v29, %v10550_v9  ;;  %v11598_v31 = vld [vmem:[#allocation13 + $0x1c4] sm:$0xf0] }
 0x53f   :  { %v10647_v39 = vor.u32 %v11598_v31, %v10646_v7 }
 0x540   :  { %6940 = vmatpush.bf16.msra.mxu2 %v10591_v37  ;;  %v10448_v37 = vld [vmem:[#allocation13 + $0x38] sm:$0xf0] }
 0x541   :  { %6490 = vmatpush.bf16.msra.mxu3 %v10367_v43  ;;  %v10431_v43 = vor.u32 %v11544_v38, %v10430_v35  ;;  %v11547_v35 = vld [vmem:[#allocation13 + $0x34] sm:$0xf]  ;;  %v10638_v38 = vld [vmem:[#allocation13 + $0x1b0] sm:$0xf] }
 0x542   :  { %v10639_v55 = vor.u32 %v11596_v8, %v10638_v38  ;;  %v10552_v38 = vld [vmem:[#allocation13 + $0x108] sm:$0xf0] }
 0x543   :  { %6918 = vmatpush.bf16.msra.mxu0 %v10431_v43  ;;  %v10451_v43 = vor.u32 %v11547_v35, %v10448_v37  ;;  %v11573_v37 = vld [vmem:[#allocation13 + $0x104] sm:$0xf] }
 0x544   :  { %10351 = vmatmul.msk.bf16.vlgmr.msrb.gmra.mxu3 %vm6153_vm0, %v12627_v40  ;;  %10418 = vmatmul.msk.bf16.vlgmr.msrb.gmra.mxu2 %vm6153_vm0, %v12637_v36  ;;  %v11569_v40 = vld [vmem:[#allocation13 + $0xe4] sm:$0xf]  ;;  %v10555_v8 = vor.u32 %v11573_v37, %v10552_v38 }
 0x545   :  { %v10539_v57 = vor.u32 %v11569_v40, %v10536_v46  ;;  %6941 = vmatpush.bf16.msra.mxu2 %v10583_v48  ;;  %v10575_v40 = vor.u32 %v11580_v44, %v10574_v42  ;;  %v10671_v46 = vor.u32 %v11604_v50, %v10670_v59  ;;  %v11545_v48 = vld [vmem:[#allocation13 + $0x24] sm:$0xf]  ;;  %v10630_v42 = vld [vmem:[#allocation13 + $0x1a0] sm:$0xf]  ;;  %v11583_v59 = vld [vmem:[#allocation13 + $0x154] sm:$0xf] }
 0x546   :  { %v10443_v41 = vor.u32 %v11545_v48, %v10440_v27  ;;  %v10592_v50 = vld [vmem:[#allocation13 + $0x158] sm:$0xf0]  ;;  %v11595_v48 = vld [vmem:[#allocation13 + $0x1b4] sm:$0xf]  ;;  %v11613_v38 = vld [vmem:[#allocation14 + $0x40] sm:$0xff] }
 0x547   :  { %6978 = vmatpush.bf16.msra.mxu1 %v10539_v57  ;;  %6919 = vmatpush.bf16.msra.mxu0 %v10423_v21  ;;  %v12688_v57 = vld [vmem:[%s12755_s2] sm:$0xf] }
 0x548   :  { %6951 = vmatpush.bf16.msrb.mxu3 %v10671_v46  ;;  %v11543_v46 = vld [vmem:[#allocation13 + $0x14] sm:$0xf]  ;;  %v6502_v7 = vperm.slane %v12688_v57, 0  ;;  %v10640_v27 = vld [vmem:[#allocation13 + $0x1b8] sm:$0xf0] }
 0x549   :  { %6942 = vmatpush.bf16.msra.mxu2 %v10575_v40  ;;  %v10595_v40 = vor.u32 %v11583_v59, %v10592_v50  ;;  %v10435_v61 = vor.u32 %v11543_v46, %v10432_v60  ;;  %v10624_v59 = vld [vmem:[#allocation13 + $0x198] sm:$0xf0] }
 0x54b   :  { %6979 = vmatpush.bf16.msra.mxu1 %v10531_v63  ;;  %6964 = vmatpush.bf16.msrb.mxu0 %v10483_v2  ;;  %v10566_v63 = vld [vmem:[#allocation13 + $0x120] sm:$0xf]  ;;  %v11594_v2 = vld [vmem:[#allocation13 + $0x1a4] sm:$0xf0] }
 0x54c   :  { %v10631_v44 = vor.u32 %v11594_v2, %v10630_v42  ;;  %v10632_v42 = vld [vmem:[#allocation13 + $0x1a8] sm:$0xf0] }
 0x54f   :  { %6965 = vmatpush.bf16.msrb.mxu0 %v10475_v4  ;;  %v11592_v4 = vld [vmem:[#allocation13 + $0x194] sm:$0xf0] }
 0x553   :  { %6966 = vmatpush.bf16.msrb.mxu0 %v10467_v54  ;;  %v10615_v54 = vor.u32 %v11590_v23, %v10614_v13 }
 0x554   :  { %10419 = vmatmul.msk.bf16.vlgmr.msra.gmra.mxu3 %vm6153_vm0, %v12637_v36  ;;  %v10520_v36 = vld [vmem:[#allocation13 + $0xc8] sm:$0xf0] }
 0x555   :  { %v10523_v53 = vor.u32 %v11565_v14, %v10520_v36  ;;  %v6503_v14 = vperm.slane %v12688_v57, 1  ;;  %v10567_v36 = vor.u32 %v11578_v56, %v10566_v63  ;;  %v11581_v56 = vld [vmem:[#allocation13 + $0x144] sm:$0xf] }
 0x557   :  { %6980 = vmatpush.bf16.msra.mxu1 %v10523_v53  ;;  %v11602_v53 = vld [vmem:[#allocation13 + $0x1e4] sm:$0xf0]  ;;  %6943 = vmatpush.bf16.msra.mxu2 %v10567_v36  ;;  %v10424_v36 = vld [vmem:[#allocation13 + $0x8] sm:$0xf0] }
 0x558   :  { %v10663_v3 = vor.u32 %v11602_v53, %v10662_v0  ;;  %v10584_v0 = vld [vmem:[#allocation13 + $0x148] sm:$0xf0] }
 0x55a   :  { %6952 = vmatpush.bf16.msrb.mxu3 %v10663_v3 }
 0x55b   :  { %6981 = vmatpush.bf16.msra.mxu1 %v10515_v16  ;;  %v11576_v16 = vld [vmem:[#allocation13 + $0x114] sm:$0xf0] }
 0x55e   :  { %6953 = vmatpush.bf16.msrb.mxu3 %v10655_v18  ;;  %v11577_v18 = vld [vmem:[#allocation13 + $0x124] sm:$0xf] }
 0x55f   :  { %6982 = vmatpush.bf16.msra.mxu1 %v10507_v22 }
 0x562   :  { %6954 = vmatpush.bf16.msrb.mxu3 %v10647_v39 }
 0x563   :  { %6983 = vmatpush.bf16.msra.mxu1 %v10499_v34  ;;  %v10608_v34 = vld [vmem:[#allocation13 + $0x178] sm:$0xf0] }
 0x564   :  { %v10611_v28 = vor.u32 %v11587_v32, %v10608_v34  ;;  %v11599_v32 = vld [vmem:[#allocation13 + $0x1d4] sm:$0xf]  ;;  %v10656_v34 = vld [vmem:[#allocation13 + $0x1d8] sm:$0xf0] }
 0x566   :  { %6955 = vmatpush.bf16.msrb.mxu3 %v10639_v55 }
 0x567   :  { %6984 = vmatpush.bf16.msra.mxu1 %v10491_v11  ;;  %v10600_v11 = vld [vmem:[#allocation13 + $0x168] sm:$0xf0] }
 0x568   :  { %v10603_v25 = vor.u32 %v11585_v51, %v10600_v11  ;;  %v10648_v51 = vld [vmem:[#allocation13 + $0x1c8] sm:$0xf0] }
 0x56a   :  { %6956 = vmatpush.bf16.msrb.mxu3 %v10631_v44  ;;  %v11591_v44 = vld [vmem:[#allocation13 + $0x194] sm:$0xf] }
 0x56d   :  { %v12685_v1 = vpop.f32.mrf.mxu1  ;;  %v12695_v15 = vpop.f32.mrf.mxu0 }
 0x575   :  { %v6468_v26 = vpop.f32.mrf.mxu1  ;;  %v6455_v12 = vpop.f32.mrf.mxu0 }
 0x576   :  { %v10456_v26 = vld [vmem:[#allocation13 + $0x48] sm:$0xf0] }
 0x577   :  { %v10459_v52 = vor.u32 %v11549_v45, %v10456_v26  ;;  %v11601_v45 = vld [vmem:[#allocation13 + $0x1e4] sm:$0xf] }
 0x579   :  { %6967 = vmatpush.bf16.msrb.mxu0 %v10459_v52 }
 0x57d   :  { %6968 = vmatpush.bf16.msrb.mxu0 %v10451_v43  ;;  %v11597_v43 = vld [vmem:[#allocation13 + $0x1c4] sm:$0xf] }
 0x57e   :  { %v10651_v11 = vor.u32 %v11597_v43, %v10648_v51  ;;  %v11628_v51 = vld [vmem:[%s12757_s24 + $0x38] sm:$0xff] }
 0x581   :  { %6969 = vmatpush.bf16.msrb.mxu0 %v10443_v41  ;;  %v10643_v41 = vor.u32 %v11595_v48, %v10640_v27 }
 0x585   :  { %6970 = vmatpush.bf16.msrb.mxu0 %v10435_v61 }
 0x597   :  { %v12690_v58 = vpop.f32.mrf.mxu2  ;;  %v6179_v62 = vpop.f32.mrf.mxu3 }
 0x598   :  { %v6315_v24 = vadd.f32 %v12641_v10, %v6179_v62  ;;  %v10559_v10 = vor.u32 %v11576_v16, %v10558_v47  ;;  %v10622_v62 = vld [vmem:[#allocation13 + $0x190] sm:$0xf]  ;;  %v11579_v47 = vld [vmem:[#allocation13 + $0x134] sm:$0xf]  ;;  %v10576_v16 = vld [vmem:[#allocation13 + $0x138] sm:$0xf0] }
 0x599   :  { %v10623_v63 = vor.u32 %v11592_v4, %v10622_v62  ;;  %v10627_v62 = vor.u32 %v11591_v44, %v10624_v59  ;;  %v11589_v4 = vld [vmem:[#allocation13 + $0x184] sm:$0xf] }
 0x59a   :  { %v6497_v6 = vadd.f32 %v12685_v1, %v6315_v24  ;;  %6944 = vmatpush.bf16.msra.mxu2 %v10559_v10  ;;  %v10587_v24 = vor.u32 %v11581_v56, %v10584_v0  ;;  %v10672_v10 = vld [vmem:[#allocation13 + $0x1f8] sm:$0xf0] }
 0x59b   :  { %6957 = vmatpush.bf16.msrb.mxu3 %v10623_v63  ;;  %v10675_v5 = vor.u32 %v11603_v17, %v10672_v10  ;;  %v10616_v63 = vld [vmem:[#allocation13 + $0x188] sm:$0xf0]  ;;  %v11612_v10 = vld [vmem:[#allocation14 + $0x38] sm:$0xff] }
 0x59c   :  { %v6511_v49 = vadd.f32 %v6503_v14, %v6497_v6  ;;  %v11541_v14 = vld [vmem:[#allocation13 + $0x4] sm:$0xf] }
 0x59d   :  { %v10427_v6 = vor.u32 %v11541_v14, %v10424_v36 }
 0x59e   :  { %v6515_v20 = vmax.f32 %v6511_v49, 0.0  ;;  %6945 = vmatpush.bf16.msra.mxu2 %v10551_v30  ;;  %v10579_v49 = vor.u32 %v11579_v47, %v10576_v16  ;;  %v11575_v30 = vld [vmem:[#allocation13 + $0x114] sm:$0xf] }
 0x59f   :  { %v6168_v1 = vpop.f32.mrf.mxu2  ;;  %v6181_v22 = vpop.f32.mrf.mxu3  ;;  %6971 = vmatpush.bf16.msrb.mxu0 %v10427_v6  ;;  %6958 = vmatpush.bf16.msrb.mxu3 %v10615_v54 }
 0x5a0   :  { %v12697_v19 = vpack.c.bf16 %v6515_v20, %v6515_v20  ;;  %v10568_v20 = vld [vmem:[#allocation13 + $0x128] sm:$0xf0] }
 0x5a1   :  { %v10571_v26 = vor.u32 %v11577_v18, %v10568_v20  ;;  %v10664_v1 = vld [vmem:[#allocation13 + $0x1e8] sm:$0xf0]  ;;  %v11611_v18 = vld [vmem:[#allocation14 + $0x30] sm:$0xff] }
 0x5a2   :  { %6933 = vmatmul.bf16.vlgmr.msrb.gmra.mxu1 %v12697_v19  ;;  %6990 = vmatpush.bf16.msrb.mxu2 %v10611_v28  ;;  %v10667_v22 = vor.u32 %v11601_v45, %v10664_v1  ;;  %v10659_v28 = vor.u32 %v11599_v32, %v10656_v34  ;;  %v11610_v20 = vld [vmem:[#allocation14 + $0x28] sm:$0xff]  ;;  %v11608_v45 = vld [vmem:[#allocation14 + $0x18] sm:$0xff]  ;;  %v11607_v1 = vld [vmem:[#allocation14 + $0x10] sm:$0xff] }
 0x5a3   :  { %7003 = vmatpush.bf16.msra.mxu3 %v10675_v5  ;;  %v11615_v32 = vld [vmem:[#allocation14 + $0x50] sm:$0xff] }
 0x5a6   :  { %6991 = vmatpush.bf16.msrb.mxu2 %v10603_v25 }
 0x5a7   :  { %v12700_v21 = vpop.f32.mrf.mxu2  ;;  %v12702_v33 = vpop.f32.mrf.mxu3  ;;  %7004 = vmatpush.bf16.msra.mxu3 %v10667_v22  ;;  %v11619_v22 = vld [vmem:[#allocation14 + $0x70] sm:$0xff] }
 0x5aa   :  { %6992 = vmatpush.bf16.msrb.mxu2 %v10595_v40  ;;  %v6504_v40 = vperm.slane %v12688_v57, 2 }
 0x5ab   :  { %7005 = vmatpush.bf16.msra.mxu3 %v10659_v28  ;;  %v11614_v28 = vld [vmem:[#allocation14 + $0x48] sm:$0xff] }
 0x5ae   :  { %6993 = vmatpush.bf16.msrb.mxu2 %v10587_v24  ;;  %v10619_v24 = vor.u32 %v11589_v4, %v10616_v63  ;;  %v11626_v63 = vld [vmem:[%s12757_s24 + $0x28] sm:$0xff] }
 0x5af   :  { %v6194_v53 = vpop.f32.mrf.mxu2  ;;  %v6207_v3 = vpop.f32.mrf.mxu3  ;;  %7006 = vmatpush.bf16.msra.mxu3 %v10651_v11  ;;  %v11627_v11 = vld [vmem:[%s12757_s24 + $0x30] sm:$0xff] }
 0x5b0   :  { %v6505_v3 = vperm.slane %v12688_v57, 3  ;;  %v11609_v57 = vld [vmem:[#allocation14 + $0x20] sm:$0xff] }
 0x5b2   :  { %6985 = vmatmul.bf16.vlgmr.msra.gmra.mxu1 %v12697_v19  ;;  %6994 = vmatpush.bf16.msrb.mxu2 %v10579_v49  ;;  %v10560_v19 = vld [vmem:[#allocation13 + $0x118] sm:$0xf0] }
 0x5b3   :  { %v10563_v31 = vor.u32 %v11575_v30, %v10560_v19  ;;  %7007 = vmatpush.bf16.msra.mxu3 %v10643_v41  ;;  %v11605_v30 = vld [vmem:[#allocation14] sm:$0xff] }
 0x5b4   :  { %v11617_v19 = vld [vmem:[#allocation14 + $0x60] sm:$0xff] }
 0x5b6   :  { %6995 = vmatpush.bf16.msrb.mxu2 %v10571_v26  ;;  %v11620_v26 = vld [vmem:[#allocation14 + $0x78] sm:$0xff] }
 0x5b7   :  { %v6301_v52 = vpop.f32.mrf.mxu3  ;;  %v6327_v9 = vpop.f32.mrf.mxu2  ;;  %7165 = vmatpush.bf16.msrb.mxu1 %v11620_v26 }
 0x5b8   :  { %v6302_v29 = vadd.f32 %v6301_v52, %v12690_v58  ;;  %v6328_v50 = vadd.f32 %v6327_v9, %v12700_v21  ;;  %v11606_v9 = vld [vmem:[#allocation14 + $0x8] sm:$0xff] }
 0x5ba   :  { %v6496_v39 = vadd.f32 %v12695_v15, %v6302_v29  ;;  %6996 = vmatpush.bf16.msrb.mxu2 %v10563_v31  ;;  %v11593_v15 = vld [vmem:[#allocation13 + $0x1a4] sm:$0xf]  ;;  %v11618_v29 = vld [vmem:[#allocation14 + $0x68] sm:$0xff]  ;;  %v11616_v31 = vld [vmem:[#allocation14 + $0x58] sm:$0xff] }
 0x5bb   :  { %v10635_v2 = vor.u32 %v11593_v15, %v10632_v42  ;;  %7166 = vmatpush.bf16.msrb.mxu1 %v11619_v22 }
 0x5bc   :  { %v6510_v35 = vadd.f32 %v6502_v7, %v6496_v39 }
 0x5bd   :  { %7008 = vmatpush.bf16.msra.mxu3 %v10635_v2 }
 0x5be   :  { %v6514_v58 = vmax.f32 %v6510_v35, 0.0  ;;  %6997 = vmatpush.bf16.msrb.mxu2 %v10555_v8  ;;  %v6586_v35 = vld [vmem:[%s12756_s10] sm:$0x3] }
 0x5bf   :  { %v6303_v55 = vpop.f32.mrf.mxu3  ;;  %v6329_v25 = vpop.f32.mrf.mxu2  ;;  %7167 = vmatpush.bf16.msrb.mxu1 %v11618_v29  ;;  %v6588_v43 = vperm.slane %v6586_v35, 0  ;;  %v6589_v15 = vperm.slane %v6586_v35, 1 }
 0x5c0   :  { %v6518_v12 = vpack.c.bf16 %v6514_v58, %v6514_v58 }
 0x5c1   :  { %7009 = vmatpush.bf16.msra.mxu3 %v10627_v62 }
 0x5c2   :  { %6920 = vmatmul.bf16.vlgmr.msra.gmra.mxu0 %v6518_v12 }
 0x5c3   :  { %7152 = vmatpush.bf16.msra.mxu0 %v11612_v10  ;;  %7168 = vmatpush.bf16.msrb.mxu1 %v11617_v19 }
 0x5c5   :  { %7010 = vmatpush.bf16.msra.mxu3 %v10619_v24  ;;  %v11623_v24 = vld [vmem:[%s12757_s24 + $0x10] sm:$0xff] }
 0x5c7   :  { %v6340_v46 = vpop.f32.mrf.mxu3  ;;  %v6479_v60 = vpop.f32.mrf.mxu2  ;;  %7153 = vmatpush.bf16.msra.mxu0 %v11611_v18  ;;  %7169 = vmatpush.bf16.msrb.mxu1 %v11616_v31 }
 0x5c8   :  { %v6498_v61 = vadd.f32 %v6479_v60, %v6328_v50  ;;  %v6341_v21 = vadd.f32 %v6340_v46, %v12702_v33 }
 0x5ca   :  { %v6512_v56 = vadd.f32 %v6504_v40, %v6498_v61 }
 0x5cb   :  { %7154 = vmatpush.bf16.msra.mxu0 %v11610_v20  ;;  %7170 = vmatpush.bf16.msrb.mxu1 %v11615_v32 }
 0x5cc   :  { %v6516_v0 = vmax.f32 %v6512_v56, 0.0  ;;  %v11625_v56 = vld [vmem:[%s12757_s24 + $0x20] sm:$0xff] }
 0x5ce   :  { %v6520_v14 = vpack.c.bf16 %v6516_v0, %v6516_v0  ;;  %v11624_v0 = vld [vmem:[%s12757_s24 + $0x18] sm:$0xff] }
 0x5cf   :  { %v6342_v36 = vpop.f32.mrf.mxu3  ;;  %v6481_v53 = vpop.f32.mrf.mxu2  ;;  %7155 = vmatpush.bf16.msra.mxu0 %v11609_v57  ;;  %7171 = vmatpush.bf16.msrb.mxu1 %v11614_v28 }
 0x5d0   :  { %6946 = vmatmul.bf16.vlgmr.msra.gmra.mxu2 %v6520_v14  ;;  %v11621_v36 = vld [vmem:[%s12757_s24] sm:$0xff] }
 0x5d1   :  { %7248 = vmatpush.bf16.msra.mxu2 %v11628_v51 }
 0x5d2   :  { %6972 = vmatmul.bf16.vlgmr.msrb.gmra.mxu0 %v6518_v12 }
 0x5d3   :  { %7156 = vmatpush.bf16.msra.mxu0 %v11608_v45  ;;  %7172 = vmatpush.bf16.msrb.mxu1 %v11613_v38  ;;  %v11683_v45 = vld [vmem:[#allocation2] ss:$0 sm:$0xff] }
 0x5d5   :  { %7249 = vmatpush.bf16.msra.mxu2 %v11627_v11 }
 0x5d7   :  { %v6492_v6 = vpop.f32.mrf.mxu3  ;;  %7157 = vmatpush.bf16.msra.mxu0 %v11607_v1 }
 0x5d8   :  { %v6499_v13 = vadd.f32 %v6492_v6, %v6341_v21 }
 0x5d9   :  { %7250 = vmatpush.bf16.msra.mxu2 %v11626_v63 }
 0x5da   :  { %v6513_v23 = vadd.f32 %v6505_v3, %v6499_v13  ;;  %v11680_v3 = vld [vmem:[%s12758_s11] ss:$0 sm:$0xff] }
 0x5db   :  { %7158 = vmatpush.bf16.msra.mxu0 %v11606_v9 }
 0x5dc   :  { %v6517_v54 = vmax.f32 %v6513_v23, 0.0 }
 0x5dd   :  { %7251 = vmatpush.bf16.msra.mxu2 %v11625_v56 }
 0x5de   :  { %v6521_v47 = vpack.c.bf16 %v6517_v54, %v6517_v54 }
 0x5df   :  { %v6494_v16 = vpop.f32.mrf.mxu3  ;;  %7159 = vmatpush.bf16.msra.mxu0 %v11605_v30 }
 0x5e0   :  { %6959 = vmatmul.bf16.vlgmr.msrb.gmra.mxu3 %v6521_v47  ;;  %6998 = vmatmul.bf16.vlgmr.msrb.gmra.mxu2 %v6520_v14  ;;  %v11622_v14 = vld [vmem:[%s12757_s24 + $0x8] sm:$0xff] }
 0x5e1   :  { %7252 = vmatpush.bf16.msra.mxu2 %v11624_v0 }
 0x5e5   :  { %7253 = vmatpush.bf16.msra.mxu2 %v11623_v24 }
 0x5e9   :  { %7254 = vmatpush.bf16.msra.mxu2 %v11622_v14 }
 0x5ed   :  { %7255 = vmatpush.bf16.msra.mxu2 %v11621_v36 }
 0x5f0   :  { %7011 = vmatmul.bf16.vlgmr.msra.gmra.mxu3 %v6521_v47 }
 0x61f   :  { %v6934_v17 = vpop.f32.mrf.mxu1 }
 0x627   :  { %v6936_v49 = vpop.f32.mrf.mxu1 }
 0x62f   :  { %v6986_v5 = vpop.f32.mrf.mxu1 }
 0x637   :  { %v6988_v33 = vpop.f32.mrf.mxu1 }
 0x63f   :  { %v6921_v52 = vpop.f32.mrf.mxu0 }
 0x640   :  { %v6922_v58 = vadd.f32 %v6921_v52, %v6588_v43 }
 0x642   :  { %v6935_v55 = vadd.f32 %v6934_v17, %v6922_v58  ;;  %v11681_v17 = vld [vmem:[%s12085_s6] ss:$0 sm:$0xff] }
 0x647   :  { %v6923_v7 = vpop.f32.mrf.mxu0 }
 0x64f   :  { %v6973_v34 = vpop.f32.mrf.mxu0 }
 0x650   :  { %v6974_v59 = vadd.f32 %v6973_v34, %v6589_v15 }
 0x652   :  { %v6987_v50 = vadd.f32 %v6986_v5, %v6974_v59  ;;  %v11682_v5 = vld [vmem:[%s12090_s8] ss:$0 sm:$0xff] }
 0x653   :  { %v6947_v39 = vpop.f32.mrf.mxu2 }
 0x654   :  { %v6948_v25 = vadd.f32 %v6947_v39, %v6935_v55 }
 0x657   :  { %v6975_v37 = vpop.f32.mrf.mxu0 }
 0x65b   :  { %v6949_v8 = vpop.f32.mrf.mxu2 }
 0x663   :  { %v6960_v12 = vpop.f32.mrf.mxu3  ;;  %v6999_v48 = vpop.f32.mrf.mxu2 }
 0x664   :  { %v6961_v27 = vadd.f32 %v6960_v12, %v6948_v25  ;;  %v7000_v40 = vadd.f32 %v6999_v48, %v6987_v50 }
 0x666   :  { %v7016_v41 = vmax.f32 %v6961_v27, 0.0 }
 0x668   :  { %v7018_v42 = vpack.c.bf16 %v7016_v41, %v7016_v41 }
 0x66a   :  { %7160 = vmatmul.bf16.vlgmr.msra.gmra.mxu0 %v7018_v42 }
 0x66b   :  { %v6962_v2 = vpop.f32.mrf.mxu3  ;;  %v7001_v44 = vpop.f32.mrf.mxu2 }
 0x673   :  { %v7012_v46 = vpop.f32.mrf.mxu3 }
 0x674   :  { %v7013_v60 = vadd.f32 %v7012_v46, %v7000_v40 }
 0x676   :  { %v7017_v61 = vmax.f32 %v7013_v60, 0.0 }
 0x678   :  { %v7019_v62 = vpack.c.bf16 %v7017_v61, %v7017_v61 }
 0x67a   :  { %7173 = vmatmul.bf16.vlgmr.msrb.gmra.mxu1 %v7019_v62 }
 0x67b   :  { %v7014_v4 = vpop.f32.mrf.mxu3 }
 0x6e7   :  { %v7161_v53 = vpop.f32.mrf.mxu0 }
 0x6e8   :  { %v7162_v6 = vadd.f32 %v11680_v3, %v7161_v53 }
 0x6ef   :  { %v7163_v21 = vpop.f32.mrf.mxu0 }
 0x6f7   :  { %v7174_v13 = vpop.f32.mrf.mxu1 }
 0x6f8   :  { %v7175_v23 = vadd.f32 %v7174_v13, %v7162_v6 }
 0x6fa   :  { %v7178_v54 = vmax.f32 %v7175_v23, 0.0 }
 0x6fc   :  { %v7179_v47 = vpack.c.bf16 %v7178_v54, %v7178_v54 }
 0x6fe   :  { %7256 = vmatmul.bf16.vlgmr.msra.gmra.mxu2 %v7179_v47 }
 0x6ff   :  { %v7176_v16 = vpop.f32.mrf.mxu1 }
 0x781   :  { %v7257_v49 = vpop.f32.mrf.mxu2 }
 0x782   :  { %v7258_v10 = vadd.f32 %v11681_v17, %v7257_v49 }
 0x784   :  { %v7261_v18 = vmax.f32 %v7258_v10, 0.0 }
 0x786   :  { %v7266_v20 = vmul.f32 %v11682_v5, %v7261_v18 }
 0x788   :  { %v7267_v33 = vsel %vm6153_vm0, %v7266_v20, 0.0 }
 0x789   :  { %v7259_v57 = vpop.f32.mrf.mxu2  ;;  %7268 = vadd.xlane.f32.xlu0 %v7267_v33 }
 0x7fc   :  { %v7269_v26 = vpop.xlane.xlu0 %7268 }
 0x7fd   :  { %v7274_v1 = vadd.f32 %v11683_v45, %v7269_v26 }
 0x7ff   :  { %v10772_v22 = vmul.f32 -1.442695, %v7274_v1 }
 0x801   :  { %11684 = vpow2.f32 %v10772_v22 }
 0x807   :  { %v11685_v52 = vpop.eup %11684 }
 0x808   :  { %v7278_v9 = vadd.f32 1.0, %v11685_v52 }
 0x80a   :  { %11686 = vrcp.f32 %v7278_v9  ;;  %v7290_v19 = vand.u32 2147483648, %v7278_v9  ;;  %v7288_v32 = vand.u32 2147483647, %v7278_v9  ;;  %vm7284_vm2 = vweird.f32 %v7278_v9 }
 0x80c   :  { %v7291_v39 = vor.u32 1.1754944e-38, %v7290_v19  ;;  %vm7289_vm5 = vcmp.eq.f32.partialorder %v7288_v32, 8.507059e+37 }
 0x810   :  { %v11687_v29 = vpop.eup %11686 }
 0x811   :  { %v7280_v7 = vmul.f32 %v11687_v29, %v7278_v9  ;;  %vm7285_vm1 = vweird.f32 %v11687_v29 }
 0x812   :  { %vm7286_vm3 = vmor %vm7284_vm2, %vm7285_vm1 }
 0x813   :  { %v7281_v30 = vsub.f32 1.0, %v7280_v7 }
 0x815   :  { %v7282_v31 = vmul.f32 %v11687_v29, %v7281_v30 }
 0x817   :  { %v7283_v34 = vadd.f32 %v11687_v29, %v7282_v31 }
 0x819   :  { %v7287_v28 = vsel %vm7286_vm3, %v11687_v29, %v7283_v34 }
 0x81a   :  { %v7292_v35 = vsel %vm7289_vm5, %v7291_v39, %v7287_v28 }
 0x81b   :  { %7295 = vst.msk [vmem:[%s12098_s19] sm:$0xff] %vm7294_vm4, %v7292_v35 }
 0x81c   :  { %7300 = vsyncpa [#allocation4], 1 }
 0x81d   :  { %7301 = vsyncpa [#allocation6], 1 }
 0x81e   :  { %7302 = vsyncpa [#allocation9], 1 }
 0x81f   :  { %7303 = vsyncpa [#allocation12], 1 }
 0x820   :  { %7304 = vsyncpa [#allocation15], 1 }

</bundles_post_ra>
